<compile_context>
chip_gen: v6e
topology: v6e:2x2x1
jax: 0.10.0
libtpu: 0.0.40
codegen_flags: <defaults>
</compile_context>

<pallas_src>
import jax
import jax.numpy as jnp
from jax.experimental import pallas as pl
from jax.experimental.pallas import tpu as pltpu

# ------------------------- small test configuration -------------------------
D_MODEL = 128      # config.d_model (real plbart: 768; shrunk for a quick test)
STYLE_DIM = 128    # style_dim argument of InRepPlusGAN.__init__
D_IN = D_MODEL + STYLE_DIM
HIDDEN_1 = 768     # hard-coded in Modifier.__init__
HIDDEN_2 = 768     # hard-coded in Modifier.__init__
VOCAB = 512        # config.vocab_size (shrunk)
PAD_TOKEN_ID = 1
B = 2
S_ENC = 8
S_DEC = 8

TM_MOD = 128       # modifier row tile (sweep to 256 at production token counts)
TM_LM = 256        # lm_head+CE row tile (review: 256, sweep 512 where VMEM allows)
TN_LM = VOCAB      # vocab tile; = VOCAB here -> single vocab step.  At real
                   # vocab (~50k) sweep 1024-4096 (cap ~2048 on v7x 64 MiB VMEM).

assert VOCAB % TN_LM == 0
assert TM_LM % 8 == 0 and TM_MOD % 8 == 0


def _pick_vmem_limit_bytes():
    """Per-generation scoped-VMEM budget (~56 MiB v7x, ~100 MiB v5e/v6e)."""
    try:
        cap = int(pltpu.get_tpu_info().vmem_capacity_bytes)
    except Exception:
        cap = 64 * 1024 * 1024  # conservative fallback fits every generation
    return max(32 * 1024 * 1024, min(cap - 8 * 1024 * 1024, 100 * 1024 * 1024))


VMEM_LIMIT = _pick_vmem_limit_bytes()


# ------------------------------- glue (JAX) ---------------------------------
def shift_tokens_right(input_ids, pad_token_id):
    """JAX port of the MBart-style shift used by the module."""
    prev = jnp.where(input_ids == -100, pad_token_id, input_ids)
    index_of_eos = jnp.sum(prev != pad_token_id, axis=1) - 1
    decoder_start = jnp.take_along_axis(prev, index_of_eos[:, None], axis=1)[:, 0]
    return jnp.concatenate([decoder_start[:, None], prev[:, :-1]], axis=1)


def _pad_rows(x, multiple, value=0):
    """Pad axis 0 up to a multiple of `multiple` (so the grid drops nothing)."""
    n = x.shape[0]
    npad = pl.cdiv(n, multiple) * multiple
    if npad == n:
        return x
    pads = [(0, npad - n)] + [(0, 0)] * (x.ndim - 1)
    return jnp.pad(x, pads, constant_values=value)


# ----------------------------- Pallas kernels --------------------------------
def modifier_kernel(x_ref, w1_ref, b1_ref, w2_ref, b2_ref, w3_ref, b3_ref, o_ref):
    # Layer 1 as a single K = D_MODEL+STYLE_DIM dot (concat done in the
    # wrapper) -> fills the 256-deep MXU on v6e/v7x in one pass.
    # bf16 inputs, f32 accumulation, bf16 writeback.
    h = jnp.dot(x_ref[...], w1_ref[...],
                preferred_element_type=jnp.float32) + b1_ref[...]
    h = jnp.maximum(h, 0.0).astype(jnp.bfloat16)
    h2 = jnp.dot(h, w2_ref[...], preferred_element_type=jnp.float32) + b2_ref[...]
    h2 = jnp.maximum(h2, 0.0).astype(jnp.bfloat16)
    out = jnp.dot(h2, w3_ref[...], preferred_element_type=jnp.float32) + b3_ref[...]
    o_ref[...] = out.astype(o_ref.dtype)


def modifier_pallas(x_flat, p):
    n = x_flat.shape[0]
    x = _pad_rows(x_flat.astype(jnp.bfloat16), TM_MOD)
    npad = x.shape[0]
    # production knob (not applied here): pipeline_mode=pl.Buffered(1) on the
    # grid-invariant weight/bias specs below to drop their redundant double
    # buffer on v7x's 64 MiB VMEM.
    out = pl.pallas_call(
        modifier_kernel,
        out_shape=jax.ShapeDtypeStruct((npad, D_MODEL), jnp.bfloat16),
        grid_spec=pltpu.PrefetchScalarGridSpec(
            num_scalar_prefetch=0,
            grid=(npad // TM_MOD,),
            in_specs=[
                pl.BlockSpec((TM_MOD, D_IN), lambda i: (i, 0)),
                pl.BlockSpec((D_IN, HIDDEN_1), lambda i: (0, 0)),
                pl.BlockSpec((1, HIDDEN_1), lambda i: (0, 0)),
                pl.BlockSpec((HIDDEN_1, HIDDEN_2), lambda i: (0, 0)),
                pl.BlockSpec((1, HIDDEN_2), lambda i: (0, 0)),
                pl.BlockSpec((HIDDEN_2, D_MODEL), lambda i: (0, 0)),
                pl.BlockSpec((1, D_MODEL), lambda i: (0, 0)),
            ],
            out_specs=pl.BlockSpec((TM_MOD, D_MODEL), lambda i: (i, 0)),
        ),
        compiler_params=pltpu.CompilerParams(
            dimension_semantics=("parallel",),
            vmem_limit_bytes=VMEM_LIMIT),
    )(x, p["mod_w1"], p["mod_b1"], p["mod_w2"], p["mod_b2"],
      p["mod_w3"], p["mod_b3"])
    return out[:n]


def lm_head_ce_kernel(h_ref, w_ref, fbias_ref, lbl_ref,
                      logits_ref, loss_ref, m_sc, l_sc, tgt_sc):
    # Fused lm_head (+ final_logits_bias) and masked cross-entropy.
    # Grid = (row tiles [parallel], vocab tiles [arbitrary]); online
    # max / log-sum-exp + target-logit accumulation over the vocab axis.
    j = pl.program_id(1)

    @pl.when(j == 0)
    def _():
        m_sc[...] = jnp.full_like(m_sc, -jnp.inf)
        l_sc[...] = jnp.zeros_like(l_sc)
        tgt_sc[...] = jnp.zeros_like(tgt_sc)

    logits = jnp.dot(h_ref[...], w_ref[...],
                     preferred_element_type=jnp.float32) + fbias_ref[...]
    # bf16 writeback halves HBM traffic of the dominant (rows x vocab) output;
    # all loss math below stays in f32 (already in registers).
    logits_ref[...] = logits.astype(logits_ref.dtype)

    # labels: (TM_LM, 1) int32 per-row scalars
    lbl = lbl_ref[...]
    col = jax.lax.broadcasted_iota(jnp.int32, logits.shape, 1) + j * TN_LM
    tgt_sc[...] += jnp.sum(jnp.where(col == lbl, logits, 0.0),
                           axis=-1, keepdims=True)

    m_new = jnp.maximum(m_sc[...], jnp.max(logits, axis=-1, keepdims=True))
    alpha = jnp.exp(m_sc[...] - m_new)
    l_sc[...] = alpha * l_sc[...] + jnp.sum(jnp.exp(logits - m_new),
                                            axis=-1, keepdims=True)
    m_sc[...] = m_new

    @pl.when(j == pl.num_programs(1) - 1)
    def _():
        lse = m_sc[...] + jnp.log(l_sc[...])
        valid = lbl_ref[...] != -100
        # TODO(synk): labels outside [0, VOCAB) other than -100 silently yield
        # target-logit 0 instead of raising like torch.nn.CrossEntropyLoss.
        row_loss = jnp.where(valid, lse - tgt_sc[...], 0.0)        # (TM_LM, 1)
        # Lane-dense per-row-tile loss sum: one full (1,1,128) vst instead of
        # a (TM_LM, 1) masked partial-store output + extra XLA reduction.
        loss_ref[...] = jnp.broadcast_to(jnp.sum(row_loss), (1, 1, 128))


def lm_head_ce_pallas(dec_hidden_flat, labels_flat, p):
    n = dec_hidden_flat.shape[0]
    h = _pad_rows(dec_hidden_flat.astype(jnp.bfloat16), TM_LM)
    lbl = _pad_rows(labels_flat.astype(jnp.int32).reshape(n, 1), TM_LM, value=-100)
    npad = h.shape[0]
    n_row_tiles = npad // TM_LM
    grid = (n_row_tiles, VOCAB // TN_LM)

    # production knob (not applied here): pipeline_mode=pl.Buffered(3) on the
    # (D_MODEL, TN_LM) weight spec if the vocab-tile DMA is exposed.
    logits_pad, tile_loss = pl.pallas_call(
        lm_head_ce_kernel,
        out_shape=(jax.ShapeDtypeStruct((npad, VOCAB), jnp.bfloat16),
                   jax.ShapeDtypeStruct((n_row_tiles, 1, 128), jnp.float32)),
        grid_spec=pltpu.PrefetchScalarGridSpec(
            num_scalar_prefetch=0,
            grid=grid,
            in_specs=[
                pl.BlockSpec((TM_LM, D_MODEL), lambda i, j: (i, 0)),
                pl.BlockSpec((D_MODEL, TN_LM), lambda i, j: (0, j)),
                pl.BlockSpec((1, TN_LM), lambda i, j: (0, j)),
                pl.BlockSpec((TM_LM, 1), lambda i, j: (i, 0)),
            ],
            out_specs=[
                pl.BlockSpec((TM_LM, TN_LM), lambda i, j: (i, j)),
                pl.BlockSpec((1, 1, 128), lambda i, j: (i, 0, 0)),
            ],
            scratch_shapes=[pltpu.VMEM((TM_LM, 1), jnp.float32),
                            pltpu.VMEM((TM_LM, 1), jnp.float32),
                            pltpu.VMEM((TM_LM, 1), jnp.float32)],
        ),
        compiler_params=pltpu.CompilerParams(
            dimension_semantics=("parallel", "arbitrary"),
            vmem_limit_bytes=VMEM_LIMIT),
    )(h, p["lm_w"], p["final_logits_bias"], lbl)

    loss_sum = jnp.sum(tile_loss[:, 0, 0])
    return logits_pad[:n], loss_sum


# --------------------------- decoder stand-in (JAX) ---------------------------
def standin_decoder(p, decoder_input_ids, encoder_hidden_states, encoder_attention_mask):
    # TODO(synk): the real pretrained PLBart/CodeT5 decoder (run under no_grad)
    # cannot be reproduced without its checkpoint; this is a deterministic
    # single-layer cross-attention stand-in that consumes the modifier outputs
    # as `encoder_hidden_states`, matching the dataflow of the original forward.
    emb = p["dec_embed"][decoder_input_ids]                       # (B, Sd, D)
    q = emb @ p["wq"]
    k = encoder_hidden_states @ p["wk"]
    v = encoder_hidden_states @ p["wv"]
    scores = jnp.einsum("bqd,bkd->bqk", q, k) / jnp.sqrt(jnp.float32(D_MODEL))
    mask = encoder_attention_mask[:, None, :].astype(jnp.float32)
    scores = scores + (1.0 - mask) * -1e9
    attn = jax.nn.softmax(scores, axis=-1)
    return emb + jnp.einsum("bqk,bkd->bqd", attn, v)              # (B, Sd, D)


# ------------------------------ full forward ---------------------------------
def inrep_plus_gan_forward(p, input_ids, style_encoding, attention_mask, labels,
                           encoder_last_hidden_state):
    # labels given -> decoder_input_ids = shift_tokens_right(labels, pad)
    decoder_input_ids = shift_tokens_right(labels, PAD_TOKEN_ID)

    # TODO(synk): pretrained encoder bypassed; `encoder_last_hidden_state` is
    # supplied directly (the original forward also accepts encoder_outputs).
    bsz, seq_len, _ = encoder_last_hidden_state.shape

    # style_encoding.unsqueeze(1).expand(-1, seq_len, -1) + feature-axis concat
    # done once here so the modifier kernel runs a single full-depth layer-1 dot.
    sty = jnp.broadcast_to(style_encoding[:, None, :], (bsz, seq_len, STYLE_DIM))
    combined = jnp.concatenate(
        [encoder_last_hidden_state, sty], axis=-1).reshape(bsz * seq_len, D_IN)

    # Modifier MLP over every (batch, position) token — Pallas kernel
    modifier_outputs = modifier_pallas(combined, p).reshape(bsz, seq_len, D_MODEL)

    # decoder (stand-in), cross-attending over the modifier outputs
    dec_hidden = standin_decoder(p, decoder_input_ids, modifier_outputs,
                                 attention_mask)

    # lm_head (+ final_logits_bias) fused with masked CE — Pallas kernel
    labels_flat = labels.reshape(-1)
    logits_flat, loss_sum = lm_head_ce_pallas(
        dec_hidden.reshape(-1, D_MODEL), labels_flat, p)
    lm_logits = logits_flat.reshape(bsz, -1, VOCAB)

    # CrossEntropyLoss(ignore_index=-100, reduction='mean'): mean over valid
    # tokens (0/0 -> NaN in the all-ignored degenerate case, like PyTorch).
    count = jnp.sum((labels_flat != -100).astype(jnp.float32))
    masked_lm_loss = loss_sum / count

    return masked_lm_loss, lm_logits, modifier_outputs


# ------------------------------ parameter init --------------------------------
def init_params(key):
    ks = jax.random.split(key, 12)

    def lin(k, fan_in, fan_out):
        bound = 1.0 / jnp.sqrt(jnp.float32(fan_in))
        kw, kb = jax.random.split(k)
        w = jax.random.uniform(kw, (fan_in, fan_out), jnp.float32, -bound, bound)
        b = jax.random.uniform(kb, (1, fan_out), jnp.float32, -bound, bound)
        return w, b

    p = {}
    w1, p["mod_b1"] = lin(ks[0], D_IN, HIDDEN_1)
    p["mod_w1"] = w1.astype(jnp.bfloat16)       # single fused-K layer-1 weight
    w2, p["mod_b2"] = lin(ks[1], HIDDEN_1, HIDDEN_2)
    p["mod_w2"] = w2.astype(jnp.bfloat16)
    w3, p["mod_b3"] = lin(ks[2], HIDDEN_2, D_MODEL)
    p["mod_w3"] = w3.astype(jnp.bfloat16)
    # lm_head: Linear(d_model, vocab, bias=False); final_logits_bias buffer
    p["lm_w"] = (jax.random.normal(ks[3], (D_MODEL, VOCAB), jnp.float32)
                 * 0.02).astype(jnp.bfloat16)
    p["final_logits_bias"] = jnp.zeros((1, VOCAB), jnp.float32)
    # decoder stand-in params (plain JAX path, kept f32)
    p["dec_embed"] = jax.random.normal(ks[4], (VOCAB, D_MODEL), jnp.float32) * 0.02
    p["wq"] = jax.random.normal(ks[5], (D_MODEL, D_MODEL), jnp.float32) * 0.02
    p["wk"] = jax.random.normal(ks[6], (D_MODEL, D_MODEL), jnp.float32) * 0.02
    p["wv"] = jax.random.normal(ks[7], (D_MODEL, D_MODEL), jnp.float32) * 0.02
    return p


# ------------------------------------ main ------------------------------------
if __name__ == "__main__":
    key = jax.random.PRNGKey(0)
    kp, k1, k2, k3, k4 = jax.random.split(key, 5)

    params = init_params(kp)

    input_ids = jax.random.randint(k1, (B, S_ENC), 2, VOCAB, dtype=jnp.int32)
    attention_mask = jnp.ones((B, S_ENC), jnp.int32)
    style_encoding = jax.random.normal(k2, (B, STYLE_DIM), jnp.float32)
    labels = jax.random.randint(k3, (B, S_DEC), 2, VOCAB, dtype=jnp.int32)
    encoder_last_hidden_state = jax.random.normal(
        k4, (B, S_ENC, D_MODEL), jnp.float32)

    fwd = jax.jit(inrep_plus_gan_forward)
    loss, lm_logits, modifier_outputs = fwd(
        params, input_ids, style_encoding, attention_mask, labels,
        encoder_last_hidden_state)

    jax.block_until_ready((loss, lm_logits, modifier_outputs))
    assert lm_logits.shape == (B, S_DEC, VOCAB)
    assert modifier_outputs.shape == (B, S_ENC, D_MODEL)
    assert jnp.isfinite(loss)
    print("KERNEL_OK")
</pallas_src>

<mosaic_0001>
module attributes {stable_mosaic.version = 11 : i64} {
  func.func @modifier_kernel(%arg0: i32, %arg1: memref<128x256xbf16, #tpu.memory_space<vmem>>, %arg2: memref<256x768xbf16, #tpu.memory_space<vmem>>, %arg3: memref<1x768xf32, #tpu.memory_space<vmem>>, %arg4: memref<768x768xbf16, #tpu.memory_space<vmem>>, %arg5: memref<1x768xf32, #tpu.memory_space<vmem>>, %arg6: memref<768x128xbf16, #tpu.memory_space<vmem>>, %arg7: memref<1x128xf32, #tpu.memory_space<vmem>>, %arg8: memref<128x128xbf16, #tpu.memory_space<vmem>>) attributes {dimension_semantics = [#tpu.dimension_semantics<parallel>], iteration_bounds = array<i64: 1>, scalar_prefetch = 0 : i64, scratch_operands = 0 : i64, tpu.core_type = #tpu.core_type<tc>, window_params = [{transform_indices = @transform_0, window_bounds = array<i64: 128, 256>}, {pipeline_mode = #tpu.pipeline_mode<synchronous>, transform_indices = @transform_1, window_bounds = array<i64: 256, 768>}, {pipeline_mode = #tpu.pipeline_mode<synchronous>, transform_indices = @transform_2, window_bounds = array<i64: 1, 768>}, {pipeline_mode = #tpu.pipeline_mode<synchronous>, transform_indices = @transform_3, window_bounds = array<i64: 768, 768>}, {pipeline_mode = #tpu.pipeline_mode<synchronous>, transform_indices = @transform_4, window_bounds = array<i64: 1, 768>}, {pipeline_mode = #tpu.pipeline_mode<synchronous>, transform_indices = @transform_5, window_bounds = array<i64: 768, 128>}, {pipeline_mode = #tpu.pipeline_mode<synchronous>, transform_indices = @transform_6, window_bounds = array<i64: 1, 128>}, {transform_indices = @transform_7, window_bounds = array<i64: 128, 128>}]} {
    %c0 = arith.constant 0 : index
    %c0_0 = arith.constant 0 : index
    %0 = vector.load %arg1[%c0, %c0_0] : memref<128x256xbf16, #tpu.memory_space<vmem>>, vector<128x256xbf16>
    %c0_1 = arith.constant 0 : index
    %c0_2 = arith.constant 0 : index
    %1 = vector.load %arg2[%c0_1, %c0_2] : memref<256x768xbf16, #tpu.memory_space<vmem>>, vector<256x768xbf16>
    %cst = arith.constant dense<0.000000e+00> : vector<128x768xf32>
    %2 = tpu.matmul %0, %1, %cst {dimension_numbers = #tpu.dot_dimension_numbers<[1], [0], [0], [1], [0, 0, 1, 1], [], []>} : vector<128x256xbf16>, vector<256x768xbf16>, vector<128x768xf32> -> vector<128x768xf32>
    %c0_3 = arith.constant 0 : index
    %c0_4 = arith.constant 0 : index
    %3 = vector.load %arg3[%c0_3, %c0_4] : memref<1x768xf32, #tpu.memory_space<vmem>>, vector<1x768xf32>
    %4 = vector.broadcast %3 : vector<1x768xf32> to vector<128x768xf32>
    %5 = arith.addf %2, %4 : vector<128x768xf32>
    %cst_5 = arith.constant 0.000000e+00 : f32
    %6 = vector.broadcast %cst_5 : f32 to vector<128x768xf32>
    %7 = arith.maximumf %5, %6 : vector<128x768xf32>
    %8 = arith.truncf %7 : vector<128x768xf32> to vector<128x768xbf16>
    %c0_6 = arith.constant 0 : index
    %c0_7 = arith.constant 0 : index
    %9 = vector.load %arg4[%c0_6, %c0_7] : memref<768x768xbf16, #tpu.memory_space<vmem>>, vector<768x768xbf16>
    %cst_8 = arith.constant dense<0.000000e+00> : vector<128x768xf32>
    %10 = tpu.matmul %8, %9, %cst_8 {dimension_numbers = #tpu.dot_dimension_numbers<[1], [0], [0], [1], [0, 0, 1, 1], [], []>} : vector<128x768xbf16>, vector<768x768xbf16>, vector<128x768xf32> -> vector<128x768xf32>
    %c0_9 = arith.constant 0 : index
    %c0_10 = arith.constant 0 : index
    %11 = vector.load %arg5[%c0_9, %c0_10] : memref<1x768xf32, #tpu.memory_space<vmem>>, vector<1x768xf32>
    %12 = vector.broadcast %11 : vector<1x768xf32> to vector<128x768xf32>
    %13 = arith.addf %10, %12 : vector<128x768xf32>
    %cst_11 = arith.constant 0.000000e+00 : f32
    %14 = vector.broadcast %cst_11 : f32 to vector<128x768xf32>
    %15 = arith.maximumf %13, %14 : vector<128x768xf32>
    %16 = arith.truncf %15 : vector<128x768xf32> to vector<128x768xbf16>
    %c0_12 = arith.constant 0 : index
    %c0_13 = arith.constant 0 : index
    %17 = vector.load %arg6[%c0_12, %c0_13] : memref<768x128xbf16, #tpu.memory_space<vmem>>, vector<768x128xbf16>
    %cst_14 = arith.constant dense<0.000000e+00> : vector<128x128xf32>
    %18 = tpu.matmul %16, %17, %cst_14 {dimension_numbers = #tpu.dot_dimension_numbers<[1], [0], [0], [1], [0, 0, 1, 1], [], []>} : vector<128x768xbf16>, vector<768x128xbf16>, vector<128x128xf32> -> vector<128x128xf32>
    %c0_15 = arith.constant 0 : index
    %c0_16 = arith.constant 0 : index
    %19 = vector.load %arg7[%c0_15, %c0_16] : memref<1x128xf32, #tpu.memory_space<vmem>>, vector<1x128xf32>
    %20 = vector.broadcast %19 : vector<1x128xf32> to vector<128x128xf32>
    %21 = arith.addf %18, %20 : vector<128x128xf32>
    %22 = arith.truncf %21 : vector<128x128xf32> to vector<128x128xbf16>
    %c0_17 = arith.constant 0 : index
    %c0_18 = arith.constant 0 : index
    %23 = vector.load %arg8[%c0_17, %c0_18] : memref<128x128xbf16, #tpu.memory_space<vmem>>, vector<128x128xbf16>
    tpu.vector_store %arg8[%c0_17, %c0_18], %22 {strides = array<i32>} : memref<128x128xbf16, #tpu.memory_space<vmem>>, vector<128x128xbf16>,
    return
  }
  func.func @transform_0(%arg0: i32) -> (i32, i32) {
    %c0_i32 = arith.constant 0 : i32
    %c0_i32_0 = arith.constant 0 : i32
    return %arg0, %c0_i32 : i32, i32
  }
  func.func @transform_1(%arg0: i32) -> (i32, i32) {
    %c0_i32 = arith.constant 0 : i32
    %c0_i32_0 = arith.constant 0 : i32
    %c0_i32_1 = arith.constant 0 : i32
    return %c0_i32, %c0_i32_0 : i32, i32
  }
  func.func @transform_2(%arg0: i32) -> (i32, i32) {
    %c0_i32 = arith.constant 0 : i32
    %c0_i32_0 = arith.constant 0 : i32
    %c0_i32_1 = arith.constant 0 : i32
    return %c0_i32, %c0_i32_0 : i32, i32
  }
  func.func @transform_3(%arg0: i32) -> (i32, i32) {
    %c0_i32 = arith.constant 0 : i32
    %c0_i32_0 = arith.constant 0 : i32
    %c0_i32_1 = arith.constant 0 : i32
    return %c0_i32, %c0_i32_0 : i32, i32
  }
  func.func @transform_4(%arg0: i32) -> (i32, i32) {
    %c0_i32 = arith.constant 0 : i32
    %c0_i32_0 = arith.constant 0 : i32
    %c0_i32_1 = arith.constant 0 : i32
    return %c0_i32, %c0_i32_0 : i32, i32
  }
  func.func @transform_5(%arg0: i32) -> (i32, i32) {
    %c0_i32 = arith.constant 0 : i32
    %c0_i32_0 = arith.constant 0 : i32
    %c0_i32_1 = arith.constant 0 : i32
    return %c0_i32, %c0_i32_0 : i32, i32
  }
  func.func @transform_6(%arg0: i32) -> (i32, i32) {
    %c0_i32 = arith.constant 0 : i32
    %c0_i32_0 = arith.constant 0 : i32
    %c0_i32_1 = arith.constant 0 : i32
    return %c0_i32, %c0_i32_0 : i32, i32
  }
  func.func @transform_7(%arg0: i32) -> (i32, i32) {
    %c0_i32 = arith.constant 0 : i32
    %c0_i32_0 = arith.constant 0 : i32
    return %arg0, %c0_i32 : i32, i32
  }
}

module attributes {stable_mosaic.version = 11 : i64} {
  func.func @lm_head_ce_kernel(%arg0: i32, %arg1: i32, %arg2: memref<256x128xbf16, #tpu.memory_space<vmem>>, %arg3: memref<128x512xbf16, #tpu.memory_space<vmem>>, %arg4: memref<1x512xf32, #tpu.memory_space<vmem>>, %arg5: memref<256x1xi32, #tpu.memory_space<vmem>>, %arg6: memref<256x512xbf16, #tpu.memory_space<vmem>>, %arg7: memref<1x1x128xf32, #tpu.memory_space<vmem>>, %arg8: memref<256x1xf32, #tpu.memory_space<vmem>>, %arg9: memref<256x1xf32, #tpu.memory_space<vmem>>, %arg10: memref<256x1xf32, #tpu.memory_space<vmem>>) attributes {dimension_semantics = [#tpu.dimension_semantics<parallel>, #tpu.dimension_semantics<arbitrary>], iteration_bounds = array<i64: 1, 1>, scalar_prefetch = 0 : i64, scratch_operands = 3 : i64, tpu.core_type = #tpu.core_type<tc>, window_params = [{transform_indices = @transform_0, window_bounds = array<i64: 256, 128>}, {transform_indices = @transform_1, window_bounds = array<i64: 128, 512>}, {transform_indices = @transform_2, window_bounds = array<i64: 1, 512>}, {transform_indices = @transform_3, window_bounds = array<i64: 256, 1>}, {transform_indices = @transform_4, window_bounds = array<i64: 256, 512>}, {transform_indices = @transform_5, window_bounds = array<i64: 1, 1, 128>}]} {
    %c0_i32 = arith.constant 0 : i32
    %0 = arith.cmpi eq, %arg1, %c0_i32 : i32
    %1 = arith.extui %0 : i1 to i32
    %c0_i32_0 = arith.constant 0 : i32
    %2 = arith.cmpi ne, %1, %c0_i32_0 : i32
    scf.if %2 {
      %cst_30 = arith.constant 0xFF800000 : f32
      %45 = vector.broadcast %cst_30 : f32 to vector<256x1xf32>
      %c0_31 = arith.constant 0 : index
      %c0_32 = arith.constant 0 : index
      %46 = vector.load %arg8[%c0_31, %c0_32] : memref<256x1xf32, #tpu.memory_space<vmem>>, vector<256x1xf32>
      tpu.vector_store %arg8[%c0_31, %c0_32], %45 {strides = array<i32>} : memref<256x1xf32, #tpu.memory_space<vmem>>, vector<256x1xf32>,
      %cst_33 = arith.constant 0.000000e+00 : f32
      %47 = vector.broadcast %cst_33 : f32 to vector<256x1xf32>
      %c0_34 = arith.constant 0 : index
      %c0_35 = arith.constant 0 : index
      %48 = vector.load %arg9[%c0_34, %c0_35] : memref<256x1xf32, #tpu.memory_space<vmem>>, vector<256x1xf32>
      tpu.vector_store %arg9[%c0_34, %c0_35], %47 {strides = array<i32>} : memref<256x1xf32, #tpu.memory_space<vmem>>, vector<256x1xf32>,
      %cst_36 = arith.constant 0.000000e+00 : f32
      %49 = vector.broadcast %cst_36 : f32 to vector<256x1xf32>
      %c0_37 = arith.constant 0 : index
      %c0_38 = arith.constant 0 : index
      %50 = vector.load %arg10[%c0_37, %c0_38] : memref<256x1xf32, #tpu.memory_space<vmem>>, vector<256x1xf32>
      tpu.vector_store %arg10[%c0_37, %c0_38], %49 {strides = array<i32>} : memref<256x1xf32, #tpu.memory_space<vmem>>, vector<256x1xf32>,
    } else {
    }
    %c0 = arith.constant 0 : index
    %c0_1 = arith.constant 0 : index
    %3 = vector.load %arg2[%c0, %c0_1] : memref<256x128xbf16, #tpu.memory_space<vmem>>, vector<256x128xbf16>
    %c0_2 = arith.constant 0 : index
    %c0_3 = arith.constant 0 : index
    %4 = vector.load %arg3[%c0_2, %c0_3] : memref<128x512xbf16, #tpu.memory_space<vmem>>, vector<128x512xbf16>
    %cst = arith.constant dense<0.000000e+00> : vector<256x512xf32>
    %5 = tpu.matmul %3, %4, %cst {dimension_numbers = #tpu.dot_dimension_numbers<[1], [0], [0], [1], [0, 0, 1, 1], [], []>} : vector<256x128xbf16>, vector<128x512xbf16>, vector<256x512xf32> -> vector<256x512xf32>
    %c0_4 = arith.constant 0 : index
    %c0_5 = arith.constant 0 : index
    %6 = vector.load %arg4[%c0_4, %c0_5] : memref<1x512xf32, #tpu.memory_space<vmem>>, vector<1x512xf32>
    %7 = vector.broadcast %6 : vector<1x512xf32> to vector<256x512xf32>
    %8 = arith.addf %5, %7 : vector<256x512xf32>
    %9 = arith.truncf %8 : vector<256x512xf32> to vector<256x512xbf16>
    %c0_6 = arith.constant 0 : index
    %c0_7 = arith.constant 0 : index
    %10 = vector.load %arg6[%c0_6, %c0_7] : memref<256x512xbf16, #tpu.memory_space<vmem>>, vector<256x512xbf16>
    tpu.vector_store %arg6[%c0_6, %c0_7], %9 {strides = array<i32>} : memref<256x512xbf16, #tpu.memory_space<vmem>>, vector<256x512xbf16>,
    %c0_8 = arith.constant 0 : index
    %c0_9 = arith.constant 0 : index
    %11 = vector.load %arg5[%c0_8, %c0_9] : memref<256x1xi32, #tpu.memory_space<vmem>>, vector<256x1xi32>
    %12 = tpu.iota {dimensions = array<i32: 1>} : vector<256x512xi32>
    %c512_i32 = arith.constant 512 : i32
    %13 = arith.muli %arg1, %c512_i32 : i32
    %14 = vector.broadcast %13 : i32 to vector<256x512xi32>
    %15 = arith.addi %12, %14 : vector<256x512xi32>
    %c0_10 = arith.constant 0 : index
    %c0_11 = arith.constant 0 : index
    %16 = vector.load %arg10[%c0_10, %c0_11] : memref<256x1xf32, #tpu.memory_space<vmem>>, vector<256x1xf32>
    %17 = vector.broadcast %11 : vector<256x1xi32> to vector<256x512xi32>
    %18 = arith.cmpi eq, %15, %17 : vector<256x512xi32>
    %cst_12 = arith.constant 0.000000e+00 : f32
    %19 = vector.broadcast %cst_12 : f32 to vector<256x512xf32>
    %20 = arith.select %18, %8, %19 : vector<256x512xi1>, vector<256x512xf32>
    %cst_13 = arith.constant dense<0.000000e+00> : vector<256xf32>
    %21 = vector.multi_reduction <add>, %20, %cst_13 [1] : vector<256x512xf32> to vector<256xf32>
    %22 = vector.shape_cast %21 : vector<256xf32> to vector<256x1xf32>
    %23 = arith.addf %16, %22 : vector<256x1xf32>
    %c0_14 = arith.constant 0 : index
    %c0_15 = arith.constant 0 : index
    %24 = vector.load %arg10[%c0_14, %c0_15] : memref<256x1xf32, #tpu.memory_space<vmem>>, vector<256x1xf32>
    tpu.vector_store %arg10[%c0_14, %c0_15], %23 {strides = array<i32>} : memref<256x1xf32, #tpu.memory_space<vmem>>, vector<256x1xf32>,
    %c0_16 = arith.constant 0 : index
    %c0_17 = arith.constant 0 : index
    %25 = vector.load %arg8[%c0_16, %c0_17] : memref<256x1xf32, #tpu.memory_space<vmem>>, vector<256x1xf32>
    %cst_18 = arith.constant dense<0xFF800000> : vector<256xf32>
    %26 = vector.multi_reduction <maximumf>, %8, %cst_18 [1] : vector<256x512xf32> to vector<256xf32>
    %27 = vector.shape_cast %26 : vector<256xf32> to vector<256x1xf32>
    %28 = arith.maximumf %25, %27 : vector<256x1xf32>
    %c0_19 = arith.constant 0 : index
    %c0_20 = arith.constant 0 : index
    %29 = vector.load %arg8[%c0_19, %c0_20] : memref<256x1xf32, #tpu.memory_space<vmem>>, vector<256x1xf32>
    %30 = arith.subf %29, %28 : vector<256x1xf32>
    %31 = math.exp %30 : vector<256x1xf32>
    %c0_21 = arith.constant 0 : index
    %c0_22 = arith.constant 0 : index
    %32 = vector.load %arg9[%c0_21, %c0_22] : memref<256x1xf32, #tpu.memory_space<vmem>>, vector<256x1xf32>
    %33 = arith.mulf %31, %32 : vector<256x1xf32>
    %34 = vector.broadcast %28 : vector<256x1xf32> to vector<256x512xf32>
    %35 = arith.subf %8, %34 : vector<256x512xf32>
    %36 = math.exp %35 : vector<256x512xf32>
    %cst_23 = arith.constant dense<0.000000e+00> : vector<256xf32>
    %37 = vector.multi_reduction <add>, %36, %cst_23 [1] : vector<256x512xf32> to vector<256xf32>
    %38 = vector.shape_cast %37 : vector<256xf32> to vector<256x1xf32>
    %39 = arith.addf %33, %38 : vector<256x1xf32>
    %c0_24 = arith.constant 0 : index
    %c0_25 = arith.constant 0 : index
    %40 = vector.load %arg9[%c0_24, %c0_25] : memref<256x1xf32, #tpu.memory_space<vmem>>, vector<256x1xf32>
    tpu.vector_store %arg9[%c0_24, %c0_25], %39 {strides = array<i32>} : memref<256x1xf32, #tpu.memory_space<vmem>>, vector<256x1xf32>,
    %c0_26 = arith.constant 0 : index
    %c0_27 = arith.constant 0 : index
    %41 = vector.load %arg8[%c0_26, %c0_27] : memref<256x1xf32, #tpu.memory_space<vmem>>, vector<256x1xf32>
    tpu.vector_store %arg8[%c0_26, %c0_27], %28 {strides = array<i32>} : memref<256x1xf32, #tpu.memory_space<vmem>>, vector<256x1xf32>,
    %c0_i32_28 = arith.constant 0 : i32
    %42 = arith.cmpi eq, %arg1, %c0_i32_28 : i32
    %43 = arith.extui %42 : i1 to i32
    %c0_i32_29 = arith.constant 0 : i32
    %44 = arith.cmpi ne, %43, %c0_i32_29 : i32
    scf.if %44 {
      %c0_30 = arith.constant 0 : index
      %c0_31 = arith.constant 0 : index
      %45 = vector.load %arg8[%c0_30, %c0_31] : memref<256x1xf32, #tpu.memory_space<vmem>>, vector<256x1xf32>
      %c0_32 = arith.constant 0 : index
      %c0_33 = arith.constant 0 : index
      %46 = vector.load %arg9[%c0_32, %c0_33] : memref<256x1xf32, #tpu.memory_space<vmem>>, vector<256x1xf32>
      %47 = math.log %46 : vector<256x1xf32>
      %48 = arith.addf %45, %47 : vector<256x1xf32>
      %c0_34 = arith.constant 0 : index
      %c0_35 = arith.constant 0 : index
      %49 = vector.load %arg5[%c0_34, %c0_35] : memref<256x1xi32, #tpu.memory_space<vmem>>, vector<256x1xi32>
      %c-100_i32 = arith.constant -100 : i32
      %50 = vector.broadcast %c-100_i32 : i32 to vector<256x1xi32>
      %51 = arith.cmpi ne, %49, %50 : vector<256x1xi32>
      %c0_36 = arith.constant 0 : index
      %c0_37 = arith.constant 0 : index
      %52 = vector.load %arg10[%c0_36, %c0_37] : memref<256x1xf32, #tpu.memory_space<vmem>>, vector<256x1xf32>
      %53 = arith.subf %48, %52 : vector<256x1xf32>
      %cst_38 = arith.constant 0.000000e+00 : f32
      %54 = vector.broadcast %cst_38 : f32 to vector<256x1xf32>
      %55 = arith.select %51, %53, %54 : vector<256x1xi1>, vector<256x1xf32>
      %56 = vector.shape_cast %55 : vector<256x1xf32> to vector<1x256x1xf32>
      %cst_39 = arith.constant dense<0.000000e+00> : vector<1xf32>
      %57 = vector.multi_reduction <add>, %56, %cst_39 [1, 2] : vector<1x256x1xf32> to vector<1xf32>
      %58 = vector.shape_cast %57 : vector<1xf32> to vector<1x1x1xf32>
      %59 = vector.extract %58[0, 0, 0] : f32 from vector<1x1x1xf32>
      %60 = vector.broadcast %59 : f32 to vector<1x1x128xf32>
      %c0_40 = arith.constant 0 : index
      %c0_41 = arith.constant 0 : index
      %c0_42 = arith.constant 0 : index
      %61 = vector.load %arg7[%c0_40, %c0_41, %c0_42] : memref<1x1x128xf32, #tpu.memory_space<vmem>>, vector<1x1x128xf32>
      tpu.vector_store %arg7[%c0_40, %c0_41, %c0_42], %60 {strides = array<i32>} : memref<1x1x128xf32, #tpu.memory_space<vmem>>, vector<1x1x128xf32>,
    } else {
    }
    return
  }
  func.func @transform_0(%arg0: i32, %arg1: i32) -> (i32, i32) {
    %c0_i32 = arith.constant 0 : i32
    %c0_i32_0 = arith.constant 0 : i32
    return %arg0, %c0_i32 : i32, i32
  }
  func.func @transform_1(%arg0: i32, %arg1: i32) -> (i32, i32) {
    %c0_i32 = arith.constant 0 : i32
    %c0_i32_0 = arith.constant 0 : i32
    return %c0_i32, %arg1 : i32, i32
  }
  func.func @transform_2(%arg0: i32, %arg1: i32) -> (i32, i32) {
    %c0_i32 = arith.constant 0 : i32
    %c0_i32_0 = arith.constant 0 : i32
    return %c0_i32, %arg1 : i32, i32
  }
  func.func @transform_3(%arg0: i32, %arg1: i32) -> (i32, i32) {
    %c0_i32 = arith.constant 0 : i32
    %c0_i32_0 = arith.constant 0 : i32
    return %arg0, %c0_i32 : i32, i32
  }
  func.func @transform_4(%arg0: i32, %arg1: i32) -> (i32, i32) {
    %c0_i32 = arith.constant 0 : i32
    return %arg0, %arg1 : i32, i32
  }
  func.func @transform_5(%arg0: i32, %arg1: i32) -> (i32, i32, i32) {
    %c0_i32 = arith.constant 0 : i32
    %c0_i32_0 = arith.constant 0 : i32
    %c0_i32_1 = arith.constant 0 : i32
    return %arg0, %c0_i32, %c0_i32_0 : i32, i32, i32
  }
}

</mosaic_0001>

<bundles_post_ra>
// kernel: inrep_plus_gan_forward.3
= control target key start
LH: loop header
LB: loop body
LE: loop exit
PB: predicated region body
PF: predicated region fallthrough
CT: control target
= control target key end

     0   :  { %v4169_v1 = vmov 0   ;;  %vm24_vm11 = vcmask 7168   ;;  %s7292_s1 = inlined_call_operand.vmem [shape: bf16[128,512], index: 1, kind: input, shape index: {}]   ;;  %s7293_s0 = inlined_call_operand.vmem [shape: bf16[256,128], index: 0, kind: input, shape index: {}]   ;;  %s7294_s3 = inlined_call_operand.vmem [shape: s32[256,1], index: 3, kind: input, shape index: {}]   ;;  %s7295_s2 = inlined_call_operand.vmem [shape: f32[1,512], index: 2, kind: input, shape index: {}]   ;;  %s7296_s4 = inlined_call_operand.vmem [shape: bf16[256,512], index: 4, kind: output, shape index: {0}]   ;;  %s7297_s5 = inlined_call_operand.vmem [shape: f32[1,1,128], index: 5, kind: output, shape index: {1}]  }
   0x1   :  { %v3721_v0 = vld [vmem:[%s7292_s1 + $0xe4] ss:$16 sps:$4 sm:$0xff]   ;;  %495 = vmatprep.mubr.bf16.mxu0 %v4169_v1  ;;  %688 = vmatprep.mubr.bf16.mxu1 %v4169_v1  ;;  %v3723_v2 = vld [vmem:[%s7292_s1 + $0xec] ss:$16 sps:$4 sm:$0xff]   ;;  %v3725_v3 = vld [vmem:[%s7292_s1 + $0xe0] ss:$16 sps:$4 sm:$0xff]  }
   0x2   :  { %3720 = vset.pattern.permute.xlu1 %v4169_v1  ;;  %3719 = vset.pattern.permute.xlu0 %v4169_v1  ;;  %v3726_v4 = vld [vmem:[%s7292_s1 + $0xe8] ss:$16 sps:$4 sm:$0xff]   ;;  %v3727_v5 = vld [vmem:[%s7292_s1 + $0xc4] ss:$16 sps:$4 sm:$0xff]   ;;  %v3729_v6 = vld [vmem:[%s7292_s1 + $0xcc] ss:$16 sps:$4 sm:$0xff]  }
   0x3   :  { %463 = vmatprep.subr.bf16.mxu0 %v3721_v0  ;;  %656 = vmatprep.subr.bf16.mxu1 %v3723_v2  ;;  %v3731_v7 = vld [vmem:[%s7292_s1 + $0xc0] ss:$16 sps:$4 sm:$0xff]   ;;  %v3732_v8 = vld [vmem:[%s7292_s1 + $0xc8] ss:$16 sps:$4 sm:$0xff]   ;;  %v3733_v9 = vld [vmem:[%s7292_s1 + $0xa4] ss:$16 sps:$4 sm:$0xff]  }
   0x4   :  { %464 = vmatpush1.bf16.msra.mxu0 %v3725_v3  ;;  %657 = vmatpush1.bf16.msra.mxu1 %v3726_v4  ;;  %v3735_v10 = vld [vmem:[%s7292_s1 + $0xac] ss:$16 sps:$4 sm:$0xff]   ;;  %v3737_v11 = vld [vmem:[%s7292_s1 + $0xa0] ss:$16 sps:$4 sm:$0xff]   ;;  %v3738_v12 = vld [vmem:[%s7292_s1 + $0xa8] ss:$16 sps:$4 sm:$0xff]  }
   0x5   :  { %465 = vmatprep.subr.bf16.mxu0 %v3727_v5  ;;  %658 = vmatprep.subr.bf16.mxu1 %v3729_v6  ;;  %v3739_v13 = vld [vmem:[%s7292_s1 + $0x84] ss:$16 sps:$4 sm:$0xff]   ;;  %v3741_v14 = vld [vmem:[%s7292_s1 + $0x8c] ss:$16 sps:$4 sm:$0xff]   ;;  %v3743_v15 = vld [vmem:[%s7292_s1 + $0x80] ss:$16 sps:$4 sm:$0xff]  }
   0x6   :  { %v3744_v16 = vld [vmem:[%s7292_s1 + $0x88] ss:$16 sps:$4 sm:$0xff]   ;;  %v3745_v17 = vld [vmem:[%s7292_s1 + $0x64] ss:$16 sps:$4 sm:$0xff]   ;;  %v3747_v18 = vld [vmem:[%s7292_s1 + $0x6c] ss:$16 sps:$4 sm:$0xff]  }
   0x7   :  { %v3749_v19 = vld [vmem:[%s7292_s1 + $0x60] ss:$16 sps:$4 sm:$0xff]   ;;  %v3750_v20 = vld [vmem:[%s7292_s1 + $0x68] ss:$16 sps:$4 sm:$0xff]   ;;  %v3751_v21 = vld [vmem:[%s7292_s1 + $0x44] ss:$16 sps:$4 sm:$0xff]  }
   0x8   :  { %466 = vmatpush1.bf16.msra.mxu0 %v3731_v7  ;;  %659 = vmatpush1.bf16.msra.mxu1 %v3732_v8  ;;  %v3753_v22 = vld [vmem:[%s7292_s1 + $0x4c] ss:$16 sps:$4 sm:$0xff]   ;;  %v3755_v23 = vld [vmem:[%s7292_s1 + $0x40] ss:$16 sps:$4 sm:$0xff]   ;;  %v3756_v24 = vld [vmem:[%s7292_s1 + $0x48] ss:$16 sps:$4 sm:$0xff]  }
   0x9   :  { %467 = vmatprep.subr.bf16.mxu0 %v3733_v9  ;;  %660 = vmatprep.subr.bf16.mxu1 %v3735_v10  ;;  %v3757_v25 = vld [vmem:[%s7292_s1 + $0x24] ss:$16 sps:$4 sm:$0xff]   ;;  %v3759_v26 = vld [vmem:[%s7292_s1 + $0x2c] ss:$16 sps:$4 sm:$0xff]   ;;  %v3761_v27 = vld [vmem:[%s7292_s1 + $0x20] ss:$16 sps:$4 sm:$0xff]  }
   0xa   :  { %v1299_v28 = vld [vmem:[%s7294_s3 + $0x10] sm:$0xff]  ;;  %v3762_v29 = vld [vmem:[%s7292_s1 + $0x28] ss:$16 sps:$4 sm:$0xff]   ;;  %v3765_v31 = vld [vmem:[%s7292_s1 + $0xc] ss:$16 sps:$4 sm:$0xff]  }
   0xb   :  { %v3763_v30 = vld [vmem:[%s7292_s1 + $0x4] ss:$16 sps:$4 sm:$0xff]   ;;  %1379 = vperm.xlu1 %3720, %v1299_v28   ;;  %v3767_v33 = vld [vmem:[%s7292_s1] ss:$16 sps:$4 sm:$0xff]   ;;  %v1300_v34 = vld [vmem:[%s7294_s3 + $0x18] sm:$0xff] }
   0xc   :  { %468 = vmatpush1.bf16.msra.mxu0 %v3737_v11  ;;  %661 = vmatpush1.bf16.msra.mxu1 %v3738_v12  ;;  %v1297_v32 = vld [vmem:[%s7294_s3] sm:$0xff]  ;;  %v1298_v35 = vld [vmem:[%s7294_s3 + $0x8] sm:$0xff]  ;;  %v1304_v40 = vld [vmem:[%s7294_s3 + $0x38] sm:$0xff] }
   0xd   :  { %469 = vmatprep.subr.bf16.mxu0 %v3739_v13  ;;  %662 = vmatprep.subr.bf16.mxu1 %v3741_v14  ;;  %v3768_v36 = vld [vmem:[%s7292_s1 + $0x8] ss:$16 sps:$4 sm:$0xff]   ;;  %v3769_v37 = vld [vmem:[%s7293_s0] sm:$0xff]   ;;  %v1303_v41 = vld [vmem:[%s7294_s3 + $0x30] sm:$0xff] }
   0xe   :  { %1373 = vperm.xlu0 %3719, %v1297_v32   ;;  %v1302_v38 = vld [vmem:[%s7294_s3 + $0x28] sm:$0xff]  ;;  %v1301_v39 = vld [vmem:[%s7294_s3 + $0x20] sm:$0xff]  ;;  %v1307_v45 = vld [vmem:[%s7294_s3 + $0x50] sm:$0xff] }
   0xf   :  { %1382 = vperm.xlu1 %3720, %v1300_v34   ;;  %v3770_v42 = vld [vmem:[%s7293_s0 + $0x8] sm:$0xff]   ;;  %v1305_v44 = vld [vmem:[%s7294_s3 + $0x40] sm:$0xff]  ;;  %v3771_v47 = vld [vmem:[%s7293_s0 + $0x10] sm:$0xff]  }
  0x10   :  { %470 = vmatpush1.bf16.msra.mxu0 %v3743_v15  ;;  %663 = vmatpush1.bf16.msra.mxu1 %v3744_v16  ;;  %v1306_v43 = vld [vmem:[%s7294_s3 + $0x48] sm:$0xff]  ;;  %v1313_v46 = vld [vmem:[%s7294_s3 + $0x80] sm:$0xff]  ;;  %v1308_v48 = vld [vmem:[%s7294_s3 + $0x58] sm:$0xff] }
  0x11   :  { %471 = vmatprep.subr.bf16.mxu0 %v3745_v17  ;;  %664 = vmatprep.subr.bf16.mxu1 %v3747_v18  ;;  %v1315_v49 = vld [vmem:[%s7294_s3 + $0x90] sm:$0xff]  ;;  %v1309_v50 = vld [vmem:[%s7294_s3 + $0x60] sm:$0xff]  ;;  %v3772_v52 = vld [vmem:[%s7293_s0 + $0x18] sm:$0xff]   ;;  %v187_v18 = vlaneseq }
  0x12   :  { %1376 = vperm.xlu0 %3719, %v1298_v35   ;;  %v1317_v51 = vld [vmem:[%s7294_s3 + $0xa0] sm:$0xff]  ;;  %v1310_v53 = vld [vmem:[%s7294_s3 + $0x68] sm:$0xff]  ;;  %v1319_v54 = vld [vmem:[%s7294_s3 + $0xb0] sm:$0xff] }
  0x13   :  { %1388 = vperm.xlu1 %3720, %v1302_v38   ;;  %v1311_v55 = vld [vmem:[%s7294_s3 + $0x70] sm:$0xff]  ;;  %v1321_v56 = vld [vmem:[%s7294_s3 + $0xc0] sm:$0xff]  ;;  %v1312_v58 = vld [vmem:[%s7294_s3 + $0x78] sm:$0xff] }
  0x14   :  { %472 = vmatpush1.bf16.msra.mxu0 %v3749_v19  ;;  %665 = vmatpush1.bf16.msra.mxu1 %v3750_v20  ;;  %v3773_v57 = vld [vmem:[%s7293_s0 + $0x20] sm:$0xff]   ;;  %v1323_v59 = vld [vmem:[%s7294_s3 + $0xd0] sm:$0xff]  ;;  %v1314_v60 = vld [vmem:[%s7294_s3 + $0x88] sm:$0xff]  ;;  %v188_v19 = vshrl.u32 %v187_v18, 7 }
  0x15   :  { %473 = vmatprep.subr.bf16.mxu0 %v3751_v21  ;;  %666 = vmatprep.subr.bf16.mxu1 %v3753_v22  ;;  %v1325_v61 = vld [vmem:[%s7294_s3 + $0xe0] sm:$0xff]  ;;  %v3774_v62 = vld [vmem:[%s7293_s0 + $0x28] sm:$0xff]   ;;  %v1316_v63 = vld [vmem:[%s7294_s3 + $0x98] sm:$0xff]  ;;  %v4476_v21 = vand.u32 127, %v187_v18 }
  0x16   :  { %1385 = vperm.xlu0 %3719, %v1301_v39   ;;  %v1328_v0 = vld [vmem:[%s7294_s3 + $0xf8] sm:$0xff]  ;;  %v1318_v2 = vld [vmem:[%s7294_s3 + $0xa8] sm:$0xff]  ;;  %v3775_v3 = vld [vmem:[%s7293_s0 + $0x30] sm:$0xff]   ;;  %v189_v20 = vsub.s32 0, %v188_v19 }
  0x17   :  { %1394 = vperm.xlu1 %3720, %v1304_v40   ;;  %v1320_v4 = vld [vmem:[%s7294_s3 + $0xb8] sm:$0xff]  ;;  %v1322_v5 = vld [vmem:[%s7294_s3 + $0xc8] sm:$0xff]  ;;  %v3777_v9 = vld [vmem:[%s7293_s0 + $0x40] sm:$0xff]   ;;  %v4496_v34 = vadd.s32 384, %v4476_v21 }
  0x18   :  { %474 = vmatpush1.bf16.msra.mxu0 %v3755_v23  ;;  %667 = vmatpush1.bf16.msra.mxu1 %v3756_v24  ;;  %v3776_v6 = vld [vmem:[%s7293_s0 + $0x38] sm:$0xff]   ;;  %v1326_v8 = vld [vmem:[%s7294_s3 + $0xe8] sm:$0xff]  ;;  %v1327_v10 = vld [vmem:[%s7294_s3 + $0xf0] sm:$0xff]  ;;  %v197_v23 = vsub.s32 2, %v188_v19  ;;  %v193_v24 = vsub.s32 1, %v188_v19 }
  0x19   :  { %475 = vmatprep.subr.bf16.mxu0 %v3757_v25  ;;  %668 = vmatprep.subr.bf16.mxu1 %v3759_v26  ;;  %v1324_v7 = vld [vmem:[%s7294_s3 + $0xd8] sm:$0xff]  ;;  %v3778_v11 = vld [vmem:[%s7293_s0 + $0x48] sm:$0xff]   ;;  %v3779_v12 = vld [vmem:[%s7293_s0 + $0x50] sm:$0xff]   ;;  %v201_v25 = vsub.s32 3, %v188_v19 }
  0x1a   :  { %1391 = vperm.xlu0 %3719, %v1303_v41   ;;  %v3780_v13 = vld [vmem:[%s7293_s0 + $0x58] sm:$0xff]   ;;  %v3781_v14 = vld [vmem:[%s7293_s0 + $0x60] sm:$0xff]   ;;  %v3782_v15 = vld [vmem:[%s7293_s0 + $0x68] sm:$0xff]  }
  0x1b   :  { %1400 = vperm.xlu1 %3720, %v1306_v43   ;;  %v3783_v16 = vld [vmem:[%s7293_s0 + $0x70] sm:$0xff]   ;;  %v3784_v17 = vld [vmem:[%s7293_s0 + $0x78] sm:$0xff]   ;;  %v185_v22 = vld [vmem:[%s7295_s2] sm:$0xf] }
  0x1c   :  { %476 = vmatpush1.bf16.msra.mxu0 %v3761_v27  ;;  %669 = vmatpush1.bf16.msra.mxu1 %v3762_v29  ;;  %v4484_v27 = vadd.s32 128, %v4476_v21  ;;  %v4486_v28 = vrot.slane %v185_v22, %v197_v23  ;;  %v4488_v29 = vrot.slane %v185_v22, %v193_v24 }
  0x1d   :  { %477 = vmatprep.subr.bf16.mxu0 %v3763_v30  ;;  %670 = vmatprep.subr.bf16.mxu1 %v3765_v31  ;;  %v4490_v30 = vrot.slane %v185_v22, %v201_v25 }
  0x1e   :  { %1397 = vperm.xlu0 %3719, %v1305_v44  }
  0x1f   :  { %1403 = vperm.xlu1 %3720, %v1307_v45  }
  0x20   :  { %478 = vmatpush1.bf16.msra.mxu0 %v3767_v33  ;;  %671 = vmatpush1.bf16.msra.mxu1 %v3768_v36  ;;  %v4493_v33 = vadd.s32 256, %v4476_v21 }
  0x22   :  { %1421 = vperm.xlu0 %3719, %v1313_v46  }
  0x23   :  { %496 = vmatmul.mubr.bf16.vlgmr.msra.gmra.mxu0 %v3769_v37  ;;  %689 = vmatmul.mubr.bf16.vlgmr.msra.gmra.mxu1 %v3769_v37 }
  0x24   :  { %505 = vmatprep.mubr.bf16.mxu0 %v4169_v1  ;;  %698 = vmatprep.mubr.bf16.mxu1 %v4169_v1 }
  0x25   :  { %1406 = vperm.xlu1 %3720, %v1308_v48  }
  0x26   :  { %1427 = vperm.xlu0 %3719, %v1315_v49  }
  0x29   :  { %1409 = vperm.xlu1 %3720, %v1309_v50  }
  0x2a   :  { %1433 = vperm.xlu0 %3719, %v1317_v51  }
  0x2b   :  { %506 = vmatmul.mubr.bf16.gmra.mxu0 %v3770_v42  ;;  %699 = vmatmul.mubr.bf16.gmra.mxu1 %v3770_v42 }
  0x2c   :  { %515 = vmatprep.mubr.bf16.mxu0 %v4169_v1  ;;  %708 = vmatprep.mubr.bf16.mxu1 %v4169_v1 }
  0x2d   :  { %1412 = vperm.xlu1 %3720, %v1310_v53  }
  0x2e   :  { %1439 = vperm.xlu0 %3719, %v1319_v54  }
  0x31   :  { %1415 = vperm.xlu1 %3720, %v1311_v55  }
  0x32   :  { %1445 = vperm.xlu0 %3719, %v1321_v56  }
  0x33   :  { %516 = vmatmul.mubr.bf16.gmra.mxu0 %v3771_v47  ;;  %709 = vmatmul.mubr.bf16.gmra.mxu1 %v3771_v47 }
  0x34   :  { %525 = vmatprep.mubr.bf16.mxu0 %v4169_v1  ;;  %718 = vmatprep.mubr.bf16.mxu1 %v4169_v1 }
  0x35   :  { %1418 = vperm.xlu1 %3720, %v1312_v58  }
  0x36   :  { %1451 = vperm.xlu0 %3719, %v1323_v59  }
  0x39   :  { %1424 = vperm.xlu1 %3720, %v1314_v60  }
  0x3a   :  { %1457 = vperm.xlu0 %3719, %v1325_v61  }
  0x3b   :  { %526 = vmatmul.mubr.bf16.gmra.mxu0 %v3772_v52  ;;  %719 = vmatmul.mubr.bf16.gmra.mxu1 %v3772_v52 }
  0x3c   :  { %535 = vmatprep.mubr.bf16.mxu0 %v4169_v1  ;;  %728 = vmatprep.mubr.bf16.mxu1 %v4169_v1 }
  0x3d   :  { %1430 = vperm.xlu1 %3720, %v1316_v63  }
  0x3e   :  { %1466 = vperm.xlu0 %3719, %v1328_v0  }
  0x41   :  { %1436 = vperm.xlu1 %3720, %v1318_v2   ;;  %v4170_v2 = vmov -inf  }
  0x42   :  { %25 = vst.msk [vmem:[#allocation2] sm:$0xff] %vm24_vm11, %v4170_v2  ;;  %26 = vst.msk [vmem:[#allocation2 + $0x8] sm:$0xff] %vm24_vm11, %v4170_v2 }
  0x43   :  { %536 = vmatmul.mubr.bf16.gmra.mxu0 %v3773_v57  ;;  %729 = vmatmul.mubr.bf16.gmra.mxu1 %v3773_v57  ;;  %27 = vst.msk [vmem:[#allocation2 + $0x10] sm:$0xff] %vm24_vm11, %v4170_v2  ;;  %28 = vst.msk [vmem:[#allocation2 + $0x18] sm:$0xff] %vm24_vm11, %v4170_v2 }
  0x44   :  { %545 = vmatprep.mubr.bf16.mxu0 %v4169_v1  ;;  %738 = vmatprep.mubr.bf16.mxu1 %v4169_v1  ;;  %29 = vst.msk [vmem:[#allocation2 + $0x20] sm:$0xff] %vm24_vm11, %v4170_v2  ;;  %30 = vst.msk [vmem:[#allocation2 + $0x28] sm:$0xff] %vm24_vm11, %v4170_v2 }
  0x45   :  { %1442 = vperm.xlu1 %3720, %v1320_v4   ;;  %31 = vst.msk [vmem:[#allocation2 + $0x30] sm:$0xff] %vm24_vm11, %v4170_v2  ;;  %32 = vst.msk [vmem:[#allocation2 + $0x38] sm:$0xff] %vm24_vm11, %v4170_v2 }
  0x46   :  { %33 = vst.msk [vmem:[#allocation2 + $0x40] sm:$0xff] %vm24_vm11, %v4170_v2  ;;  %34 = vst.msk [vmem:[#allocation2 + $0x48] sm:$0xff] %vm24_vm11, %v4170_v2 }
  0x47   :  { %35 = vst.msk [vmem:[#allocation2 + $0x50] sm:$0xff] %vm24_vm11, %v4170_v2  ;;  %36 = vst.msk [vmem:[#allocation2 + $0x58] sm:$0xff] %vm24_vm11, %v4170_v2 }
  0x48   :  { %37 = vst.msk [vmem:[#allocation2 + $0x60] sm:$0xff] %vm24_vm11, %v4170_v2  ;;  %38 = vst.msk [vmem:[#allocation2 + $0x68] sm:$0xff] %vm24_vm11, %v4170_v2 }
  0x49   :  { %1448 = vperm.xlu1 %3720, %v1322_v5   ;;  %39 = vst.msk [vmem:[#allocation2 + $0x70] sm:$0xff] %vm24_vm11, %v4170_v2  ;;  %40 = vst.msk [vmem:[#allocation2 + $0x78] sm:$0xff] %vm24_vm11, %v4170_v2 }
  0x4a   :  { %41 = vst.msk [vmem:[#allocation2 + $0x80] sm:$0xff] %vm24_vm11, %v4170_v2  ;;  %42 = vst.msk [vmem:[#allocation2 + $0x88] sm:$0xff] %vm24_vm11, %v4170_v2 }
  0x4b   :  { %546 = vmatmul.mubr.bf16.gmra.mxu0 %v3774_v62  ;;  %739 = vmatmul.mubr.bf16.gmra.mxu1 %v3774_v62  ;;  %43 = vst.msk [vmem:[#allocation2 + $0x90] sm:$0xff] %vm24_vm11, %v4170_v2  ;;  %44 = vst.msk [vmem:[#allocation2 + $0x98] sm:$0xff] %vm24_vm11, %v4170_v2 }
  0x4c   :  { %555 = vmatprep.mubr.bf16.mxu0 %v4169_v1  ;;  %748 = vmatprep.mubr.bf16.mxu1 %v4169_v1  ;;  %45 = vst.msk [vmem:[#allocation2 + $0xa0] sm:$0xff] %vm24_vm11, %v4170_v2  ;;  %46 = vst.msk [vmem:[#allocation2 + $0xa8] sm:$0xff] %vm24_vm11, %v4170_v2 }
  0x4d   :  { %1454 = vperm.xlu1 %3720, %v1324_v7   ;;  %47 = vst.msk [vmem:[#allocation2 + $0xb0] sm:$0xff] %vm24_vm11, %v4170_v2  ;;  %48 = vst.msk [vmem:[#allocation2 + $0xb8] sm:$0xff] %vm24_vm11, %v4170_v2 }
  0x4e   :  { %49 = vst.msk [vmem:[#allocation2 + $0xc0] sm:$0xff] %vm24_vm11, %v4170_v2  ;;  %50 = vst.msk [vmem:[#allocation2 + $0xc8] sm:$0xff] %vm24_vm11, %v4170_v2 }
  0x4f   :  { %51 = vst.msk [vmem:[#allocation2 + $0xd0] sm:$0xff] %vm24_vm11, %v4170_v2  ;;  %52 = vst.msk [vmem:[#allocation2 + $0xd8] sm:$0xff] %vm24_vm11, %v4170_v2 }
  0x50   :  { %53 = vst.msk [vmem:[#allocation2 + $0xe0] sm:$0xff] %vm24_vm11, %v4170_v2  ;;  %54 = vst.msk [vmem:[#allocation2 + $0xe8] sm:$0xff] %vm24_vm11, %v4170_v2 }
  0x51   :  { %1460 = vperm.xlu1 %3720, %v1326_v8   ;;  %55 = vst.msk [vmem:[#allocation2 + $0xf0] sm:$0xff] %vm24_vm11, %v4170_v2  ;;  %56 = vst.msk [vmem:[#allocation2 + $0xf8] sm:$0xff] %vm24_vm11, %v4170_v2 }
  0x53   :  { %556 = vmatmul.mubr.bf16.gmra.mxu0 %v3775_v3  ;;  %749 = vmatmul.mubr.bf16.gmra.mxu1 %v3775_v3 }
  0x54   :  { %565 = vmatprep.mubr.bf16.mxu0 %v4169_v1  ;;  %758 = vmatprep.mubr.bf16.mxu1 %v4169_v1 }
  0x55   :  { %1463 = vperm.xlu1 %3720, %v1327_v10  }
  0x5b   :  { %566 = vmatmul.mubr.bf16.gmra.mxu0 %v3776_v6  ;;  %759 = vmatmul.mubr.bf16.gmra.mxu1 %v3776_v6 }
  0x5c   :  { %575 = vmatprep.mubr.bf16.mxu0 %v4169_v1  ;;  %768 = vmatprep.mubr.bf16.mxu1 %v4169_v1 }
  0x63   :  { %576 = vmatmul.mubr.bf16.gmra.mxu0 %v3777_v9  ;;  %769 = vmatmul.mubr.bf16.gmra.mxu1 %v3777_v9 }
  0x64   :  { %585 = vmatprep.mubr.bf16.mxu0 %v4169_v1  ;;  %778 = vmatprep.mubr.bf16.mxu1 %v4169_v1 }
  0x6b   :  { %586 = vmatmul.mubr.bf16.gmra.mxu0 %v3778_v11  ;;  %779 = vmatmul.mubr.bf16.gmra.mxu1 %v3778_v11 }
  0x6c   :  { %595 = vmatprep.mubr.bf16.mxu0 %v4169_v1  ;;  %788 = vmatprep.mubr.bf16.mxu1 %v4169_v1 }
  0x73   :  { %596 = vmatmul.mubr.bf16.gmra.mxu0 %v3779_v12  ;;  %789 = vmatmul.mubr.bf16.gmra.mxu1 %v3779_v12 }
  0x74   :  { %605 = vmatprep.mubr.bf16.mxu0 %v4169_v1  ;;  %798 = vmatprep.mubr.bf16.mxu1 %v4169_v1 }
  0x7b   :  { %606 = vmatmul.mubr.bf16.gmra.mxu0 %v3780_v13  ;;  %799 = vmatmul.mubr.bf16.gmra.mxu1 %v3780_v13 }
  0x7c   :  { %615 = vmatprep.mubr.bf16.mxu0 %v4169_v1  ;;  %808 = vmatprep.mubr.bf16.mxu1 %v4169_v1 }
  0x83   :  { %616 = vmatmul.mubr.bf16.gmra.mxu0 %v3781_v14  ;;  %809 = vmatmul.mubr.bf16.gmra.mxu1 %v3781_v14 }
  0x84   :  { %625 = vmatprep.mubr.bf16.mxu0 %v4169_v1  ;;  %818 = vmatprep.mubr.bf16.mxu1 %v4169_v1 }
  0x86   :  { %v4502_v38 = vpop.permute.xlu1 %1379 }
  0x87   :  { %vm1476_vm4 = vcmp.eq.s32.totalorder %v4476_v21, %v4502_v38  ;;  %vm1477_vm5 = vcmp.eq.s32.totalorder %v4484_v27, %v4502_v38  ;;  %vm1478_vm9 = vcmp.eq.s32.totalorder %v4493_v33, %v4502_v38  ;;  %vm1479_vm12 = vcmp.eq.s32.totalorder %v4496_v34, %v4502_v38 }
  0x89   :  { %v1374_v26 = vpop.permute.xlu0 %1373 }
  0x8a   :  { %vm1468_vm0 = vcmp.eq.s32.totalorder %v4476_v21, %v1374_v26  ;;  %vm1469_vm1 = vcmp.eq.s32.totalorder %v4484_v27, %v1374_v26  ;;  %vm1470_vm2 = vcmp.eq.s32.totalorder %v4493_v33, %v1374_v26  ;;  %vm1471_vm3 = vcmp.eq.s32.totalorder %v4496_v34, %v1374_v26  ;;  %v4617_v9 = vpop.permute.xlu1 %1382 }
  0x8b   :  { %626 = vmatmul.mubr.bf16.gmra.mxu0 %v3782_v15  ;;  %819 = vmatmul.mubr.bf16.gmra.mxu1 %v3782_v15  ;;  %vm1480_vm13 = vcmp.eq.s32.totalorder %v4476_v21, %v4617_v9  ;;  %vm1481_vm14 = vcmp.eq.s32.totalorder %v4484_v27, %v4617_v9  ;;  %vm1482_vm15 = vcmp.eq.s32.totalorder %v4493_v33, %v4617_v9 }
  0x8c   :  { %635 = vmatprep.mubr.bf16.mxu0 %v4169_v1  ;;  %828 = vmatprep.mubr.bf16.mxu1 %v4169_v1 }
  0x8d   :  { %v4504_v39 = vpop.permute.xlu0 %1376 }
  0x8e   :  { %vm1472_vm6 = vcmp.eq.s32.totalorder %v4476_v21, %v4504_v39  ;;  %vm1473_vm7 = vcmp.eq.s32.totalorder %v4484_v27, %v4504_v39  ;;  %vm1474_vm8 = vcmp.eq.s32.totalorder %v4493_v33, %v4504_v39  ;;  %vm1475_vm10 = vcmp.eq.s32.totalorder %v4496_v34, %v4504_v39 }
  0x93   :  { %636 = vmatmul.mubr.bf16.gmra.mxu0 %v3783_v16  ;;  %829 = vmatmul.mubr.bf16.gmra.mxu1 %v3783_v16 }
  0x94   :  { %645 = vmatprep.mubr.bf16.mxu0 %v4169_v1  ;;  %838 = vmatprep.mubr.bf16.mxu1 %v4169_v1  ;;  %v4481_v1 = vrot.slane %v185_v22, %v189_v20 }
  0x9b   :  { %646 = vmatmul.mubr.bf16.gmra.mxu0 %v3784_v17  ;;  %839 = vmatmul.mubr.bf16.gmra.mxu1 %v3784_v17 }
  0xe3   :  { %v497_v31 = vpop.f32.mrf.mxu0  ;;  %v690_v32 = vpop.f32.mrf.mxu1 }
  0xe4   :  { %v4499_v35 = vadd.f32 %v497_v31, %v4481_v1  ;;  %v4507_v40 = vadd.f32 %v690_v32, %v4486_v28 }
  0xe5   :  { %v499_v36 = vpop.f32.mrf.mxu0  ;;  %v692_v37 = vpop.f32.mrf.mxu1 }
  0xe6   :  { %v4510_v41 = vadd.f32 %v499_v36, %v4488_v29  ;;  %v4513_v42 = vadd.f32 %v692_v37, %v4490_v30  ;;  %v1596_v51 = vsel %vm1468_vm0, %v4499_v35, 0.0  ;;  %v1598_v60 = vsel %vm1470_vm2, %v4507_v40, 0.0 }
  0xe7   :  { %v501_v43 = vpop.f32.mrf.mxu0  ;;  %v694_v44 = vpop.f32.mrf.mxu1  ;;  %vm1483_vm0 = vcmp.eq.s32.totalorder %v4496_v34, %v4617_v9 }
  0xe8   :  { %v3650_v45 = vpack.c.bf16 %v4510_v41, %v4499_v35  ;;  %v3651_v46 = vpack.c.bf16 %v4513_v42, %v4507_v40  ;;  %v4531_v47 = vadd.f32 %v501_v43, %v4481_v1  ;;  %v1981_v50 = vmax.f32 %v4499_v35, %v4510_v41 }
  0xe9   :  { %v503_v48 = vpop.f32.mrf.mxu0  ;;  %v696_v49 = vpop.f32.mrf.mxu1  ;;  %v1597_v52 = vsel %vm1469_vm1, %v4510_v41, 0.0  ;;  %v4552_v53 = vadd.f32 %v694_v44, %v4486_v28  ;;  %v1599_v0 = vsel %vm1471_vm3, %v4513_v42, 0.0 }
  0xea   :  { %1233 = vst [vmem:[%s7296_s4] sm:$0xff] %v3650_v45  ;;  %1234 = vst [vmem:[%s7296_s4 + $0x8] sm:$0xff] %v3651_v46  ;;  %v4555_v54 = vadd.f32 %v503_v48, %v4488_v29  ;;  %v4558_v55 = vadd.f32 %v696_v49, %v4490_v30  ;;  %v1724_v56 = vadd.f32 %v1597_v52, %v1596_v51  ;;  %v1600_v13 = vsel %vm1472_vm6, %v4531_v47, 0.0 }
  0xeb   :  { %v507_v57 = vpop.f32.mrf.mxu0  ;;  %v700_v58 = vpop.f32.mrf.mxu1  ;;  %v1982_v59 = vmax.f32 %v1981_v50, %v4507_v40  ;;  %v1602_v44 = vsel %vm1474_vm8, %v4552_v53, 0.0 }
  0xec   :  { %v3652_v61 = vpack.c.bf16 %v4555_v54, %v4531_v47  ;;  %v3653_v62 = vpack.c.bf16 %v4558_v55, %v4552_v53  ;;  %v4571_v63 = vadd.f32 %v507_v57, %v4481_v1  ;;  %v1725_v6 = vadd.f32 %v1724_v56, %v1598_v60 }
  0xed   :  { %v509_v3 = vpop.f32.mrf.mxu0  ;;  %v702_v4 = vpop.f32.mrf.mxu1  ;;  %v1983_v5 = vmax.f32 %v1982_v59, %v4513_v42  ;;  %v1986_v7 = vmax.f32 %v4531_v47, %v4555_v54  ;;  %v1601_v8 = vsel %vm1473_vm7, %v4555_v54, 0.0  ;;  %v4626_v10 = vadd.f32 %v700_v58, %v4486_v28 }
  0xee   :  { %1235 = vst [vmem:[%s7296_s4 + $0x10] sm:$0xff] %v3652_v61  ;;  %1236 = vst [vmem:[%s7296_s4 + $0x18] sm:$0xff] %v3653_v62  ;;  %v4629_v11 = vadd.f32 %v509_v3, %v4488_v29  ;;  %v4632_v12 = vadd.f32 %v702_v4, %v4490_v30  ;;  %v1726_v16 = vadd.f32 %v1725_v6, %v1599_v0  ;;  %v1604_v22 = vsel %vm1476_vm4, %v4571_v63, 0.0 }
  0xef   :  { %1984 = vmax.xlane.f32.xlu0 %v1983_v5  ;;  %v511_v14 = vpop.f32.mrf.mxu0  ;;  %v704_v15 = vpop.f32.mrf.mxu1  ;;  %v1987_v17 = vmax.f32 %v1986_v7, %v4552_v53  ;;  %v1729_v18 = vadd.f32 %v1601_v8, %v1600_v13  ;;  %v1603_v56 = vsel %vm1475_vm10, %v4558_v55, 0.0  ;;  %v1606_v57 = vsel %vm1478_vm9, %v4626_v10, 0.0 }
  0xf0   :  { %v3654_v19 = vpack.c.bf16 %v4629_v11, %v4571_v63  ;;  %v3655_v20 = vpack.c.bf16 %v4632_v12, %v4626_v10  ;;  %v4652_v23 = vadd.f32 %v511_v14, %v4481_v1  ;;  %1727 = vadd.xlane.f32.xlu1 %v1726_v16  ;;  %v1991_v31 = vmax.f32 %v4571_v63, %v4629_v11 }
  0xf1   :  { %v513_v24 = vpop.f32.mrf.mxu0  ;;  %v706_v25 = vpop.f32.mrf.mxu1  ;;  %v1988_v26 = vmax.f32 %v1987_v17, %v4558_v55  ;;  %v1605_v32 = vsel %vm1477_vm5, %v4629_v11, 0.0  ;;  %v4668_v36 = vadd.f32 %v704_v15, %v4486_v28  ;;  %v1730_v49 = vadd.f32 %v1729_v18, %v1602_v44 }
  0xf2   :  { %1237 = vst [vmem:[%s7296_s4 + $0x20] sm:$0xff] %v3654_v19  ;;  %1238 = vst [vmem:[%s7296_s4 + $0x28] sm:$0xff] %v3655_v20  ;;  %v4671_v37 = vadd.f32 %v513_v24, %v4488_v29  ;;  %v4674_v43 = vadd.f32 %v706_v25, %v4490_v30  ;;  %v1992_v48 = vmax.f32 %v1991_v31, %v4626_v10  ;;  %v1608_v62 = vsel %vm1480_vm13, %v4652_v23, 0.0  ;;  %v4725_v15 = vpop.permute.xlu0 %1385 }
  0xf3   :  { %v517_v45 = vpop.f32.mrf.mxu0  ;;  %v710_v46 = vpop.f32.mrf.mxu1  ;;  %v1734_v50 = vadd.f32 %v1605_v32, %v1604_v22  ;;  %v1731_v7 = vadd.f32 %v1730_v49, %v1603_v56  ;;  %v1607_v18 = vsel %vm1479_vm12, %v4632_v12, 0.0  ;;  %v1610_v24 = vsel %vm1482_vm15, %v4668_v36, 0.0 }
  0xf4   :  { %v3656_v51 = vpack.c.bf16 %v4671_v37, %v4652_v23  ;;  %v3657_v52 = vpack.c.bf16 %v4674_v43, %v4668_v36  ;;  %1989 = vmax.xlane.f32.xlu1 %v1988_v26  ;;  %v1993_v60 = vmax.f32 %v1992_v48, %v4632_v12  ;;  %v1996_v61 = vmax.f32 %v4652_v23, %v4671_v37  ;;  %v4766_v49 = vpop.permute.xlu1 %1388 }
  0xf5   :  { %v519_v58 = vpop.f32.mrf.mxu0  ;;  %v712_v59 = vpop.f32.mrf.mxu1  ;;  %v1609_v39 = vsel %vm1481_vm14, %v4671_v37, 0.0  ;;  %v4713_v0 = vadd.f32 %v517_v45, %v4481_v1  ;;  %v4716_v2 = vadd.f32 %v710_v46, %v4486_v28  ;;  %v1735_v13 = vadd.f32 %v1734_v50, %v1606_v57 }
  0xf6   :  { %1239 = vst [vmem:[%s7296_s4 + $0x30] sm:$0xff] %v3656_v51  ;;  %1240 = vst [vmem:[%s7296_s4 + $0x38] sm:$0xff] %v3657_v52  ;;  %v4719_v3 = vadd.f32 %v519_v58, %v4488_v29  ;;  %v4722_v4 = vadd.f32 %v712_v59, %v4490_v30  ;;  %1994 = vmax.xlane.f32.xlu0 %v1993_v60  ;;  %v1997_v8 = vmax.f32 %v1996_v61, %v4668_v36 }
  0xf7   :  { %7543 = vst [vmem:[#allocation5_spill] sm:$0xff] %v4713_v0  ;;  %7544 = vst [vmem:[#allocation6_spill] sm:$0xff] %v4716_v2  ;;  %v521_v5 = vpop.f32.mrf.mxu0  ;;  %v714_v6 = vpop.f32.mrf.mxu1  ;;  %v1739_v14 = vadd.f32 %v1609_v39, %v1608_v62  ;;  %vm1484_vm1 = vcmp.eq.s32.totalorder %v4476_v21, %v4725_v15  ;;  %v1736_v45 = vadd.f32 %v1735_v13, %v1607_v18  ;;  %v1611_v58 = vsel %vm1483_vm0, %v4674_v43, 0.0 }
  0xf8   :  { %7545 = vst [vmem:[#allocation7_spill] sm:$0xff] %v4719_v3  ;;  %7546 = vst [vmem:[#allocation8_spill] sm:$0xff] %v4722_v4  ;;  %v3658_v16 = vpack.c.bf16 %v4719_v3, %v4713_v0  ;;  %v3659_v17 = vpack.c.bf16 %v4722_v4, %v4716_v2  ;;  %1732 = vadd.xlane.f32.xlu1 %v1731_v7  ;;  %v1998_v22 = vmax.f32 %v1997_v8, %v4674_v43 }
  0xf9   :  { %v523_v19 = vpop.f32.mrf.mxu0  ;;  %v716_v20 = vpop.f32.mrf.mxu1  ;;  %v4751_v38 = vadd.f32 %v521_v5, %v4481_v1  ;;  %v4754_v25 = vadd.f32 %v714_v6, %v4486_v28  ;;  %v1740_v46 = vadd.f32 %v1739_v14, %v1610_v24  ;;  %v2001_v48 = vmax.f32 %v4713_v0, %v4719_v3 }
  0xfa   :  { %1241 = vst [vmem:[%s7296_s4 + $0x40] sm:$0xff] %v3658_v16  ;;  %1242 = vst [vmem:[%s7296_s4 + $0x48] sm:$0xff] %v3659_v17  ;;  %v4757_v26 = vadd.f32 %v523_v19, %v4488_v29  ;;  %v4760_v31 = vadd.f32 %v716_v20, %v4490_v30  ;;  %1999 = vmax.xlane.f32.xlu0 %v1998_v22  ;;  %vm1485_vm2 = vcmp.eq.s32.totalorder %v4484_v27, %v4725_v15 }
  0xfb   :  { %7547 = vst [vmem:[#allocation9_spill] sm:$0xff] %v4754_v25  ;;  %v527_v32 = vpop.f32.mrf.mxu0  ;;  %v720_v44 = vpop.f32.mrf.mxu1  ;;  %vm1486_vm3 = vcmp.eq.s32.totalorder %v4493_v33, %v4725_v15  ;;  %v1613_v52 = vsel %vm1485_vm2, %v4719_v3, 0.0  ;;  %v1612_v60 = vsel %vm1484_vm1, %v4713_v0, 0.0  ;;  %vm1489_vm4 = vcmp.eq.s32.totalorder %v4484_v27, %v4766_v49 }
  0xfc   :  { %7548 = vst [vmem:[#allocation10_spill] sm:$0xff] %v4760_v31  ;;  %v3660_v50 = vpack.c.bf16 %v4757_v26, %v4751_v38  ;;  %v3661_v51 = vpack.c.bf16 %v4760_v31, %v4754_v25  ;;  %1737 = vadd.xlane.f32.xlu1 %v1736_v45  ;;  %v2006_v59 = vmax.f32 %v4751_v38, %v4757_v26  ;;  %v1617_v18 = vsel %vm1489_vm4, %v4757_v26, 0.0 }
  0xfd   :  { %v529_v56 = vpop.f32.mrf.mxu0  ;;  %v722_v57 = vpop.f32.mrf.mxu1  ;;  %v4794_v9 = vadd.f32 %v527_v32, %v4481_v1  ;;  %v4797_v61 = vadd.f32 %v720_v44, %v4486_v28  ;;  %v1741_v7 = vadd.f32 %v1740_v46, %v1611_v58  ;;  %v2002_v13 = vmax.f32 %v2001_v48, %v4716_v2 }
  0xfe   :  { %1243 = vst [vmem:[%s7296_s4 + $0x50] sm:$0xff] %v3660_v50  ;;  %1244 = vst [vmem:[%s7296_s4 + $0x58] sm:$0xff] %v3661_v51  ;;  %v4800_v62 = vadd.f32 %v529_v56, %v4488_v29  ;;  %v4803_v39 = vadd.f32 %v722_v57, %v4490_v30  ;;  %v2007_v8 = vmax.f32 %v2006_v59, %v4754_v25  ;;  %v1614_v24 = vsel %vm1486_vm3, %v4716_v2, 0.0  ;;  %v4825_v44 = vpop.permute.xlu0 %1391 }
  0xff   :  { %7549 = vst [vmem:[#allocation11_spill] sm:$0xff] %v4794_v9  ;;  %7550 = vst [vmem:[#allocation12_spill] sm:$0xff] %v4797_v61  ;;  %v531_v5 = vpop.f32.mrf.mxu0  ;;  %v724_v6 = vpop.f32.mrf.mxu1  ;;  %v1744_v14 = vadd.f32 %v1613_v52, %v1612_v60  ;;  %vm1488_vm5 = vcmp.eq.s32.totalorder %v4476_v21, %v4766_v49  ;;  %vm1487_vm6 = vcmp.eq.s32.totalorder %v4496_v34, %v4725_v15 }
 0x100   :  { %7551 = vst [vmem:[#allocation13_spill] sm:$0xff] %v4800_v62  ;;  %7552 = vst [vmem:[#allocation14_spill] sm:$0xff] %v4803_v39  ;;  %v3662_v16 = vpack.c.bf16 %v4800_v62, %v4794_v9  ;;  %v3663_v17 = vpack.c.bf16 %v4803_v39, %v4797_v61  ;;  %1742 = vadd.xlane.f32.xlu1 %v1741_v7  ;;  %v2008_v22 = vmax.f32 %v2007_v8, %v4760_v31 }
 0x101   :  { %v533_v19 = vpop.f32.mrf.mxu0  ;;  %v726_v20 = vpop.f32.mrf.mxu1  ;;  %v1616_v32 = vsel %vm1488_vm5, %v4751_v38, 0.0  ;;  %v4834_v45 = vadd.f32 %v531_v5, %v4481_v1  ;;  %v4837_v46 = vadd.f32 %v724_v6, %v4486_v28  ;;  %v2003_v56 = vmax.f32 %v2002_v13, %v4722_v4 }
 0x102   :  { %1245 = vst [vmem:[%s7296_s4 + $0x60] sm:$0xff] %v3662_v16  ;;  %1246 = vst [vmem:[%s7296_s4 + $0x68] sm:$0xff] %v3663_v17  ;;  %v4840_v48 = vadd.f32 %v533_v19, %v4488_v29  ;;  %v4843_v50 = vadd.f32 %v726_v20, %v4490_v30  ;;  %2009 = vmax.xlane.f32.xlu0 %v2008_v22  ;;  %v1745_v57 = vadd.f32 %v1744_v14, %v1614_v24 }
 0x103   :  { %7553 = vst [vmem:[#allocation15_spill] sm:$0xff] %v4834_v45  ;;  %7554 = vst [vmem:[#allocation16_spill] sm:$0xff] %v4837_v46  ;;  %v537_v51 = vpop.f32.mrf.mxu0  ;;  %v730_v52 = vpop.f32.mrf.mxu1  ;;  %vm1490_vm7 = vcmp.eq.s32.totalorder %v4493_v33, %v4766_v49  ;;  %v1749_v58 = vadd.f32 %v1617_v18, %v1616_v32  ;;  %vm1491_vm8 = vcmp.eq.s32.totalorder %v4496_v34, %v4766_v49  ;;  %v1615_v7 = vsel %vm1487_vm6, %v4722_v4, 0.0 }
 0x104   :  { %7555 = vst [vmem:[#allocation17_spill] sm:$0xff] %v4840_v48  ;;  %7556 = vst [vmem:[#allocation18_spill] sm:$0xff] %v4843_v50  ;;  %v3664_v59 = vpack.c.bf16 %v4840_v48, %v4834_v45  ;;  %v3665_v60 = vpack.c.bf16 %v4843_v50, %v4837_v46  ;;  %vm1492_vm9 = vcmp.eq.s32.totalorder %v4476_v21, %v4825_v44  ;;  %2004 = vmax.xlane.f32.xlu1 %v2003_v56 }
 0x105   :  { %v539_v5 = vpop.f32.mrf.mxu0  ;;  %v732_v6 = vpop.f32.mrf.mxu1  ;;  %v2016_v8 = vmax.f32 %v4834_v45, %v4840_v48  ;;  %v1618_v13 = vsel %vm1490_vm7, %v4754_v25, 0.0  ;;  %vm1493_vm10 = vcmp.eq.s32.totalorder %v4484_v27, %v4825_v44  ;;  %v4872_v14 = vadd.f32 %v537_v51, %v4481_v1 }
 0x106   :  { %1247 = vst [vmem:[%s7296_s4 + $0x70] sm:$0xff] %v3664_v59  ;;  %1248 = vst [vmem:[%s7296_s4 + $0x78] sm:$0xff] %v3665_v60  ;;  %v4875_v15 = vadd.f32 %v730_v52, %v4486_v28  ;;  %v4878_v16 = vadd.f32 %v539_v5, %v4488_v29  ;;  %v4881_v17 = vadd.f32 %v732_v6, %v4490_v30  ;;  %v1621_v56 = vsel %vm1493_vm10, %v4800_v62, 0.0  ;;  %v4907_v6 = vpop.permute.xlu1 %1394 }
 0x107   :  { %7557 = vst [vmem:[#allocation19_spill] sm:$0xff] %v4872_v14  ;;  %v541_v18 = vpop.f32.mrf.mxu0  ;;  %v734_v19 = vpop.f32.mrf.mxu1  ;;  %v1746_v20 = vadd.f32 %v1745_v57, %v1615_v7  ;;  %v2017_v22 = vmax.f32 %v2016_v8, %v4837_v46  ;;  %v1750_v24 = vadd.f32 %v1749_v58, %v1618_v13  ;;  %v2011_v32 = vmax.f32 %v4794_v9, %v4800_v62 }
 0x108   :  { %7558 = vst [vmem:[#allocation20_spill] sm:$0xff] %v4875_v15  ;;  %7559 = vst [vmem:[#allocation21_spill] sm:$0xff] %v4878_v16  ;;  %v3666_v51 = vpack.c.bf16 %v4878_v16, %v4872_v14  ;;  %v3667_v52 = vpack.c.bf16 %v4881_v17, %v4875_v15  ;;  %vm1494_vm12 = vcmp.eq.s32.totalorder %v4493_v33, %v4825_v44  ;;  %v1619_v60 = vsel %vm1491_vm8, %v4760_v31, 0.0 }
 0x109   :  { %7560 = vst [vmem:[#allocation22_spill] sm:$0xff] %v4881_v17  ;;  %1747 = vadd.xlane.f32.xlu1 %v1746_v20  ;;  %v543_v57 = vpop.f32.mrf.mxu0  ;;  %v736_v58 = vpop.f32.mrf.mxu1  ;;  %v2018_v59 = vmax.f32 %v2017_v22, %v4843_v50  ;;  %vm1495_vm13 = vcmp.eq.s32.totalorder %v4496_v34, %v4825_v44  ;;  %v1620_v5 = vsel %vm1492_vm9, %v4794_v9, 0.0  ;;  %v4916_v49 = vadd.f32 %v541_v18, %v4481_v1 }
 0x10a   :  { %1249 = vst [vmem:[%s7296_s4 + $0x80] sm:$0xff] %v3666_v51  ;;  %1250 = vst [vmem:[%s7296_s4 + $0x88] sm:$0xff] %v3667_v52  ;;  %v4919_v7 = vadd.f32 %v734_v19, %v4486_v28  ;;  %v4922_v8 = vadd.f32 %v543_v57, %v4488_v29  ;;  %v4925_v13 = vadd.f32 %v736_v58, %v4490_v30 }
 0x10b   :  { %7561 = vst [vmem:[#allocation23_spill] sm:$0xff] %v4916_v49  ;;  %2019 = vmax.xlane.f32.xlu0 %v2018_v59  ;;  %v547_v20 = vpop.f32.mrf.mxu0  ;;  %v740_v22 = vpop.f32.mrf.mxu1  ;;  %v1751_v51 = vadd.f32 %v1750_v24, %v1619_v60  ;;  %v2012_v62 = vmax.f32 %v2011_v32, %v4797_v61  ;;  %v1754_v9 = vadd.f32 %v1621_v56, %v1620_v5  ;;  %v1622_v56 = vsel %vm1494_vm12, %v4797_v61, 0.0 }
 0x10c   :  { %7562 = vst [vmem:[#allocation24_spill] sm:$0xff] %v4919_v7  ;;  %7563 = vst [vmem:[#allocation25_spill] sm:$0xff] %v4922_v8  ;;  %vm1497_vm14 = vcmp.eq.s32.totalorder %v4484_v27, %v4907_v6  ;;  %v3668_v18 = vpack.c.bf16 %v4922_v8, %v4916_v49  ;;  %v3669_v19 = vpack.c.bf16 %v4925_v13, %v4919_v7  ;;  %v4946_v59 = vpop.permute.xlu0 %1397 }
 0x10d   :  { %7564 = vst [vmem:[#allocation26_spill] sm:$0xff] %v4925_v13  ;;  %vm1496_vm15 = vcmp.eq.s32.totalorder %v4476_v21, %v4907_v6  ;;  %v1625_v52 = vsel %vm1497_vm14, %v4840_v48, 0.0  ;;  %1752 = vadd.xlane.f32.xlu1 %v1751_v51  ;;  %v549_v57 = vpop.f32.mrf.mxu0  ;;  %v742_v24 = vpop.f32.mrf.mxu1  ;;  %v2026_v32 = vmax.f32 %v4916_v49, %v4922_v8  ;;  %vm1498_vm0 = vcmp.eq.s32.totalorder %v4493_v33, %v4907_v6 }
 0x10e   :  { %v1624_v58 = vsel %vm1496_vm15, %v4834_v45, 0.0  ;;  %1251 = vst [vmem:[%s7296_s4 + $0x90] sm:$0xff] %v3668_v18  ;;  %1252 = vst [vmem:[%s7296_s4 + $0x98] sm:$0xff] %v3669_v19  ;;  %v4955_v60 = vadd.f32 %v547_v20, %v4481_v1  ;;  %v4958_v5 = vadd.f32 %v740_v22, %v4486_v28  ;;  %v4961_v51 = vadd.f32 %v549_v57, %v4488_v29 }
 0x10f   :  { %v4964_v61 = vadd.f32 %v742_v24, %v4490_v30  ;;  %v551_v48 = vpop.f32.mrf.mxu0  ;;  %v744_v45 = vpop.f32.mrf.mxu1  ;;  %v2013_v18 = vmax.f32 %v2012_v62, %v4803_v39  ;;  %v2027_v4 = vmax.f32 %v2026_v32, %v4919_v7  ;;  %v1755_v2 = vadd.f32 %v1754_v9, %v1622_v56 }
 0x110   :  { %7565 = vst [vmem:[#allocation27_spill] sm:$0xff] %v4955_v60  ;;  %7566 = vst [vmem:[#allocation28_spill] sm:$0xff] %v4958_v5  ;;  %v1759_v19 = vadd.f32 %v1625_v52, %v1624_v58  ;;  %v3670_v20 = vpack.c.bf16 %v4961_v51, %v4955_v60  ;;  %vm1499_vm1 = vcmp.eq.s32.totalorder %v4496_v34, %v4907_v6  ;;  %v1623_v9 = vsel %vm1495_vm13, %v4803_v39, 0.0 }
 0x111   :  { %7567 = vst [vmem:[#allocation29_spill] sm:$0xff] %v4961_v51  ;;  %7568 = vst [vmem:[#allocation30_spill] sm:$0xff] %v4964_v61  ;;  %v3671_v22 = vpack.c.bf16 %v4964_v61, %v4958_v5  ;;  %vm1500_vm2 = vcmp.eq.s32.totalorder %v4476_v21, %v4946_v59  ;;  %2014 = vmax.xlane.f32.xlu1 %v2013_v18  ;;  %v553_v57 = vpop.f32.mrf.mxu0  ;;  %v746_v24 = vpop.f32.mrf.mxu1  ;;  %v2028_v62 = vmax.f32 %v2027_v4, %v4925_v13 }
 0x112   :  { %v1626_v52 = vsel %vm1498_vm0, %v4837_v46, 0.0  ;;  %vm1501_vm3 = vcmp.eq.s32.totalorder %v4484_v27, %v4946_v59  ;;  %1253 = vst [vmem:[%s7296_s4 + $0xa0] sm:$0xff] %v3670_v20  ;;  %v4994_v4 = vadd.f32 %v551_v48, %v4481_v1  ;;  %v4997_v44 = vadd.f32 %v744_v45, %v4486_v28  ;;  %v5015_v45 = vpop.permute.xlu1 %1400 }
 0x113   :  { %1254 = vst [vmem:[%s7296_s4 + $0xa8] sm:$0xff] %v3671_v22  ;;  %v5000_v32 = vadd.f32 %v553_v57, %v4488_v29  ;;  %v5003_v56 = vadd.f32 %v746_v24, %v4490_v30  ;;  %2029 = vmax.xlane.f32.xlu0 %v2028_v62  ;;  %v5005_v58 = vpop.f32.mrf.mxu0  ;;  %v5007_v18 = vpop.f32.mrf.mxu1  ;;  %v5009_v20 = vadd.f32 %v1755_v2, %v1623_v9  ;;  %v5027_v2 = vsel %vm1501_vm3, %v4878_v16, 0.0 }
 0x114   :  { %v5011_v22 = vadd.f32 %v1759_v19, %v1626_v52  ;;  %vm1502_vm4 = vcmp.eq.s32.totalorder %v4493_v33, %v4946_v59  ;;  %v4171_v19 = vmov 0.0   ;;  %v1627_v52 = vsel %vm1499_vm1, %v4843_v50, 0.0 }
 0x115   :  { %v3672_v57 = vpack.c.bf16 %v5000_v32, %v4994_v4  ;;  %89 = vst.msk [vmem:[#allocation4] sm:$0xff] %vm24_vm11, %v4171_v19  ;;  %57 = vst.msk [vmem:[#allocation3] sm:$0xff] %vm24_vm11, %v4171_v19  ;;  %1757 = vadd.xlane.f32.xlu1 %v5009_v20  ;;  %v559_v62 = vpop.f32.mrf.mxu0  ;;  %v752_v9 = vpop.f32.mrf.mxu1  ;;  %v2036_v48 = vmax.f32 %v4994_v4, %v5000_v32  ;;  %v1628_v24 = vsel %vm1500_vm2, %v4872_v14, 0.0 }
 0x116   :  { %58 = vst.msk [vmem:[#allocation3 + $0x8] sm:$0xff] %vm24_vm11, %v4171_v19  ;;  %59 = vst.msk [vmem:[#allocation3 + $0x10] sm:$0xff] %vm24_vm11, %v4171_v19  ;;  %vm1505_vm5 = vcmp.eq.s32.totalorder %v4484_v27, %v5015_v45  ;;  %v7569_v6 = vpack.c.bf16 %v5003_v56, %v4997_v44  ;;  %v5184_v20 = vadd.f32 %v5005_v58, %v4481_v1 }
 0x117   :  { %60 = vst.msk [vmem:[#allocation3 + $0x18] sm:$0xff] %vm24_vm11, %v4171_v19  ;;  %61 = vst.msk [vmem:[#allocation3 + $0x20] sm:$0xff] %vm24_vm11, %v4171_v19  ;;  %v5191_v50 = vadd.f32 %v559_v62, %v4488_v29  ;;  %v561_v39 = vpop.f32.mrf.mxu0  ;;  %v754_v46 = vpop.f32.mrf.mxu1  ;;  %v1761_v3 = vadd.f32 %v5011_v22, %v1627_v52  ;;  %v7570_v58 = vmax.f32 %v4872_v14, %v4878_v16  ;;  %v1633_v22 = vsel %vm1505_vm5, %v4922_v8, 0.0 }
 0x118   :  { %62 = vst.msk [vmem:[#allocation3 + $0x28] sm:$0xff] %vm24_vm11, %v4171_v19  ;;  %63 = vst.msk [vmem:[#allocation3 + $0x30] sm:$0xff] %vm24_vm11, %v4171_v19  ;;  %vm1504_vm6 = vcmp.eq.s32.totalorder %v4476_v21, %v5015_v45  ;;  %vm1503_vm7 = vcmp.eq.s32.totalorder %v4496_v34, %v4946_v59  ;;  %vm1506_vm8 = vcmp.eq.s32.totalorder %v4493_v33, %v5015_v45 }
 0x119   :  { %64 = vst.msk [vmem:[#allocation3 + $0x38] sm:$0xff] %vm24_vm11, %v4171_v19  ;;  %65 = vst.msk [vmem:[#allocation3 + $0x40] sm:$0xff] %vm24_vm11, %v4171_v19  ;;  %v2022_v0 = vmax.f32 %v7570_v58, %v4875_v15  ;;  %v3674_v62 = vpack.c.bf16 %v5191_v50, %v5184_v20  ;;  %1762 = vadd.xlane.f32.xlu1 %v1761_v3  ;;  %v756_v52 = vpop.f32.mrf.mxu1  ;;  %v5226_v3 = vadd.f32 %v561_v39, %v4481_v1 }
 0x11a   :  { %66 = vst.msk [vmem:[#allocation3 + $0x48] sm:$0xff] %vm24_vm11, %v4171_v19  ;;  %67 = vst.msk [vmem:[#allocation3 + $0x50] sm:$0xff] %vm24_vm11, %v4171_v19  ;;  %vm1507_vm9 = vcmp.eq.s32.totalorder %v4496_v34, %v5015_v45  ;;  %v1631_v59 = vsel %vm1503_vm7, %v4881_v17, 0.0 }
 0x11b   :  { %68 = vst.msk [vmem:[#allocation3 + $0x58] sm:$0xff] %vm24_vm11, %v4171_v19  ;;  %69 = vst.msk [vmem:[#allocation3 + $0x60] sm:$0xff] %vm24_vm11, %v4171_v19  ;;  %v760_v8 = vpop.f32.mrf.mxu1 }
 0x11c   :  { %70 = vst.msk [vmem:[#allocation3 + $0x68] sm:$0xff] %vm24_vm11, %v4171_v19  ;;  %71 = vst.msk [vmem:[#allocation3 + $0x70] sm:$0xff] %vm24_vm11, %v4171_v19 }
 0x11d   :  { %72 = vst.msk [vmem:[#allocation3 + $0x78] sm:$0xff] %vm24_vm11, %v4171_v19  ;;  %73 = vst.msk [vmem:[#allocation3 + $0x80] sm:$0xff] %vm24_vm11, %v4171_v19 }
 0x11e   :  { %74 = vst.msk [vmem:[#allocation3 + $0x88] sm:$0xff] %vm24_vm11, %v4171_v19  ;;  %75 = vst.msk [vmem:[#allocation3 + $0x90] sm:$0xff] %vm24_vm11, %v4171_v19 }
 0x11f   :  { %76 = vst.msk [vmem:[#allocation3 + $0x98] sm:$0xff] %vm24_vm11, %v4171_v19  ;;  %77 = vst.msk [vmem:[#allocation3 + $0xa0] sm:$0xff] %vm24_vm11, %v4171_v19 }
 0x120   :  { %78 = vst.msk [vmem:[#allocation3 + $0xa8] sm:$0xff] %vm24_vm11, %v4171_v19  ;;  %79 = vst.msk [vmem:[#allocation3 + $0xb0] sm:$0xff] %vm24_vm11, %v4171_v19 }
 0x121   :  { %80 = vst.msk [vmem:[#allocation3 + $0xb8] sm:$0xff] %vm24_vm11, %v4171_v19  ;;  %81 = vst.msk [vmem:[#allocation3 + $0xc0] sm:$0xff] %vm24_vm11, %v4171_v19 }
 0x122   :  { %82 = vst.msk [vmem:[#allocation3 + $0xc8] sm:$0xff] %vm24_vm11, %v4171_v19  ;;  %83 = vst.msk [vmem:[#allocation3 + $0xd0] sm:$0xff] %vm24_vm11, %v4171_v19 }
 0x123   :  { %84 = vst.msk [vmem:[#allocation3 + $0xd8] sm:$0xff] %vm24_vm11, %v4171_v19  ;;  %85 = vst.msk [vmem:[#allocation3 + $0xe0] sm:$0xff] %vm24_vm11, %v4171_v19 }
 0x124   :  { %86 = vst.msk [vmem:[#allocation3 + $0xe8] sm:$0xff] %vm24_vm11, %v4171_v19  ;;  %87 = vst.msk [vmem:[#allocation3 + $0xf0] sm:$0xff] %vm24_vm11, %v4171_v19 }
 0x125   :  { %88 = vst.msk [vmem:[#allocation3 + $0xf8] sm:$0xff] %vm24_vm11, %v4171_v19  ;;  %90 = vst.msk [vmem:[#allocation4 + $0x8] sm:$0xff] %vm24_vm11, %v4171_v19 }
 0x126   :  { %91 = vst.msk [vmem:[#allocation4 + $0x10] sm:$0xff] %vm24_vm11, %v4171_v19  ;;  %92 = vst.msk [vmem:[#allocation4 + $0x18] sm:$0xff] %vm24_vm11, %v4171_v19 }
 0x127   :  { %93 = vst.msk [vmem:[#allocation4 + $0x20] sm:$0xff] %vm24_vm11, %v4171_v19  ;;  %94 = vst.msk [vmem:[#allocation4 + $0x28] sm:$0xff] %vm24_vm11, %v4171_v19 }
 0x128   :  { %95 = vst.msk [vmem:[#allocation4 + $0x30] sm:$0xff] %vm24_vm11, %v4171_v19  ;;  %96 = vst.msk [vmem:[#allocation4 + $0x38] sm:$0xff] %vm24_vm11, %v4171_v19 }
 0x129   :  { %97 = vst.msk [vmem:[#allocation4 + $0x40] sm:$0xff] %vm24_vm11, %v4171_v19  ;;  %98 = vst.msk [vmem:[#allocation4 + $0x48] sm:$0xff] %vm24_vm11, %v4171_v19 }
 0x12a   :  { %99 = vst.msk [vmem:[#allocation4 + $0x50] sm:$0xff] %vm24_vm11, %v4171_v19  ;;  %100 = vst.msk [vmem:[#allocation4 + $0x58] sm:$0xff] %vm24_vm11, %v4171_v19 }
 0x12b   :  { %101 = vst.msk [vmem:[#allocation4 + $0x60] sm:$0xff] %vm24_vm11, %v4171_v19  ;;  %102 = vst.msk [vmem:[#allocation4 + $0x68] sm:$0xff] %vm24_vm11, %v4171_v19 }
 0x12c   :  { %103 = vst.msk [vmem:[#allocation4 + $0x70] sm:$0xff] %vm24_vm11, %v4171_v19  ;;  %104 = vst.msk [vmem:[#allocation4 + $0x78] sm:$0xff] %vm24_vm11, %v4171_v19 }
 0x12d   :  { %105 = vst.msk [vmem:[#allocation4 + $0x80] sm:$0xff] %vm24_vm11, %v4171_v19  ;;  %106 = vst.msk [vmem:[#allocation4 + $0x88] sm:$0xff] %vm24_vm11, %v4171_v19 }
 0x12e   :  { %107 = vst.msk [vmem:[#allocation4 + $0x90] sm:$0xff] %vm24_vm11, %v4171_v19  ;;  %108 = vst.msk [vmem:[#allocation4 + $0x98] sm:$0xff] %vm24_vm11, %v4171_v19 }
 0x12f   :  { %109 = vst.msk [vmem:[#allocation4 + $0xa0] sm:$0xff] %vm24_vm11, %v4171_v19  ;;  %110 = vst.msk [vmem:[#allocation4 + $0xa8] sm:$0xff] %vm24_vm11, %v4171_v19 }
 0x130   :  { %111 = vst.msk [vmem:[#allocation4 + $0xb0] sm:$0xff] %vm24_vm11, %v4171_v19  ;;  %112 = vst.msk [vmem:[#allocation4 + $0xb8] sm:$0xff] %vm24_vm11, %v4171_v19 }
 0x131   :  { %113 = vst.msk [vmem:[#allocation4 + $0xc0] sm:$0xff] %vm24_vm11, %v4171_v19  ;;  %114 = vst.msk [vmem:[#allocation4 + $0xc8] sm:$0xff] %vm24_vm11, %v4171_v19 }
 0x132   :  { %115 = vst.msk [vmem:[#allocation4 + $0xd0] sm:$0xff] %vm24_vm11, %v4171_v19  ;;  %116 = vst.msk [vmem:[#allocation4 + $0xd8] sm:$0xff] %vm24_vm11, %v4171_v19 }
 0x133   :  { %117 = vst.msk [vmem:[#allocation4 + $0xe0] sm:$0xff] %vm24_vm11, %v4171_v19  ;;  %118 = vst.msk [vmem:[#allocation4 + $0xe8] sm:$0xff] %vm24_vm11, %v4171_v19 }
 0x134   :  { %119 = vst.msk [vmem:[#allocation4 + $0xf0] sm:$0xff] %vm24_vm11, %v4171_v19  ;;  %120 = vst.msk [vmem:[#allocation4 + $0xf8] sm:$0xff] %vm24_vm11, %v4171_v19  ;;  %v5188_v19 = vadd.f32 %v5007_v18, %v4486_v28  ;;  %v1764_v18 = vadd.f32 %v5027_v2, %v1628_v24  ;;  %v1630_v24 = vsel %vm1502_vm4, %v4875_v15, 0.0  ;;  %v1632_v2 = vsel %vm1504_vm6, %v4916_v49, 0.0  ;;  %v5240_v49 = vpop.permute.xlu1 %1403 }
 0x135   :  { %1255 = vst [vmem:[%s7296_s4 + $0xb0] sm:$0xff] %v3672_v57  ;;  %1256 = vst [vmem:[%s7296_s4 + $0xb8] sm:$0xff] %v7569_v6  ;;  %v5194_v57 = vadd.f32 %v752_v9, %v4490_v30  ;;  %v2037_v6 = vmax.f32 %v2036_v48, %v4997_v44  ;;  %v563_v48 = vpop.f32.mrf.mxu0  ;;  %v5235_v15 = vadd.f32 %v756_v52, %v4490_v30  ;;  %v762_v52 = vpop.f32.mrf.mxu1 }
 0x136   :  { %1257 = vst [vmem:[%s7296_s4 + $0xc0] sm:$0xff] %v3674_v62  ;;  %v5232_v16 = vadd.f32 %v563_v48, %v4488_v29  ;;  %v2023_v62 = vmax.f32 %v2022_v0, %v4881_v17  ;;  %v1769_v39 = vadd.f32 %v1633_v22, %v1632_v2  ;;  %v1634_v22 = vsel %vm1506_vm8, %v4919_v7, 0.0 }
 0x137   :  { %v3675_v9 = vpack.c.bf16 %v5194_v57, %v5188_v19  ;;  %v2038_v58 = vmax.f32 %v2037_v6, %v5003_v56  ;;  %v5229_v6 = vadd.f32 %v754_v46, %v4486_v28  ;;  %7571 = vst [vmem:[#allocation31_spill] sm:$0xff] %v5235_v15  ;;  %v567_v14 = vpop.f32.mrf.mxu0  ;;  %vm1509_vm10 = vcmp.eq.s32.totalorder %v4484_v27, %v5240_v49  ;;  %v764_v7 = vpop.f32.mrf.mxu1 }
 0x138   :  { %v3676_v46 = vpack.c.bf16 %v5232_v16, %v5226_v3  ;;  %2024 = vmax.xlane.f32.xlu1 %v2023_v62  ;;  %v5272_v62 = vadd.f32 %v762_v52, %v4490_v30  ;;  %v1770_v25 = vadd.f32 %v1769_v39, %v1634_v22  ;;  %vm1508_vm12 = vcmp.eq.s32.totalorder %v4476_v21, %v5240_v49 }
 0x139   :  { %1258 = vst [vmem:[%s7296_s4 + $0xc8] sm:$0xff] %v3675_v9  ;;  %2039 = vmax.xlane.f32.xlu0 %v2038_v58  ;;  %v1765_v9 = vadd.f32 %v1764_v18, %v1630_v24  ;;  %v3677_v48 = vpack.c.bf16 %v5235_v15, %v5229_v6  ;;  %v569_v0 = vpop.f32.mrf.mxu0  ;;  %v2046_v18 = vmax.f32 %v5226_v3, %v5232_v16  ;;  %v766_v39 = vpop.f32.mrf.mxu1 }
 0x13a   :  { %1259 = vst [vmem:[%s7296_s4 + $0xd0] sm:$0xff] %v3676_v46  ;;  %v5263_v58 = vadd.f32 %v567_v14, %v4481_v1  ;;  %v5266_v24 = vadd.f32 %v760_v8, %v4486_v28  ;;  %v5269_v2 = vadd.f32 %v569_v0, %v4488_v29  ;;  %7573 = vst [vmem:[#allocation33_spill] sm:$0xff] %v5272_v62 }
 0x13b   :  { %1260 = vst [vmem:[%s7296_s4 + $0xd8] sm:$0xff] %v3677_v48  ;;  %v571_v17 = vpop.f32.mrf.mxu0  ;;  %v1766_v31 = vadd.f32 %v1765_v9, %v1631_v59  ;;  %v2047_v46 = vmax.f32 %v2046_v18, %v5229_v6  ;;  %v2031_v48 = vmax.f32 %v4955_v60, %v4961_v51  ;;  %v1637_v9 = vsel %vm1509_vm10, %v4961_v51, 0.0 }
 0x13c   :  { %7572 = vst [vmem:[#allocation32_spill] sm:$0xff] %v5266_v24  ;;  %v3678_v14 = vpack.c.bf16 %v5269_v2, %v5263_v58  ;;  %v3679_v8 = vpack.c.bf16 %v5272_v62, %v5266_v24  ;;  %v1635_v59 = vsel %vm1507_vm9, %v4925_v13, 0.0  ;;  %v1636_v18 = vsel %vm1508_vm12, %v4955_v60, 0.0  ;;  %v770_v60 = vpop.f32.mrf.mxu1 }
 0x13d   :  { %1767 = vadd.xlane.f32.xlu1 %v1766_v31  ;;  %v573_v0 = vpop.f32.mrf.mxu0  ;;  %v2048_v52 = vmax.f32 %v2047_v46, %v5235_v15  ;;  %v5300_v31 = vadd.f32 %v571_v17, %v4481_v1  ;;  %v5303_v22 = vadd.f32 %v764_v7, %v4486_v28  ;;  %v5309_v45 = vadd.f32 %v766_v39, %v4490_v30 }
 0x13e   :  { %1261 = vst [vmem:[%s7296_s4 + $0xe0] sm:$0xff] %v3678_v14  ;;  %1262 = vst [vmem:[%s7296_s4 + $0xe8] sm:$0xff] %v3679_v8  ;;  %v5306_v46 = vadd.f32 %v573_v0, %v4488_v29  ;;  %v1771_v14 = vadd.f32 %v1770_v25, %v1635_v59  ;;  %v2032_v13 = vmax.f32 %v2031_v48, %v4958_v5  ;;  %v772_v0 = vpop.f32.mrf.mxu1 }
 0x13f   :  { %7574 = vst [vmem:[#allocation34_spill] sm:$0xff] %v5300_v31  ;;  %7575 = vst [vmem:[#allocation35_spill] sm:$0xff] %v5303_v22  ;;  %2049 = vmax.xlane.f32.xlu0 %v2048_v52  ;;  %v577_v51 = vpop.f32.mrf.mxu0  ;;  %v1774_v15 = vadd.f32 %v1637_v9, %v1636_v18  ;;  %v3681_v7 = vpack.c.bf16 %v5309_v45, %v5303_v22  ;;  %vm1510_vm13 = vcmp.eq.s32.totalorder %v4493_v33, %v5240_v49 }
 0x140   :  { %7576 = vst [vmem:[#allocation36_spill] sm:$0xff] %v5306_v46  ;;  %7577 = vst [vmem:[#allocation37_spill] sm:$0xff] %v5309_v45  ;;  %v3680_v17 = vpack.c.bf16 %v5306_v46, %v5300_v31  ;;  %v2056_v39 = vmax.f32 %v5300_v31, %v5306_v46  ;;  %v1638_v25 = vsel %vm1510_vm13, %v4958_v5, 0.0  ;;  %v5328_v48 = vadd.f32 %v577_v51, %v4481_v1 }
 0x141   :  { %1772 = vadd.xlane.f32.xlu1 %v1771_v14  ;;  %v579_v8 = vpop.f32.mrf.mxu0  ;;  %1264 = vst [vmem:[%s7296_s4 + $0xf8] sm:$0xff] %v3681_v7  ;;  %v5331_v9 = vadd.f32 %v770_v60, %v4486_v28  ;;  %v5337_v59 = vadd.f32 %v772_v0, %v4490_v30  ;;  %v774_v14 = vpop.f32.mrf.mxu1  ;;  %v1775_v46 = vadd.f32 %v1774_v15, %v1638_v25 }
 0x142   :  { %1263 = vst [vmem:[%s7296_s4 + $0xf0] sm:$0xff] %v3680_v17  ;;  %7578 = vst [vmem:[#allocation38_spill] sm:$0xff] %v5328_v48  ;;  %v5334_v52 = vadd.f32 %v579_v8, %v4488_v29  ;;  %v2033_v17 = vmax.f32 %v2032_v13, %v4964_v61  ;;  %v2057_v5 = vmax.f32 %v2056_v39, %v5303_v22 }
 0x143   :  { %7579 = vst [vmem:[#allocation39_spill] sm:$0xff] %v5331_v9  ;;  %7581 = vst [vmem:[#allocation41_spill] sm:$0xff] %v5337_v59  ;;  %v581_v18 = vpop.f32.mrf.mxu0  ;;  %v2041_v51 = vmax.f32 %v5184_v20, %v5191_v50  ;;  %v3683_v7 = vpack.c.bf16 %v5337_v59, %v5331_v9  ;;  %vm1511_vm14 = vcmp.eq.s32.totalorder %v4496_v34, %v5240_v49  ;;  %v776_v0 = vpop.f32.mrf.mxu1 }
 0x144   :  { %7580 = vst [vmem:[#allocation40_spill] sm:$0xff] %v5334_v52  ;;  %v3682_v60 = vpack.c.bf16 %v5334_v52, %v5328_v48  ;;  %v2058_v13 = vmax.f32 %v2057_v5, %v5309_v45  ;;  %v1639_v39 = vsel %vm1511_vm14, %v4964_v61, 0.0  ;;  %v2051_v15 = vmax.f32 %v5263_v58, %v5269_v2 }
 0x145   :  { %2034 = vmax.xlane.f32.xlu1 %v2033_v17  ;;  %v583_v8 = vpop.f32.mrf.mxu0  ;;  %1266 = vst [vmem:[%s7296_s4 + $0x108] sm:$0xff] %v3683_v7  ;;  %v5360_v49 = vadd.f32 %v581_v18, %v4481_v1  ;;  %v5363_v25 = vadd.f32 %v774_v14, %v4486_v28  ;;  %v5369_v17 = vadd.f32 %v776_v0, %v4490_v30  ;;  %v780_v45 = vpop.f32.mrf.mxu1 }
 0x146   :  { %1265 = vst [vmem:[%s7296_s4 + $0x100] sm:$0xff] %v3682_v60  ;;  %v5366_v5 = vadd.f32 %v583_v8, %v4488_v29  ;;  %2059 = vmax.xlane.f32.xlu0 %v2058_v13  ;;  %v1776_v60 = vadd.f32 %v1775_v46, %v1639_v39  ;;  %v2042_v22 = vmax.f32 %v2041_v51, %v5188_v19  ;;  %v5381_v46 = vpop.permute.xlu1 %1406 }
 0x147   :  { %7582 = vst [vmem:[#allocation42_spill] sm:$0xff] %v5360_v49  ;;  %7583 = vst [vmem:[#allocation43_spill] sm:$0xff] %v5363_v25  ;;  %v587_v61 = vpop.f32.mrf.mxu0  ;;  %v3685_v18 = vpack.c.bf16 %v5369_v17, %v5363_v25  ;;  %v782_v31 = vpop.f32.mrf.mxu1  ;;  %v2052_v0 = vmax.f32 %v2051_v15, %v5266_v24  ;;  %v2061_v13 = vmax.f32 %v5328_v48, %v5334_v52 }
 0x148   :  { %7584 = vst [vmem:[#allocation44_spill] sm:$0xff] %v5366_v5  ;;  %7585 = vst [vmem:[#allocation45_spill] sm:$0xff] %v5369_v17  ;;  %v3684_v7 = vpack.c.bf16 %v5366_v5, %v5360_v49  ;;  %v2066_v8 = vmax.f32 %v5360_v49, %v5366_v5  ;;  %v5390_v51 = vadd.f32 %v587_v61, %v4481_v1 }
 0x149   :  { %1777 = vadd.xlane.f32.xlu1 %v1776_v60  ;;  %v589_v14 = vpop.f32.mrf.mxu0  ;;  %1268 = vst [vmem:[%s7296_s4 + $0x118] sm:$0xff] %v3685_v18  ;;  %v5393_v39 = vadd.f32 %v780_v45, %v4486_v28  ;;  %v5399_v60 = vadd.f32 %v782_v31, %v4490_v30  ;;  %v784_v48 = vpop.f32.mrf.mxu1  ;;  %v2053_v31 = vmax.f32 %v2052_v0, %v5272_v62 }
 0x14a   :  { %1267 = vst [vmem:[%s7296_s4 + $0x110] sm:$0xff] %v3684_v7  ;;  %7586 = vst [vmem:[#allocation46_spill] sm:$0xff] %v5390_v51  ;;  %v5396_v15 = vadd.f32 %v589_v14, %v4488_v29  ;;  %v2043_v7 = vmax.f32 %v2042_v22, %v5194_v57  ;;  %v2067_v5 = vmax.f32 %v2066_v8, %v5363_v25 }
 0x14b   :  { %7587 = vst [vmem:[#allocation47_spill] sm:$0xff] %v5393_v39  ;;  %7589 = vst [vmem:[#allocation49_spill] sm:$0xff] %v5399_v60  ;;  %v591_v49 = vpop.f32.mrf.mxu0  ;;  %v3687_v61 = vpack.c.bf16 %v5399_v60, %v5393_v39  ;;  %v786_v52 = vpop.f32.mrf.mxu1  ;;  %v2062_v24 = vmax.f32 %v2061_v13, %v5331_v9  ;;  %vm1513_vm15 = vcmp.eq.s32.totalorder %v4484_v27, %v5381_v46 }
 0x14c   :  { %7588 = vst [vmem:[#allocation48_spill] sm:$0xff] %v5396_v15  ;;  %v3686_v18 = vpack.c.bf16 %v5396_v15, %v5390_v51  ;;  %v2068_v14 = vmax.f32 %v2067_v5, %v5369_v17  ;;  %v2071_v22 = vmax.f32 %v5390_v51, %v5396_v15  ;;  %v5419_v8 = vadd.f32 %v591_v49, %v4481_v1 }
 0x14d   :  { %2044 = vmax.xlane.f32.xlu1 %v2043_v7  ;;  %v593_v45 = vpop.f32.mrf.mxu0  ;;  %1270 = vst [vmem:[%s7296_s4 + $0x128] sm:$0xff] %v3687_v61  ;;  %v5422_v5 = vadd.f32 %v784_v48, %v4486_v28  ;;  %v5428_v13 = vadd.f32 %v786_v52, %v4490_v30  ;;  %v790_v17 = vpop.f32.mrf.mxu1  ;;  %vm1512_vm0 = vcmp.eq.s32.totalorder %v4476_v21, %v5381_v46 }
 0x14e   :  { %1269 = vst [vmem:[%s7296_s4 + $0x120] sm:$0xff] %v3686_v18  ;;  %7590 = vst [vmem:[#allocation50_spill] sm:$0xff] %v5419_v8  ;;  %v5425_v0 = vadd.f32 %v593_v45, %v4488_v29  ;;  %2069 = vmax.xlane.f32.xlu0 %v2068_v14  ;;  %v5430_v18 = vpop.permute.xlu1 %1409  ;;  %v2063_v45 = vmax.f32 %v2062_v24, %v5337_v59  ;;  %v2072_v14 = vmax.f32 %v2071_v22, %v5393_v39 }
 0x14f   :  { %7591 = vst [vmem:[#allocation51_spill] sm:$0xff] %v5422_v5  ;;  %7593 = vst [vmem:[#allocation53_spill] sm:$0xff] %v5428_v13  ;;  %v597_v7 = vpop.f32.mrf.mxu0  ;;  %v3689_v49 = vpack.c.bf16 %v5428_v13, %v5422_v5  ;;  %v792_v25 = vpop.f32.mrf.mxu1  ;;  %vm1517_vm1 = vcmp.eq.s32.totalorder %v4484_v27, %v5430_v18  ;;  %vm1514_vm2 = vcmp.eq.s32.totalorder %v4493_v33, %v5381_v46 }
 0x150   :  { %7592 = vst [vmem:[#allocation52_spill] sm:$0xff] %v5425_v0  ;;  %v3688_v61 = vpack.c.bf16 %v5425_v0, %v5419_v8  ;;  %v2076_v52 = vmax.f32 %v5419_v8, %v5425_v0  ;;  %v5447_v9 = vadd.f32 %v597_v7, %v4481_v1  ;;  %v5456_v59 = vadd.f32 %v792_v25, %v4490_v30 }
 0x151   :  { %2054 = vmax.xlane.f32.xlu1 %v2053_v31  ;;  %v599_v48 = vpop.f32.mrf.mxu0  ;;  %1272 = vst [vmem:[%s7296_s4 + $0x138] sm:$0xff] %v3689_v49  ;;  %v5450_v31 = vadd.f32 %v790_v17, %v4486_v28  ;;  %v794_v8 = vpop.f32.mrf.mxu1  ;;  %vm1515_vm3 = vcmp.eq.s32.totalorder %v4496_v34, %v5381_v46  ;;  %vm1516_vm4 = vcmp.eq.s32.totalorder %v4476_v21, %v5430_v18 }
 0x152   :  { %1271 = vst [vmem:[%s7296_s4 + $0x130] sm:$0xff] %v3688_v61  ;;  %7594 = vst [vmem:[#allocation54_spill] sm:$0xff] %v5447_v9  ;;  %v5453_v24 = vadd.f32 %v599_v48, %v4488_v29  ;;  %v2077_v61 = vmax.f32 %v2076_v52, %v5422_v5  ;;  %v2073_v48 = vmax.f32 %v2072_v14, %v5399_v60  ;;  %v5467_v51 = vpop.permute.xlu1 %1412 }
 0x153   :  { %7595 = vst [vmem:[#allocation55_spill] sm:$0xff] %v5450_v31  ;;  %7597 = vst [vmem:[#allocation57_spill] sm:$0xff] %v5456_v59  ;;  %v601_v22 = vpop.f32.mrf.mxu0  ;;  %v3691_v7 = vpack.c.bf16 %v5456_v59, %v5450_v31  ;;  %v796_v17 = vpop.f32.mrf.mxu1  ;;  %v5479_v52 = vadd.f32 %v794_v8, %v4486_v28  ;;  %vm1518_vm5 = vcmp.eq.s32.totalorder %v4493_v33, %v5430_v18 }
 0x154   :  { %7596 = vst [vmem:[#allocation56_spill] sm:$0xff] %v5453_v24  ;;  %v3690_v0 = vpack.c.bf16 %v5453_v24, %v5447_v9  ;;  %v2078_v39 = vmax.f32 %v2077_v61, %v5428_v13  ;;  %v2081_v25 = vmax.f32 %v5447_v9, %v5453_v24  ;;  %v5485_v61 = vadd.f32 %v796_v17, %v4490_v30 }
 0x155   :  { %2064 = vmax.xlane.f32.xlu1 %v2063_v45  ;;  %v603_v49 = vpop.f32.mrf.mxu0  ;;  %1274 = vst [vmem:[%s7296_s4 + $0x148] sm:$0xff] %v3691_v7  ;;  %v5476_v45 = vadd.f32 %v601_v22, %v4481_v1  ;;  %7599 = vst [vmem:[#allocation59_spill] sm:$0xff] %v5479_v52  ;;  %v800_v13 = vpop.f32.mrf.mxu1  ;;  %vm1519_vm6 = vcmp.eq.s32.totalorder %v4496_v34, %v5430_v18  ;;  %vm1520_vm7 = vcmp.eq.s32.totalorder %v4476_v21, %v5467_v51 }
 0x156   :  { %1273 = vst [vmem:[%s7296_s4 + $0x140] sm:$0xff] %v3690_v0  ;;  %v5482_v14 = vadd.f32 %v603_v49, %v4488_v29  ;;  %7601 = vst [vmem:[#allocation61_spill] sm:$0xff] %v5485_v61  ;;  %2079 = vmax.xlane.f32.xlu0 %v2078_v39  ;;  %v2082_v0 = vmax.f32 %v2081_v25, %v5450_v31  ;;  %v3693_v22 = vpack.c.bf16 %v5485_v61, %v5479_v52  ;;  %v5514_v31 = vpop.permute.xlu1 %1415 }
 0x157   :  { %7598 = vst [vmem:[#allocation58_spill] sm:$0xff] %v5476_v45  ;;  %v607_v24 = vpop.f32.mrf.mxu0  ;;  %v802_v5 = vpop.f32.mrf.mxu1  ;;  %vm1521_vm8 = vcmp.eq.s32.totalorder %v4484_v27, %v5467_v51  ;;  %vm1522_vm9 = vcmp.eq.s32.totalorder %v4493_v33, %v5467_v51  ;;  %vm1524_vm10 = vcmp.eq.s32.totalorder %v4476_v21, %v5514_v31  ;;  %vm1523_vm12 = vcmp.eq.s32.totalorder %v4496_v34, %v5467_v51 }
 0x158   :  { %7600 = vst [vmem:[#allocation60_spill] sm:$0xff] %v5482_v14  ;;  %v3692_v7 = vpack.c.bf16 %v5482_v14, %v5476_v45  ;;  %v2083_v49 = vmax.f32 %v2082_v0, %v5456_v59  ;;  %v2086_v17 = vmax.f32 %v5476_v45, %v5482_v14  ;;  %1276 = vst [vmem:[%s7296_s4 + $0x158] sm:$0xff] %v3693_v22 }
 0x159   :  { %2074 = vmax.xlane.f32.xlu1 %v2073_v48  ;;  %v609_v8 = vpop.f32.mrf.mxu0  ;;  %v5502_v39 = vadd.f32 %v607_v24, %v4481_v1  ;;  %v5505_v48 = vadd.f32 %v800_v13, %v4486_v28  ;;  %v5511_v0 = vadd.f32 %v802_v5, %v4490_v30  ;;  %v804_v14 = vpop.f32.mrf.mxu1  ;;  %vm1525_vm13 = vcmp.eq.s32.totalorder %v4484_v27, %v5514_v31 }
 0x15a   :  { %1275 = vst [vmem:[%s7296_s4 + $0x150] sm:$0xff] %v3692_v7  ;;  %v5508_v25 = vadd.f32 %v609_v8, %v4488_v29  ;;  %v2087_v7 = vmax.f32 %v2086_v17, %v5479_v52 }
 0x15b   :  { %7602 = vst [vmem:[#allocation62_spill] sm:$0xff] %v5502_v39  ;;  %7603 = vst [vmem:[#allocation63_spill] sm:$0xff] %v5505_v48  ;;  %v611_v59 = vpop.f32.mrf.mxu0  ;;  %v3695_v24 = vpack.c.bf16 %v5511_v0, %v5505_v48  ;;  %v806_v45 = vpop.f32.mrf.mxu1 }
 0x15c   :  { %7604 = vst [vmem:[#allocation64_spill] sm:$0xff] %v5508_v25  ;;  %7605 = vst [vmem:[#allocation65_spill] sm:$0xff] %v5511_v0  ;;  %v3694_v22 = vpack.c.bf16 %v5508_v25, %v5502_v39  ;;  %v2088_v8 = vmax.f32 %v2087_v7, %v5485_v61  ;;  %v2091_v5 = vmax.f32 %v5502_v39, %v5508_v25 }
 0x15d   :  { %2084 = vmax.xlane.f32.xlu1 %v2083_v49  ;;  %v613_v13 = vpop.f32.mrf.mxu0  ;;  %1278 = vst [vmem:[%s7296_s4 + $0x168] sm:$0xff] %v3695_v24  ;;  %v5530_v17 = vadd.f32 %v611_v59, %v4481_v1  ;;  %v5533_v49 = vadd.f32 %v804_v14, %v4486_v28  ;;  %v5539_v7 = vadd.f32 %v806_v45, %v4490_v30  ;;  %v810_v61 = vpop.f32.mrf.mxu1 }
 0x15e   :  { %1277 = vst [vmem:[%s7296_s4 + $0x160] sm:$0xff] %v3694_v22  ;;  %v5536_v52 = vadd.f32 %v613_v13, %v4488_v29  ;;  %2089 = vmax.xlane.f32.xlu0 %v2088_v8  ;;  %v2092_v22 = vmax.f32 %v2091_v5, %v5505_v48  ;;  %v5549_v45 = vpop.permute.xlu1 %1418  ;;  %v5561_v5 = vadd.f32 %v810_v61, %v4486_v28 }
 0x15f   :  { %7606 = vst [vmem:[#allocation66_spill] sm:$0xff] %v5530_v17  ;;  %7607 = vst [vmem:[#allocation67_spill] sm:$0xff] %v5533_v49  ;;  %v617_v25 = vpop.f32.mrf.mxu0  ;;  %v3697_v59 = vpack.c.bf16 %v5539_v7, %v5533_v49  ;;  %v812_v14 = vpop.f32.mrf.mxu1  ;;  %vm1528_vm14 = vcmp.eq.s32.totalorder %v4476_v21, %v5549_v45 }
 0x160   :  { %7608 = vst [vmem:[#allocation68_spill] sm:$0xff] %v5536_v52  ;;  %7609 = vst [vmem:[#allocation69_spill] sm:$0xff] %v5539_v7  ;;  %v3696_v24 = vpack.c.bf16 %v5536_v52, %v5530_v17  ;;  %v2093_v60 = vmax.f32 %v2092_v22, %v5511_v0  ;;  %v2096_v13 = vmax.f32 %v5530_v17, %v5536_v52 }
 0x161   :  { %v619_v39 = vpop.f32.mrf.mxu0  ;;  %1280 = vst [vmem:[%s7296_s4 + $0x178] sm:$0xff] %v3697_v59  ;;  %v5558_v8 = vadd.f32 %v617_v25, %v4481_v1  ;;  %7611 = vst [vmem:[#allocation71_spill] sm:$0xff] %v5561_v5  ;;  %v5567_v0 = vadd.f32 %v812_v14, %v4490_v30  ;;  %v814_v52 = vpop.f32.mrf.mxu1 }
 0x162   :  { %1279 = vst [vmem:[%s7296_s4 + $0x170] sm:$0xff] %v3696_v24  ;;  %v5564_v22 = vadd.f32 %v619_v39, %v4488_v29  ;;  %2094 = vmax.xlane.f32.xlu1 %v2093_v60  ;;  %v2097_v24 = vmax.f32 %v2096_v13, %v5533_v49  ;;  %v5577_v14 = vpop.permute.xlu0 %1421  ;;  %v5589_v13 = vadd.f32 %v814_v52, %v4486_v28  ;;  %v5598_v49 = vpop.permute.xlu1 %1424 }
 0x163   :  { %7610 = vst [vmem:[#allocation70_spill] sm:$0xff] %v5558_v8  ;;  %7613 = vst [vmem:[#allocation73_spill] sm:$0xff] %v5567_v0  ;;  %v621_v48 = vpop.f32.mrf.mxu0  ;;  %v3699_v25 = vpack.c.bf16 %v5567_v0, %v5561_v5  ;;  %v816_v61 = vpop.f32.mrf.mxu1 }
 0x164   :  { %7612 = vst [vmem:[#allocation72_spill] sm:$0xff] %v5564_v22  ;;  %v3698_v59 = vpack.c.bf16 %v5564_v22, %v5558_v8  ;;  %v2098_v9 = vmax.f32 %v2097_v24, %v5539_v7  ;;  %v2101_v39 = vmax.f32 %v5558_v8, %v5564_v22  ;;  %v5586_v60 = vadd.f32 %v621_v48, %v4481_v1 }
 0x165   :  { %v623_v17 = vpop.f32.mrf.mxu0  ;;  %1282 = vst [vmem:[%s7296_s4 + $0x188] sm:$0xff] %v3699_v25  ;;  %7615 = vst [vmem:[#allocation75_spill] sm:$0xff] %v5589_v13  ;;  %v5595_v22 = vadd.f32 %v816_v61, %v4490_v30  ;;  %v820_v7 = vpop.f32.mrf.mxu1 }
 0x166   :  { %1281 = vst [vmem:[%s7296_s4 + $0x180] sm:$0xff] %v3698_v59  ;;  %7614 = vst [vmem:[#allocation74_spill] sm:$0xff] %v5586_v60  ;;  %v5592_v24 = vadd.f32 %v623_v17, %v4488_v29  ;;  %2099 = vmax.xlane.f32.xlu0 %v2098_v9  ;;  %v2102_v59 = vmax.f32 %v2101_v39, %v5561_v5  ;;  %v5617_v39 = vadd.f32 %v820_v7, %v4486_v28 }
 0x167   :  { %7617 = vst [vmem:[#allocation77_spill] sm:$0xff] %v5595_v22  ;;  %v627_v8 = vpop.f32.mrf.mxu0  ;;  %v3701_v52 = vpack.c.bf16 %v5595_v22, %v5589_v13  ;;  %v822_v15 = vpop.f32.mrf.mxu1 }
 0x168   :  { %7616 = vst [vmem:[#allocation76_spill] sm:$0xff] %v5592_v24  ;;  %v3700_v48 = vpack.c.bf16 %v5592_v24, %v5586_v60  ;;  %v2103_v17 = vmax.f32 %v2102_v59, %v5567_v0  ;;  %v2106_v61 = vmax.f32 %v5586_v60, %v5592_v24  ;;  %v5614_v9 = vadd.f32 %v627_v8, %v4481_v1  ;;  %v5626_v60 = vpop.permute.xlu0 %1427 }
 0x169   :  { %v629_v25 = vpop.f32.mrf.mxu0  ;;  %1284 = vst [vmem:[%s7296_s4 + $0x198] sm:$0xff] %v3701_v52  ;;  %7619 = vst [vmem:[#allocation79_spill] sm:$0xff] %v5617_v39  ;;  %v5623_v59 = vadd.f32 %v822_v15, %v4490_v30  ;;  %v824_v24 = vpop.f32.mrf.mxu1 }
 0x16a   :  { %1283 = vst [vmem:[%s7296_s4 + $0x190] sm:$0xff] %v3700_v48  ;;  %7618 = vst [vmem:[#allocation78_spill] sm:$0xff] %v5614_v9  ;;  %v5620_v5 = vadd.f32 %v629_v25, %v4488_v29  ;;  %2104 = vmax.xlane.f32.xlu1 %v2103_v17  ;;  %v2107_v48 = vmax.f32 %v2106_v61, %v5589_v13  ;;  %v5635_v17 = vpop.permute.xlu1 %1430  ;;  %v5647_v13 = vadd.f32 %v824_v24, %v4486_v28 }
 0x16b   :  { %7621 = vst [vmem:[#allocation81_spill] sm:$0xff] %v5623_v59  ;;  %v631_v0 = vpop.f32.mrf.mxu0  ;;  %7622 = vst [vmem:[#allocation82_spill] sm:$0xff] %v5626_v60  ;;  %v3703_v7 = vpack.c.bf16 %v5623_v59, %v5617_v39  ;;  %v826_v62 = vpop.f32.mrf.mxu1 }
 0x16c   :  { %7620 = vst [vmem:[#allocation80_spill] sm:$0xff] %v5620_v5  ;;  %v3702_v8 = vpack.c.bf16 %v5620_v5, %v5614_v9  ;;  %v2108_v25 = vmax.f32 %v2107_v48, %v5595_v22  ;;  %v2111_v15 = vmax.f32 %v5614_v9, %v5620_v5  ;;  %7623 = vst [vmem:[#allocation83_spill] sm:$0xff] %v5635_v17 }
 0x16d   :  { %v633_v52 = vpop.f32.mrf.mxu0  ;;  %1286 = vst [vmem:[%s7296_s4 + $0x1a8] sm:$0xff] %v3703_v7  ;;  %v5644_v61 = vadd.f32 %v631_v0, %v4481_v1  ;;  %7625 = vst [vmem:[#allocation85_spill] sm:$0xff] %v5647_v13  ;;  %v5653_v5 = vadd.f32 %v826_v62, %v4490_v30  ;;  %v830_v22 = vpop.f32.mrf.mxu1 }
 0x16e   :  { %1285 = vst [vmem:[%s7296_s4 + $0x1a0] sm:$0xff] %v3702_v8  ;;  %v5650_v48 = vadd.f32 %v633_v52, %v4488_v29  ;;  %2109 = vmax.xlane.f32.xlu0 %v2108_v25  ;;  %v2112_v8 = vmax.f32 %v2111_v15, %v5617_v39  ;;  %v5663_v62 = vpop.permute.xlu0 %1433  ;;  %v5675_v15 = vadd.f32 %v830_v22, %v4486_v28 }
 0x16f   :  { %7624 = vst [vmem:[#allocation84_spill] sm:$0xff] %v5644_v61  ;;  %7627 = vst [vmem:[#allocation87_spill] sm:$0xff] %v5653_v5  ;;  %v637_v9 = vpop.f32.mrf.mxu0  ;;  %v3705_v0 = vpack.c.bf16 %v5653_v5, %v5647_v13  ;;  %v832_v24 = vpop.f32.mrf.mxu1 }
 0x170   :  { %7626 = vst [vmem:[#allocation86_spill] sm:$0xff] %v5650_v48  ;;  %v3704_v7 = vpack.c.bf16 %v5650_v48, %v5644_v61  ;;  %v2113_v60 = vmax.f32 %v2112_v8, %v5623_v59  ;;  %v2116_v52 = vmax.f32 %v5644_v61, %v5650_v48  ;;  %7628 = vst [vmem:[#allocation88_spill] sm:$0xff] %v5663_v62  ;;  %v5684_v61 = vpop.permute.xlu1 %1436 }
 0x171   :  { %v639_v17 = vpop.f32.mrf.mxu0  ;;  %1288 = vst [vmem:[%s7296_s4 + $0x1b8] sm:$0xff] %v3705_v0  ;;  %v5672_v25 = vadd.f32 %v637_v9, %v4481_v1  ;;  %7630 = vst [vmem:[#allocation90_spill] sm:$0xff] %v5675_v15  ;;  %v5681_v59 = vadd.f32 %v832_v24, %v4490_v30  ;;  %v834_v48 = vpop.f32.mrf.mxu1 }
 0x172   :  { %1287 = vst [vmem:[%s7296_s4 + $0x1b0] sm:$0xff] %v3704_v7  ;;  %v5678_v8 = vadd.f32 %v639_v17, %v4488_v29  ;;  %2114 = vmax.xlane.f32.xlu1 %v2113_v60  ;;  %v2117_v7 = vmax.f32 %v2116_v52, %v5647_v13  ;;  %7633 = vst [vmem:[#allocation93_spill] sm:$0xff] %v5684_v61  ;;  %v5703_v52 = vadd.f32 %v834_v48, %v4486_v28 }
 0x173   :  { %7629 = vst [vmem:[#allocation89_spill] sm:$0xff] %v5672_v25  ;;  %7632 = vst [vmem:[#allocation92_spill] sm:$0xff] %v5681_v59  ;;  %v641_v39 = vpop.f32.mrf.mxu0  ;;  %v3707_v22 = vpack.c.bf16 %v5681_v59, %v5675_v15  ;;  %v836_v62 = vpop.f32.mrf.mxu1 }
 0x174   :  { %7631 = vst [vmem:[#allocation91_spill] sm:$0xff] %v5678_v8  ;;  %v3706_v9 = vpack.c.bf16 %v5678_v8, %v5672_v25  ;;  %v2118_v17 = vmax.f32 %v2117_v7, %v5653_v5  ;;  %v2121_v24 = vmax.f32 %v5672_v25, %v5678_v8  ;;  %v5700_v60 = vadd.f32 %v641_v39, %v4481_v1  ;;  %v5712_v5 = vpop.permute.xlu0 %1439 }
 0x175   :  { %v643_v0 = vpop.f32.mrf.mxu0  ;;  %1290 = vst [vmem:[%s7296_s4 + $0x1c8] sm:$0xff] %v3707_v22  ;;  %7635 = vst [vmem:[#allocation95_spill] sm:$0xff] %v5703_v52  ;;  %v5709_v7 = vadd.f32 %v836_v62, %v4490_v30  ;;  %v840_v25 = vpop.f32.mrf.mxu1 }
 0x176   :  { %1289 = vst [vmem:[%s7296_s4 + $0x1c0] sm:$0xff] %v3706_v9  ;;  %7634 = vst [vmem:[#allocation94_spill] sm:$0xff] %v5700_v60  ;;  %v5706_v13 = vadd.f32 %v643_v0, %v4488_v29  ;;  %2119 = vmax.xlane.f32.xlu0 %v2118_v17  ;;  %v2122_v9 = vmax.f32 %v2121_v24, %v5675_v15  ;;  %v5721_v17 = vpop.permute.xlu1 %1442  ;;  %v5733_v15 = vadd.f32 %v840_v25, %v4486_v28 }
 0x177   :  { %7637 = vst [vmem:[#allocation97_spill] sm:$0xff] %v5709_v7  ;;  %v647_v8 = vpop.f32.mrf.mxu0  ;;  %7638 = vst [vmem:[#allocation98_spill] sm:$0xff] %v5712_v5  ;;  %v3709_v48 = vpack.c.bf16 %v5709_v7, %v5703_v52  ;;  %v842_v61 = vpop.f32.mrf.mxu1 }
 0x178   :  { %7636 = vst [vmem:[#allocation96_spill] sm:$0xff] %v5706_v13  ;;  %v3708_v39 = vpack.c.bf16 %v5706_v13, %v5700_v60  ;;  %v2123_v0 = vmax.f32 %v2122_v9, %v5681_v59  ;;  %v2126_v62 = vmax.f32 %v5700_v60, %v5706_v13  ;;  %7639 = vst [vmem:[#allocation99_spill] sm:$0xff] %v5721_v17 }
 0x179   :  { %v649_v22 = vpop.f32.mrf.mxu0  ;;  %1292 = vst [vmem:[%s7296_s4 + $0x1d8] sm:$0xff] %v3709_v48  ;;  %v5730_v24 = vadd.f32 %v647_v8, %v4481_v1  ;;  %7641 = vst [vmem:[#allocation101_spill] sm:$0xff] %v5733_v15  ;;  %v5739_v59 = vadd.f32 %v842_v61, %v4490_v30  ;;  %v844_v60 = vpop.f32.mrf.mxu1 }
 0x17a   :  { %1291 = vst [vmem:[%s7296_s4 + $0x1d0] sm:$0xff] %v3708_v39  ;;  %v5736_v9 = vadd.f32 %v649_v22, %v4488_v29  ;;  %2124 = vmax.xlane.f32.xlu1 %v2123_v0  ;;  %v2127_v39 = vmax.f32 %v2126_v62, %v5703_v52  ;;  %v5749_v61 = vpop.permute.xlu0 %1445  ;;  %v5761_v62 = vadd.f32 %v844_v60, %v4486_v28 }
 0x17b   :  { %7640 = vst [vmem:[#allocation100_spill] sm:$0xff] %v5730_v24  ;;  %7643 = vst [vmem:[#allocation103_spill] sm:$0xff] %v5739_v59  ;;  %v651_v13 = vpop.f32.mrf.mxu0  ;;  %v3711_v8 = vpack.c.bf16 %v5739_v59, %v5733_v15  ;;  %v846_v25 = vpop.f32.mrf.mxu1 }
 0x17c   :  { %7642 = vst [vmem:[#allocation102_spill] sm:$0xff] %v5736_v9  ;;  %v3710_v48 = vpack.c.bf16 %v5736_v9, %v5730_v24  ;;  %v2128_v5 = vmax.f32 %v2127_v39, %v5709_v7  ;;  %v2131_v22 = vmax.f32 %v5730_v24, %v5736_v9  ;;  %7644 = vst [vmem:[#allocation104_spill] sm:$0xff] %v5749_v61 }
 0x17d   :  { %v653_v17 = vpop.f32.mrf.mxu0  ;;  %1294 = vst [vmem:[%s7296_s4 + $0x1e8] sm:$0xff] %v3711_v8  ;;  %v5758_v0 = vadd.f32 %v651_v13, %v4481_v1  ;;  %7646 = vst [vmem:[#allocation106_spill] sm:$0xff] %v5761_v62  ;;  %v5767_v7 = vadd.f32 %v846_v25, %v4490_v30 }
 0x17e   :  { %1293 = vst [vmem:[%s7296_s4 + $0x1e0] sm:$0xff] %v3710_v48  ;;  %v5764_v39 = vadd.f32 %v653_v17, %v4488_v29  ;;  %2129 = vmax.xlane.f32.xlu0 %v2128_v5  ;;  %v2132_v61 = vmax.f32 %v2131_v22, %v5733_v15  ;;  %v5770_v48 = vpop.permute.xlu1 %1448  ;;  %v5786_v5 = vpop.permute.xlu0 %1451  ;;  %v5898_v15 = vld [vmem:[#allocation2 + $0x40] sm:$0xff] }
 0x17f   :  { %7645 = vst [vmem:[#allocation105_spill] sm:$0xff] %v5758_v0  ;;  %7648 = vst [vmem:[#allocation108_spill] sm:$0xff] %v5767_v7  ;;  %v3713_v1 = vpack.c.bf16 %v5767_v7, %v5761_v62 }
 0x180   :  { %7647 = vst [vmem:[#allocation107_spill] sm:$0xff] %v5764_v39  ;;  %v3712_v8 = vpack.c.bf16 %v5764_v39, %v5758_v0  ;;  %v2136_v28 = vmax.f32 %v5758_v0, %v5764_v39  ;;  %v2133_v29 = vmax.f32 %v2132_v61, %v5739_v59  ;;  %7649 = vst [vmem:[#allocation109_spill] sm:$0xff] %v5786_v5  ;;  %v1341_v59 = vld [vmem:[#allocation4 + $0x8] sm:$0xff] }
 0x181   :  { %1296 = vst [vmem:[%s7296_s4 + $0x1f8] sm:$0xff] %v3713_v1  ;;  %7674 = vst [vmem:[#allocation134_spill] sm:$0xff] %v5898_v15 }
 0x182   :  { %1295 = vst [vmem:[%s7296_s4 + $0x1f0] sm:$0xff] %v3712_v8  ;;  %v2137_v30 = vmax.f32 %v2136_v28, %v5761_v62  ;;  %2134 = vmax.xlane.f32.xlu1 %v2133_v29  ;;  %v5789_v60 = vpop.permute.xlu1 %1454  ;;  %v5791_v17 = vpop.permute.xlu0 %1457  ;;  %v5799_v8 = vld [vmem:[#allocation2] sm:$0xff] }
 0x183   :  { %7650 = vst [vmem:[#allocation110_spill] sm:$0xff] %v5789_v60  ;;  %7651 = vst [vmem:[#allocation111_spill] sm:$0xff] %v5791_v17  ;;  %v1340_v28 = vld [vmem:[#allocation4] sm:$0xff]  ;;  %v5809_v17 = vld [vmem:[#allocation2 + $0x8] sm:$0xff] }
 0x184   :  { %v2138_v13 = vmax.f32 %v2137_v30, %v5767_v7  ;;  %7655 = vst [vmem:[#allocation115_spill] sm:$0xff] %v5799_v8  ;;  %7657 = vst [vmem:[#allocation117_spill] sm:$0xff] %v5809_v17  ;;  %v5812_v7 = vld [vmem:[#allocation2 + $0x10] sm:$0xff]  ;;  %v7762_v60 = vld [vmem:[#allocation50_spill] sm:$0xff] }
 0x185   :  { %7658 = vst [vmem:[#allocation118_spill] sm:$0xff] %v5812_v7 }
 0x186   :  { %2139 = vmax.xlane.f32.xlu0 %v2138_v13  ;;  %v5793_v25 = vpop.permute.xlu1 %1460  ;;  %v5795_v22 = vpop.permute.xlu0 %1466 }
 0x187   :  { %7652 = vst [vmem:[#allocation112_spill] sm:$0xff] %v5793_v25  ;;  %7653 = vst [vmem:[#allocation113_spill] sm:$0xff] %v5795_v22 }
 0x18a   :  { %v5797_v61 = vpop.permute.xlu1 %1463  ;;  %v1985_v1 = vpop.xlane.xlu0 %1984 }
 0x18b   :  { %7654 = vst [vmem:[#allocation114_spill] sm:$0xff] %v5797_v61  ;;  %v5802_v29 = vmax.f32 %v5799_v8, %v1985_v1 }
 0x18d   :  { %7656 = vst [vmem:[#allocation116_spill] sm:$0xff] %v5802_v29  ;;  %3101 = vst.msk [vmem:[#allocation2] sm:$0xff] %vm24_vm11, %v5802_v29 }
 0x18e   :  { %v1728_v5 = vpop.xlane.xlu1 %1727  ;;  %v1995_v62 = vpop.xlane.xlu0 %1994 }
 0x18f   :  { %v1884_v13 = vadd.f32 %v1728_v5, %v1340_v28  ;;  %v5822_v5 = vmax.f32 %v5812_v7, %v1995_v62 }
 0x191   :  { %1917 = vst.msk [vmem:[#allocation4] sm:$0xff] %vm24_vm11, %v1884_v13  ;;  %7660 = vst [vmem:[#allocation120_spill] sm:$0xff] %v5822_v5  ;;  %v5825_v13 = vld [vmem:[#allocation2 + $0x18] sm:$0xff] }
 0x192   :  { %v1990_v61 = vpop.xlane.xlu1 %1989  ;;  %7661 = vst [vmem:[#allocation121_spill] sm:$0xff] %v5825_v13  ;;  %3103 = vst.msk [vmem:[#allocation2 + $0x10] sm:$0xff] %vm24_vm11, %v5822_v5  ;;  %v2000_v30 = vpop.xlane.xlu0 %1999 }
 0x193   :  { %2335 = vperm.xlu1 %3720, %v5802_v29   ;;  %v5815_v1 = vmax.f32 %v5809_v17, %v1990_v61  ;;  %v1342_v17 = vld [vmem:[#allocation4 + $0x10] sm:$0xff]  ;;  %v5834_v62 = vmax.f32 %v5825_v13, %v2000_v30  ;;  %v5844_v30 = vld [vmem:[#allocation2 + $0x20] sm:$0xff] }
 0x194   :  { %7664 = vst [vmem:[#allocation124_spill] sm:$0xff] %v5844_v30 }
 0x195   :  { %7659 = vst [vmem:[#allocation119_spill] sm:$0xff] %v5815_v1  ;;  %3102 = vst.msk [vmem:[#allocation2 + $0x8] sm:$0xff] %vm24_vm11, %v5815_v1 }
 0x196   :  { %v1733_v28 = vpop.xlane.xlu1 %1732  ;;  %7662 = vst [vmem:[#allocation122_spill] sm:$0xff] %v5834_v62  ;;  %3104 = vst.msk [vmem:[#allocation2 + $0x18] sm:$0xff] %vm24_vm11, %v5834_v62  ;;  %v2010_v7 = vpop.xlane.xlu0 %2009 }
 0x197   :  { %v1885_v29 = vadd.f32 %v1733_v28, %v1341_v59  ;;  %2345 = vperm.xlu1 %3720, %v5822_v5   ;;  %v1343_v59 = vld [vmem:[#allocation4 + $0x18] sm:$0xff]  ;;  %v5842_v5 = vld [vmem:[#allocation2 + $0x28] sm:$0xff] }
 0x198   :  { %7663 = vst [vmem:[#allocation123_spill] sm:$0xff] %v5842_v5  ;;  %v5848_v8 = vmax.f32 %v5842_v5, %v2010_v7  ;;  %v1345_v5 = vld [vmem:[#allocation4 + $0x28] sm:$0xff] }
 0x199   :  { %1918 = vst.msk [vmem:[#allocation4 + $0x8] sm:$0xff] %vm24_vm11, %v1885_v29 }
 0x19a   :  { %7665 = vst [vmem:[#allocation125_spill] sm:$0xff] %v5848_v8  ;;  %3106 = vst.msk [vmem:[#allocation2 + $0x28] sm:$0xff] %vm24_vm11, %v5848_v8 }
 0x19b   :  { %2350 = vperm.xlu1 %3720, %v5834_v62   ;;  %v1346_v62 = vld [vmem:[#allocation4 + $0x30] sm:$0xff] }
 0x19c   :  { %2340 = vperm.xlu0 %3719, %v5815_v1   ;;  %v1738_v1 = vpop.xlane.xlu1 %1737 }
 0x19d   :  { %v1886_v61 = vadd.f32 %v1738_v1, %v1342_v17  ;;  %v2020_v17 = vpop.xlane.xlu0 %2019 }
 0x19f   :  { %1919 = vst.msk [vmem:[#allocation4 + $0x10] sm:$0xff] %vm24_vm11, %v1886_v61  ;;  %2360 = vperm.xlu1 %3720, %v5848_v8   ;;  %v1344_v61 = vld [vmem:[#allocation4 + $0x20] sm:$0xff] }
 0x1a0   :  { %v1743_v28 = vpop.xlane.xlu1 %1742 }
 0x1a1   :  { %v1887_v29 = vadd.f32 %v1743_v28, %v1343_v59  ;;  %v5863_v28 = vld [vmem:[#allocation2 + $0x38] sm:$0xff] }
 0x1a2   :  { %7667 = vst [vmem:[#allocation127_spill] sm:$0xff] %v5863_v28 }
 0x1a3   :  { %1920 = vst.msk [vmem:[#allocation4 + $0x18] sm:$0xff] %vm24_vm11, %v1887_v29 }
 0x1a4   :  { %v2005_v13 = vpop.xlane.xlu1 %2004 }
 0x1a5   :  { %v5855_v1 = vmax.f32 %v5844_v30, %v2005_v13  ;;  %v5867_v13 = vmax.f32 %v5863_v28, %v2020_v17  ;;  %v5896_v28 = vld [vmem:[#allocation2 + $0x58] sm:$0xff] }
 0x1a6   :  { %7673 = vst [vmem:[#allocation133_spill] sm:$0xff] %v5896_v28 }
 0x1a7   :  { %7666 = vst [vmem:[#allocation126_spill] sm:$0xff] %v5855_v1  ;;  %3105 = vst.msk [vmem:[#allocation2 + $0x20] sm:$0xff] %vm24_vm11, %v5855_v1  ;;  %2355 = vperm.xlu0 %3719, %v5855_v1   ;;  %2370 = vperm.xlu1 %3720, %v5867_v13   ;;  %v5874_v1 = vld [vmem:[#allocation2 + $0x30] sm:$0xff] }
 0x1a8   :  { %v1748_v7 = vpop.xlane.xlu1 %1747  ;;  %7668 = vst [vmem:[#allocation128_spill] sm:$0xff] %v5867_v13  ;;  %3108 = vst.msk [vmem:[#allocation2 + $0x38] sm:$0xff] %vm24_vm11, %v5867_v13  ;;  %v1347_v13 = vld [vmem:[#allocation4 + $0x38] sm:$0xff] }
 0x1a9   :  { %v1888_v29 = vadd.f32 %v1748_v7, %v1344_v61  ;;  %7669 = vst [vmem:[#allocation129_spill] sm:$0xff] %v5874_v1  ;;  %v5877_v7 = vld [vmem:[#allocation2 + $0x48] sm:$0xff] }
 0x1aa   :  { %7670 = vst [vmem:[#allocation130_spill] sm:$0xff] %v5877_v7 }
 0x1ab   :  { %1921 = vst.msk [vmem:[#allocation4 + $0x20] sm:$0xff] %vm24_vm11, %v1888_v29  ;;  %v2030_v29 = vpop.xlane.xlu0 %2029 }
 0x1ac   :  { %v1753_v8 = vpop.xlane.xlu1 %1752 }
 0x1ad   :  { %v1889_v30 = vadd.f32 %v1753_v8, %v1345_v5  ;;  %v5887_v8 = vmax.f32 %v5877_v7, %v2030_v29 }
 0x1af   :  { %1922 = vst.msk [vmem:[#allocation4 + $0x28] sm:$0xff] %vm24_vm11, %v1889_v30  ;;  %7672 = vst [vmem:[#allocation132_spill] sm:$0xff] %v5887_v8  ;;  %2380 = vperm.xlu1 %3720, %v5887_v8  }
 0x1b0   :  { %v2015_v61 = vpop.xlane.xlu1 %2014  ;;  %3110 = vst.msk [vmem:[#allocation2 + $0x48] sm:$0xff] %vm24_vm11, %v5887_v8  ;;  %v1350_v8 = vld [vmem:[#allocation4 + $0x50] sm:$0xff] }
 0x1b1   :  { %v5880_v17 = vmax.f32 %v5874_v1, %v2015_v61 }
 0x1b3   :  { %7671 = vst [vmem:[#allocation131_spill] sm:$0xff] %v5880_v17  ;;  %3107 = vst.msk [vmem:[#allocation2 + $0x30] sm:$0xff] %vm24_vm11, %v5880_v17  ;;  %2365 = vperm.xlu0 %3719, %v5880_v17  }
 0x1b4   :  { %v1758_v5 = vpop.xlane.xlu1 %1757 }
 0x1b5   :  { %v1890_v61 = vadd.f32 %v1758_v5, %v1346_v62 }
 0x1b7   :  { %1923 = vst.msk [vmem:[#allocation4 + $0x30] sm:$0xff] %vm24_vm11, %v1890_v61  ;;  %v5917_v61 = vld [vmem:[#allocation2 + $0x68] sm:$0xff] }
 0x1b8   :  { %v1763_v59 = vpop.xlane.xlu1 %1762  ;;  %7677 = vst [vmem:[#allocation137_spill] sm:$0xff] %v5917_v61 }
 0x1b9   :  { %v1891_v29 = vadd.f32 %v1763_v59, %v1347_v13  ;;  %v1348_v59 = vld [vmem:[#allocation4 + $0x40] sm:$0xff] }
 0x1bb   :  { %1924 = vst.msk [vmem:[#allocation4 + $0x38] sm:$0xff] %vm24_vm11, %v1891_v29 }
 0x1c1   :  { %v2025_v7 = vpop.xlane.xlu1 %2024 }
 0x1c2   :  { %v2040_v1 = vpop.xlane.xlu0 %2039  ;;  %v5909_v5 = vmax.f32 %v5898_v15, %v2025_v7 }
 0x1c3   :  { %v5902_v30 = vmax.f32 %v5896_v28, %v2040_v1  ;;  %v1349_v28 = vld [vmem:[#allocation4 + $0x48] sm:$0xff] }
 0x1c4   :  { %7676 = vst [vmem:[#allocation136_spill] sm:$0xff] %v5909_v5  ;;  %3109 = vst.msk [vmem:[#allocation2 + $0x40] sm:$0xff] %vm24_vm11, %v5909_v5  ;;  %2375 = vperm.xlu0 %3719, %v5909_v5   ;;  %v5928_v5 = vld [vmem:[#allocation2 + $0x50] sm:$0xff] }
 0x1c5   :  { %7675 = vst [vmem:[#allocation135_spill] sm:$0xff] %v5902_v30  ;;  %3112 = vst.msk [vmem:[#allocation2 + $0x58] sm:$0xff] %vm24_vm11, %v5902_v30  ;;  %2390 = vperm.xlu1 %3720, %v5902_v30  }
 0x1c6   :  { %v1768_v1 = vpop.xlane.xlu1 %1767  ;;  %7679 = vst [vmem:[#allocation139_spill] sm:$0xff] %v5928_v5 }
 0x1c7   :  { %v1892_v29 = vadd.f32 %v1768_v1, %v1348_v59  ;;  %v5931_v1 = vld [vmem:[#allocation2 + $0x78] sm:$0xff] }
 0x1c8   :  { %v2050_v62 = vpop.xlane.xlu0 %2049  ;;  %7680 = vst [vmem:[#allocation140_spill] sm:$0xff] %v5931_v1 }
 0x1c9   :  { %1925 = vst.msk [vmem:[#allocation4 + $0x40] sm:$0xff] %vm24_vm11, %v1892_v29  ;;  %v5921_v7 = vmax.f32 %v5917_v61, %v2050_v62  ;;  %v5952_v61 = vld [vmem:[#allocation2 + $0x88] sm:$0xff] }
 0x1ca   :  { %v1773_v30 = vpop.xlane.xlu1 %1772  ;;  %7684 = vst [vmem:[#allocation144_spill] sm:$0xff] %v5952_v61 }
 0x1cb   :  { %7678 = vst [vmem:[#allocation138_spill] sm:$0xff] %v5921_v7  ;;  %3114 = vst.msk [vmem:[#allocation2 + $0x68] sm:$0xff] %vm24_vm11, %v5921_v7  ;;  %v1893_v15 = vadd.f32 %v1773_v30, %v1349_v28  ;;  %2400 = vperm.xlu1 %3720, %v5921_v7   ;;  %v5949_v7 = vld [vmem:[#allocation2 + $0x60] sm:$0xff] }
 0x1cc   :  { %7683 = vst [vmem:[#allocation143_spill] sm:$0xff] %v5949_v7  ;;  %v5975_v30 = vld [vmem:[#allocation2 + $0x80] sm:$0xff] }
 0x1cd   :  { %1926 = vst.msk [vmem:[#allocation4 + $0x48] sm:$0xff] %vm24_vm11, %v1893_v15  ;;  %7689 = vst [vmem:[#allocation149_spill] sm:$0xff] %v5975_v30 }
 0x1ce   :  { %v2035_v59 = vpop.xlane.xlu1 %2034 }
 0x1cf   :  { %v5934_v62 = vmax.f32 %v5928_v5, %v2035_v59  ;;  %v2060_v29 = vpop.xlane.xlu0 %2059  ;;  %v5957_v5 = vld [vmem:[#allocation2 + $0x70] sm:$0xff] }
 0x1d0   :  { %v5941_v28 = vmax.f32 %v5931_v1, %v2060_v29  ;;  %7686 = vst [vmem:[#allocation146_spill] sm:$0xff] %v5957_v5  ;;  %v5987_v1 = vld [vmem:[#allocation2 + $0x90] sm:$0xff] }
 0x1d1   :  { %7681 = vst [vmem:[#allocation141_spill] sm:$0xff] %v5934_v62  ;;  %3111 = vst.msk [vmem:[#allocation2 + $0x50] sm:$0xff] %vm24_vm11, %v5934_v62  ;;  %2385 = vperm.xlu0 %3719, %v5934_v62  }
 0x1d2   :  { %7682 = vst [vmem:[#allocation142_spill] sm:$0xff] %v5941_v28  ;;  %v1778_v15 = vpop.xlane.xlu1 %1777  ;;  %3116 = vst.msk [vmem:[#allocation2 + $0x78] sm:$0xff] %vm24_vm11, %v5941_v28  ;;  %2410 = vperm.xlu1 %3720, %v5941_v28  }
 0x1d3   :  { %v1894_v59 = vadd.f32 %v1778_v15, %v1350_v8  ;;  %7692 = vst [vmem:[#allocation152_spill] sm:$0xff] %v5987_v1 }
 0x1d5   :  { %1927 = vst.msk [vmem:[#allocation4 + $0x50] sm:$0xff] %vm24_vm11, %v1894_v59  ;;  %v5982_v59 = vld [vmem:[#allocation2 + $0x98] sm:$0xff] }
 0x1d6   :  { %v2045_v13 = vpop.xlane.xlu1 %2044  ;;  %7690 = vst [vmem:[#allocation150_spill] sm:$0xff] %v5982_v59 }
 0x1d7   :  { %v5955_v29 = vmax.f32 %v5949_v7, %v2045_v13  ;;  %v2070_v62 = vpop.xlane.xlu0 %2069  ;;  %v1645_v7 = vsel %vm1517_vm1, %v5191_v50, 0.0  ;;  %vm1527_vm1 = vcmp.eq.s32.totalorder %v4496_v34, %v5514_v31 }
 0x1d8   :  { %v5964_v8 = vmax.f32 %v5952_v61, %v2070_v62 }
 0x1d9   :  { %7685 = vst [vmem:[#allocation145_spill] sm:$0xff] %v5955_v29  ;;  %3113 = vst.msk [vmem:[#allocation2 + $0x60] sm:$0xff] %vm24_vm11, %v5955_v29  ;;  %2395 = vperm.xlu0 %3719, %v5955_v29  }
 0x1da   :  { %7687 = vst [vmem:[#allocation147_spill] sm:$0xff] %v5964_v8  ;;  %v2055_v15 = vpop.xlane.xlu1 %2054  ;;  %3118 = vst.msk [vmem:[#allocation2 + $0x88] sm:$0xff] %vm24_vm11, %v5964_v8  ;;  %2420 = vperm.xlu1 %3720, %v5964_v8   ;;  %v6005_v8 = vld [vmem:[#allocation2 + $0xa0] sm:$0xff] }
 0x1db   :  { %v5972_v13 = vmax.f32 %v5957_v5, %v2055_v15  ;;  %7695 = vst [vmem:[#allocation155_spill] sm:$0xff] %v6005_v8  ;;  %v6012_v5 = vld [vmem:[#allocation2 + $0xa8] sm:$0xff] }
 0x1dc   :  { %7696 = vst [vmem:[#allocation156_spill] sm:$0xff] %v6012_v5 }
 0x1dd   :  { %7688 = vst [vmem:[#allocation148_spill] sm:$0xff] %v5972_v13  ;;  %3115 = vst.msk [vmem:[#allocation2 + $0x70] sm:$0xff] %vm24_vm11, %v5972_v13  ;;  %2405 = vperm.xlu0 %3719, %v5972_v13  }
 0x1de   :  { %v2065_v28 = vpop.xlane.xlu1 %2064 }
 0x1df   :  { %v5985_v61 = vmax.f32 %v5975_v30, %v2065_v28  ;;  %v2080_v15 = vpop.xlane.xlu0 %2079 }
 0x1e0   :  { %v5994_v62 = vmax.f32 %v5982_v59, %v2080_v15 }
 0x1e1   :  { %7691 = vst [vmem:[#allocation151_spill] sm:$0xff] %v5985_v61  ;;  %3117 = vst.msk [vmem:[#allocation2 + $0x80] sm:$0xff] %vm24_vm11, %v5985_v61  ;;  %2415 = vperm.xlu0 %3719, %v5985_v61  }
 0x1e2   :  { %7693 = vst [vmem:[#allocation153_spill] sm:$0xff] %v5994_v62  ;;  %v2075_v13 = vpop.xlane.xlu1 %2074  ;;  %3120 = vst.msk [vmem:[#allocation2 + $0x98] sm:$0xff] %vm24_vm11, %v5994_v62  ;;  %2430 = vperm.xlu1 %3720, %v5994_v62  }
 0x1e3   :  { %v6002_v28 = vmax.f32 %v5987_v1, %v2075_v13  ;;  %v6025_v1 = vld [vmem:[#allocation2 + $0xb0] sm:$0xff] }
 0x1e4   :  { %7699 = vst [vmem:[#allocation159_spill] sm:$0xff] %v6025_v1 }
 0x1e5   :  { %7694 = vst [vmem:[#allocation154_spill] sm:$0xff] %v6002_v28  ;;  %3119 = vst.msk [vmem:[#allocation2 + $0x90] sm:$0xff] %vm24_vm11, %v6002_v28  ;;  %2425 = vperm.xlu0 %3719, %v6002_v28  }
 0x1e6   :  { %v2085_v61 = vpop.xlane.xlu1 %2084 }
 0x1e7   :  { %v6015_v59 = vmax.f32 %v6005_v8, %v2085_v61  ;;  %v2090_v13 = vpop.xlane.xlu0 %2089  ;;  %v6035_v8 = vld [vmem:[#allocation2 + $0xb8] sm:$0xff] }
 0x1e8   :  { %v6022_v15 = vmax.f32 %v6012_v5, %v2090_v13  ;;  %7701 = vst [vmem:[#allocation161_spill] sm:$0xff] %v6035_v8 }
 0x1e9   :  { %7697 = vst [vmem:[#allocation157_spill] sm:$0xff] %v6015_v59  ;;  %3121 = vst.msk [vmem:[#allocation2 + $0xa0] sm:$0xff] %vm24_vm11, %v6015_v59  ;;  %2435 = vperm.xlu0 %3719, %v6015_v59   ;;  %v6045_v59 = vld [vmem:[#allocation2 + $0xc0] sm:$0xff] }
 0x1ea   :  { %7698 = vst [vmem:[#allocation158_spill] sm:$0xff] %v6022_v15  ;;  %3122 = vst.msk [vmem:[#allocation2 + $0xa8] sm:$0xff] %vm24_vm11, %v6022_v15  ;;  %2440 = vperm.xlu1 %3720, %v6022_v15   ;;  %v6055_v15 = vld [vmem:[#allocation2 + $0xc8] sm:$0xff] }
 0x1eb   :  { %v2095_v61 = vpop.xlane.xlu1 %2094  ;;  %7703 = vst [vmem:[#allocation163_spill] sm:$0xff] %v6045_v59  ;;  %7705 = vst [vmem:[#allocation165_spill] sm:$0xff] %v6055_v15 }
 0x1ec   :  { %v6033_v62 = vmax.f32 %v6025_v1, %v2095_v61 }
 0x1ee   :  { %7700 = vst [vmem:[#allocation160_spill] sm:$0xff] %v6033_v62  ;;  %3123 = vst.msk [vmem:[#allocation2 + $0xb0] sm:$0xff] %vm24_vm11, %v6033_v62  ;;  %2445 = vperm.xlu0 %3719, %v6033_v62   ;;  %v6065_v62 = vld [vmem:[#allocation2 + $0xd0] sm:$0xff] }
 0x1ef   :  { %v2100_v28 = vpop.xlane.xlu0 %2099  ;;  %7707 = vst [vmem:[#allocation167_spill] sm:$0xff] %v6065_v62 }
 0x1f0   :  { %v6043_v5 = vmax.f32 %v6035_v8, %v2100_v28 }
 0x1f2   :  { %7702 = vst [vmem:[#allocation162_spill] sm:$0xff] %v6043_v5  ;;  %3124 = vst.msk [vmem:[#allocation2 + $0xb8] sm:$0xff] %vm24_vm11, %v6043_v5  ;;  %2450 = vperm.xlu1 %3720, %v6043_v5   ;;  %v6075_v5 = vld [vmem:[#allocation2 + $0xd8] sm:$0xff] }
 0x1f3   :  { %v2105_v13 = vpop.xlane.xlu1 %2104  ;;  %7709 = vst [vmem:[#allocation169_spill] sm:$0xff] %v6075_v5 }
 0x1f4   :  { %v6053_v1 = vmax.f32 %v6045_v59, %v2105_v13 }
 0x1f6   :  { %7704 = vst [vmem:[#allocation164_spill] sm:$0xff] %v6053_v1  ;;  %3125 = vst.msk [vmem:[#allocation2 + $0xc0] sm:$0xff] %vm24_vm11, %v6053_v1  ;;  %2455 = vperm.xlu0 %3719, %v6053_v1   ;;  %v6085_v1 = vld [vmem:[#allocation2 + $0xe0] sm:$0xff] }
 0x1f7   :  { %v2110_v61 = vpop.xlane.xlu0 %2109  ;;  %7711 = vst [vmem:[#allocation171_spill] sm:$0xff] %v6085_v1 }
 0x1f8   :  { %v6063_v8 = vmax.f32 %v6055_v15, %v2110_v61 }
 0x1fa   :  { %7706 = vst [vmem:[#allocation166_spill] sm:$0xff] %v6063_v8  ;;  %3126 = vst.msk [vmem:[#allocation2 + $0xc8] sm:$0xff] %vm24_vm11, %v6063_v8  ;;  %2460 = vperm.xlu1 %3720, %v6063_v8   ;;  %v6095_v8 = vld [vmem:[#allocation2 + $0xe8] sm:$0xff] }
 0x1fb   :  { %v2115_v28 = vpop.xlane.xlu1 %2114  ;;  %7713 = vst [vmem:[#allocation173_spill] sm:$0xff] %v6095_v8 }
 0x1fc   :  { %v6073_v59 = vmax.f32 %v6065_v62, %v2115_v28 }
 0x1fe   :  { %7708 = vst [vmem:[#allocation168_spill] sm:$0xff] %v6073_v59  ;;  %3127 = vst.msk [vmem:[#allocation2 + $0xd0] sm:$0xff] %vm24_vm11, %v6073_v59  ;;  %2465 = vperm.xlu0 %3719, %v6073_v59   ;;  %v6105_v59 = vld [vmem:[#allocation2 + $0xf0] sm:$0xff] }
 0x1ff   :  { %v2120_v13 = vpop.xlane.xlu0 %2119  ;;  %7715 = vst [vmem:[#allocation175_spill] sm:$0xff] %v6105_v59 }
 0x200   :  { %v6083_v15 = vmax.f32 %v6075_v5, %v2120_v13 }
 0x202   :  { %7710 = vst [vmem:[#allocation170_spill] sm:$0xff] %v6083_v15  ;;  %3128 = vst.msk [vmem:[#allocation2 + $0xd8] sm:$0xff] %vm24_vm11, %v6083_v15  ;;  %2470 = vperm.xlu0 %3719, %v6083_v15   ;;  %v6115_v15 = vld [vmem:[#allocation2 + $0xf8] sm:$0xff] }
 0x203   :  { %v2125_v61 = vpop.xlane.xlu1 %2124  ;;  %7717 = vst [vmem:[#allocation177_spill] sm:$0xff] %v6115_v15 }
 0x204   :  { %v6093_v62 = vmax.f32 %v6085_v1, %v2125_v61 }
 0x206   :  { %7712 = vst [vmem:[#allocation172_spill] sm:$0xff] %v6093_v62  ;;  %3129 = vst.msk [vmem:[#allocation2 + $0xe0] sm:$0xff] %vm24_vm11, %v6093_v62  ;;  %2475 = vperm.xlu0 %3719, %v6093_v62  }
 0x207   :  { %v2130_v28 = vpop.xlane.xlu0 %2129 }
 0x208   :  { %v6103_v5 = vmax.f32 %v6095_v8, %v2130_v28 }
 0x20a   :  { %7714 = vst [vmem:[#allocation174_spill] sm:$0xff] %v6103_v5  ;;  %3130 = vst.msk [vmem:[#allocation2 + $0xe8] sm:$0xff] %vm24_vm11, %v6103_v5  ;;  %2480 = vperm.xlu0 %3719, %v6103_v5  }
 0x20b   :  { %v2135_v13 = vpop.xlane.xlu1 %2134 }
 0x20c   :  { %v6113_v1 = vmax.f32 %v6105_v59, %v2135_v13  ;;  %v1641_v13 = vsel %vm1513_vm15, %v5000_v32, 0.0  ;;  %vm1526_vm15 = vcmp.eq.s32.totalorder %v4493_v33, %v5514_v31  ;;  %v7737_v31 = vld [vmem:[#allocation12_spill] sm:$0xff] }
 0x20e   :  { %7716 = vst [vmem:[#allocation176_spill] sm:$0xff] %v6113_v1  ;;  %3131 = vst.msk [vmem:[#allocation2 + $0xf0] sm:$0xff] %vm24_vm11, %v6113_v1  ;;  %2485 = vperm.xlu0 %3719, %v6113_v1   ;;  %v1640_v1 = vsel %vm1512_vm0, %v4994_v4, 0.0  ;;  %vm1529_vm0 = vcmp.eq.s32.totalorder %v4484_v27, %v5549_v45 }
 0x20f   :  { %v2140_v61 = vpop.xlane.xlu0 %2139  ;;  %v2336_v59 = vpop.permute.xlu1 %2335  ;;  %v1779_v29 = vadd.f32 %v1641_v13, %v1640_v1 }
 0x210   :  { %v6125_v5 = vmax.f32 %v6115_v15, %v2140_v61  ;;  %v2493_v8 = vsub.f32 %v4499_v35, %v2336_v59  ;;  %v2494_v62 = vsub.f32 %v4510_v41, %v2336_v59  ;;  %v2495_v61 = vsub.f32 %v4507_v40, %v2336_v59 }
 0x211   :  { %v2496_v30 = vsub.f32 %v4513_v42, %v2336_v59  ;;  %v1642_v35 = vsel %vm1514_vm2, %v4997_v44, 0.0  ;;  %v1644_v40 = vsel %vm1516_vm4, %v5184_v20, 0.0  ;;  %vm1533_vm2 = vcmp.eq.s32.totalorder %v4484_v27, %v5577_v14 }
 0x212   :  { %7718 = vst [vmem:[#allocation178_spill] sm:$0xff] %v6125_v5  ;;  %3132 = vst.msk [vmem:[#allocation2 + $0xf8] sm:$0xff] %vm24_vm11, %v6125_v5  ;;  %2490 = vperm.xlu0 %3719, %v6125_v5   ;;  %v2621_v28 = vmul.f32 1.442695, %v2493_v8  ;;  %v2623_v15 = vmul.f32 1.442695, %v2494_v62  ;;  %v1780_v1 = vadd.f32 %v1779_v29, %v1642_v35  ;;  %v1784_v13 = vadd.f32 %v1645_v7, %v1644_v40 }
 0x213   :  { %v2625_v17 = vmul.f32 1.442695, %v2495_v61  ;;  %v2627_v41 = vmul.f32 1.442695, %v2496_v30  ;;  %v1643_v61 = vsel %vm1515_vm3, %v5003_v56, 0.0  ;;  %v1646_v5 = vsel %vm1518_vm5, %v5188_v19, 0.0 }
 0x214   :  { %3785 = vpow2.f32 %v2621_v28  ;;  %v2346_v28 = vpop.permute.xlu1 %2345  ;;  %v1781_v35 = vadd.f32 %v1780_v1, %v1643_v61  ;;  %v1785_v40 = vadd.f32 %v1784_v13, %v1646_v5  ;;  %v1647_v5 = vsel %vm1519_vm6, %v5194_v57, 0.0 }
 0x215   :  { %3787 = vpow2.f32 %v2623_v15  ;;  %vm1537_vm3 = vcmp.eq.s32.totalorder %v4484_v27, %v5598_v49  ;;  %vm1532_vm4 = vcmp.eq.s32.totalorder %v4476_v21, %v5577_v14  ;;  %vm1530_vm5 = vcmp.eq.s32.totalorder %v4493_v33, %v5549_v45 }
 0x216   :  { %3789 = vpow2.f32 %v2625_v17  ;;  %v2503_v17 = vsub.f32 %v4626_v10, %v2346_v28 }
 0x217   :  { %v2341_v42 = vpop.permute.xlu0 %2340  ;;  %3791 = vpow2.f32 %v2627_v41 }
 0x218   :  { %v2497_v8 = vsub.f32 %v4531_v47, %v2341_v42  ;;  %v2498_v59 = vsub.f32 %v4555_v54, %v2341_v42  ;;  %v2499_v62 = vsub.f32 %v4552_v53, %v2341_v42  ;;  %v2500_v30 = vsub.f32 %v4558_v55, %v2341_v42  ;;  %v2351_v39 = vpop.permute.xlu1 %2350 }
 0x219   :  { %v2501_v47 = vsub.f32 %v4571_v63, %v2346_v28  ;;  %v2502_v53 = vsub.f32 %v4629_v11, %v2346_v28  ;;  %v2504_v42 = vsub.f32 %v4632_v12, %v2346_v28  ;;  %v2505_v63 = vsub.f32 %v4652_v23, %v2351_v39 }
 0x21a   :  { %v2629_v15 = vmul.f32 1.442695, %v2497_v8  ;;  %v2631_v29 = vmul.f32 1.442695, %v2498_v59  ;;  %v2633_v54 = vmul.f32 1.442695, %v2499_v62  ;;  %v2506_v41 = vsub.f32 %v4671_v37, %v2351_v39 }
 0x21b   :  { %v2637_v7 = vmul.f32 1.442695, %v2501_v47  ;;  %v2639_v46 = vmul.f32 1.442695, %v2502_v53  ;;  %v2635_v55 = vmul.f32 1.442695, %v2500_v30  ;;  %v2507_v11 = vsub.f32 %v4668_v36, %v2351_v39 }
 0x21c   :  { %3793 = vpow2.f32 %v2629_v15  ;;  %v2641_v10 = vmul.f32 1.442695, %v2503_v17  ;;  %v2645_v1 = vmul.f32 1.442695, %v2505_v63  ;;  %v1786_v8 = vadd.f32 %v1785_v40, %v1647_v5  ;;  %v7719_v17 = vld [vmem:[#allocation9_spill] sm:$0xff]  ;;  %v7722_v63 = vld [vmem:[#allocation7_spill] sm:$0xff] }
 0x21d   :  { %3795 = vpow2.f32 %v2631_v29  ;;  %v2647_v59 = vmul.f32 1.442695, %v2506_v41  ;;  %v2643_v12 = vmul.f32 1.442695, %v2504_v42  ;;  %v2508_v23 = vsub.f32 %v4674_v43, %v2351_v39  ;;  %v2361_v39 = vpop.permute.xlu1 %2360 }
 0x21e   :  { %1782 = vadd.xlane.f32.xlu1 %v1781_v35  ;;  %3797 = vpow2.f32 %v2633_v54  ;;  %v2649_v36 = vmul.f32 1.442695, %v2507_v11  ;;  %v1649_v62 = vsel %vm1521_vm8, %v5232_v16, 0.0  ;;  %v1648_v43 = vsel %vm1520_vm7, %v5226_v3, 0.0  ;;  %v7720_v35 = vld [vmem:[#allocation10_spill] sm:$0xff] }
 0x21f   :  { %3799 = vpow2.f32 %v2637_v7  ;;  %v2651_v61 = vmul.f32 1.442695, %v2508_v23  ;;  %v2513_v30 = vsub.f32 %v4751_v38, %v2361_v39  ;;  %v2514_v15 = vsub.f32 %v4757_v26, %v2361_v39  ;;  %v7721_v38 = vld [vmem:[#allocation5_spill] sm:$0xff] }
 0x220   :  { %3801 = vpow2.f32 %v2639_v46  ;;  %v1653_v29 = vsel %vm1525_vm13, %v5269_v2, 0.0  ;;  %v1789_v54 = vadd.f32 %v1649_v62, %v1648_v43  ;;  %v2515_v7 = vsub.f32 %v7719_v17, %v2361_v39 }
 0x221   :  { %3803 = vpow2.f32 %v2635_v55  ;;  %v3786_v37 = vpop.eup %3785  ;;  %v2516_v40 = vsub.f32 %v7720_v35, %v2361_v39  ;;  %v2661_v46 = vmul.f32 1.442695, %v2513_v30  ;;  %v2663_v42 = vmul.f32 1.442695, %v2514_v15 }
 0x222   :  { %1787 = vadd.xlane.f32.xlu1 %v1786_v8  ;;  %3805 = vpow2.f32 %v2641_v10  ;;  %v3788_v18 = vpop.eup %3787  ;;  %v2356_v47 = vpop.permute.xlu0 %2355  ;;  %v7723_v10 = vld [vmem:[#allocation6_spill] sm:$0xff]  ;;  %v7724_v8 = vld [vmem:[#allocation8_spill] sm:$0xff]  ;;  %v1650_v23 = vsel %vm1522_vm9, %v5229_v6, 0.0  ;;  %vm1536_vm7 = vcmp.eq.s32.totalorder %v4476_v21, %v5598_v49  ;;  %vm1534_vm9 = vcmp.eq.s32.totalorder %v4493_v33, %v5577_v14 }
 0x223   :  { %3807 = vpow2.f32 %v2645_v1  ;;  %v2877_v13 = vadd.f32 %v3788_v18, %v3786_v37  ;;  %v3790_v28 = vpop.eup %3789  ;;  %v2509_v55 = vsub.f32 %v7721_v38, %v2356_v47  ;;  %v2510_v41 = vsub.f32 %v7722_v63, %v2356_v47  ;;  %v7725_v18 = vld [vmem:[#allocation31_spill] sm:$0xff]  ;;  %v6219_v17 = vpop.permute.xlu1 %2370 }
 0x224   :  { %3809 = vpow2.f32 %v2647_v59  ;;  %v3792_v53 = vpop.eup %3791  ;;  %v2511_v11 = vsub.f32 %v7723_v10, %v2356_v47  ;;  %v2512_v59 = vsub.f32 %v7724_v8, %v2356_v47  ;;  %v1652_v37 = vsel %vm1524_vm10, %v5263_v58, 0.0 }
 0x225   :  { %3811 = vpow2.f32 %v2643_v12  ;;  %v2878_v5 = vadd.f32 %v3790_v28, %v2877_v13  ;;  %v2653_v12 = vmul.f32 1.442695, %v2509_v55  ;;  %v1651_v62 = vsel %vm1523_vm12, %v7725_v18, 0.0 }
 0x226   :  { %3813 = vpow2.f32 %v2649_v36  ;;  %v2655_v36 = vmul.f32 1.442695, %v2510_v41  ;;  %v1790_v43 = vadd.f32 %v1789_v54, %v1650_v23  ;;  %v2665_v13 = vmul.f32 1.442695, %v2515_v7  ;;  %v7726_v54 = vld [vmem:[#allocation15_spill] sm:$0xff]  ;;  %v7727_v7 = vld [vmem:[#allocation17_spill] sm:$0xff] }
 0x227   :  { %3815 = vpow2.f32 %v2651_v61  ;;  %v1794_v61 = vadd.f32 %v1653_v29, %v1652_v37  ;;  %v2667_v15 = vmul.f32 1.442695, %v2516_v40  ;;  %v2657_v47 = vmul.f32 1.442695, %v2511_v11  ;;  %v7728_v40 = vld [vmem:[#allocation16_spill] sm:$0xff]  ;;  %v7729_v41 = vld [vmem:[#allocation34_spill] sm:$0xff] }
 0x228   :  { %3817 = vpow2.f32 %v2661_v46  ;;  %v2879_v35 = vadd.f32 %v3792_v53, %v2878_v5  ;;  %v2659_v51 = vmul.f32 1.442695, %v2512_v59  ;;  %v2521_v55 = vsub.f32 %v7726_v54, %v6219_v17  ;;  %v7730_v5 = vld [vmem:[#allocation32_spill] sm:$0xff] }
 0x229   :  { %v3794_v26 = vpop.eup %3793  ;;  %3819 = vpow2.f32 %v2663_v42  ;;  %v2522_v46 = vsub.f32 %v7727_v7, %v6219_v17  ;;  %v6235_v10 = vsel %vm1528_vm14, %v7729_v41, 0.0  ;;  %vm1538_vm10 = vcmp.eq.s32.totalorder %v4493_v33, %v5598_v49 }
 0x22a   :  { %v3796_v1 = vpop.eup %3795  ;;  %3821 = vpow2.f32 %v2653_v12  ;;  %v2677_v11 = vmul.f32 1.442695, %v2521_v55  ;;  %v6269_v0 = vpop.permute.xlu1 %2380  ;;  %vm1531_vm14 = vcmp.eq.s32.totalorder %v4496_v34, %v5549_v45 }
 0x22b   :  { %v3798_v39 = vpop.eup %3797  ;;  %v2882_v28 = vadd.f32 %v3796_v1, %v3794_v26  ;;  %3823 = vpow2.f32 %v2655_v36  ;;  %v2523_v26 = vsub.f32 %v7728_v40, %v6219_v17  ;;  %v1654_v1 = vsel %vm1526_vm15, %v7730_v5, 0.0  ;;  %v7731_v36 = vld [vmem:[#allocation82_spill] sm:$0xff] }
 0x22c   :  { %v3800_v30 = vpop.eup %3799  ;;  %3825 = vpow2.f32 %v2665_v13  ;;  %v2679_v59 = vmul.f32 1.442695, %v2522_v46  ;;  %vm1541_vm6 = vcmp.eq.s32.totalorder %v4484_v27, %v7731_v36  ;;  %vm1540_vm8 = vcmp.eq.s32.totalorder %v4476_v21, %v7731_v36  ;;  %v7736_v46 = vld [vmem:[#allocation13_spill] sm:$0xff] }
 0x22d   :  { %v3802_v38 = vpop.eup %3801  ;;  %v2883_v42 = vadd.f32 %v3798_v39, %v2882_v28  ;;  %3827 = vpow2.f32 %v2657_v47  ;;  %v7732_v39 = vld [vmem:[#allocation36_spill] sm:$0xff]  ;;  %v6253_v28 = vadd.f32 %v1790_v43, %v1651_v62  ;;  %v6263_v7 = vadd.f32 %v1794_v61, %v1654_v1  ;;  %v7735_v62 = vld [vmem:[#allocation11_spill] sm:$0xff] }
 0x22e   :  { %v3804_v29 = vpop.eup %3803  ;;  %v2887_v63 = vadd.f32 %v3802_v38, %v3800_v30  ;;  %v1657_v13 = vsel %vm1529_vm0, %v7732_v39, 0.0  ;;  %3829 = vpow2.f32 %v2667_v15  ;;  %v7734_v30 = vld [vmem:[#allocation33_spill] sm:$0xff]  ;;  %v2681_v38 = vmul.f32 1.442695, %v2523_v26  ;;  %v2366_v54 = vpop.permute.xlu0 %2365 }
 0x22f   :  { %v3806_v53 = vpop.eup %3805  ;;  %v2884_v12 = vadd.f32 %v3804_v29, %v2883_v42  ;;  %7733 = vst [vmem:[#allocation9_spill] sm:$0xff] %v6253_v28  ;;  %v6259_v47 = vsel %vm1527_vm1, %v7734_v30, 0.0  ;;  %3831 = vpow2.f32 %v2659_v51  ;;  %v2517_v43 = vsub.f32 %v7735_v62, %v2366_v54  ;;  %v7738_v42 = vld [vmem:[#allocation14_spill] sm:$0xff] }
 0x230   :  { %v3808_v8 = vpop.eup %3807  ;;  %v2888_v23 = vadd.f32 %v3806_v53, %v2887_v63  ;;  %3833 = vpow2.f32 %v2677_v11  ;;  %v2518_v29 = vsub.f32 %v7736_v46, %v2366_v54  ;;  %v2519_v40 = vsub.f32 %v7737_v31, %v2366_v54  ;;  %v7739_v11 = vld [vmem:[#allocation23_spill] sm:$0xff]  ;;  %v7744_v31 = vld [vmem:[#allocation44_spill] sm:$0xff] }
 0x231   :  { %2880 = vadd.xlane.f32.xlu0 %v2879_v35  ;;  %v3810_v37 = vpop.eup %3809  ;;  %2885 = vadd.xlane.f32.xlu1 %v2884_v12  ;;  %3835 = vpow2.f32 %v2679_v59  ;;  %v2520_v63 = vsub.f32 %v7738_v42, %v2366_v54  ;;  %v2669_v61 = vmul.f32 1.442695, %v2517_v43  ;;  %v7740_v59 = vld [vmem:[#allocation40_spill] sm:$0xff]  ;;  %vm1542_vm12 = vcmp.eq.s32.totalorder %v4493_v33, %v7731_v36 }
 0x232   :  { %v3812_v35 = vpop.eup %3811  ;;  %v2892_v55 = vadd.f32 %v3810_v37, %v3808_v8  ;;  %v2671_v26 = vmul.f32 1.442695, %v2518_v29  ;;  %v2673_v1 = vmul.f32 1.442695, %v2519_v40  ;;  %v2529_v8 = vsub.f32 %v7739_v11, %v6269_v0  ;;  %v7745_v40 = vld [vmem:[#allocation24_spill] sm:$0xff] }
 0x233   :  { %v3814_v15 = vpop.eup %3813  ;;  %v2889_v53 = vadd.f32 %v3812_v35, %v2888_v23  ;;  %v1661_v23 = vsel %vm1533_vm2, %v7740_v59, 0.0  ;;  %3837 = vpow2.f32 %v2681_v38  ;;  %v2675_v37 = vmul.f32 1.442695, %v2520_v63  ;;  %v7741_v35 = vld [vmem:[#allocation25_spill] sm:$0xff] }
 0x234   :  { %v2893_v51 = vadd.f32 %v3814_v15, %v2892_v55  ;;  %v3816_v12 = vpop.eup %3815  ;;  %v2530_v54 = vsub.f32 %v7741_v35, %v6269_v0  ;;  %v7742_v55 = vld [vmem:[#allocation83_spill] sm:$0xff]  ;;  %v7743_v15 = vld [vmem:[#allocation18_spill] sm:$0xff]  ;;  %3839 = vpow2.f32 %v2669_v61  ;;  %v2693_v43 = vmul.f32 1.442695, %v2529_v8 }
 0x235   :  { %2890 = vadd.xlane.f32.xlu1 %v2889_v53  ;;  %vm1545_vm13 = vcmp.eq.s32.totalorder %v4484_v27, %v7742_v55  ;;  %v2524_v62 = vsub.f32 %v7743_v15, %v6219_v17  ;;  %v3818_v29 = vpop.eup %3817  ;;  %v1665_v38 = vsel %vm1537_vm3, %v7744_v31, 0.0  ;;  %3841 = vpow2.f32 %v2671_v26  ;;  %v7746_v17 = vld [vmem:[#allocation38_spill] sm:$0xff]  ;;  %v7747_v61 = vld [vmem:[#allocation35_spill] sm:$0xff] }
 0x236   :  { %v2894_v46 = vadd.f32 %v3816_v12, %v2893_v51  ;;  %v2531_v42 = vsub.f32 %v7745_v40, %v6269_v0  ;;  %v2695_v63 = vmul.f32 1.442695, %v2530_v54  ;;  %v3820_v53 = vpop.eup %3819  ;;  %vm1544_vm15 = vcmp.eq.s32.totalorder %v4476_v21, %v7742_v55  ;;  %v7748_v12 = vld [vmem:[#allocation42_spill] sm:$0xff]  ;;  %v7749_v54 = vld [vmem:[#allocation48_spill] sm:$0xff] }
 0x237   :  { %v1660_v51 = vsel %vm1532_vm4, %v7746_v17, 0.0  ;;  %3843 = vpow2.f32 %v2673_v1  ;;  %v1658_v26 = vsel %vm1530_vm5, %v7747_v61, 0.0  ;;  %v1799_v11 = vadd.f32 %v1657_v13, %v6235_v10  ;;  %v3822_v8 = vpop.eup %3821  ;;  %v7750_v13 = vld [vmem:[#allocation88_spill] sm:$0xff] }
 0x238   :  { %2895 = vadd.xlane.f32.xlu0 %v2894_v46  ;;  %vm1535_vm0 = vcmp.eq.s32.totalorder %v4496_v34, %v5577_v14  ;;  %v1664_v35 = vsel %vm1536_vm7, %v7748_v12, 0.0  ;;  %v1669_v1 = vsel %vm1541_vm6, %v7749_v54, 0.0  ;;  %3845 = vpow2.f32 %v2675_v37  ;;  %v3824_v10 = vpop.eup %3823  ;;  %v7751_v46 = vld [vmem:[#allocation46_spill] sm:$0xff] }
 0x239   :  { %v1804_v15 = vadd.f32 %v1661_v23, %v1660_v51  ;;  %vm1539_vm1 = vcmp.eq.s32.totalorder %v4496_v34, %v5598_v49  ;;  %vm1548_vm2 = vcmp.eq.s32.totalorder %v4476_v21, %v7750_v13  ;;  %v1668_v40 = vsel %vm1540_vm8, %v7751_v46, 0.0  ;;  %v3826_v37 = vpop.eup %3825  ;;  %v7752_v23 = vld [vmem:[#allocation26_spill] sm:$0xff] }
 0x23a   :  { %v2683_v52 = vmul.f32 1.442695, %v2524_v62  ;;  %3847 = vpow2.f32 %v2693_v43  ;;  %v1809_v9 = vadd.f32 %v1665_v38, %v1664_v35  ;;  %vm1543_vm3 = vcmp.eq.s32.totalorder %v4496_v34, %v7731_v36  ;;  %v3828_v25 = vpop.eup %3827  ;;  %v7754_v43 = vld [vmem:[#allocation39_spill] sm:$0xff] }
 0x23b   :  { %v2532_v51 = vsub.f32 %v7752_v23, %v6269_v0  ;;  %3849 = vpow2.f32 %v2695_v63  ;;  %v2697_v24 = vmul.f32 1.442695, %v2531_v42  ;;  %v2897_v22 = vadd.f32 %v3824_v10, %v3822_v8  ;;  %v3830_v54 = vpop.eup %3829  ;;  %v7755_v10 = vld [vmem:[#allocation43_spill] sm:$0xff] }
 0x23c   :  { %vm1546_vm4 = vcmp.eq.s32.totalorder %v4493_v33, %v7742_v55  ;;  %v2902_v28 = vadd.f32 %v3820_v53, %v3818_v29  ;;  %v6334_v62 = vadd.f32 %v6263_v7, %v6259_v47  ;;  %v1662_v38 = vsel %vm1534_vm9, %v7754_v43, 0.0  ;;  %v3832_v47 = vpop.eup %3831  ;;  %v7756_v7 = vld [vmem:[#allocation93_spill] sm:$0xff] }
 0x23d   :  { %v1814_v35 = vadd.f32 %v1669_v1, %v1668_v40  ;;  %v2898_v42 = vadd.f32 %v3828_v25, %v2897_v22  ;;  %v1800_v63 = vadd.f32 %v1799_v11, %v1658_v26  ;;  %v1805_v8 = vadd.f32 %v1804_v15, %v1662_v38  ;;  %v7757_v25 = vld [vmem:[#allocation19_spill] sm:$0xff]  ;;  %v3834_v1 = vpop.eup %3833  ;;  %v7759_v15 = vld [vmem:[#allocation52_spill] sm:$0xff]  ;;  %v7760_v38 = vld [vmem:[#allocation21_spill] sm:$0xff] }
 0x23e   :  { %7753 = vst [vmem:[#allocation10_spill] sm:$0xff] %v6334_v62  ;;  %v1666_v29 = vsel %vm1538_vm10, %v7755_v10, 0.0  ;;  %vm1547_vm5 = vcmp.eq.s32.totalorder %v4496_v34, %v7742_v55  ;;  %vm1549_vm6 = vcmp.eq.s32.totalorder %v4484_v27, %v7750_v13  ;;  %vm1552_vm7 = vcmp.eq.s32.totalorder %v4476_v21, %v7756_v7  ;;  %v7758_v26 = vld [vmem:[#allocation47_spill] sm:$0xff]  ;;  %v7761_v62 = vld [vmem:[#allocation37_spill] sm:$0xff] }
 0x23f   :  { %v6340_v0 = vpop.permute.xlu0 %2375  ;;  %3851 = vpow2.f32 %v2683_v52  ;;  %v1810_v53 = vadd.f32 %v1809_v9, %v1666_v29  ;;  %v1670_v11 = vsel %vm1542_vm12, %v7758_v26, 0.0  ;;  %v1673_v40 = vsel %vm1545_vm13, %v7759_v15, 0.0  ;;  %v3836_v9 = vpop.eup %3835 }
 0x240   :  { %v2525_v22 = vsub.f32 %v7757_v25, %v6340_v0  ;;  %3853 = vpow2.f32 %v2697_v24  ;;  %v2699_v23 = vmul.f32 1.442695, %v2532_v51  ;;  %v2526_v52 = vsub.f32 %v7760_v38, %v6340_v0  ;;  %v7764_v38 = vld [vmem:[#allocation41_spill] sm:$0xff]  ;;  %v2391_v45 = vpop.permute.xlu1 %2390 }
 0x241   :  { %vm1550_vm8 = vcmp.eq.s32.totalorder %v4493_v33, %v7750_v13  ;;  %v2899_v29 = vadd.f32 %v3832_v47, %v2898_v42  ;;  %v2903_v25 = vadd.f32 %v3826_v37, %v2902_v28  ;;  %v1659_v26 = vsel %vm1531_vm14, %v7761_v62, 0.0  ;;  %v3838_v28 = vpop.eup %3837  ;;  %v7766_v47 = vld [vmem:[#allocation45_spill] sm:$0xff] }
 0x242   :  { %v1815_v46 = vadd.f32 %v1814_v35, %v1670_v11  ;;  %v1672_v24 = vsel %vm1544_vm15, %v7762_v60, 0.0  ;;  %v2685_v51 = vmul.f32 1.442695, %v2525_v22  ;;  %v6374_v15 = vadd.f32 %v1800_v63, %v1659_v26  ;;  %v3840_v14 = vpop.eup %3839  ;;  %v7767_v26 = vld [vmem:[#allocation54_spill] sm:$0xff] }
 0x243   :  { %v1663_v42 = vsel %vm1535_vm0, %v7764_v38, 0.0  ;;  %vm1553_vm9 = vcmp.eq.s32.totalorder %v4484_v27, %v7756_v7  ;;  %v2687_v37 = vmul.f32 1.442695, %v2526_v52  ;;  %2900 = vadd.xlane.f32.xlu1 %v2899_v29  ;;  %v1667_v63 = vsel %vm1539_vm1, %v7766_v47, 0.0  ;;  %v3842_v49 = vpop.eup %3841 }
 0x244   :  { %7763 = vst [vmem:[#allocation5_spill] sm:$0xff] %v6374_v15  ;;  %v6382_v35 = vadd.f32 %v1805_v8, %v1663_v42  ;;  %v1819_v22 = vadd.f32 %v1673_v40, %v1672_v24  ;;  %vm1551_vm10 = vcmp.eq.s32.totalorder %v4496_v34, %v7750_v13  ;;  %v1676_v11 = vsel %vm1548_vm2, %v7767_v26, 0.0  ;;  %v7769_v8 = vld [vmem:[#allocation49_spill] sm:$0xff]  ;;  %v7770_v40 = vld [vmem:[#allocation20_spill] sm:$0xff]  ;;  %v7772_v15 = vld [vmem:[#allocation51_spill] sm:$0xff] }
 0x245   :  { %3855 = vpow2.f32 %v2699_v23  ;;  %v6394_v52 = vadd.f32 %v1810_v53, %v1667_v63  ;;  %v1671_v29 = vsel %vm1543_vm3, %v7769_v8, 0.0  ;;  %v2527_v24 = vsub.f32 %v7770_v40, %v6340_v0  ;;  %v3844_v23 = vpop.eup %3843  ;;  %v7773_v8 = vld [vmem:[#allocation98_spill] sm:$0xff] }
 0x246   :  { %7765 = vst [vmem:[#allocation7_spill] sm:$0xff] %v6382_v35  ;;  %v2904_v42 = vadd.f32 %v3830_v54, %v2903_v25  ;;  %v6402_v35 = vadd.f32 %v1815_v46, %v1671_v29  ;;  %v1674_v26 = vsel %vm1546_vm4, %v7772_v15, 0.0  ;;  %v2537_v53 = vsub.f32 %v4994_v4, %v2391_v45  ;;  %v3846_v36 = vpop.eup %3845  ;;  %v7774_v40 = vld [vmem:[#allocation22_spill] sm:$0xff]  ;;  %v7775_v46 = vld [vmem:[#allocation53_spill] sm:$0xff]  ;;  %v7776_v4 = vld [vmem:[#allocation56_spill] sm:$0xff] }
 0x247   :  { %7768 = vst [vmem:[#allocation6_spill] sm:$0xff] %v6394_v52  ;;  %3857 = vpow2.f32 %v2685_v51  ;;  %v2907_v63 = vadd.f32 %v3842_v49, %v3840_v14  ;;  %v2912_v52 = vadd.f32 %v3836_v9, %v3834_v1  ;;  %vm1556_vm12 = vcmp.eq.s32.totalorder %v4476_v21, %v7773_v8  ;;  %v7777_v9 = vld [vmem:[#allocation58_spill] sm:$0xff] }
 0x248   :  { %7771 = vst [vmem:[#allocation8_spill] sm:$0xff] %v6402_v35  ;;  %v2528_v54 = vsub.f32 %v7774_v40, %v6340_v0  ;;  %3859 = vpow2.f32 %v2687_v37  ;;  %2905 = vadd.xlane.f32.xlu1 %v2904_v42  ;;  %v1675_v25 = vsel %vm1547_vm5, %v7775_v46, 0.0  ;;  %v1820_v29 = vadd.f32 %v1819_v22, %v1674_v26  ;;  %v3848_v35 = vpop.eup %3847  ;;  %v6428_v37 = vpop.permute.xlu1 %2400  ;;  %v7778_v42 = vld [vmem:[#allocation55_spill] sm:$0xff] }
 0x249   :  { %v1677_v1 = vsel %vm1549_vm6, %v7776_v4, 0.0  ;;  %v6425_v51 = vsel %vm1552_vm7, %v7777_v9, 0.0  ;;  %v2538_v0 = vsub.f32 %v5000_v32, %v2391_v45  ;;  %v2908_v14 = vadd.f32 %v3844_v23, %v2907_v63  ;;  %v3850_v55 = vpop.eup %3849 }
 0x24a   :  { %vm1554_vm13 = vcmp.eq.s32.totalorder %v4493_v33, %v7756_v7  ;;  %v2539_v22 = vsub.f32 %v4997_v44, %v2391_v45  ;;  %v2540_v26 = vsub.f32 %v5003_v56, %v2391_v45  ;;  %v2689_v49 = vmul.f32 1.442695, %v2527_v24  ;;  %v7779_v45 = vld [vmem:[#allocation60_spill] sm:$0xff] }
 0x24b   :  { %v1678_v40 = vsel %vm1550_vm8, %v7778_v42, 0.0  ;;  %v2709_v46 = vmul.f32 1.442695, %v2537_v53  ;;  %v2909_v32 = vadd.f32 %v3846_v36, %v2908_v14  ;;  %v2913_v15 = vadd.f32 %v3838_v28, %v2912_v52  ;;  %v7780_v28 = vld [vmem:[#allocation57_spill] sm:$0xff]  ;;  %v7781_v36 = vld [vmem:[#allocation27_spill] sm:$0xff] }
 0x24c   :  { %v6438_v9 = vpop.permute.xlu0 %2385  ;;  %v2922_v23 = vadd.f32 %v3850_v55, %v3848_v35  ;;  %v2691_v63 = vmul.f32 1.442695, %v2528_v54  ;;  %v2545_v4 = vsub.f32 %v5226_v3, %v6428_v37  ;;  %v6442_v60 = vadd.f32 %v1820_v29, %v1675_v25  ;;  %v3852_v56 = vpop.eup %3851  ;;  %v7783_v55 = vld [vmem:[#allocation99_spill] sm:$0xff] }
 0x24d   :  { %v1824_v44 = vadd.f32 %v1677_v1, %v1676_v11  ;;  %v1681_v24 = vsel %vm1553_vm9, %v7779_v45, 0.0  ;;  %v2711_v42 = vmul.f32 1.442695, %v2538_v0  ;;  %v2546_v53 = vsub.f32 %v5232_v16, %v6428_v37  ;;  %2910 = vadd.xlane.f32.xlu1 %v2909_v32  ;;  %v3854_v3 = vpop.eup %3853  ;;  %v7782_v16 = vld [vmem:[#allocation29_spill] sm:$0xff]  ;;  %v7786_v32 = vld [vmem:[#allocation59_spill] sm:$0xff] }
 0x24e   :  { %v1679_v35 = vsel %vm1551_vm10, %v7780_v28, 0.0  ;;  %vm1555_vm14 = vcmp.eq.s32.totalorder %v4496_v34, %v7756_v7  ;;  %vm1557_vm15 = vcmp.eq.s32.totalorder %v4484_v27, %v7773_v8  ;;  %v2713_v11 = vmul.f32 1.442695, %v2539_v22  ;;  %v7784_v22 = vld [vmem:[#allocation62_spill] sm:$0xff] }
 0x24f   :  { %v2715_v52 = vmul.f32 1.442695, %v2540_v26  ;;  %3861 = vpow2.f32 %v2689_v49  ;;  %v2533_v54 = vsub.f32 %v7781_v36, %v6438_v9  ;;  %v2534_v25 = vsub.f32 %v7782_v16, %v6438_v9 }
 0x250   :  { %3863 = vpow2.f32 %v2709_v46  ;;  %v2914_v29 = vadd.f32 %v3852_v56, %v2913_v15  ;;  %v2923_v13 = vadd.f32 %v3854_v3, %v2922_v23  ;;  %v2547_v1 = vsub.f32 %v5229_v6, %v6428_v37  ;;  %v7785_v6 = vld [vmem:[#allocation28_spill] sm:$0xff]  ;;  %v6480_v56 = vpop.permute.xlu1 %2410 }
 0x251   :  { %3865 = vpow2.f32 %v2691_v63  ;;  %v2725_v0 = vmul.f32 1.442695, %v2545_v4  ;;  %v1825_v14 = vadd.f32 %v1824_v44, %v1678_v40  ;;  %vm1560_vm0 = vcmp.eq.s32.totalorder %v4476_v21, %v7783_v55  ;;  %v7787_v63 = vld [vmem:[#allocation30_spill] sm:$0xff] }
 0x252   :  { %v1684_v26 = vsel %vm1556_vm12, %v7784_v22, 0.0  ;;  %3867 = vpow2.f32 %v2711_v42  ;;  %v2548_v46 = vsub.f32 %v7725_v18, %v6428_v37  ;;  %v2727_v15 = vmul.f32 1.442695, %v2546_v53  ;;  %2915 = vadd.xlane.f32.xlu1 %v2914_v29  ;;  %v3856_v49 = vpop.eup %3855 }
 0x253   :  { %3869 = vpow2.f32 %v2713_v11  ;;  %v2535_v4 = vsub.f32 %v7785_v6, %v6438_v9  ;;  %v2701_v40 = vmul.f32 1.442695, %v2533_v54  ;;  %v1682_v23 = vsel %vm1554_vm13, %v7786_v32, 0.0 }
 0x254   :  { %3871 = vpow2.f32 %v2715_v52  ;;  %v2536_v42 = vsub.f32 %v7787_v63, %v6438_v9  ;;  %v2703_v44 = vmul.f32 1.442695, %v2534_v25  ;;  %v2396_v18 = vpop.permute.xlu0 %2395  ;;  %v2924_v37 = vadd.f32 %v3856_v49, %v2923_v13  ;;  %v3858_v53 = vpop.eup %3857  ;;  %v7788_v13 = vld [vmem:[#allocation61_spill] sm:$0xff]  ;;  %v7790_v49 = vld [vmem:[#allocation66_spill] sm:$0xff] }
 0x255   :  { %vm1561_vm1 = vcmp.eq.s32.totalorder %v4484_v27, %v7783_v55  ;;  %3873 = vpow2.f32 %v2725_v0  ;;  %v2729_v3 = vmul.f32 1.442695, %v2547_v1  ;;  %v2541_v11 = vsub.f32 %v5184_v20, %v2396_v18  ;;  %v3860_v54 = vpop.eup %3859  ;;  %v6517_v63 = vpop.permute.xlu1 %2420 }
 0x256   :  { %v6485_v36 = vadd.f32 %v1825_v14, %v1679_v35  ;;  %3875 = vpow2.f32 %v2727_v15  ;;  %v2731_v52 = vmul.f32 1.442695, %v2548_v46  ;;  %v2542_v9 = vsub.f32 %v5191_v50, %v2396_v18  ;;  %2925 = vadd.xlane.f32.xlu1 %v2924_v37  ;;  %v7789_v35 = vld [vmem:[#allocation64_spill] sm:$0xff] }
 0x257   :  { %v1829_v16 = vadd.f32 %v1681_v24, %v6425_v51  ;;  %3877 = vpow2.f32 %v2701_v40  ;;  %v2705_v25 = vmul.f32 1.442695, %v2535_v4  ;;  %v2553_v29 = vsub.f32 %v7729_v41, %v6480_v56 }
 0x258   :  { %v6495_v20 = vsel %vm1555_vm14, %v7788_v13, 0.0  ;;  %vm1558_vm2 = vcmp.eq.s32.totalorder %v4493_v33, %v7773_v8  ;;  %v1685_v50 = vsel %vm1557_vm15, %v7789_v35, 0.0  ;;  %3879 = vpow2.f32 %v2703_v44  ;;  %v6507_v1 = vpop.permute.xlu0 %2405 }
 0x259   :  { %v2707_v51 = vmul.f32 1.442695, %v2536_v42  ;;  %v2554_v24 = vsub.f32 %v7732_v39, %v6480_v56  ;;  %3881 = vpow2.f32 %v2729_v3  ;;  %v2555_v41 = vsub.f32 %v7747_v61, %v6480_v56 }
 0x25a   :  { %v2717_v7 = vmul.f32 1.442695, %v2541_v11  ;;  %v2917_v0 = vadd.f32 %v3860_v54, %v3858_v53  ;;  %3883 = vpow2.f32 %v2731_v52  ;;  %v2543_v14 = vsub.f32 %v5188_v19, %v2396_v18  ;;  %v7791_v53 = vld [vmem:[#allocation68_spill] sm:$0xff] }
 0x25b   :  { %v2719_v46 = vmul.f32 1.442695, %v2542_v9  ;;  %v1830_v15 = vadd.f32 %v1829_v16, %v1682_v23  ;;  %v1688_v6 = vsel %vm1560_vm0, %v7790_v49, 0.0  ;;  %3885 = vpow2.f32 %v2705_v25  ;;  %v7792_v16 = vld [vmem:[#allocation63_spill] sm:$0xff] }
 0x25c   :  { %v2741_v39 = vmul.f32 1.442695, %v2553_v29  ;;  %v2544_v4 = vsub.f32 %v5194_v57, %v2396_v18  ;;  %vm1559_vm3 = vcmp.eq.s32.totalorder %v4496_v34, %v7773_v8  ;;  %v3862_v61 = vpop.eup %3861  ;;  %3887 = vpow2.f32 %v2707_v51  ;;  %v6551_v51 = vpop.permute.xlu0 %2415 }
 0x25d   :  { %v2743_v40 = vmul.f32 1.442695, %v2554_v24  ;;  %v2549_v19 = vsub.f32 %v5263_v58, %v6507_v1  ;;  %v1834_v23 = vadd.f32 %v1685_v50, %v1684_v26  ;;  %vm1562_vm4 = vcmp.eq.s32.totalorder %v4493_v33, %v7783_v55  ;;  %v6523_v42 = vpop.eup %3863 }
 0x25e   :  { %v2745_v44 = vmul.f32 1.442695, %v2555_v41  ;;  %3889 = vpow2.f32 %v2717_v7  ;;  %v2550_v57 = vsub.f32 %v5269_v2, %v6507_v1  ;;  %v2918_v18 = vadd.f32 %v3862_v61, %v2917_v0  ;;  %v3866_v37 = vpop.eup %3865 }
 0x25f   :  { %v1689_v3 = vsel %vm1561_vm1, %v7791_v53, 0.0  ;;  %v2556_v58 = vsub.f32 %v7761_v62, %v6480_v56  ;;  %3891 = vpow2.f32 %v2719_v46  ;;  %v2721_v26 = vmul.f32 1.442695, %v2543_v14  ;;  %v3868_v11 = vpop.eup %3867 }
 0x260   :  { %vm1563_vm5 = vcmp.eq.s32.totalorder %v4496_v34, %v7783_v55  ;;  %3893 = vpow2.f32 %v2741_v39  ;;  %v2723_v54 = vmul.f32 1.442695, %v2544_v4  ;;  %v2561_v2 = vsub.f32 %v7748_v12, %v6517_v63  ;;  %v6537_v9 = vpop.eup %3869 }
 0x261   :  { %v2919_v52 = vadd.f32 %v3866_v37, %v2918_v18  ;;  %vm1568_vm6 = vcmp.eq.s32.totalorder %v4476_v21, %v5770_v48  ;;  %3895 = vpow2.f32 %v2743_v40  ;;  %v2562_v62 = vsub.f32 %v7744_v31, %v6517_v63  ;;  %v6547_v29 = vpop.eup %3871 }
 0x262   :  { %v2733_v56 = vmul.f32 1.442695, %v2549_v19  ;;  %v1686_v25 = vsel %vm1558_vm2, %v7792_v16, 0.0  ;;  %3897 = vpow2.f32 %v2745_v44  ;;  %v2551_v12 = vsub.f32 %v7730_v5, %v6507_v1  ;;  %v6553_v41 = vpop.eup %3873  ;;  %v7793_v19 = vld [vmem:[#allocation65_spill] sm:$0xff] }
 0x263   :  { %v2735_v50 = vmul.f32 1.442695, %v2550_v57  ;;  %2920 = vadd.xlane.f32.xlu0 %v2919_v52  ;;  %v1835_v24 = vadd.f32 %v1834_v23, %v1686_v25  ;;  %vm1569_vm7 = vcmp.eq.s32.totalorder %v4484_v27, %v5770_v48  ;;  %v2747_v31 = vmul.f32 1.442695, %v2556_v58  ;;  %v6559_v14 = vpop.eup %3875 }
 0x264   :  { %3899 = vpow2.f32 %v2721_v26  ;;  %v2563_v7 = vsub.f32 %v7755_v10, %v6517_v63  ;;  %v1839_v0 = vadd.f32 %v1689_v3, %v1688_v6  ;;  %v2757_v5 = vmul.f32 1.442695, %v2561_v2  ;;  %v3878_v4 = vpop.eup %3877  ;;  %v7795_v3 = vld [vmem:[#allocation69_spill] sm:$0xff] }
 0x265   :  { %3901 = vpow2.f32 %v2723_v54  ;;  %v2552_v46 = vsub.f32 %v7734_v30, %v6507_v1  ;;  %v6564_v39 = vadd.f32 %v1830_v15, %v6495_v20  ;;  %v2759_v61 = vmul.f32 1.442695, %v2562_v62  ;;  %v3880_v6 = vpop.eup %3879  ;;  %v7794_v1 = vld [vmem:[#allocation67_spill] sm:$0xff] }
 0x266   :  { %3903 = vpow2.f32 %v2733_v56  ;;  %v2557_v40 = vsub.f32 %v7746_v17, %v6551_v51  ;;  %v1687_v10 = vsel %vm1559_vm3, %v7793_v19, 0.0  ;;  %vm1570_vm8 = vcmp.eq.s32.totalorder %v4493_v33, %v5770_v48  ;;  %v6580_v17 = vpop.eup %3881 }
 0x267   :  { %3905 = vpow2.f32 %v2735_v50  ;;  %v2737_v30 = vmul.f32 1.442695, %v2551_v12  ;;  %v2558_v20 = vsub.f32 %v7740_v59, %v6551_v51  ;;  %v1690_v15 = vsel %vm1562_vm4, %v7794_v1, 0.0  ;;  %v6584_v57 = vpop.eup %3883  ;;  %v6588_v59 = vpop.permute.xlu0 %2425  ;;  %v7797_v12 = vld [vmem:[#allocation110_spill] sm:$0xff] }
 0x268   :  { %3907 = vpow2.f32 %v2747_v31  ;;  %v2761_v23 = vmul.f32 1.442695, %v2563_v7  ;;  %v6582_v8 = vadd.f32 %v1835_v24, %v1687_v10  ;;  %v1840_v44 = vadd.f32 %v1839_v0, %v1690_v15  ;;  %v3886_v26 = vpop.eup %3885  ;;  %v7798_v7 = vld [vmem:[#allocation76_spill] sm:$0xff] }
 0x269   :  { %v2564_v18 = vsub.f32 %v7766_v47, %v6517_v63  ;;  %3909 = vpow2.f32 %v2757_v5  ;;  %v2739_v37 = vmul.f32 1.442695, %v2552_v46  ;;  %v1691_v58 = vsel %vm1563_vm5, %v7795_v3, 0.0  ;;  %v3888_v62 = vpop.eup %3887  ;;  %v7796_v47 = vld [vmem:[#allocation74_spill] sm:$0xff] }
 0x26a   :  { %3911 = vpow2.f32 %v2759_v61  ;;  %v2749_v54 = vmul.f32 1.442695, %v2557_v40  ;;  %v2927_v2 = vadd.f32 %v3880_v6, %v3878_v4  ;;  %v2932_v52 = vadd.f32 %v3868_v11, %v6523_v42  ;;  %v6607_v11 = vpop.permute.xlu1 %2430  ;;  %v7799_v5 = vld [vmem:[#allocation46_spill] sm:$0xff] }
 0x26b   :  { %vm1571_vm9 = vcmp.eq.s32.totalorder %v4496_v34, %v5770_v48  ;;  %v1696_v63 = vsel %vm1568_vm6, %v7796_v47, 0.0  ;;  %3913 = vpow2.f32 %v2737_v30  ;;  %v2559_v55 = vsub.f32 %v7754_v43, %v6551_v51  ;;  %v3890_v25 = vpop.eup %3889  ;;  %v7801_v30 = vld [vmem:[#allocation50_spill] sm:$0xff]  ;;  %v6622_v15 = vpop.permute.xlu0 %2435 }
 0x26c   :  { %v2751_v56 = vmul.f32 1.442695, %v2558_v20  ;;  %vm1576_vm10 = vcmp.eq.s32.totalorder %v4476_v21, %v7797_v12  ;;  %3915 = vpow2.f32 %v2761_v23  ;;  %v2560_v42 = vsub.f32 %v7764_v38, %v6551_v51  ;;  %v3892_v31 = vpop.eup %3891  ;;  %v7800_v38 = vld [vmem:[#allocation48_spill] sm:$0xff]  ;;  %v7802_v23 = vld [vmem:[#allocation75_spill] sm:$0xff] }
 0x26d   :  { %v2928_v50 = vadd.f32 %v3886_v26, %v2927_v2  ;;  %v6609_v24 = vadd.f32 %v1840_v44, %v1691_v58  ;;  %v1697_v43 = vsel %vm1569_vm7, %v7798_v7, 0.0  ;;  %v2763_v0 = vmul.f32 1.442695, %v2564_v18  ;;  %v3894_v4 = vpop.eup %3893  ;;  %v7803_v58 = vld [vmem:[#allocation52_spill] sm:$0xff] }
 0x26e   :  { %3917 = vpow2.f32 %v2739_v37  ;;  %v2565_v46 = vsub.f32 %v7799_v5, %v6588_v59  ;;  %v2566_v51 = vsub.f32 %v7800_v38, %v6588_v59  ;;  %v2933_v40 = vadd.f32 %v6537_v9, %v2932_v52  ;;  %v3896_v10 = vpop.eup %3895  ;;  %v7804_v52 = vld [vmem:[#allocation47_spill] sm:$0xff]  ;;  %v7805_v38 = vld [vmem:[#allocation54_spill] sm:$0xff] }
 0x26f   :  { %3919 = vpow2.f32 %v2749_v54  ;;  %v2929_v61 = vadd.f32 %v3888_v62, %v2928_v50  ;;  %v2753_v6 = vmul.f32 1.442695, %v2559_v55  ;;  %v2569_v20 = vsub.f32 %v7801_v30, %v6607_v11  ;;  %v6628_v18 = vpop.eup %3897 }
 0x270   :  { %3921 = vpow2.f32 %v2751_v56  ;;  %v1698_v44 = vsel %vm1570_vm8, %v7802_v23, 0.0  ;;  %v2755_v37 = vmul.f32 1.442695, %v2560_v42  ;;  %v2570_v26 = vsub.f32 %v7803_v58, %v6607_v11 }
 0x271   :  { %2930 = vadd.xlane.f32.xlu1 %v2929_v61  ;;  %v2937_v9 = vadd.f32 %v3892_v31, %v3890_v25  ;;  %v2942_v54 = vadd.f32 %v6559_v14, %v6553_v41  ;;  %v3900_v2 = vpop.eup %3899  ;;  %3923 = vpow2.f32 %v2763_v0  ;;  %v2567_v62 = vsub.f32 %v7804_v52, %v6588_v59  ;;  %v7806_v41 = vld [vmem:[#allocation56_spill] sm:$0xff]  ;;  %v7807_v31 = vld [vmem:[#allocation77_spill] sm:$0xff] }
 0x272   :  { %v2765_v55 = vmul.f32 1.442695, %v2565_v46  ;;  %v1849_v56 = vadd.f32 %v1697_v43, %v1696_v63  ;;  %v3902_v50 = vpop.eup %3901  ;;  %v2767_v5 = vmul.f32 1.442695, %v2566_v51  ;;  %v2573_v42 = vsub.f32 %v7805_v38, %v6622_v15  ;;  %v6645_v46 = vpop.permute.xlu1 %2440 }
 0x273   :  { %v2934_v30 = vadd.f32 %v6547_v29, %v2933_v40  ;;  %v2938_v58 = vadd.f32 %v3900_v2, %v2937_v9  ;;  %v3904_v61 = vpop.eup %3903  ;;  %3925 = vpow2.f32 %v2753_v6  ;;  %v2773_v25 = vmul.f32 1.442695, %v2569_v20  ;;  %v7808_v6 = vld [vmem:[#allocation84_spill] sm:$0xff]  ;;  %v7809_v20 = vld [vmem:[#allocation51_spill] sm:$0xff] }
 0x274   :  { %v2574_v14 = vsub.f32 %v7806_v41, %v6622_v15  ;;  %v1699_v0 = vsel %vm1571_vm9, %v7807_v31, 0.0  ;;  %v3906_v63 = vpop.eup %3905  ;;  %3927 = vpow2.f32 %v2755_v37  ;;  %v2775_v43 = vmul.f32 1.442695, %v2570_v26 }
 0x275   :  { %2935 = vadd.xlane.f32.xlu1 %v2934_v30  ;;  %v2939_v51 = vadd.f32 %v3902_v50, %v2938_v58  ;;  %v2943_v29 = vadd.f32 %v6580_v17, %v2942_v54  ;;  %vm1578_vm12 = vcmp.eq.s32.totalorder %v4493_v33, %v7797_v12  ;;  %v6650_v40 = vpop.eup %3907  ;;  %v6656_v48 = vsel %vm1576_vm10, %v7808_v6, 0.0  ;;  %v7810_v17 = vld [vmem:[#allocation49_spill] sm:$0xff]  ;;  %v6664_v50 = vpop.permute.xlu0 %2445  ;;  %v7811_v58 = vld [vmem:[#allocation58_spill] sm:$0xff] }
 0x276   :  { %v2571_v37 = vsub.f32 %v7809_v20, %v6607_v11  ;;  %3929 = vpow2.f32 %v2765_v55  ;;  %v1850_v26 = vadd.f32 %v1849_v56, %v1698_v44  ;;  %v6660_v9 = vpop.eup %3909  ;;  %v2568_v54 = vsub.f32 %v7810_v17, %v6588_v59  ;;  %v7812_v56 = vld [vmem:[#allocation9_spill] sm:$0xff] }
 0x277   :  { %3931 = vpow2.f32 %v2767_v5  ;;  %v2769_v2 = vmul.f32 1.442695, %v2567_v62  ;;  %v2781_v52 = vmul.f32 1.442695, %v2573_v42  ;;  %2940 = vadd.xlane.f32.xlu0 %v2939_v51  ;;  %v3912_v38 = vpop.eup %3911  ;;  %v2783_v30 = vmul.f32 1.442695, %v2574_v14 }
 0x278   :  { %3933 = vpow2.f32 %v2773_v25  ;;  %v2577_v41 = vsub.f32 %v7811_v58, %v6645_v46  ;;  %v2947_v20 = vadd.f32 %v3906_v63, %v3904_v61  ;;  %v3914_v55 = vpop.eup %3913  ;;  %v2578_v44 = vsub.f32 %v7779_v45, %v6645_v46  ;;  %v7813_v42 = vld [vmem:[#allocation53_spill] sm:$0xff]  ;;  %v7814_v61 = vld [vmem:[#allocation55_spill] sm:$0xff] }
 0x279   :  { %3935 = vpow2.f32 %v2775_v43  ;;  %1792 = vadd.xlane.f32.xlu1 %v7812_v56  ;;  %v2944_v59 = vadd.f32 %v6584_v57, %v2943_v29  ;;  %v2952_v62 = vadd.f32 %v3896_v10, %v3894_v4  ;;  %v6672_v5 = vpop.eup %3915  ;;  %vm1577_vm13 = vcmp.eq.s32.totalorder %v4484_v27, %v7797_v12  ;;  %v6684_v10 = vpop.permute.xlu0 %2455 }
 0x27a   :  { %v2572_v25 = vsub.f32 %v7813_v42, %v6607_v11  ;;  %v2777_v14 = vmul.f32 1.442695, %v2571_v37  ;;  %v2575_v63 = vsub.f32 %v7814_v61, %v6622_v15  ;;  %v2948_v43 = vadd.f32 %v3914_v55, %v2947_v20 }
 0x27b   :  { %v3918_v51 = vpop.eup %3917  ;;  %3937 = vpow2.f32 %v2769_v2  ;;  %v2771_v45 = vmul.f32 1.442695, %v2568_v54  ;;  %v2576_v57 = vsub.f32 %v7780_v28, %v6622_v15  ;;  %v2581_v4 = vsub.f32 %v7784_v22, %v6664_v50  ;;  %2945 = vadd.xlane.f32.xlu0 %v2944_v59  ;;  %v6692_v15 = vpop.permute.xlu1 %2450  ;;  %v7815_v22 = vld [vmem:[#allocation10_spill] sm:$0xff] }
 0x27c   :  { %vm1579_vm14 = vcmp.eq.s32.totalorder %v4496_v34, %v7797_v12  ;;  %v3920_v11 = vpop.eup %3919  ;;  %3939 = vpow2.f32 %v2781_v52  ;;  %v2789_v29 = vmul.f32 1.442695, %v2577_v41  ;;  %v2582_v37 = vsub.f32 %v7789_v35, %v6664_v50  ;;  %v7816_v52 = vld [vmem:[#allocation85_spill] sm:$0xff] }
 0x27d   :  { %v6690_v17 = vadd.f32 %v1850_v26, %v1699_v0  ;;  %v3922_v54 = vpop.eup %3921  ;;  %3941 = vpow2.f32 %v2783_v30  ;;  %v2791_v28 = vmul.f32 1.442695, %v2578_v44  ;;  %1797 = vadd.xlane.f32.xlu1 %v7815_v22  ;;  %v2949_v2 = vadd.f32 %v3918_v51, %v2948_v43  ;;  %v6704_v44 = vpop.permute.xlu0 %2465 }
 0x27e   :  { %v2953_v58 = vadd.f32 %v6628_v18, %v2952_v62  ;;  %3943 = vpow2.f32 %v2777_v14  ;;  %v2779_v20 = vmul.f32 1.442695, %v2572_v25  ;;  %v2785_v55 = vmul.f32 1.442695, %v2575_v63  ;;  %v3924_v0 = vpop.eup %3923  ;;  %v7817_v25 = vld [vmem:[#allocation5_spill] sm:$0xff] }
 0x27f   :  { %v6700_v35 = vsel %vm1578_vm12, %v7816_v52, 0.0  ;;  %3945 = vpow2.f32 %v2771_v45  ;;  %v2787_v26 = vmul.f32 1.442695, %v2576_v57  ;;  %v2579_v30 = vsub.f32 %v7786_v32, %v6645_v46  ;;  %2950 = vadd.xlane.f32.xlu0 %v2949_v2  ;;  %v7818_v45 = vld [vmem:[#allocation86_spill] sm:$0xff] }
 0x280   :  { %v2797_v41 = vmul.f32 1.442695, %v2581_v4  ;;  %3947 = vpow2.f32 %v2789_v29  ;;  %v2799_v18 = vmul.f32 1.442695, %v2582_v37  ;;  %v2585_v56 = vsub.f32 %v7790_v49, %v6692_v15  ;;  %v3926_v62 = vpop.eup %3925 }
 0x281   :  { %v2957_v59 = vadd.f32 %v3922_v54, %v3920_v11  ;;  %3949 = vpow2.f32 %v2791_v28  ;;  %v2586_v42 = vsub.f32 %v7791_v53, %v6692_v15  ;;  %1802 = vadd.xlane.f32.xlu1 %v7817_v25  ;;  %v2954_v14 = vadd.f32 %v6650_v40, %v2953_v58  ;;  %v3928_v61 = vpop.eup %3927  ;;  %v7819_v40 = vld [vmem:[#allocation70_spill] sm:$0xff]  ;;  %v6731_v54 = vpop.permute.xlu1 %2460  ;;  %v7822_v28 = vld [vmem:[#allocation7_spill] sm:$0xff]  ;;  %v7823_v25 = vld [vmem:[#allocation112_spill] sm:$0xff] }
 0x282   :  { %v2962_v32 = vadd.f32 %v3912_v38, %v6660_v9  ;;  %3951 = vpow2.f32 %v2779_v20  ;;  %v2580_v63 = vsub.f32 %v7788_v13, %v6645_v46  ;;  %v2583_v49 = vsub.f32 %v7792_v16, %v6664_v50  ;;  %v7820_v13 = vld [vmem:[#allocation72_spill] sm:$0xff]  ;;  %v7821_v16 = vld [vmem:[#allocation87_spill] sm:$0xff]  ;;  %v6734_v2 = vpop.permute.xlu0 %2470 }
 0x283   :  { %v2958_v43 = vadd.f32 %v3926_v62, %v2957_v59  ;;  %v3930_v51 = vpop.eup %3929  ;;  %v1705_v53 = vsel %vm1577_vm13, %v7818_v45, 0.0  ;;  %3953 = vpow2.f32 %v2785_v55  ;;  %v2793_v57 = vmul.f32 1.442695, %v2579_v30  ;;  %2955 = vadd.xlane.f32.xlu0 %v2954_v14 }
 0x284   :  { %v2589_v9 = vsub.f32 %v7819_v40, %v6684_v10  ;;  %v3932_v38 = vpop.eup %3931  ;;  %3955 = vpow2.f32 %v2797_v41  ;;  %v2805_v4 = vmul.f32 1.442695, %v2585_v56  ;;  %v2590_v46 = vsub.f32 %v7820_v13, %v6684_v10 }
 0x285   :  { %v6729_v11 = vsel %vm1579_vm14, %v7821_v16, 0.0  ;;  %v3934_v29 = vpop.eup %3933  ;;  %3957 = vpow2.f32 %v2799_v18  ;;  %v2807_v37 = vmul.f32 1.442695, %v2586_v42  ;;  %1807 = vadd.xlane.f32.xlu1 %v7822_v28  ;;  %v2959_v22 = vadd.f32 %v3928_v61, %v2958_v43  ;;  %v7825_v43 = vld [vmem:[#allocation71_spill] sm:$0xff] }
 0x286   :  { %v2963_v58 = vadd.f32 %v6672_v5, %v2962_v32  ;;  %v3936_v20 = vpop.eup %3935  ;;  %3959 = vpow2.f32 %v2787_v26  ;;  %v2795_v55 = vmul.f32 1.442695, %v2580_v63  ;;  %v2584_v12 = vsub.f32 %v7793_v19, %v6664_v50  ;;  %v7824_v19 = vld [vmem:[#allocation6_spill] sm:$0xff] }
 0x287   :  { %v2801_v30 = vmul.f32 1.442695, %v2583_v49  ;;  %3961 = vpow2.f32 %v2793_v57  ;;  %v2587_v41 = vsub.f32 %v7794_v1, %v6692_v15  ;;  %v2813_v18 = vmul.f32 1.442695, %v2589_v9  ;;  %2960 = vadd.xlane.f32.xlu0 %v2959_v22  ;;  %v7826_v57 = vld [vmem:[#allocation78_spill] sm:$0xff] }
 0x288   :  { %v2967_v56 = vadd.f32 %v3932_v38, %v3930_v51  ;;  %v3938_v59 = vpop.eup %3937  ;;  %3963 = vpow2.f32 %v2805_v4  ;;  %v2815_v62 = vmul.f32 1.442695, %v2590_v46  ;;  %v2593_v5 = vsub.f32 %v7796_v47, %v6731_v54 }
 0x289   :  { %v2594_v26 = vsub.f32 %v7798_v7, %v6731_v54  ;;  %v3940_v42 = vpop.eup %3939  ;;  %vm1584_vm15 = vcmp.eq.s32.totalorder %v4476_v21, %v7823_v25  ;;  %3965 = vpow2.f32 %v2807_v37  ;;  %1812 = vadd.xlane.f32.xlu1 %v7824_v19  ;;  %v2964_v1 = vadd.f32 %v3924_v0, %v2963_v58  ;;  %v6755_v0 = vpop.permute.xlu0 %2475 }
 0x28a   :  { %v2968_v50 = vadd.f32 %v3938_v59, %v2967_v56  ;;  %v2972_v14 = vadd.f32 %v3936_v20, %v3934_v29  ;;  %v3942_v32 = vpop.eup %3941  ;;  %3967 = vpow2.f32 %v2795_v55  ;;  %v2803_v61 = vmul.f32 1.442695, %v2584_v12  ;;  %v7829_v20 = vld [vmem:[#allocation73_spill] sm:$0xff] }
 0x28b   :  { %v2588_v63 = vsub.f32 %v7795_v3, %v6692_v15  ;;  %v1859_v47 = vadd.f32 %v1705_v53, %v6656_v48  ;;  %v3944_v49 = vpop.eup %3943  ;;  %3969 = vpow2.f32 %v2801_v30  ;;  %v2809_v7 = vmul.f32 1.442695, %v2587_v41  ;;  %2965 = vadd.xlane.f32.xlu0 %v2964_v1  ;;  %v7827_v3 = vld [vmem:[#allocation80_spill] sm:$0xff] }
 0x28c   :  { %v2591_v51 = vsub.f32 %v7825_v43, %v6684_v10  ;;  %v2597_v9 = vsub.f32 %v7826_v57, %v6704_v44  ;;  %v3946_v38 = vpop.eup %3945  ;;  %3971 = vpow2.f32 %v2813_v18  ;;  %v2821_v4 = vmul.f32 1.442695, %v2593_v5  ;;  %v7828_v53 = vld [vmem:[#allocation8_spill] sm:$0xff] }
 0x28d   :  { %v2823_v46 = vmul.f32 1.442695, %v2594_v26  ;;  %v2598_v15 = vsub.f32 %v7827_v3, %v6704_v44  ;;  %v3948_v48 = vpop.eup %3947  ;;  %3973 = vpow2.f32 %v2815_v62  ;;  %1817 = vadd.xlane.f32.xlu1 %v7828_v53  ;;  %v2969_v29 = vadd.f32 %v3946_v38, %v2968_v50  ;;  %v7830_v50 = vld [vmem:[#allocation94_spill] sm:$0xff]  ;;  %v7833_v38 = vld [vmem:[#allocation91_spill] sm:$0xff] }
 0x28e   :  { %v2973_v37 = vadd.f32 %v3944_v49, %v2972_v14  ;;  %v2977_v28 = vadd.f32 %v3942_v32, %v3940_v42  ;;  %v3950_v22 = vpop.eup %3949  ;;  %3975 = vpow2.f32 %v2803_v61  ;;  %v2811_v58 = vmul.f32 1.442695, %v2588_v63  ;;  %v7831_v61 = vld [vmem:[#allocation79_spill] sm:$0xff] }
 0x28f   :  { %v2592_v55 = vsub.f32 %v7829_v20, %v6684_v10  ;;  %v1860_v12 = vadd.f32 %v1859_v47, %v6700_v35  ;;  %v3952_v30 = vpop.eup %3951  ;;  %3977 = vpow2.f32 %v2809_v7  ;;  %v2817_v41 = vmul.f32 1.442695, %v2591_v51  ;;  %2970 = vadd.xlane.f32.xlu0 %v2969_v29  ;;  %v6772_v35 = vpop.permute.xlu0 %2480  ;;  %v7832_v47 = vld [vmem:[#allocation89_spill] sm:$0xff] }
 0x290   :  { %v2595_v18 = vsub.f32 %v7802_v23, %v6731_v54  ;;  %v2829_v56 = vmul.f32 1.442695, %v2597_v9  ;;  %v3954_v59 = vpop.eup %3953  ;;  %3979 = vpow2.f32 %v2821_v4  ;;  %v2831_v62 = vmul.f32 1.442695, %v2598_v15  ;;  %v7834_v29 = vld [vmem:[#allocation81_spill] sm:$0xff] }
 0x291   :  { %v2601_v5 = vsub.f32 %v7808_v6, %v6734_v2  ;;  %v2602_v26 = vsub.f32 %v7818_v45, %v6734_v2  ;;  %v3956_v10 = vpop.eup %3955  ;;  %vm1585_vm0 = vcmp.eq.s32.totalorder %v4484_v27, %v7823_v25  ;;  %3981 = vpow2.f32 %v2823_v46  ;;  %1822 = vadd.xlane.f32.xlu1 %v6442_v60 }
 0x292   :  { %v2974_v23 = vadd.f32 %v3952_v30, %v2973_v37  ;;  %v2978_v42 = vadd.f32 %v3954_v59, %v2977_v28  ;;  %v2982_v19 = vadd.f32 %v3950_v22, %v3948_v48  ;;  %v3958_v1 = vpop.eup %3957  ;;  %v6778_v6 = vsel %vm1584_vm15, %v7830_v50, 0.0 }
 0x293   :  { %3983 = vpow2.f32 %v2811_v58  ;;  %v2819_v45 = vmul.f32 1.442695, %v2592_v55  ;;  %v2596_v14 = vsub.f32 %v7807_v31, %v6731_v54  ;;  %v3960_v32 = vpop.eup %3959  ;;  %v2825_v60 = vmul.f32 1.442695, %v2595_v18 }
 0x294   :  { %3985 = vpow2.f32 %v2817_v41  ;;  %v2599_v63 = vsub.f32 %v7831_v61, %v6704_v44  ;;  %v2605_v49 = vsub.f32 %v7832_v47, %v6755_v0  ;;  %2975 = vadd.xlane.f32.xlu0 %v2974_v23  ;;  %v3962_v7 = vpop.eup %3961  ;;  %v2837_v51 = vmul.f32 1.442695, %v2601_v5 }
 0x295   :  { %3987 = vpow2.f32 %v2829_v56  ;;  %v2839_v9 = vmul.f32 1.442695, %v2602_v26  ;;  %v2606_v4 = vsub.f32 %v7833_v38, %v6755_v0  ;;  %v3964_v46 = vpop.eup %3963  ;;  %1827 = vadd.xlane.f32.xlu1 %v6485_v36  ;;  %v2979_v31 = vadd.f32 %v3960_v32, %v2978_v42  ;;  %v6796_v36 = vpop.permute.xlu0 %2485 }
 0x296   :  { %3989 = vpow2.f32 %v2831_v62  ;;  %v2983_v54 = vadd.f32 %v3962_v7, %v2982_v19  ;;  %v2987_v15 = vadd.f32 %v3958_v1, %v3956_v10  ;;  %v3966_v48 = vpop.eup %3965  ;;  %v2827_v53 = vmul.f32 1.442695, %v2596_v14  ;;  %v7836_v19 = vld [vmem:[#allocation113_spill] sm:$0xff]  ;;  %v7837_v1 = vld [vmem:[#allocation90_spill] sm:$0xff] }
 0x297   :  { %3991 = vpow2.f32 %v2819_v45  ;;  %v2600_v37 = vsub.f32 %v7834_v29, %v6704_v44  ;;  %v6792_v28 = vadd.f32 %v1860_v12, %v6729_v11  ;;  %v3968_v22 = vpop.eup %3967  ;;  %v2833_v58 = vmul.f32 1.442695, %v2599_v63  ;;  %v7835_v44 = vld [vmem:[#allocation96_spill] sm:$0xff] }
 0x298   :  { %3993 = vpow2.f32 %v2825_v60  ;;  %v2603_v55 = vsub.f32 %v7816_v52, %v6734_v2  ;;  %v2845_v30 = vmul.f32 1.442695, %v2605_v49  ;;  %2980 = vadd.xlane.f32.xlu0 %v2979_v31  ;;  %v3970_v41 = vpop.eup %3969  ;;  %v2847_v18 = vmul.f32 1.442695, %v2606_v4  ;;  %v7838_v45 = vld [vmem:[#allocation100_spill] sm:$0xff]  ;;  %v7839_v49 = vld [vmem:[#allocation102_spill] sm:$0xff] }
 0x299   :  { %3995 = vpow2.f32 %v2837_v51  ;;  %v2609_v56 = vsub.f32 %v7830_v50, %v6772_v35  ;;  %v2610_v11 = vsub.f32 %v7835_v44, %v6772_v35  ;;  %v3972_v12 = vpop.eup %3971  ;;  %1832 = vadd.xlane.f32.xlu1 %v6564_v39  ;;  %v2984_v59 = vadd.f32 %v3968_v22, %v2983_v54  ;;  %v6821_v7 = vpop.permute.xlu0 %2490  ;;  %v7840_v54 = vld [vmem:[#allocation92_spill] sm:$0xff]  ;;  %v7841_v22 = vld [vmem:[#allocation95_spill] sm:$0xff] }
 0x29a   :  { %3997 = vpow2.f32 %v2839_v9  ;;  %v2988_v62 = vadd.f32 %v3970_v41, %v2987_v15  ;;  %v2992_v52 = vadd.f32 %v3966_v48, %v3964_v46  ;;  %vm1586_vm1 = vcmp.eq.s32.totalorder %v4493_v33, %v7823_v25  ;;  %v3974_v5 = vpop.eup %3973  ;;  %v7842_v41 = vld [vmem:[#allocation105_spill] sm:$0xff] }
 0x29b   :  { %v1713_v26 = vsel %vm1585_vm0, %v7835_v44, 0.0  ;;  %3999 = vpow2.f32 %v2827_v53  ;;  %v2835_v10 = vmul.f32 1.442695, %v2600_v37  ;;  %v2604_v23 = vsub.f32 %v7821_v16, %v6734_v2  ;;  %v3976_v42 = vpop.eup %3975 }
 0x29c   :  { %vm1593_vm2 = vcmp.eq.s32.totalorder %v4484_v27, %v7836_v19  ;;  %4001 = vpow2.f32 %v2833_v58  ;;  %v2841_v39 = vmul.f32 1.442695, %v2603_v55  ;;  %v2607_v50 = vsub.f32 %v7837_v1, %v6755_v0  ;;  %2985 = vadd.xlane.f32.xlu0 %v2984_v59  ;;  %v3978_v32 = vpop.eup %3977 }
 0x29d   :  { %v2613_v14 = vsub.f32 %v7838_v45, %v6796_v36  ;;  %4003 = vpow2.f32 %v2845_v30  ;;  %v2853_v60 = vmul.f32 1.442695, %v2609_v56  ;;  %v2855_v63 = vmul.f32 1.442695, %v2610_v11  ;;  %v3980_v2 = vpop.eup %3979  ;;  %1837 = vadd.xlane.f32.xlu1 %v6582_v8 }
 0x29e   :  { %v2614_v16 = vsub.f32 %v7839_v49, %v6796_v36  ;;  %vm1592_vm3 = vcmp.eq.s32.totalorder %v4476_v21, %v7836_v19  ;;  %4005 = vpow2.f32 %v2847_v18  ;;  %v2989_v51 = vadd.f32 %v3976_v42, %v2988_v62  ;;  %v3982_v46 = vpop.eup %3981 }
 0x29f   :  { %v2993_v9 = vadd.f32 %v3978_v32, %v2992_v52  ;;  %v2997_v4 = vadd.f32 %v3974_v5, %v3972_v12  ;;  %4007 = vpow2.f32 %v2835_v10  ;;  %v2843_v31 = vmul.f32 1.442695, %v2604_v23  ;;  %v7844_v52 = vld [vmem:[#allocation97_spill] sm:$0xff] }
 0x2a0   :  { %v2608_v15 = vsub.f32 %v7840_v54, %v6755_v0  ;;  %v1869_v48 = vadd.f32 %v1713_v26, %v6778_v6  ;;  %v3984_v53 = vpop.eup %3983  ;;  %4009 = vpow2.f32 %v2841_v39  ;;  %v2849_v37 = vmul.f32 1.442695, %v2607_v50  ;;  %2990 = vadd.xlane.f32.xlu0 %v2989_v51  ;;  %v7843_v0 = vld [vmem:[#allocation107_spill] sm:$0xff]  ;;  %v7845_v23 = vld [vmem:[#allocation101_spill] sm:$0xff] }
 0x2a1   :  { %v2611_v58 = vsub.f32 %v7841_v22, %v6772_v35  ;;  %v2861_v55 = vmul.f32 1.442695, %v2613_v14  ;;  %vm1587_vm4 = vcmp.eq.s32.totalorder %v4496_v34, %v7823_v25  ;;  %v3986_v8 = vpop.eup %3985  ;;  %4011 = vpow2.f32 %v2853_v60  ;;  %1842 = vadd.xlane.f32.xlu1 %v6609_v24  ;;  %v7854_v25 = vld [vmem:[#allocation108_spill] sm:$0xff] }
 0x2a2   :  { %v2863_v30 = vmul.f32 1.442695, %v2614_v16  ;;  %v2617_v18 = vsub.f32 %v7842_v41, %v6821_v7  ;;  %v2618_v6 = vsub.f32 %v7843_v0, %v6821_v7  ;;  %v3988_v56 = vpop.eup %3987  ;;  %4013 = vpow2.f32 %v2855_v63 }
 0x2a3   :  { %v2994_v44 = vadd.f32 %v3984_v53, %v2993_v9  ;;  %v2998_v11 = vadd.f32 %v3986_v8, %v2997_v4  ;;  %v3002_v12 = vadd.f32 %v3982_v46, %v3980_v2  ;;  %vm1594_vm5 = vcmp.eq.s32.totalorder %v4493_v33, %v7836_v19  ;;  %v3990_v59 = vpop.eup %3989  ;;  %v7846_v46 = vld [vmem:[#allocation103_spill] sm:$0xff]  ;;  %v7847_v53 = vld [vmem:[#allocation106_spill] sm:$0xff] }
 0x2a4   :  { %4015 = vpow2.f32 %v2843_v31  ;;  %v2851_v62 = vmul.f32 1.442695, %v2608_v15  ;;  %v2612_v5 = vsub.f32 %v7844_v52, %v6772_v35  ;;  %v1714_v26 = vsel %vm1586_vm1, %v7841_v22, 0.0  ;;  %v3992_v10 = vpop.eup %3991 }
 0x2a5   :  { %4017 = vpow2.f32 %v2849_v37  ;;  %v2857_v24 = vmul.f32 1.442695, %v2611_v58  ;;  %v2615_v42 = vsub.f32 %v7845_v23, %v6796_v36  ;;  %2995 = vadd.xlane.f32.xlu0 %v2994_v44  ;;  %v1870_v39 = vadd.f32 %v1869_v48, %v1714_v26  ;;  %v3994_v50 = vpop.eup %3993  ;;  %1852 = vadd.xlane.f32.xlu1 %v6690_v17  ;;  %v7848_v58 = vld [vmem:[#allocation115_spill] sm:$0xff] }
 0x2a6   :  { %v1721_v14 = vsel %vm1593_vm2, %v7843_v0, 0.0  ;;  %4019 = vpow2.f32 %v2861_v55  ;;  %v2869_v35 = vmul.f32 1.442695, %v2617_v18  ;;  %v2871_v32 = vmul.f32 1.442695, %v2618_v6  ;;  %v3996_v60 = vpop.eup %3995  ;;  %v7849_v55 = vld [vmem:[#allocation116_spill] sm:$0xff] }
 0x2a7   :  { %4021 = vpow2.f32 %v2863_v30  ;;  %v2999_v63 = vadd.f32 %v3992_v10, %v2998_v11  ;;  %v3003_v16 = vadd.f32 %v3994_v50, %v3002_v12  ;;  %v3007_v2 = vadd.f32 %v3990_v59, %v3988_v56  ;;  %v3998_v51 = vpop.eup %3997  ;;  %v7851_v18 = vld [vmem:[#allocation117_spill] sm:$0xff]  ;;  %v1351_v59 = vld [vmem:[#allocation4 + $0x58] sm:$0xff]  ;;  %v1783_v50 = vpop.xlane.xlu1 %1782 }
 0x2a8   :  { %v1720_v9 = vsel %vm1592_vm3, %v7842_v41, 0.0  ;;  %4023 = vpow2.f32 %v2851_v62  ;;  %v2859_v4 = vmul.f32 1.442695, %v2612_v5  ;;  %v2616_v31 = vsub.f32 %v7846_v46, %v6796_v36  ;;  %v4000_v15 = vpop.eup %3999  ;;  %v7852_v41 = vld [vmem:[#allocation119_spill] sm:$0xff] }
 0x2a9   :  { %4025 = vpow2.f32 %v2857_v24  ;;  %v2865_v48 = vmul.f32 1.442695, %v2615_v42  ;;  %v2619_v17 = vsub.f32 %v7847_v53, %v6821_v7  ;;  %3000 = vadd.xlane.f32.xlu0 %v2999_v63  ;;  %v1879_v37 = vadd.f32 %v1721_v14, %v1720_v9  ;;  %v4002_v22 = vpop.eup %4001  ;;  %1862 = vadd.xlane.f32.xlu1 %v6792_v28 }
 0x2aa   :  { %v7850_v8 = vsub.f32 %v7848_v58, %v7849_v55  ;;  %v7853_v0 = vsub.f32 %v7851_v18, %v7852_v41  ;;  %4027 = vpow2.f32 %v2869_v35  ;;  %v1715_v36 = vsel %vm1587_vm4, %v7844_v52, 0.0  ;;  %v4004_v56 = vpop.eup %4003  ;;  %v7858_v18 = vld [vmem:[#allocation121_spill] sm:$0xff]  ;;  %v7859_v41 = vld [vmem:[#allocation122_spill] sm:$0xff] }
 0x2ab   :  { %4029 = vpow2.f32 %v2871_v32  ;;  %v3004_v44 = vadd.f32 %v4000_v15, %v3003_v16  ;;  %v3008_v11 = vadd.f32 %v4002_v22, %v3007_v2  ;;  %v3012_v12 = vadd.f32 %v3998_v51, %v3996_v60  ;;  %v4006_v62 = vpop.eup %4005  ;;  %v1352_v16 = vld [vmem:[#allocation4 + $0x60] sm:$0xff]  ;;  %v7855_v51 = vld [vmem:[#allocation118_spill] sm:$0xff] }
 0x2ac   :  { %v2205_v30 = vmul.f32 1.442695, %v7850_v8  ;;  %v2207_v6 = vmul.f32 1.442695, %v7853_v0  ;;  %4031 = vpow2.f32 %v2859_v4  ;;  %v2867_v5 = vmul.f32 1.442695, %v2616_v31  ;;  %v4008_v24 = vpop.eup %4007 }
 0x2ad   :  { %v1871_v26 = vadd.f32 %v1870_v39, %v1715_v36  ;;  %v1722_v10 = vsel %vm1594_vm5, %v7847_v53, 0.0  ;;  %4033 = vpow2.f32 %v2865_v48  ;;  %v2620_v52 = vsub.f32 %v7854_v25, %v6821_v7  ;;  %3005 = vadd.xlane.f32.xlu0 %v3004_v44  ;;  %v4010_v14 = vpop.eup %4009  ;;  %v7856_v7 = vld [vmem:[#allocation120_spill] sm:$0xff]  ;;  %v1788_v53 = vpop.xlane.xlu1 %1787 }
 0x2ae   :  { %v2873_v42 = vmul.f32 1.442695, %v2619_v17  ;;  %v1880_v28 = vadd.f32 %v1879_v37, %v1722_v10  ;;  %4035 = vpow2.f32 %v2205_v30  ;;  %vm1595_vm6 = vcmp.eq.s32.totalorder %v4496_v34, %v7836_v19  ;;  %v4012_v35 = vpop.eup %4011  ;;  %v7861_v10 = vld [vmem:[#allocation104_spill] sm:$0xff] }
 0x2af   :  { %v1895_v39 = vadd.f32 %v1783_v50, %v1351_v59  ;;  %4037 = vpow2.f32 %v2207_v6  ;;  %1872 = vadd.xlane.f32.xlu1 %v1871_v26  ;;  %v3009_v32 = vadd.f32 %v4008_v24, %v3008_v11  ;;  %v3013_v60 = vadd.f32 %v4010_v14, %v3012_v12  ;;  %v4014_v2 = vpop.eup %4013  ;;  %v2269_v14 = vld [vmem:[#allocation3] sm:$0xff] }
 0x2b0   :  { %v3017_v63 = vadd.f32 %v4006_v62, %v4004_v56  ;;  %v7857_v9 = vsub.f32 %v7855_v51, %v7856_v7  ;;  %4039 = vpow2.f32 %v2867_v5  ;;  %v1723_v31 = vsel %vm1595_vm6, %v7854_v25, 0.0  ;;  %v2270_v51 = vld [vmem:[#allocation3 + $0x8] sm:$0xff] }
 0x2b1   :  { %1928 = vst.msk [vmem:[#allocation4 + $0x58] sm:$0xff] %vm24_vm11, %v1895_v39  ;;  %v4016_v15 = vpop.eup %4015  ;;  %4041 = vpow2.f32 %v2873_v42  ;;  %v2875_v19 = vmul.f32 1.442695, %v2620_v52  ;;  %v1881_v48 = vadd.f32 %v1880_v28, %v1723_v31  ;;  %3010 = vadd.xlane.f32.xlu0 %v3009_v32  ;;  %v1896_v37 = vadd.f32 %v1788_v53, %v1352_v16  ;;  %v7864_v16 = vld [vmem:[#allocation126_spill] sm:$0xff] }
 0x2b2   :  { %v2209_v4 = vmul.f32 1.442695, %v7857_v9  ;;  %v4018_v17 = vpop.eup %4017  ;;  %v3014_v58 = vadd.f32 %v4016_v15, %v3013_v60  ;;  %v3022_v8 = vadd.f32 %v4014_v2, %v4012_v35  ;;  %v7860_v0 = vsub.f32 %v7858_v18, %v7859_v41  ;;  %v7862_v60 = vld [vmem:[#allocation109_spill] sm:$0xff]  ;;  %v2271_v18 = vld [vmem:[#allocation3 + $0x10] sm:$0xff] }
 0x2b3   :  { %v4020_v22 = vpop.eup %4019  ;;  %1882 = vadd.xlane.f32.xlu1 %v1881_v48  ;;  %v3018_v55 = vadd.f32 %v4018_v17, %v3017_v63  ;;  %1929 = vst.msk [vmem:[#allocation4 + $0x60] sm:$0xff] %vm24_vm11, %v1896_v37  ;;  %vm1565_vm7 = vcmp.eq.s32.totalorder %v4484_v27, %v7861_v10  ;;  %vm1564_vm8 = vcmp.eq.s32.totalorder %v4476_v21, %v7861_v10  ;;  %v7863_v63 = vld [vmem:[#allocation124_spill] sm:$0xff] }
 0x2b4   :  { %v4022_v30 = vpop.eup %4021  ;;  %4043 = vpow2.f32 %v2209_v4  ;;  %v2211_v6 = vmul.f32 1.442695, %v7860_v0  ;;  %v1693_v25 = vsel %vm1565_vm7, %v7820_v13, 0.0  ;;  %v1692_v35 = vsel %vm1564_vm8, %v7819_v40, 0.0  ;;  %v7869_v0 = vld [vmem:[#allocation111_spill] sm:$0xff] }
 0x2b5   :  { %v4024_v36 = vpop.eup %4023  ;;  %4045 = vpow2.f32 %v2875_v19  ;;  %3015 = vadd.xlane.f32.xlu0 %v3014_v58  ;;  %v3027_v59 = vadd.f32 %v4022_v30, %v4020_v22  ;;  %vm1573_vm9 = vcmp.eq.s32.totalorder %v4484_v27, %v7862_v60  ;;  %v7865_v2 = vsub.f32 %v7863_v63, %v7864_v16  ;;  %v7866_v22 = vld [vmem:[#allocation123_spill] sm:$0xff]  ;;  %v7867_v58 = vld [vmem:[#allocation125_spill] sm:$0xff] }
 0x2b6   :  { %v4026_v56 = vpop.eup %4025  ;;  %v3019_v11 = vadd.f32 %v4024_v36, %v3018_v55  ;;  %4047 = vpow2.f32 %v2211_v6  ;;  %v1844_v7 = vadd.f32 %v1693_v25, %v1692_v35  ;;  %v1701_v9 = vsel %vm1573_vm9, %v7827_v3, 0.0 }
 0x2b7   :  { %v4028_v44 = vpop.eup %4027  ;;  %v3023_v12 = vadd.f32 %v4026_v56, %v3022_v8  ;;  %v2213_v13 = vmul.f32 1.442695, %v7865_v2  ;;  %vm1572_vm10 = vcmp.eq.s32.totalorder %v4476_v21, %v7862_v60  ;;  %vm1566_vm12 = vcmp.eq.s32.totalorder %v4493_v33, %v7861_v10 }
 0x2b8   :  { %v4030_v62 = vpop.eup %4029  ;;  %v1700_v48 = vsel %vm1572_vm10, %v7826_v57, 0.0  ;;  %v7868_v3 = vsub.f32 %v7866_v22, %v7867_v58  ;;  %v1694_v30 = vsel %vm1566_vm12, %v7825_v43, 0.0  ;;  %vm1581_vm13 = vcmp.eq.s32.totalorder %v4484_v27, %v7869_v0  ;;  %v7870_v43 = vld [vmem:[#allocation114_spill] sm:$0xff] }
 0x2b9   :  { %v4032_v5 = vpop.eup %4031  ;;  %3020 = vadd.xlane.f32.xlu0 %v3019_v11  ;;  %v3032_v28 = vadd.f32 %v4030_v62, %v4028_v44  ;;  %4049 = vpow2.f32 %v2213_v13  ;;  %v1854_v41 = vadd.f32 %v1701_v9, %v1700_v48  ;;  %v1845_v36 = vadd.f32 %v1844_v7, %v1694_v30  ;;  %v7877_v13 = vld [vmem:[#allocation130_spill] sm:$0xff] }
 0x2ba   :  { %v4034_v26 = vpop.eup %4033  ;;  %v3024_v52 = vadd.f32 %v4032_v5, %v3023_v12  ;;  %v2881_v40 = vpop.xlane.xlu0 %2880  ;;  %v2215_v55 = vmul.f32 1.442695, %v7868_v3  ;;  %v1709_v56 = vsel %vm1581_vm13, %v7833_v38, 0.0  ;;  %vm1567_vm14 = vcmp.eq.s32.totalorder %v4496_v34, %v7861_v10  ;;  %v2272_v12 = vld [vmem:[#allocation3 + $0x18] sm:$0xff]  ;;  %v7871_v10 = vld [vmem:[#allocation129_spill] sm:$0xff]  ;;  %v2274_v48 = vld [vmem:[#allocation3 + $0x28] sm:$0xff] }
 0x2bb   :  { %v4036_v24 = vpop.eup %4035  ;;  %v3028_v42 = vadd.f32 %v4034_v26, %v3027_v59  ;;  %v2886_v8 = vpop.xlane.xlu1 %2885  ;;  %vm1574_vm15 = vcmp.eq.s32.totalorder %v4493_v33, %v7862_v60  ;;  %vm1580_vm0 = vcmp.eq.s32.totalorder %v4476_v21, %v7869_v0  ;;  %vm1589_vm1 = vcmp.eq.s32.totalorder %v4484_v27, %v7870_v43  ;;  %v2275_v3 = vld [vmem:[#allocation3 + $0x30] sm:$0xff] }
 0x2bc   :  { %v4038_v50 = vpop.eup %4037  ;;  %v2301_v15 = vmul.f32 %v4036_v24, %v2269_v14  ;;  %v1702_v38 = vsel %vm1574_vm15, %v7831_v61, 0.0  ;;  %v1708_v59 = vsel %vm1580_vm0, %v7832_v47, 0.0  ;;  %4051 = vpow2.f32 %v2215_v55  ;;  %v7872_v24 = vld [vmem:[#allocation131_spill] sm:$0xff]  ;;  %v7880_v55 = vld [vmem:[#allocation134_spill] sm:$0xff] }
 0x2bd   :  { %v4040_v39 = vpop.eup %4039  ;;  %3025 = vadd.xlane.f32.xlu0 %v3024_v52  ;;  %v2302_v53 = vmul.f32 %v4038_v50, %v2270_v51  ;;  %v1695_v62 = vsel %vm1567_vm14, %v7829_v20, 0.0  ;;  %v1855_v26 = vadd.f32 %v1854_v41, %v1702_v38  ;;  %v7873_v25 = vsub.f32 %v7871_v10, %v7872_v24  ;;  %v7878_v51 = vld [vmem:[#allocation132_spill] sm:$0xff]  ;;  %v7886_v24 = vld [vmem:[#allocation133_spill] sm:$0xff] }
 0x2be   :  { %v4042_v32 = vpop.eup %4041  ;;  %v3029_v4 = vadd.f32 %v4040_v39, %v3028_v42  ;;  %v3037_v17 = vadd.f32 %v2881_v40, %v2301_v15  ;;  %v1846_v42 = vadd.f32 %v1845_v36, %v1695_v62  ;;  %v1717_v50 = vsel %vm1589_vm1, %v7839_v49, 0.0  ;;  %v2273_v15 = vld [vmem:[#allocation3 + $0x20] sm:$0xff] }
 0x2bf   :  { %v3033_v31 = vadd.f32 %v4042_v32, %v3032_v28  ;;  %v3038_v6 = vadd.f32 %v2886_v8, %v2302_v53  ;;  %v2891_v5 = vpop.xlane.xlu1 %2890  ;;  %v2217_v52 = vmul.f32 1.442695, %v7873_v25  ;;  %v1864_v28 = vadd.f32 %v1709_v56, %v1708_v59  ;;  %v7874_v32 = vld [vmem:[#allocation127_spill] sm:$0xff]  ;;  %v7881_v8 = vld [vmem:[#allocation136_spill] sm:$0xff]  ;;  %v7884_v62 = vld [vmem:[#allocation141_spill] sm:$0xff] }
 0x2c0   :  { %3069 = vst.msk [vmem:[#allocation3] sm:$0xff] %vm24_vm11, %v3037_v17  ;;  %vm1575_vm2 = vcmp.eq.s32.totalorder %v4496_v34, %v7862_v60  ;;  %vm1588_vm3 = vcmp.eq.s32.totalorder %v4476_v21, %v7870_v43  ;;  %vm1582_vm4 = vcmp.eq.s32.totalorder %v4493_v33, %v7869_v0  ;;  %v7875_v60 = vld [vmem:[#allocation128_spill] sm:$0xff]  ;;  %vm1583_vm5 = vcmp.eq.s32.totalorder %v4496_v34, %v7869_v0  ;;  %v7883_v59 = vld [vmem:[#allocation139_spill] sm:$0xff] }
 0x2c1   :  { %v4044_v19 = vpop.eup %4043  ;;  %3030 = vadd.xlane.f32.xlu0 %v3029_v4  ;;  %3070 = vst.msk [vmem:[#allocation3 + $0x8] sm:$0xff] %vm24_vm11, %v3038_v6  ;;  %v2896_v20 = vpop.xlane.xlu0 %2895  ;;  %v1703_v61 = vsel %vm1575_vm2, %v7834_v29, 0.0  ;;  %v1716_v47 = vsel %vm1588_vm3, %v7838_v45, 0.0  ;;  %v1710_v35 = vsel %vm1582_vm4, %v7837_v1, 0.0  ;;  %v7876_v63 = vsub.f32 %v7874_v32, %v7875_v60  ;;  %v2276_v0 = vld [vmem:[#allocation3 + $0x38] sm:$0xff]  ;;  %v7887_v25 = vld [vmem:[#allocation135_spill] sm:$0xff] }
 0x2c2   :  { %v4046_v37 = vpop.eup %4045  ;;  %v2303_v11 = vmul.f32 %v4044_v19, %v2271_v18  ;;  %v1856_v49 = vadd.f32 %v1855_v26, %v1703_v61  ;;  %4053 = vpow2.f32 %v2217_v52  ;;  %v1865_v21 = vadd.f32 %v1864_v28, %v1710_v35  ;;  %v7889_v28 = vld [vmem:[#allocation143_spill] sm:$0xff]  ;;  %v7893_v35 = vld [vmem:[#allocation138_spill] sm:$0xff] }
 0x2c3   :  { %v3034_v57 = vadd.f32 %v4046_v37, %v3033_v31  ;;  %v4048_v44 = vpop.eup %4047  ;;  %v2219_v16 = vmul.f32 1.442695, %v7876_v63  ;;  %v1874_v2 = vadd.f32 %v1717_v50, %v1716_v47  ;;  %vm1590_vm6 = vcmp.eq.s32.totalorder %v4493_v33, %v7870_v43  ;;  %v7890_v50 = vld [vmem:[#allocation145_spill] sm:$0xff]  ;;  %v7895_v63 = vld [vmem:[#allocation146_spill] sm:$0xff] }
 0x2c4   :  { %v3039_v27 = vadd.f32 %v2891_v5, %v2303_v11  ;;  %v2304_v14 = vmul.f32 %v4048_v44, %v2272_v12  ;;  %v1711_v29 = vsel %vm1583_vm5, %v7840_v54, 0.0  ;;  %v1718_v1 = vsel %vm1590_vm6, %v7845_v23, 0.0  ;;  %v2278_v44 = vld [vmem:[#allocation3 + $0x48] sm:$0xff] }
 0x2c5   :  { %3035 = vadd.xlane.f32.xlu0 %v3034_v57  ;;  %4055 = vpow2.f32 %v2219_v16  ;;  %v7879_v7 = vsub.f32 %v7877_v13, %v7878_v51  ;;  %v1866_v4 = vadd.f32 %v1865_v21, %v1711_v29  ;;  %v1875_v31 = vadd.f32 %v1874_v2, %v1718_v1  ;;  %v7896_v16 = vld [vmem:[#allocation148_spill] sm:$0xff]  ;;  %v2279_v1 = vld [vmem:[#allocation3 + $0x50] sm:$0xff]  ;;  %v7899_v13 = vld [vmem:[#allocation142_spill] sm:$0xff] }
 0x2c6   :  { %3071 = vst.msk [vmem:[#allocation3 + $0x10] sm:$0xff] %vm24_vm11, %v3039_v27  ;;  %v3040_v39 = vadd.f32 %v2896_v20, %v2304_v14  ;;  %v4050_v45 = vpop.eup %4049  ;;  %vm1591_vm7 = vcmp.eq.s32.totalorder %v4496_v34, %v7870_v43  ;;  %v7882_v34 = vsub.f32 %v7880_v55, %v7881_v8  ;;  %v7885_v5 = vsub.f32 %v7883_v59, %v7884_v62  ;;  %v2277_v27 = vld [vmem:[#allocation3 + $0x40] sm:$0xff]  ;;  %v7910_v62 = vld [vmem:[#allocation150_spill] sm:$0xff] }
 0x2c7   :  { %v2223_v9 = vmul.f32 1.442695, %v7879_v7  ;;  %v1719_v40 = vsel %vm1591_vm7, %v7846_v46, 0.0  ;;  %v2305_v33 = vmul.f32 %v4050_v45, %v2273_v15  ;;  %v7888_v52 = vsub.f32 %v7886_v24, %v7887_v25  ;;  %v7898_v45 = vld [vmem:[#allocation140_spill] sm:$0xff]  ;;  %v1354_v25 = vld [vmem:[#allocation4 + $0x70] sm:$0xff] }
 0x2c8   :  { %3072 = vst.msk [vmem:[#allocation3 + $0x18] sm:$0xff] %vm24_vm11, %v3040_v39  ;;  %v1876_v54 = vadd.f32 %v1875_v31, %v1719_v40  ;;  %v2221_v30 = vmul.f32 1.442695, %v7882_v34  ;;  %v2225_v26 = vmul.f32 1.442695, %v7885_v5  ;;  %v7891_v14 = vsub.f32 %v7889_v28, %v7890_v50  ;;  %v2280_v15 = vld [vmem:[#allocation3 + $0x58] sm:$0xff] }
 0x2c9   :  { %1847 = vadd.xlane.f32.xlu0 %v1846_v42  ;;  %v4052_v19 = vpop.eup %4051  ;;  %4057 = vpow2.f32 %v2223_v9  ;;  %v2227_v42 = vmul.f32 1.442695, %v7888_v52  ;;  %v7897_v21 = vsub.f32 %v7895_v63, %v7896_v16  ;;  %v7900_v51 = vsub.f32 %v7898_v45, %v7899_v13  ;;  %v7901_v40 = vld [vmem:[#allocation149_spill] sm:$0xff]  ;;  %v2283_v52 = vld [vmem:[#allocation3 + $0x70] sm:$0xff]  ;;  %v1355_v45 = vld [vmem:[#allocation4 + $0x78] sm:$0xff] }
 0x2ca   :  { %v2306_v17 = vmul.f32 %v4052_v19, %v2274_v48  ;;  %4059 = vpow2.f32 %v2221_v30  ;;  %v2229_v20 = vmul.f32 1.442695, %v7891_v14  ;;  %v7911_v5 = vld [vmem:[#allocation153_spill] sm:$0xff]  ;;  %v7919_v16 = vld [vmem:[#allocation159_spill] sm:$0xff]  ;;  %v2284_v13 = vld [vmem:[#allocation3 + $0x78] sm:$0xff] }
 0x2cb   :  { %4061 = vpow2.f32 %v2225_v26  ;;  %v2233_v2 = vmul.f32 1.442695, %v7897_v21  ;;  %v2235_v7 = vmul.f32 1.442695, %v7900_v51  ;;  %v7912_v26 = vsub.f32 %v7910_v62, %v7911_v5  ;;  %v7920_v21 = vld [vmem:[#allocation160_spill] sm:$0xff]  ;;  %v7922_v51 = vld [vmem:[#allocation161_spill] sm:$0xff] }
 0x2cc   :  { %v2901_v23 = vpop.xlane.xlu1 %2900  ;;  %4063 = vpow2.f32 %v2227_v42  ;;  %v7913_v42 = vld [vmem:[#allocation155_spill] sm:$0xff]  ;;  %v7932_v62 = vld [vmem:[#allocation168_spill] sm:$0xff] }
 0x2cd   :  { %1857 = vadd.xlane.f32.xlu0 %v1856_v49  ;;  %v3041_v53 = vadd.f32 %v2901_v23, %v2305_v33  ;;  %v7892_v49 = vld [vmem:[#allocation137_spill] sm:$0xff]  ;;  %4065 = vpow2.f32 %v2229_v20  ;;  %v7902_v33 = vld [vmem:[#allocation151_spill] sm:$0xff] }
 0x2ce   :  { %v7894_v32 = vsub.f32 %v7892_v49, %v7893_v35  ;;  %v7903_v19 = vsub.f32 %v7901_v40, %v7902_v33  ;;  %v3170_v35 = vld [vmem:[#allocation3 + $0x10] sm:$0xff]  ;;  %v7926_v33 = vld [vmem:[#allocation164_spill] sm:$0xff] }
 0x2cf   :  { %3073 = vst.msk [vmem:[#allocation3 + $0x20] sm:$0xff] %vm24_vm11, %v3041_v53  ;;  %v4054_v22 = vpop.eup %4053  ;;  %v2281_v53 = vld [vmem:[#allocation3 + $0x60] sm:$0xff]  ;;  %v7925_v40 = vld [vmem:[#allocation163_spill] sm:$0xff] }
 0x2d0   :  { %v2307_v46 = vmul.f32 %v4054_v22, %v2275_v3  ;;  %v2231_v60 = vmul.f32 1.442695, %v7894_v32  ;;  %v7904_v22 = vld [vmem:[#allocation144_spill] sm:$0xff] }
 0x2d1   :  { %1867 = vadd.xlane.f32.xlu0 %v1866_v4  ;;  %v2906_v37 = vpop.xlane.xlu1 %2905 }
 0x2d2   :  { %v3042_v58 = vadd.f32 %v2906_v37, %v2306_v17  ;;  %v4056_v18 = vpop.eup %4055  ;;  %4067 = vpow2.f32 %v2231_v60 }
 0x2d3   :  { %v2308_v6 = vmul.f32 %v4056_v18, %v2276_v0  ;;  %4069 = vpow2.f32 %v2233_v2  ;;  %v1353_v18 = vld [vmem:[#allocation4 + $0x68] sm:$0xff]  ;;  %v3168_v0 = vld [vmem:[#allocation3] sm:$0xff]  ;;  %v7921_v2 = vsub.f32 %v7919_v16, %v7920_v21  ;;  %v2288_v16 = vld [vmem:[#allocation3 + $0x98] sm:$0xff] }
 0x2d4   :  { %3074 = vst.msk [vmem:[#allocation3 + $0x28] sm:$0xff] %vm24_vm11, %v3042_v58  ;;  %4071 = vpow2.f32 %v2235_v7  ;;  %v7905_v58 = vld [vmem:[#allocation147_spill] sm:$0xff]  ;;  %v7923_v7 = vld [vmem:[#allocation162_spill] sm:$0xff] }
 0x2d5   :  { %1877 = vadd.xlane.f32.xlu0 %v1876_v54  ;;  %v2237_v54 = vmul.f32 1.442695, %v7903_v19  ;;  %v7906_v3 = vsub.f32 %v7904_v22, %v7905_v58  ;;  %v7927_v19 = vsub.f32 %v7925_v40, %v7926_v33  ;;  %v1356_v22 = vld [vmem:[#allocation4 + $0x80] sm:$0xff] }
 0x2d6   :  { %v2911_v41 = vpop.xlane.xlu1 %2910  ;;  %v4058_v36 = vpop.eup %4057  ;;  %v2285_v58 = vld [vmem:[#allocation3 + $0x80] sm:$0xff] }
 0x2d7   :  { %v3043_v57 = vadd.f32 %v2911_v41, %v2307_v46  ;;  %v2310_v11 = vmul.f32 %v4058_v36, %v2278_v44  ;;  %v4060_v10 = vpop.eup %4059  ;;  %v2239_v55 = vmul.f32 1.442695, %v7906_v3  ;;  %4073 = vpow2.f32 %v2237_v54  ;;  %v2282_v41 = vld [vmem:[#allocation3 + $0x68] sm:$0xff]  ;;  %v3172_v3 = vld [vmem:[#allocation3 + $0x20] sm:$0xff] }
 0x2d8   :  { %v2309_v61 = vmul.f32 %v4060_v10, %v2277_v27  ;;  %v4062_v29 = vpop.eup %4061  ;;  %v7908_v44 = vld [vmem:[#allocation154_spill] sm:$0xff]  ;;  %v2243_v10 = vmul.f32 1.442695, %v7912_v26  ;;  %v7914_v27 = vld [vmem:[#allocation157_spill] sm:$0xff]  ;;  %v2253_v54 = vmul.f32 1.442695, %v7927_v19 }
 0x2d9   :  { %3075 = vst.msk [vmem:[#allocation3 + $0x30] sm:$0xff] %vm24_vm11, %v3043_v57  ;;  %v2311_v9 = vmul.f32 %v4062_v29, %v2279_v1  ;;  %v4064_v4 = vpop.eup %4063  ;;  %4075 = vpow2.f32 %v2239_v55  ;;  %v7915_v28 = vsub.f32 %v7913_v42, %v7914_v27  ;;  %v2249_v29 = vmul.f32 1.442695, %v7921_v2  ;;  %v3136_v2 = vld [vmem:[#allocation2] sm:$0xff] }
 0x2da   :  { %v4066_v48 = vpop.eup %4065  ;;  %v2312_v17 = vmul.f32 %v4064_v4, %v2280_v15  ;;  %4077 = vlog2.f32 %v3168_v0  ;;  %v3360_v40 = vld [vmem:[#allocation4] sm:$0xff] }
 0x2db   :  { %v2916_v56 = vpop.xlane.xlu1 %2915  ;;  %v2313_v34 = vmul.f32 %v4066_v48, %v2281_v53  ;;  %v2245_v50 = vmul.f32 1.442695, %v7915_v28  ;;  %v1358_v28 = vld [vmem:[#allocation4 + $0x90] sm:$0xff] }
 0x2dc   :  { %v3044_v43 = vadd.f32 %v2916_v56, %v2308_v6  ;;  %v3169_v6 = vld [vmem:[#allocation3 + $0x8] sm:$0xff]  ;;  %v7907_v56 = vld [vmem:[#allocation152_spill] sm:$0xff] }
 0x2dd   :  { %4079 = vlog2.f32 %v3169_v6 }
 0x2de   :  { %3076 = vst.msk [vmem:[#allocation3 + $0x38] sm:$0xff] %vm24_vm11, %v3044_v43  ;;  %v7909_v43 = vsub.f32 %v7907_v56, %v7908_v44  ;;  %v1357_v56 = vld [vmem:[#allocation4 + $0x88] sm:$0xff] }
 0x2df   :  { %v2926_v12 = vpop.xlane.xlu1 %2925  ;;  %v4068_v30 = vpop.eup %4067  ;;  %v2286_v44 = vld [vmem:[#allocation3 + $0x88] sm:$0xff] }
 0x2e0   :  { %v3046_v38 = vadd.f32 %v2926_v12, %v2310_v11  ;;  %v2241_v11 = vmul.f32 1.442695, %v7909_v43  ;;  %v4070_v59 = vpop.eup %4069 }
 0x2e1   :  { %v2315_v60 = vmul.f32 %v4070_v59, %v2283_v52  ;;  %v4072_v63 = vpop.eup %4071  ;;  %v7931_v59 = vld [vmem:[#allocation167_spill] sm:$0xff] }
 0x2e2   :  { %3078 = vst.msk [vmem:[#allocation3 + $0x48] sm:$0xff] %vm24_vm11, %v3046_v38  ;;  %v2314_v38 = vmul.f32 %v4068_v30, %v2282_v41  ;;  %4081 = vpow2.f32 %v2241_v11  ;;  %v2316_v53 = vmul.f32 %v4072_v63, %v2284_v13  ;;  %v7929_v30 = vld [vmem:[#allocation166_spill] sm:$0xff]  ;;  %v3174_v11 = vld [vmem:[#allocation3 + $0x30] sm:$0xff]  ;;  %v7933_v5 = vsub.f32 %v7931_v59, %v7932_v62 }
 0x2e3   :  { %4083 = vpow2.f32 %v2243_v10  ;;  %v3173_v41 = vld [vmem:[#allocation3 + $0x28] sm:$0xff]  ;;  %v3138_v59 = vld [vmem:[#allocation2 + $0x10] sm:$0xff] }
 0x2e4   :  { %4085 = vpow2.f32 %v2245_v50  ;;  %v2257_v26 = vmul.f32 1.442695, %v7933_v5  ;;  %v2287_v50 = vld [vmem:[#allocation3 + $0x90] sm:$0xff] }
 0x2e5   :  { %4087 = vlog2.f32 %v3170_v35  ;;  %v3175_v10 = vld [vmem:[#allocation3 + $0x38] sm:$0xff] }
 0x2e9   :  { %v3177_v19 = vld [vmem:[#allocation3 + $0x48] sm:$0xff] }
 0x2ec   :  { %v2921_v47 = vpop.xlane.xlu0 %2920 }
 0x2ed   :  { %v3045_v39 = vadd.f32 %v2921_v47, %v2309_v61  ;;  %v7916_v61 = vld [vmem:[#allocation156_spill] sm:$0xff]  ;;  %v7917_v47 = vld [vmem:[#allocation158_spill] sm:$0xff] }
 0x2ef   :  { %3077 = vst.msk [vmem:[#allocation3 + $0x40] sm:$0xff] %vm24_vm11, %v3045_v39  ;;  %v7918_v39 = vsub.f32 %v7916_v61, %v7917_v47 }
 0x2f1   :  { %v2247_v49 = vmul.f32 1.442695, %v7918_v39 }
 0x2f3   :  { %4089 = vpow2.f32 %v2247_v49 }
 0x2f4   :  { %4091 = vpow2.f32 %v2249_v29  ;;  %v3137_v29 = vld [vmem:[#allocation2 + $0x8] sm:$0xff] }
 0x2f6   :  { %v3176_v47 = vld [vmem:[#allocation3 + $0x40] sm:$0xff] }
 0x2fa   :  { %v2931_v31 = vpop.xlane.xlu1 %2930 }
 0x2fb   :  { %v3047_v23 = vadd.f32 %v2931_v31, %v2311_v9  ;;  %v7924_v9 = vsub.f32 %v7922_v51, %v7923_v7  ;;  %v7030_v51 = vld [vmem:[%s7294_s3 + $0x8] sm:$0xff] }
 0x2fc   :  { %vm3329_vm8 = vcmp.ne.s32.totalorder %v7030_v51, 4294967196  ;;  %v3299_v51 = vld [vmem:[%s7294_s3 + $0x18] sm:$0xff] }
 0x2fd   :  { %3079 = vst.msk [vmem:[#allocation3 + $0x50] sm:$0xff] %vm24_vm11, %v3047_v23  ;;  %v2251_v4 = vmul.f32 1.442695, %v7924_v9  ;;  %v3171_v23 = vld [vmem:[#allocation3 + $0x18] sm:$0xff]  ;;  %vm3331_vm12 = vcmp.ne.s32.totalorder %v3299_v51, 4294967196  ;;  %v3304_v51 = vld [vmem:[%s7294_s3 + $0x40] sm:$0xff] }
 0x2fe   :  { %v2936_v37 = vpop.xlane.xlu1 %2935  ;;  %vm3336_vm1 = vcmp.ne.s32.totalorder %v3304_v51, 4294967196 }
 0x2ff   :  { %v3048_v8 = vadd.f32 %v2936_v37, %v2312_v17  ;;  %v4074_v17 = vpop.eup %4073  ;;  %4093 = vpow2.f32 %v2251_v4 }
 0x300   :  { %v2941_v46 = vpop.xlane.xlu0 %2940  ;;  %4095 = vlog2.f32 %v3171_v23  ;;  %v4076_v6 = vpop.eup %4075  ;;  %v2290_v23 = vld [vmem:[#allocation3 + $0xa8] sm:$0xff] }
 0x301   :  { %3080 = vst.msk [vmem:[#allocation3 + $0x58] sm:$0xff] %vm24_vm11, %v3048_v8  ;;  %v3049_v57 = vadd.f32 %v2941_v46, %v2313_v34  ;;  %4097 = vpow2.f32 %v2253_v54  ;;  %v7928_v34 = vld [vmem:[#allocation165_spill] sm:$0xff]  ;;  %v4078_v43 = vpop.eup %4077  ;;  %v2318_v52 = vmul.f32 %v4076_v6, %v2286_v44 }
 0x302   :  { %v1793_v36 = vpop.xlane.xlu1 %1792  ;;  %v7930_v46 = vsub.f32 %v7928_v34, %v7929_v30  ;;  %4099 = vlog2.f32 %v3172_v3  ;;  %v3201_v61 = vmul.f32 0.6931472, %v4078_v43  ;;  %v7940_v6 = vld [vmem:[#allocation173_spill] sm:$0xff] }
 0x303   :  { %3081 = vst.msk [vmem:[#allocation3 + $0x60] sm:$0xff] %vm24_vm11, %v3049_v57  ;;  %v1897_v12 = vadd.f32 %v1793_v36, %v1353_v18  ;;  %v2317_v57 = vmul.f32 %v4074_v17, %v2285_v58  ;;  %4101 = vlog2.f32 %v3173_v41  ;;  %v3361_v17 = vld [vmem:[#allocation4 + $0x8] sm:$0xff]  ;;  %v7938_v41 = vld [vmem:[#allocation172_spill] sm:$0xff] }
 0x304   :  { %v2946_v24 = vpop.xlane.xlu0 %2945  ;;  %v2255_v18 = vmul.f32 1.442695, %v7930_v46  ;;  %v3264_v9 = vadd.f32 %v3201_v61, %v3136_v2  ;;  %v2294_v61 = vld [vmem:[#allocation3 + $0xc8] sm:$0xff] }
 0x305   :  { %1930 = vst.msk [vmem:[#allocation4 + $0x68] sm:$0xff] %vm24_vm11, %v1897_v12  ;;  %v3050_v14 = vadd.f32 %v2946_v24, %v2314_v38  ;;  %v4080_v38 = vpop.eup %4079 }
 0x306   :  { %v1798_v20 = vpop.xlane.xlu1 %1797  ;;  %4103 = vpow2.f32 %v2255_v18  ;;  %v4082_v42 = vpop.eup %4081  ;;  %v7937_v18 = vld [vmem:[#allocation171_spill] sm:$0xff]  ;;  %v3392_v5 = vsub.f32 %v3264_v9, %v3360_v40 }
 0x307   :  { %3082 = vst.msk [vmem:[#allocation3 + $0x68] sm:$0xff] %vm24_vm11, %v3050_v14  ;;  %v1898_v32 = vadd.f32 %v1798_v20, %v1354_v25  ;;  %4105 = vlog2.f32 %v3174_v11  ;;  %v4084_v14 = vpop.eup %4083  ;;  %v3203_v20 = vmul.f32 0.6931472, %v4080_v38  ;;  %v2319_v63 = vmul.f32 %v4082_v42, %v2287_v50  ;;  %v1360_v11 = vld [vmem:[#allocation4 + $0xa0] sm:$0xff] }
 0x308   :  { %v2951_v1 = vpop.xlane.xlu0 %2950  ;;  %4107 = vlog2.f32 %v3175_v10  ;;  %v4086_v49 = vpop.eup %4085  ;;  %v2320_v30 = vmul.f32 %v4084_v14, %v2288_v16  ;;  %v2292_v10 = vld [vmem:[#allocation3 + $0xb8] sm:$0xff] }
 0x309   :  { %1931 = vst.msk [vmem:[#allocation4 + $0x70] sm:$0xff] %vm24_vm11, %v1898_v32  ;;  %v3051_v31 = vadd.f32 %v2951_v1, %v2315_v60  ;;  %4109 = vpow2.f32 %v2257_v26  ;;  %v4088_v32 = vpop.eup %4087  ;;  %v3265_v7 = vadd.f32 %v3203_v20, %v3137_v29  ;;  %v3179_v42 = vld [vmem:[#allocation3 + $0x58] sm:$0xff] }
 0x30a   :  { %v1803_v15 = vpop.xlane.xlu1 %1802  ;;  %v4090_v21 = vpop.eup %4089  ;;  %4111 = vlog2.f32 %v3176_v47  ;;  %v3205_v33 = vmul.f32 0.6931472, %v4088_v32  ;;  %v3139_v29 = vld [vmem:[#allocation2 + $0x18] sm:$0xff] }
 0x30b   :  { %3083 = vst.msk [vmem:[#allocation3 + $0x70] sm:$0xff] %vm24_vm11, %v3051_v31  ;;  %v1899_v48 = vadd.f32 %v1803_v15, %v1355_v45  ;;  %v1359_v45 = vld [vmem:[#allocation4 + $0x98] sm:$0xff]  ;;  %v4092_v13 = vpop.eup %4091  ;;  %v2289_v31 = vld [vmem:[#allocation3 + $0xa0] sm:$0xff]  ;;  %v3393_v62 = vsub.f32 %v3265_v7, %v3361_v17  ;;  %4113 = vlog2.f32 %v3177_v19  ;;  %v2322_v14 = vmul.f32 %v4090_v21, %v2290_v23  ;;  %v3362_v21 = vld [vmem:[#allocation4 + $0x10] sm:$0xff] }
 0x30c   :  { %v2956_v37 = vpop.xlane.xlu0 %2955  ;;  %v4094_v15 = vpop.eup %4093  ;;  %v3363_v19 = vld [vmem:[#allocation4 + $0x18] sm:$0xff] }
 0x30d   :  { %1932 = vst.msk [vmem:[#allocation4 + $0x78] sm:$0xff] %vm24_vm11, %v1899_v48  ;;  %v3052_v55 = vadd.f32 %v2956_v37, %v2316_v53  ;;  %v2291_v48 = vld [vmem:[#allocation3 + $0xb0] sm:$0xff]  ;;  %v4096_v53 = vpop.eup %4095  ;;  %v7934_v37 = vld [vmem:[#allocation169_spill] sm:$0xff] }
 0x30e   :  { %v1808_v8 = vpop.xlane.xlu1 %1807  ;;  %v4098_v46 = vpop.eup %4097  ;;  %v7051_v20 = vmul.f32 %v4092_v13, %v2291_v48 }
 0x30f   :  { %3084 = vst.msk [vmem:[#allocation3 + $0x78] sm:$0xff] %vm24_vm11, %v3052_v55  ;;  %v1900_v0 = vadd.f32 %v1808_v8, %v1356_v22  ;;  %v7935_v22 = vld [vmem:[#allocation170_spill] sm:$0xff]  ;;  %v3296_v55 = vld [vmem:[%s7294_s3] sm:$0xff]  ;;  %v3178_v8 = vld [vmem:[#allocation3 + $0x50] sm:$0xff]  ;;  %v4100_v38 = vpop.eup %4099 }
 0x310   :  { %v2961_v36 = vpop.xlane.xlu0 %2960  ;;  %v7936_v58 = vsub.f32 %v7934_v37, %v7935_v22  ;;  %vm3328_vm9 = vcmp.ne.s32.totalorder %v3296_v55, 4294967196  ;;  %4115 = vlog2.f32 %v3178_v8  ;;  %v1362_v8 = vld [vmem:[#allocation4 + $0xb0] sm:$0xff] }
 0x311   :  { %1933 = vst.msk [vmem:[#allocation4 + $0x80] sm:$0xff] %vm24_vm11, %v1900_v0  ;;  %v3053_v12 = vadd.f32 %v2961_v36, %v2317_v57  ;;  %v7939_v0 = vsub.f32 %v7937_v18, %v7938_v41  ;;  %v7941_v36 = vld [vmem:[#allocation174_spill] sm:$0xff]  ;;  %v7944_v18 = vld [vmem:[#allocation176_spill] sm:$0xff] }
 0x312   :  { %v1813_v24 = vpop.xlane.xlu1 %1812  ;;  %v2259_v3 = vmul.f32 1.442695, %v7936_v58 }
 0x313   :  { %3085 = vst.msk [vmem:[#allocation3 + $0x80] sm:$0xff] %vm24_vm11, %v3053_v12  ;;  %v1901_v25 = vadd.f32 %v1813_v24, %v1357_v56  ;;  %v2261_v57 = vmul.f32 1.442695, %v7939_v0  ;;  %v7942_v56 = vsub.f32 %v7940_v6, %v7941_v36  ;;  %v2321_v12 = vmul.f32 %v4086_v49, %v2289_v31  ;;  %v2293_v24 = vld [vmem:[#allocation3 + $0xc0] sm:$0xff] }
 0x314   :  { %v2966_v27 = vpop.xlane.xlu0 %2965  ;;  %4117 = vpow2.f32 %v2259_v3  ;;  %v3209_v49 = vmul.f32 0.6931472, %v4100_v38  ;;  %v7058_v16 = vmul.f32 %v4098_v46, %v2293_v24  ;;  %v3182_v3 = vld [vmem:[#allocation3 + $0x70] sm:$0xff] }
 0x315   :  { %1934 = vst.msk [vmem:[#allocation4 + $0x88] sm:$0xff] %vm24_vm11, %v1901_v25  ;;  %v3054_v39 = vadd.f32 %v2966_v27, %v2318_v52  ;;  %v2263_v44 = vmul.f32 1.442695, %v7942_v56  ;;  %v7048_v25 = vadd.f32 %v3205_v33, %v3138_v59  ;;  %v3207_v52 = vmul.f32 0.6931472, %v4096_v53  ;;  %v2295_v53 = vld [vmem:[#allocation3 + $0xd0] sm:$0xff] }
 0x316   :  { %v1818_v35 = vpop.xlane.xlu1 %1817  ;;  %4119 = vpow2.f32 %v2261_v57  ;;  %v7943_v46 = vld [vmem:[#allocation175_spill] sm:$0xff]  ;;  %v3183_v6 = vld [vmem:[#allocation3 + $0x78] sm:$0xff]  ;;  %v3364_v56 = vld [vmem:[#allocation4 + $0x20] sm:$0xff] }
 0x317   :  { %3086 = vst.msk [vmem:[#allocation3 + $0x88] sm:$0xff] %vm24_vm11, %v3054_v39  ;;  %v1902_v60 = vadd.f32 %v1818_v35, %v1358_v28  ;;  %v4102_v28 = vpop.eup %4101  ;;  %v3298_v39 = vld [vmem:[%s7294_s3 + $0x10] sm:$0xff]  ;;  %v3180_v35 = vld [vmem:[#allocation3 + $0x60] sm:$0xff]  ;;  %4121 = vlog2.f32 %v3179_v42  ;;  %v3394_v9 = vsub.f32 %v7048_v25, %v3362_v21  ;;  %v7945_v41 = vsub.f32 %v7943_v46, %v7944_v18 }
 0x318   :  { %v2971_v1 = vpop.xlane.xlu0 %2970  ;;  %v4104_v47 = vpop.eup %4103  ;;  %4123 = vpow2.f32 %v2263_v44  ;;  %v3211_v31 = vmul.f32 0.6931472, %v4102_v28  ;;  %vm3330_vm10 = vcmp.ne.s32.totalorder %v3298_v39, 4294967196 }
 0x319   :  { %1935 = vst.msk [vmem:[#allocation4 + $0x90] sm:$0xff] %vm24_vm11, %v1902_v60  ;;  %v3055_v4 = vadd.f32 %v2971_v1, %v2319_v63  ;;  %v1361_v60 = vld [vmem:[#allocation4 + $0xa8] sm:$0xff]  ;;  %v7056_v63 = vmul.f32 %v4094_v15, %v2292_v10  ;;  %v4106_v2 = vpop.eup %4105  ;;  %v3425_v1 = vsel %vm3329_vm8, %v3393_v62, 0.0  ;;  %4125 = vlog2.f32 %v3180_v35  ;;  %v3143_v62 = vld [vmem:[#allocation2 + $0x38] sm:$0xff] }
 0x31a   :  { %v1823_v54 = vpop.xlane.xlu1 %1822  ;;  %v4108_v7 = vpop.eup %4107  ;;  %v3181_v15 = vld [vmem:[#allocation3 + $0x68] sm:$0xff]  ;;  %v7069_v48 = vmul.f32 %v4104_v47, %v2294_v61  ;;  %v3457_v17 = vsel %vm24_vm11, %v3425_v1, 0.0  ;;  %v3213_v58 = vmul.f32 0.6931472, %v4106_v2  ;;  %v2265_v0 = vmul.f32 1.442695, %v7945_v41 }
 0x31b   :  { %3087 = vst.msk [vmem:[#allocation3 + $0x90] sm:$0xff] %vm24_vm11, %v3055_v4  ;;  %v1903_v34 = vadd.f32 %v1823_v54, %v1359_v45  ;;  %v3424_v45 = vsel %vm3328_vm9, %v3392_v5, 0.0  ;;  %v3267_v4 = vadd.f32 %v3207_v52, %v3139_v29  ;;  %v4110_v33 = vpop.eup %4109  ;;  %v3140_v54 = vld [vmem:[#allocation2 + $0x20] sm:$0xff]  ;;  %v3215_v57 = vmul.f32 0.6931472, %v4108_v7  ;;  %v3142_v5 = vld [vmem:[#allocation2 + $0x30] sm:$0xff] }
 0x31c   :  { %v3456_v37 = vsel %vm24_vm11, %v3424_v45, 0.0  ;;  %v3268_v22 = vadd.f32 %v3209_v49, %v3140_v54  ;;  %4127 = vlog2.f32 %v3181_v15  ;;  %v3426_v44 = vsel %vm3330_vm10, %v3394_v9, 0.0  ;;  %v3301_v10 = vld [vmem:[%s7294_s3 + $0x28] sm:$0xff]  ;;  %v7090_v52 = vld [vmem:[%s7294_s3 + $0x30] sm:$0xff]  ;;  %v3184_v28 = vld [vmem:[#allocation3 + $0x80] sm:$0xff] }
 0x31d   :  { %v2976_v43 = vpop.xlane.xlu0 %2975  ;;  %1936 = vst.msk [vmem:[#allocation4 + $0x98] sm:$0xff] %vm24_vm11, %v1903_v34  ;;  %v4112_v34 = vpop.eup %4111  ;;  %v7081_v59 = vmul.f32 %v4110_v33, %v2295_v53  ;;  %4129 = vlog2.f32 %v3182_v3  ;;  %v3270_v42 = vadd.f32 %v3213_v58, %v3142_v5  ;;  %v3365_v61 = vld [vmem:[#allocation4 + $0x28] sm:$0xff]  ;;  %v3459_v47 = vsel %vm24_vm11, %v3426_v44, 0.0  ;;  %v3303_v45 = vld [vmem:[%s7294_s3 + $0x38] sm:$0xff]  ;;  %v3366_v9 = vld [vmem:[#allocation4 + $0x30] sm:$0xff] }
 0x31e   :  { %v3056_v26 = vadd.f32 %v2976_v43, %v2320_v30  ;;  %v1828_v27 = vpop.xlane.xlu1 %1827  ;;  %v3141_v30 = vld [vmem:[#allocation2 + $0x28] sm:$0xff]  ;;  %v3395_v43 = vsub.f32 %v3267_v4, %v3363_v19  ;;  %v3396_v25 = vsub.f32 %v3268_v22, %v3364_v56  ;;  %4131 = vlog2.f32 %v3183_v6  ;;  %v4114_v35 = vpop.eup %4113  ;;  %v3144_v4 = vld [vmem:[#allocation2 + $0x40] sm:$0xff]  ;;  %v3146_v5 = vld [vmem:[#allocation2 + $0x50] sm:$0xff] }
 0x31f   :  { %v1904_v50 = vadd.f32 %v1828_v27, %v1360_v11  ;;  %v3300_v11 = vld [vmem:[%s7294_s3 + $0x20] sm:$0xff]  ;;  %v3217_v27 = vmul.f32 0.6931472, %v4112_v34  ;;  %v3271_v39 = vadd.f32 %v3215_v57, %v3143_v62  ;;  %4133 = vpow2.f32 %v2265_v0  ;;  %v4116_v7 = vpop.eup %4115  ;;  %v1367_v62 = vld [vmem:[#allocation4 + $0xd8] sm:$0xff] }
 0x320   :  { %3088 = vst.msk [vmem:[#allocation3 + $0x98] sm:$0xff] %vm24_vm11, %v3056_v26  ;;  %v3458_v26 = vadd.f32 %v3457_v17, %v3456_v37  ;;  %vm3332_vm13 = vcmp.ne.s32.totalorder %v3300_v11, 4294967196  ;;  %v3427_v21 = vsel %vm3331_vm12, %v3395_v43, 0.0  ;;  %vm3333_vm14 = vcmp.ne.s32.totalorder %v3301_v10, 4294967196  ;;  %v1365_v17 = vld [vmem:[#allocation4 + $0xc8] sm:$0xff]  ;;  %v3368_v0 = vld [vmem:[#allocation4 + $0x40] sm:$0xff] }
 0x321   :  { %v2981_v32 = vpop.xlane.xlu0 %2980  ;;  %1937 = vst.msk [vmem:[#allocation4 + $0xa0] sm:$0xff] %vm24_vm11, %v1904_v50  ;;  %vm3334_vm15 = vcmp.ne.s32.totalorder %v7090_v52, 4294967196  ;;  %4135 = vlog2.f32 %v3184_v28  ;;  %v7104_v15 = vpop.eup %4117  ;;  %v3428_v19 = vsel %vm3332_vm13, %v3396_v25, 0.0  ;;  %v3398_v54 = vsub.f32 %v3270_v42, %v3366_v9  ;;  %v7125_v11 = vld [vmem:[%s7294_s3 + $0x48] sm:$0xff]  ;;  %v3370_v9 = vld [vmem:[#allocation4 + $0x50] sm:$0xff] }
 0x322   :  { %v3057_v13 = vadd.f32 %v2981_v32, %v2321_v12  ;;  %v1833_v40 = vpop.xlane.xlu1 %1832  ;;  %v3269_v12 = vadd.f32 %v3211_v31, %v3141_v30  ;;  %v7946_v32 = vld [vmem:[#allocation177_spill] sm:$0xff]  ;;  %v3460_v33 = vadd.f32 %v3459_v47, %v3458_v26  ;;  %v3461_v22 = vsel %vm24_vm11, %v3427_v21, 0.0  ;;  %v3186_v3 = vld [vmem:[#allocation3 + $0x90] sm:$0xff] }
 0x323   :  { %v1905_v23 = vadd.f32 %v1833_v40, %v1361_v60  ;;  %v7947_v60 = vld [vmem:[#allocation178_spill] sm:$0xff]  ;;  %v3367_v40 = vld [vmem:[#allocation4 + $0x38] sm:$0xff]  ;;  %v7110_v37 = vpop.eup %4119  ;;  %vm3335_vm0 = vcmp.ne.s32.totalorder %v3303_v45, 4294967196  ;;  %v3219_v30 = vmul.f32 0.6931472, %v4114_v35  ;;  %v3463_v57 = vsel %vm24_vm11, %v3428_v19, 0.0 }
 0x324   :  { %3089 = vst.msk [vmem:[#allocation3 + $0xa0] sm:$0xff] %vm24_vm11, %v3057_v13  ;;  %v7948_v2 = vsub.f32 %v7946_v32, %v7947_v60  ;;  %v3397_v1 = vsub.f32 %v3269_v12, %v3365_v61  ;;  %v3399_v58 = vsub.f32 %v3271_v39, %v3367_v40  ;;  %v3221_v46 = vmul.f32 0.6931472, %v4116_v7  ;;  %v3147_v32 = vld [vmem:[#allocation2 + $0x58] sm:$0xff]  ;;  %v3369_v7 = vld [vmem:[#allocation4 + $0x48] sm:$0xff] }
 0x325   :  { %v2986_v55 = vpop.xlane.xlu0 %2985  ;;  %1938 = vst.msk [vmem:[#allocation4 + $0xa8] sm:$0xff] %vm24_vm11, %v1905_v23  ;;  %v3272_v23 = vadd.f32 %v3217_v27, %v3144_v4  ;;  %v3462_v44 = vadd.f32 %v3461_v22, %v3460_v33  ;;  %v3430_v43 = vsel %vm3334_vm15, %v3398_v54, 0.0  ;;  %vm3337_vm2 = vcmp.ne.s32.totalorder %v7125_v11, 4294967196  ;;  %v2296_v45 = vld [vmem:[#allocation3 + $0xd8] sm:$0xff]  ;;  %v3148_v33 = vld [vmem:[#allocation2 + $0x60] sm:$0xff] }
 0x326   :  { %v3058_v36 = vadd.f32 %v2986_v55, %v2322_v14  ;;  %v1838_v38 = vpop.xlane.xlu1 %1837  ;;  %v1363_v14 = vld [vmem:[#allocation4 + $0xb8] sm:$0xff]  ;;  %v2267_v29 = vmul.f32 1.442695, %v7948_v2  ;;  %v3429_v34 = vsel %vm3333_vm14, %v3397_v1, 0.0  ;;  %v3431_v10 = vsel %vm3335_vm0, %v3399_v58, 0.0  ;;  %v1369_v1 = vld [vmem:[#allocation4 + $0xe8] sm:$0xff] }
 0x327   :  { %v1906_v24 = vadd.f32 %v1838_v38, %v1362_v8  ;;  %v4122_v8 = vpop.eup %4121  ;;  %v3187_v6 = vld [vmem:[#allocation3 + $0x98] sm:$0xff]  ;;  %v3400_v12 = vsub.f32 %v3272_v23, %v3368_v0  ;;  %v3465_v26 = vsel %vm24_vm11, %v3429_v34, 0.0  ;;  %v3464_v27 = vadd.f32 %v3463_v57, %v3462_v44  ;;  %v3149_v34 = vld [vmem:[#allocation2 + $0x68] sm:$0xff]  ;;  %v2297_v44 = vld [vmem:[#allocation3 + $0xe0] sm:$0xff] }
 0x328   :  { %3090 = vst.msk [vmem:[#allocation3 + $0xa8] sm:$0xff] %vm24_vm11, %v3058_v36  ;;  %v7116_v41 = vpop.eup %4123  ;;  %v3467_v47 = vsel %vm24_vm11, %v3430_v43, 0.0  ;;  %v3469_v2 = vsel %vm24_vm11, %v3431_v10, 0.0  ;;  %v1371_v57 = vld [vmem:[#allocation4 + $0xf8] sm:$0xff]  ;;  %v3308_v43 = vld [vmem:[%s7294_s3 + $0x60] sm:$0xff] }
 0x329   :  { %v2991_v50 = vpop.xlane.xlu0 %2990  ;;  %1939 = vst.msk [vmem:[#allocation4 + $0xb0] sm:$0xff] %vm24_vm11, %v1906_v24  ;;  %v4126_v56 = vpop.eup %4125  ;;  %v3223_v24 = vmul.f32 0.6931472, %v4122_v8  ;;  %v3466_v60 = vadd.f32 %v3465_v26, %v3464_v27  ;;  %vm3340_vm5 = vcmp.ne.s32.totalorder %v3308_v43, 4294967196 }
 0x32a   :  { %v3059_v49 = vadd.f32 %v2991_v50, %v7051_v20  ;;  %v1843_v13 = vpop.xlane.xlu1 %1842  ;;  %v3185_v20 = vld [vmem:[#allocation3 + $0x88] sm:$0xff]  ;;  %v4128_v42 = vpop.eup %4127  ;;  %v7133_v50 = vadd.f32 %v3221_v46, %v3146_v5  ;;  %v3225_v39 = vmul.f32 0.6931472, %v4126_v56 }
 0x32b   :  { %v1907_v31 = vadd.f32 %v1843_v13, %v1363_v14  ;;  %4137 = vlog2.f32 %v3185_v20  ;;  %v3188_v52 = vld [vmem:[#allocation3 + $0xa0] sm:$0xff]  ;;  %v4130_v35 = vpop.eup %4129  ;;  %v7143_v4 = vadd.f32 %v3223_v24, %v3147_v32  ;;  %v3227_v20 = vmul.f32 0.6931472, %v4128_v42  ;;  %v2298_v42 = vld [vmem:[#allocation3 + $0xe8] sm:$0xff]  ;;  %v3311_v32 = vld [vmem:[%s7294_s3 + $0x78] sm:$0xff] }
 0x32c   :  { %3091 = vst.msk [vmem:[#allocation3 + $0xb0] sm:$0xff] %vm24_vm11, %v3059_v49  ;;  %4139 = vpow2.f32 %v2267_v29  ;;  %v3432_v29 = vsel %vm3336_vm1, %v3400_v12, 0.0  ;;  %v4132_v13 = vpop.eup %4131  ;;  %v3468_v19 = vadd.f32 %v3467_v47, %v3466_v60  ;;  %v3402_v51 = vsub.f32 %v7133_v50, %v3370_v9  ;;  %v3309_v12 = vld [vmem:[%s7294_s3 + $0x68] sm:$0xff]  ;;  %v3375_v9 = vld [vmem:[#allocation4 + $0x78] sm:$0xff] }
 0x32d   :  { %1940 = vst.msk [vmem:[#allocation4 + $0xb8] sm:$0xff] %vm24_vm11, %v1907_v31  ;;  %4141 = vlog2.f32 %v3186_v3  ;;  %v3471_v22 = vsel %vm24_vm11, %v3432_v29, 0.0  ;;  %v7155_v58 = vadd.f32 %v3225_v39, %v3148_v33  ;;  %v7160_v56 = vadd.f32 %v3227_v20, %v3149_v34  ;;  %v3374_v29 = vld [vmem:[#allocation4 + $0x70] sm:$0xff] }
 0x32e   :  { %v2996_v53 = vpop.xlane.xlu0 %2995  ;;  %v1853_v18 = vpop.xlane.xlu1 %1852  ;;  %4143 = vlog2.f32 %v3187_v6  ;;  %v3470_v46 = vadd.f32 %v3469_v2, %v3468_v19  ;;  %v2328_v6 = vmul.f32 %v7104_v15, %v2296_v45  ;;  %v3150_v15 = vld [vmem:[#allocation2 + $0x70] sm:$0xff]  ;;  %v2329_v47 = vmul.f32 %v7110_v37, %v2297_v44 }
 0x32f   :  { %v3060_v55 = vadd.f32 %v2996_v53, %v7056_v63  ;;  %v1909_v36 = vadd.f32 %v1853_v18, %v1365_v17  ;;  %v3145_v63 = vld [vmem:[#allocation2 + $0x48] sm:$0xff]  ;;  %4145 = vlog2.f32 %v3188_v52  ;;  %v3307_v53 = vld [vmem:[%s7294_s3 + $0x58] sm:$0xff]  ;;  %v7152_v17 = vpop.eup %4133  ;;  %v3231_v18 = vmul.f32 0.6931472, %v4132_v13 }
 0x330   :  { %v7131_v28 = vadd.f32 %v3219_v30, %v3145_v63  ;;  %v3189_v61 = vld [vmem:[#allocation3 + $0xa8] sm:$0xff]  ;;  %v4136_v8 = vpop.eup %4135  ;;  %v3371_v30 = vld [vmem:[#allocation4 + $0x58] sm:$0xff]  ;;  %vm3339_vm4 = vcmp.ne.s32.totalorder %v3307_v53, 4294967196  ;;  %v3472_v10 = vadd.f32 %v3471_v22, %v3470_v46  ;;  %vm3341_vm6 = vcmp.ne.s32.totalorder %v3309_v12, 4294967196 }
 0x331   :  { %3092 = vst.msk [vmem:[#allocation3 + $0xb8] sm:$0xff] %vm24_vm11, %v3060_v55  ;;  %1942 = vst.msk [vmem:[#allocation4 + $0xc8] sm:$0xff] %vm24_vm11, %v1909_v36  ;;  %4147 = vlog2.f32 %v3189_v61  ;;  %v3403_v36 = vsub.f32 %v7143_v4, %v3371_v30  ;;  %v3233_v27 = vmul.f32 0.6931472, %v4136_v8  ;;  %v2330_v37 = vmul.f32 %v7116_v41, %v2298_v42  ;;  %v2299_v4 = vld [vmem:[#allocation3 + $0xf0] sm:$0xff]  ;;  %v3312_v41 = vld [vmem:[%s7294_s3 + $0x80] sm:$0xff] }
 0x332   :  { %v3001_v38 = vpop.xlane.xlu0 %3000  ;;  %v1863_v14 = vpop.xlane.xlu1 %1862  ;;  %v3401_v54 = vsub.f32 %v7131_v28, %v3369_v7  ;;  %vm3343_vm8 = vcmp.ne.s32.totalorder %v3311_v32, 4294967196  ;;  %v3376_v8 = vld [vmem:[#allocation4 + $0x80] sm:$0xff]  ;;  %v2331_v34 = vmul.f32 %v7152_v17, %v2299_v4  ;;  %vm3344_vm9 = vcmp.ne.s32.totalorder %v3312_v41, 4294967196  ;;  %v3157_v32 = vld [vmem:[#allocation2 + $0xa8] sm:$0xff] }
 0x333   :  { %v3061_v25 = vadd.f32 %v3001_v38, %v7058_v16  ;;  %v1911_v49 = vadd.f32 %v1863_v14, %v1367_v62  ;;  %v3306_v16 = vld [vmem:[%s7294_s3 + $0x50] sm:$0xff]  ;;  %v3372_v38 = vld [vmem:[#allocation4 + $0x60] sm:$0xff]  ;;  %v3373_v14 = vld [vmem:[#allocation4 + $0x68] sm:$0xff]  ;;  %v3435_v2 = vsel %vm3339_vm4, %v3403_v36, 0.0 }
 0x334   :  { %v3190_v40 = vld [vmem:[#allocation3 + $0xb0] sm:$0xff]  ;;  %vm3338_vm3 = vcmp.ne.s32.totalorder %v3306_v16, 4294967196  ;;  %v3433_v62 = vsel %vm3337_vm2, %v3401_v54, 0.0  ;;  %v3404_v11 = vsub.f32 %v7155_v58, %v3372_v38  ;;  %v3152_v16 = vld [vmem:[#allocation2 + $0x80] sm:$0xff]  ;;  %v3405_v60 = vsub.f32 %v7160_v56, %v3373_v14  ;;  %v3153_v58 = vld [vmem:[#allocation2 + $0x88] sm:$0xff] }
 0x335   :  { %3093 = vst.msk [vmem:[#allocation3 + $0xc0] sm:$0xff] %vm24_vm11, %v3061_v25  ;;  %1944 = vst.msk [vmem:[#allocation4 + $0xd8] sm:$0xff] %vm24_vm11, %v1911_v49  ;;  %4149 = vlog2.f32 %v3190_v40  ;;  %v3434_v26 = vsel %vm3338_vm3, %v3402_v51, 0.0  ;;  %v3151_v25 = vld [vmem:[#allocation2 + $0x78] sm:$0xff]  ;;  %v3473_v45 = vsel %vm24_vm11, %v3433_v62, 0.0  ;;  %v3280_v20 = vadd.f32 %v3233_v27, %v3152_v16  ;;  %v3156_v14 = vld [vmem:[#allocation2 + $0xa0] sm:$0xff] }
 0x336   :  { %v3006_v21 = vpop.xlane.xlu0 %3005  ;;  %v3279_v39 = vadd.f32 %v3231_v18, %v3151_v25  ;;  %v3475_v13 = vsel %vm24_vm11, %v3434_v26, 0.0  ;;  %v3436_v40 = vsel %vm3340_vm5, %v3404_v11, 0.0  ;;  %v3474_v33 = vadd.f32 %v3473_v45, %v3472_v10  ;;  %v3379_v45 = vld [vmem:[#allocation4 + $0x98] sm:$0xff]  ;;  %v3316_v4 = vld [vmem:[%s7294_s3 + $0xa0] sm:$0xff] }
 0x337   :  { %v3062_v31 = vadd.f32 %v3006_v21, %v7069_v48  ;;  %v3229_v48 = vmul.f32 0.6931472, %v4130_v35  ;;  %v3408_v36 = vsub.f32 %v3280_v20, %v3376_v8  ;;  %vm3348_vm14 = vcmp.ne.s32.totalorder %v3316_v4, 4294967196 }
 0x338   :  { %v1873_v23 = vpop.xlane.xlu1 %1872  ;;  %v3191_v55 = vld [vmem:[#allocation3 + $0xb8] sm:$0xff]  ;;  %v4138_v24 = vpop.eup %4137  ;;  %v3407_v51 = vsub.f32 %v3279_v39, %v3375_v9 }
 0x339   :  { %3094 = vst.msk [vmem:[#allocation3 + $0xc8] sm:$0xff] %vm24_vm11, %v3062_v31  ;;  %v1913_v3 = vadd.f32 %v1873_v23, %v1369_v1  ;;  %4151 = vlog2.f32 %v3191_v55  ;;  %v3278_v28 = vadd.f32 %v3229_v48, %v3150_v15  ;;  %v7180_v50 = vpop.eup %4139  ;;  %v3235_v1 = vmul.f32 0.6931472, %v4138_v24  ;;  %v3377_v24 = vld [vmem:[#allocation4 + $0x88] sm:$0xff] }
 0x33a   :  { %v3011_v0 = vpop.xlane.xlu0 %3010  ;;  %v4142_v49 = vpop.eup %4141  ;;  %v3477_v23 = vsel %vm24_vm11, %v3435_v2, 0.0  ;;  %v3437_v48 = vsel %vm3341_vm6, %v3405_v60, 0.0  ;;  %v3439_v12 = vsel %vm3343_vm8, %v3407_v51, 0.0 }
 0x33b   :  { %1946 = vst.msk [vmem:[#allocation4 + $0xe8] sm:$0xff] %vm24_vm11, %v1913_v3  ;;  %v3063_v63 = vadd.f32 %v3011_v0, %v7081_v59  ;;  %v7175_v59 = vld [vmem:[%s7294_s3 + $0x70] sm:$0xff]  ;;  %v4144_v7 = vpop.eup %4143  ;;  %v3406_v31 = vsub.f32 %v3278_v28, %v3374_v29  ;;  %v3237_v54 = vmul.f32 0.6931472, %v4142_v49  ;;  %v3476_v3 = vadd.f32 %v3475_v13, %v3474_v33  ;;  %v3315_v29 = vld [vmem:[%s7294_s3 + $0x98] sm:$0xff] }
 0x33c   :  { %v1883_v5 = vpop.xlane.xlu1 %1882  ;;  %vm3342_vm7 = vcmp.ne.s32.totalorder %v7175_v59, 4294967196  ;;  %v4146_v53 = vpop.eup %4145  ;;  %v3192_v30 = vld [vmem:[#allocation3 + $0xc0] sm:$0xff]  ;;  %v3239_v46 = vmul.f32 0.6931472, %v4144_v7  ;;  %v3281_v18 = vadd.f32 %v3235_v1, %v3153_v58  ;;  %v3479_v0 = vsel %vm24_vm11, %v3436_v40, 0.0  ;;  %v3314_v59 = vld [vmem:[%s7294_s3 + $0x90] sm:$0xff] }
 0x33d   :  { %3095 = vst.msk [vmem:[#allocation3 + $0xd0] sm:$0xff] %vm24_vm11, %v3063_v63  ;;  %v1915_v52 = vadd.f32 %v1883_v5, %v1371_v57  ;;  %v3154_v57 = vld [vmem:[#allocation2 + $0x90] sm:$0xff]  ;;  %v3438_v56 = vsel %vm3342_vm7, %v3406_v31, 0.0  ;;  %v3478_v63 = vadd.f32 %v3477_v23, %v3476_v3  ;;  %v3241_v17 = vmul.f32 0.6931472, %v4146_v53  ;;  %v3155_v5 = vld [vmem:[#allocation2 + $0x98] sm:$0xff] }
 0x33e   :  { %v3016_v61 = vpop.xlane.xlu0 %3015  ;;  %v4148_v55 = vpop.eup %4147  ;;  %v3282_v43 = vadd.f32 %v3237_v54, %v3154_v57  ;;  %v3481_v15 = vsel %vm24_vm11, %v3437_v48, 0.0  ;;  %v3283_v42 = vadd.f32 %v3239_v46, %v3155_v5  ;;  %v3409_v27 = vsub.f32 %v3281_v18, %v3377_v24  ;;  %v3158_v33 = vld [vmem:[#allocation2 + $0xb0] sm:$0xff]  ;;  %v3380_v54 = vld [vmem:[#allocation4 + $0xa0] sm:$0xff] }
 0x33f   :  { %1948 = vst.msk [vmem:[#allocation4 + $0xf8] sm:$0xff] %vm24_vm11, %v1915_v52  ;;  %v3064_v35 = vadd.f32 %v3016_v61, %v2328_v6  ;;  %v3313_v6 = vld [vmem:[%s7294_s3 + $0x88] sm:$0xff]  ;;  %v3243_v10 = vmul.f32 0.6931472, %v4148_v55  ;;  %v3480_v25 = vadd.f32 %v3479_v0, %v3478_v63  ;;  %v3483_v28 = vsel %vm24_vm11, %v3438_v56, 0.0  ;;  %v3378_v61 = vld [vmem:[#allocation4 + $0x90] sm:$0xff] }
 0x340   :  { %v3193_v21 = vld [vmem:[#allocation3 + $0xc8] sm:$0xff]  ;;  %vm3345_vm10 = vcmp.ne.s32.totalorder %v3313_v6, 4294967196  ;;  %v3485_v49 = vsel %vm24_vm11, %v3439_v12, 0.0  ;;  %v3284_v2 = vadd.f32 %v3241_v17, %v3156_v14  ;;  %vm3346_vm12 = vcmp.ne.s32.totalorder %v3314_v59, 4294967196  ;;  %v3159_v55 = vld [vmem:[#allocation2 + $0xb8] sm:$0xff]  ;;  %v1364_v46 = vld [vmem:[#allocation4 + $0xc0] sm:$0xff] }
 0x341   :  { %3096 = vst.msk [vmem:[#allocation3 + $0xd8] sm:$0xff] %vm24_vm11, %v3064_v35  ;;  %4153 = vlog2.f32 %v3193_v21  ;;  %v3482_v39 = vadd.f32 %v3481_v15, %v3480_v25  ;;  %v2300_v35 = vld [vmem:[#allocation3 + $0xf8] sm:$0xff]  ;;  %v3285_v1 = vadd.f32 %v3243_v10, %v3157_v32  ;;  %v3411_v20 = vsub.f32 %v3283_v42, %v3379_v45  ;;  %v1366_v24 = vld [vmem:[#allocation4 + $0xd0] sm:$0xff]  ;;  %v3321_v45 = vld [vmem:[%s7294_s3 + $0xc8] sm:$0xff] }
 0x342   :  { %v3021_v19 = vpop.xlane.xlu0 %3020  ;;  %v4150_v38 = vpop.eup %4149  ;;  %4155 = vlog2.f32 %v3192_v30  ;;  %v3441_v31 = vsel %vm3345_vm10, %v3409_v27, 0.0  ;;  %v2332_v40 = vmul.f32 %v7180_v50, %v2300_v35  ;;  %vm3347_vm13 = vcmp.ne.s32.totalorder %v3315_v29, 4294967196  ;;  %v3318_v50 = vld [vmem:[%s7294_s3 + $0xb0] sm:$0xff] }
 0x343   :  { %v3065_v22 = vadd.f32 %v3021_v19, %v2329_v47  ;;  %v3440_v47 = vsel %vm3344_vm9, %v3408_v36, 0.0  ;;  %v3245_v60 = vmul.f32 0.6931472, %v4150_v38  ;;  %v3484_v13 = vadd.f32 %v3483_v28, %v3482_v39  ;;  %v3317_v19 = vld [vmem:[%s7294_s3 + $0xa8] sm:$0xff]  ;;  %v3382_v36 = vld [vmem:[#allocation4 + $0xb0] sm:$0xff] }
 0x344   :  { %v3194_v26 = vld [vmem:[#allocation3 + $0xd0] sm:$0xff]  ;;  %v3487_v51 = vsel %vm24_vm11, %v3440_v47, 0.0  ;;  %v3412_v58 = vsub.f32 %v3284_v2, %v3380_v54  ;;  %vm3349_vm15 = vcmp.ne.s32.totalorder %v3317_v19, 4294967196  ;;  %v3443_v57 = vsel %vm3347_vm13, %v3411_v20, 0.0 }
 0x345   :  { %3097 = vst.msk [vmem:[#allocation3 + $0xe0] sm:$0xff] %vm24_vm11, %v3065_v22  ;;  %v3486_v41 = vadd.f32 %v3485_v49, %v3484_v13  ;;  %v3286_v53 = vadd.f32 %v3245_v60, %v3158_v33  ;;  %v3381_v22 = vld [vmem:[#allocation4 + $0xa8] sm:$0xff]  ;;  %vm3350_vm0 = vcmp.ne.s32.totalorder %v3318_v50, 4294967196  ;;  %v1368_v60 = vld [vmem:[#allocation4 + $0xe0] sm:$0xff]  ;;  %vm3353_vm3 = vcmp.ne.s32.totalorder %v3321_v45, 4294967196 }
 0x346   :  { %v3026_v44 = vpop.xlane.xlu0 %3025  ;;  %v4152_v11 = vpop.eup %4151  ;;  %v3413_v8 = vsub.f32 %v3285_v1, %v3381_v22  ;;  %v3320_v1 = vld [vmem:[%s7294_s3 + $0xc0] sm:$0xff] }
 0x347   :  { %v3066_v62 = vadd.f32 %v3026_v44, %v2330_v37  ;;  %v3410_v37 = vsub.f32 %v3282_v43, %v3378_v61  ;;  %v3247_v9 = vmul.f32 0.6931472, %v4152_v11  ;;  %v3488_v6 = vadd.f32 %v3487_v51, %v3486_v41  ;;  %v3319_v44 = vld [vmem:[%s7294_s3 + $0xb8] sm:$0xff]  ;;  %v3161_v11 = vld [vmem:[#allocation2 + $0xc8] sm:$0xff] }
 0x348   :  { %v3195_v52 = vld [vmem:[#allocation3 + $0xd8] sm:$0xff]  ;;  %v3414_v17 = vsub.f32 %v3286_v53, %v3382_v36  ;;  %v3444_v43 = vsel %vm3348_vm14, %v3412_v58, 0.0  ;;  %v3445_v5 = vsel %vm3349_vm15, %v3413_v8, 0.0  ;;  %vm3351_vm1 = vcmp.ne.s32.totalorder %v3319_v44, 4294967196  ;;  %v1370_v53 = vld [vmem:[#allocation4 + $0xf0] sm:$0xff] }
 0x349   :  { %3098 = vst.msk [vmem:[#allocation3 + $0xe8] sm:$0xff] %vm24_vm11, %v3066_v62  ;;  %4157 = vlog2.f32 %v3195_v52  ;;  %v3442_v48 = vsel %vm3346_vm12, %v3410_v37, 0.0  ;;  %v3287_v0 = vadd.f32 %v3247_v9, %v3159_v55  ;;  %v3383_v62 = vld [vmem:[#allocation4 + $0xb8] sm:$0xff]  ;;  %v3495_v59 = vsel %vm24_vm11, %v3444_v43, 0.0  ;;  %v3160_v9 = vld [vmem:[#allocation2 + $0xc0] sm:$0xff] }
 0x34a   :  { %v3031_v16 = vpop.xlane.xlu0 %3030  ;;  %4159 = vlog2.f32 %v3194_v26  ;;  %v3491_v56 = vsel %vm24_vm11, %v3442_v48, 0.0  ;;  %v3493_v26 = vsel %vm24_vm11, %v3443_v57, 0.0  ;;  %v3446_v14 = vsel %vm3350_vm0, %v3414_v17, 0.0  ;;  %v3162_v48 = vld [vmem:[#allocation2 + $0xd0] sm:$0xff]  ;;  %v3387_v55 = vld [vmem:[#allocation4 + $0xd8] sm:$0xff]  ;;  %v3164_v43 = vld [vmem:[#allocation2 + $0xe0] sm:$0xff] }
 0x34b   :  { %v3067_v21 = vadd.f32 %v3031_v16, %v2331_v34  ;;  %v3489_v34 = vsel %vm24_vm11, %v3441_v31, 0.0  ;;  %v3415_v52 = vsub.f32 %v3287_v0, %v3383_v62  ;;  %v3497_v47 = vsel %vm24_vm11, %v3445_v5, 0.0  ;;  %v3323_v31 = vld [vmem:[%s7294_s3 + $0xd8] sm:$0xff] }
 0x34c   :  { %v3196_v7 = vld [vmem:[#allocation3 + $0xe0] sm:$0xff]  ;;  %v3490_v12 = vadd.f32 %v3489_v34, %v3488_v6  ;;  %v3499_v13 = vsel %vm24_vm11, %v3446_v14, 0.0  ;;  %vm3352_vm2 = vcmp.ne.s32.totalorder %v3320_v1, 4294967196  ;;  %vm3355_vm4 = vcmp.ne.s32.totalorder %v3323_v31, 4294967196  ;;  %v3167_v1 = vld [vmem:[#allocation2 + $0xf8] sm:$0xff] }
 0x34d   :  { %3099 = vst.msk [vmem:[#allocation3 + $0xf0] sm:$0xff] %vm24_vm11, %v3067_v21  ;;  %4161 = vlog2.f32 %v3196_v7  ;;  %v3447_v29 = vsel %vm3351_vm1, %v3415_v52, 0.0  ;;  %v3163_v21 = vld [vmem:[#allocation2 + $0xd8] sm:$0xff] }
 0x34e   :  { %v3036_v23 = vpop.xlane.xlu0 %3035  ;;  %v4154_v30 = vpop.eup %4153  ;;  %v3492_v42 = vadd.f32 %v3491_v56, %v3490_v12 }
 0x34f   :  { %v3068_v3 = vadd.f32 %v3036_v23, %v2332_v40  ;;  %v3251_v38 = vmul.f32 0.6931472, %v4154_v30  ;;  %v4156_v10 = vpop.eup %4155  ;;  %v3385_v40 = vld [vmem:[#allocation4 + $0xc8] sm:$0xff]  ;;  %v3501_v23 = vsel %vm24_vm11, %v3447_v29, 0.0 }
 0x350   :  { %v3197_v18 = vld [vmem:[#allocation3 + $0xe8] sm:$0xff]  ;;  %v3494_v61 = vadd.f32 %v3493_v26, %v3492_v42  ;;  %v3249_v16 = vmul.f32 0.6931472, %v4156_v10 }
 0x351   :  { %3100 = vst.msk [vmem:[#allocation3 + $0xf8] sm:$0xff] %vm24_vm11, %v3068_v3  ;;  %4163 = vlog2.f32 %v3197_v18  ;;  %v3289_v32 = vadd.f32 %v3251_v38, %v3161_v11  ;;  %v3322_v3 = vld [vmem:[%s7294_s3 + $0xd0] sm:$0xff]  ;;  %v3325_v38 = vld [vmem:[%s7294_s3 + $0xe8] sm:$0xff] }
 0x352   :  { %v1848_v63 = vpop.xlane.xlu0 %1847  ;;  %v3496_v37 = vadd.f32 %v3495_v59, %v3494_v61  ;;  %v3288_v41 = vadd.f32 %v3249_v16, %v3160_v9  ;;  %vm3354_vm5 = vcmp.ne.s32.totalorder %v3322_v3, 4294967196  ;;  %vm3357_vm7 = vcmp.ne.s32.totalorder %v3325_v38, 4294967196  ;;  %v3166_v61 = vld [vmem:[#allocation2 + $0xf0] sm:$0xff] }
 0x353   :  { %v1908_v15 = vadd.f32 %v1848_v63, %v1364_v46  ;;  %v3417_v51 = vsub.f32 %v3289_v32, %v3385_v40  ;;  %v3165_v63 = vld [vmem:[#allocation2 + $0xe8] sm:$0xff] }
 0x354   :  { %v3198_v25 = vld [vmem:[#allocation3 + $0xf0] sm:$0xff]  ;;  %v3498_v33 = vadd.f32 %v3497_v47, %v3496_v37 }
 0x355   :  { %1941 = vst.msk [vmem:[#allocation4 + $0xc0] sm:$0xff] %vm24_vm11, %v1908_v15  ;;  %4165 = vlog2.f32 %v3198_v25  ;;  %v3449_v56 = vsel %vm3353_vm3, %v3417_v51, 0.0  ;;  %v3324_v15 = vld [vmem:[%s7294_s3 + $0xe0] sm:$0xff]  ;;  %v3326_v47 = vld [vmem:[%s7294_s3 + $0xf0] sm:$0xff] }
 0x356   :  { %v4158_v27 = vpop.eup %4157  ;;  %v1858_v28 = vpop.xlane.xlu0 %1857  ;;  %v3500_v58 = vadd.f32 %v3499_v13, %v3498_v33  ;;  %v3505_v52 = vsel %vm24_vm11, %v3449_v56, 0.0  ;;  %vm3356_vm6 = vcmp.ne.s32.totalorder %v3324_v15, 4294967196  ;;  %vm3358_vm8 = vcmp.ne.s32.totalorder %v3326_v47, 4294967196 }
 0x357   :  { %v4160_v39 = vpop.eup %4159  ;;  %v1910_v49 = vadd.f32 %v1858_v28, %v1366_v24  ;;  %v3255_v35 = vmul.f32 0.6931472, %v4158_v27  ;;  %v3389_v24 = vld [vmem:[#allocation4 + $0xe8] sm:$0xff] }
 0x358   :  { %v3199_v2 = vld [vmem:[#allocation3 + $0xf8] sm:$0xff]  ;;  %v3253_v4 = vmul.f32 0.6931472, %v4160_v39  ;;  %v3502_v0 = vadd.f32 %v3501_v23, %v3500_v58 }
 0x359   :  { %1943 = vst.msk [vmem:[#allocation4 + $0xd0] sm:$0xff] %vm24_vm11, %v1910_v49  ;;  %4167 = vlog2.f32 %v3199_v2  ;;  %v3291_v20 = vadd.f32 %v3255_v35, %v3163_v21  ;;  %v3327_v2 = vld [vmem:[%s7294_s3 + $0xf8] sm:$0xff] }
 0x35a   :  { %v1868_v7 = vpop.xlane.xlu0 %1867  ;;  %v4162_v19 = vpop.eup %4161  ;;  %v3290_v46 = vadd.f32 %v3253_v4, %v3162_v48  ;;  %vm3359_vm9 = vcmp.ne.s32.totalorder %v3327_v2, 4294967196 }
 0x35b   :  { %v1912_v54 = vadd.f32 %v1868_v7, %v1368_v60  ;;  %v3257_v30 = vmul.f32 0.6931472, %v4162_v19  ;;  %v3419_v18 = vsub.f32 %v3291_v20, %v3387_v55  ;;  %v3391_v20 = vld [vmem:[#allocation4 + $0xf8] sm:$0xff] }
 0x35c   :  { %v3384_v22 = vld [vmem:[#allocation4 + $0xc0] sm:$0xff] }
 0x35d   :  { %1945 = vst.msk [vmem:[#allocation4 + $0xe0] sm:$0xff] %vm24_vm11, %v1912_v54  ;;  %v3416_v50 = vsub.f32 %v3288_v41, %v3384_v22  ;;  %v3292_v10 = vadd.f32 %v3257_v30, %v3164_v43  ;;  %v3451_v25 = vsel %vm3355_vm4, %v3419_v18, 0.0 }
 0x35e   :  { %v4164_v8 = vpop.eup %4163  ;;  %v1878_v34 = vpop.xlane.xlu0 %1877  ;;  %v3509_v32 = vsel %vm24_vm11, %v3451_v25, 0.0 }
 0x35f   :  { %v1914_v57 = vadd.f32 %v1878_v34, %v1370_v53  ;;  %v3259_v6 = vmul.f32 0.6931472, %v4164_v8  ;;  %v3448_v36 = vsel %vm3352_vm2, %v3416_v50, 0.0 }
 0x360   :  { %v3386_v44 = vld [vmem:[#allocation4 + $0xd0] sm:$0xff]  ;;  %v3503_v17 = vsel %vm24_vm11, %v3448_v36, 0.0 }
 0x361   :  { %1947 = vst.msk [vmem:[#allocation4 + $0xf0] sm:$0xff] %vm24_vm11, %v1914_v57  ;;  %v3293_v12 = vadd.f32 %v3259_v6, %v3165_v63  ;;  %v3418_v62 = vsub.f32 %v3290_v46, %v3386_v44  ;;  %v3504_v5 = vadd.f32 %v3503_v17, %v3502_v0 }
 0x362   :  { %v4166_v26 = vpop.eup %4165 }
 0x363   :  { %v3261_v42 = vmul.f32 0.6931472, %v4166_v26  ;;  %v3421_v59 = vsub.f32 %v3293_v12, %v3389_v24  ;;  %v3450_v27 = vsel %vm3354_vm5, %v3418_v62, 0.0  ;;  %v3506_v28 = vadd.f32 %v3505_v52, %v3504_v5 }
 0x364   :  { %v3388_v11 = vld [vmem:[#allocation4 + $0xe0] sm:$0xff]  ;;  %v3507_v14 = vsel %vm24_vm11, %v3450_v27, 0.0 }
 0x365   :  { %v3420_v39 = vsub.f32 %v3292_v10, %v3388_v11  ;;  %v3508_v49 = vadd.f32 %v3507_v14, %v3506_v28  ;;  %v3294_v35 = vadd.f32 %v3261_v42, %v3166_v61  ;;  %v3453_v37 = vsel %vm3357_vm7, %v3421_v59, 0.0 }
 0x366   :  { %v4168_v16 = vpop.eup %4167  ;;  %v3513_v31 = vsel %vm24_vm11, %v3453_v37, 0.0 }
 0x367   :  { %v3263_v60 = vmul.f32 0.6931472, %v4168_v16  ;;  %v3452_v29 = vsel %vm3356_vm6, %v3420_v39, 0.0  ;;  %v3510_v21 = vadd.f32 %v3509_v32, %v3508_v49 }
 0x368   :  { %v3390_v45 = vld [vmem:[#allocation4 + $0xf0] sm:$0xff]  ;;  %v3511_v13 = vsel %vm24_vm11, %v3452_v29, 0.0 }
 0x369   :  { %v3295_v7 = vadd.f32 %v3263_v60, %v3167_v1  ;;  %v3422_v9 = vsub.f32 %v3294_v35, %v3390_v45  ;;  %v3512_v4 = vadd.f32 %v3511_v13, %v3510_v21 }
 0x36b   :  { %v3423_v40 = vsub.f32 %v3295_v7, %v3391_v20  ;;  %v3454_v33 = vsel %vm3358_vm8, %v3422_v9, 0.0  ;;  %v3514_v19 = vadd.f32 %v3513_v31, %v3512_v4 }
 0x36c   :  { %v3515_v54 = vsel %vm24_vm11, %v3454_v33, 0.0 }
 0x36d   :  { %v3455_v41 = vsel %vm3359_vm9, %v3423_v40, 0.0  ;;  %v3516_v51 = vadd.f32 %v3515_v54, %v3514_v19 }
 0x36e   :  { %v3517_v23 = vsel %vm24_vm11, %v3455_v41, 0.0 }
 0x36f   :  { %v3518_v53 = vadd.f32 %v3517_v23, %v3516_v51 }
 0x371   :  { %3519 = vadd.xlane.f32.xlu0 %v3518_v53 }
 0x3fa   :  { %v3520_v22 = vpop.xlane.xlu0 %3519 }
 0x3fb   :  { %v3521_v58 = vrot.slane %v3520_v22, 4 }
 0x3fd   :  { %v3522_v48 = vadd.f32 %v3521_v58, %v3520_v22 }
 0x3ff   :  { %v3523_v3 = vrot.slane %v3522_v48, 2 }
 0x401   :  { %v3524_v55 = vadd.f32 %v3523_v3, %v3522_v48 }
 0x403   :  { %v3525_v50 = vrot.slane %v3524_v55, 1 }
 0x405   :  { %v3526_v8 = vadd.f32 %v3525_v50, %v3524_v55 }
 0x407   :  { %3714 = vpush %v3526_v8 }
 0x438   :  { %s3715_s3 = spop %3714 }
 0x439   :  { %v3528_v34 = vstv %s3715_s3 }
 0x43a   :  { %3529 = vst [vmem:[%s7297_s5] sm:$0x1] %v3528_v34 }

// kernel: inrep_plus_gan_forward.2
= control target key start
LH: loop header
LB: loop body
LE: loop exit
PB: predicated region body
PF: predicated region fallthrough
CT: control target
= control target key end

     0   :  { %12 = vsyncpa [#allocation3], 0  ;;  %s7830_s0 = inlined_call_operand.vmem [shape: bf16[128,256], index: 0, kind: input, shape index: {}]   ;;  %s7831_s1 = inlined_call_operand.hbm [shape: bf16[256,768], index: 1, kind: input, shape index: {}]   ;;  %s7832_s2 = inlined_call_operand.hbm [shape: f32[1,768], index: 2, kind: input, shape index: {}]   ;;  %s7833_s3 = inlined_call_operand.hbm [shape: bf16[768,768], index: 3, kind: input, shape index: {}]   ;;  %s7834_s4 = inlined_call_operand.hbm [shape: f32[1,768], index: 4, kind: input, shape index: {}]   ;;  %s7835_s5 = inlined_call_operand.hbm [shape: bf16[768,128], index: 5, kind: input, shape index: {}]   ;;  %s7836_s6 = inlined_call_operand.hbm [shape: f32[1,128], index: 6, kind: input, shape index: {}]   ;;  %s7837_s7 = inlined_call_operand.vmem [shape: bf16[128,128], index: 7, kind: output, shape index: {}]  }
   0x1   :  { %13 = vsyncpa [#allocation5], 0 }
   0x2   :  { %14 = vsyncpa [#allocation8], 0 }
   0x3   :  { %15 = vsyncpa [#allocation11], 0  ;;  %s6504_s24 = smov [#allocation4]   ;;  %s6505_s26 = smov [#allocation7]  }
   0x4   :  { %s36_s25 = sshll.u32 %s6504_s24, 4  ;;  %s58_s27 = sshll.u32 %s6505_s26, 4  ;;  %s37_s25 = int_to_ptr.vmem [resolvable:$true] %s36_s25  ;;  %s59_s27 = int_to_ptr.vmem [resolvable:$true] %s58_s27 }
   0x5   :  { %s6384_s28 = scalar_lea.vmem %s37_s25, 96  ;;  %p6389_p1 = scmp.lt.s32.totalorder %s37_s25, %s37_s25 }
   0x6   :  { %p6385_p0 = scmp.ne.s32.totalorder %s37_s25, %s6384_s28  ;;  %p6390_p2 = scmp.lt.s32.totalorder %s6384_s28, %s6384_s28 }
   0x8   :  { %p6391_p3 = por %p6390_p2, %p6389_p1 }
   0xa   :  { %p6392_p4 = pnand %p6391_p3, %p6385_p0 }
   0xc   :  { %6395 = shalt.err (!%p6392_p4)
}
   0xd   :  { %39 = dma.hbm_to_vmem [thread:$0]  %s7832_s2, 96, %s37_s25, [#allocation5]  }
   0xe   :  { %s6404_s8 = scalar_lea.vmem %s59_s27, 96  ;;  %p6409_p6 = scmp.lt.s32.totalorder %s59_s27, %s59_s27 }
   0xf   :  { %p6405_p5 = scmp.ne.s32.totalorder %s59_s27, %s6404_s8  ;;  %p6410_p7 = scmp.lt.s32.totalorder %s6404_s8, %s6404_s8 }
  0x11   :  { %p6411_p8 = por %p6410_p7, %p6409_p6 }
  0x13   :  { %p6412_p9 = pnand %p6411_p8, %p6405_p5 }
  0x15   :  { %6415 = shalt.err (!%p6412_p9)
}
  0x16   :  { %61 = dma.hbm_to_vmem [thread:$0]  %s7834_s4, 96, %s59_s27, [#allocation8]  }
  0x17   :  { %s6506_s11 = smov [#allocation2]  }
  0x18   :  { %s23_s12 = sshll.u32 %s6506_s11, 4  ;;  %s24_s12 = int_to_ptr.vmem [resolvable:$true] %s23_s12 }
  0x19   :  { %s6424_s13 = scalar_lea.vmem %s24_s12, 12288  ;;  %p6429_p11 = scmp.lt.s32.totalorder %s24_s12, %s24_s12 }
  0x1a   :  { %p6425_p10 = scmp.ne.s32.totalorder %s24_s12, %s6424_s13  ;;  %p6430_p12 = scmp.lt.s32.totalorder %s6424_s13, %s6424_s13 }
  0x1c   :  { %p6431_p13 = por %p6430_p12, %p6429_p11 }
  0x1e   :  { %p6432_p0 = pnand %p6431_p13, %p6425_p10 }
  0x20   :  { %6435 = shalt.err (!%p6432_p0)
}
  0x21   :  { %s6507_s2 = smov 384   ;;  %s6508_s14 = smov 24  }
  0x22   :  { %29 = dma.hbm_to_vmem [thread:$0]  %s7831_s1, 12288, %s24_s12, [#allocation3], %s6507_s2, %s6507_s2, %s6508_s14  }
  0x23   :  { %s6509_s17 = smov [#allocation6]   ;;  %s6510_s4 = smov [#allocation9]  }
  0x24   :  { %s45_s18 = sshll.u32 %s6509_s17, 4  ;;  %s67_s19 = sshll.u32 %s6510_s4, 4  ;;  %s46_s18 = int_to_ptr.vmem [resolvable:$true] %s45_s18  ;;  %s68_s19 = int_to_ptr.vmem [resolvable:$true] %s67_s19 }
  0x25   :  { %s6444_s20 = scalar_lea.vmem %s46_s18, 36864  ;;  %p6449_p2 = scmp.lt.s32.totalorder %s46_s18, %s46_s18 }
  0x26   :  { %p6445_p1 = scmp.ne.s32.totalorder %s46_s18, %s6444_s20  ;;  %p6450_p3 = scmp.lt.s32.totalorder %s6444_s20, %s6444_s20 }
  0x28   :  { %p6451_p4 = por %p6450_p3, %p6449_p2 }
  0x2a   :  { %p6452_p5 = pnand %p6451_p4, %p6445_p1 }
  0x2c   :  { %6455 = shalt.err (!%p6452_p5)
}
  0x2d   :  { %51 = dma.hbm_to_vmem [thread:$0]  %s7833_s3, 36864, %s46_s18, [#allocation5], %s6507_s2, %s6507_s2, %s6508_s14  }
  0x2e   :  { %s6464_s23 = scalar_lea.vmem %s68_s19, 6144  ;;  %p6469_p7 = scmp.lt.s32.totalorder %s68_s19, %s68_s19 }
  0x2f   :  { %p6465_p6 = scmp.ne.s32.totalorder %s68_s19, %s6464_s23  ;;  %p6470_p8 = scmp.lt.s32.totalorder %s6464_s23, %s6464_s23 }
  0x31   :  { %p6471_p9 = por %p6470_p8, %p6469_p7 }
  0x33   :  { %p6472_p10 = pnand %p6471_p9, %p6465_p6 }
  0x35   :  { %6475 = shalt.err (!%p6472_p10)
}
  0x36   :  { %s6511_s1 = smov 64   ;;  %s6512_s24 = smov 4  }
  0x37   :  { %73 = dma.hbm_to_vmem [thread:$0]  %s7835_s5, 6144, %s68_s19, [#allocation8], %s6511_s1, %s6511_s1, %s6512_s24  }
  0x38   :  { %s6513_s27 = smov [#allocation10]  }
  0x39   :  { %s80_s28 = sshll.u32 %s6513_s27, 4  ;;  %s81_s28 = int_to_ptr.vmem [resolvable:$true] %s80_s28 }
  0x3a   :  { %s6484_s29 = scalar_lea.vmem %s81_s28, 16  ;;  %s6488_s3 = scalar_lea.vmem %s81_s28, 32 }
  0x3b   :  { %p6485_p11 = scmp.ne.s32.totalorder %s81_s28, %s6484_s29  ;;  %p6489_p12 = scmp.lt.s32.totalorder %s81_s28, %s81_s28 }
  0x3c   :  { %p6490_p13 = scmp.lt.s32.totalorder %s6488_s3, %s6484_s29 }
  0x3e   :  { %p6491_p0 = por %p6490_p13, %p6489_p12 }
  0x40   :  { %p6492_p1 = pnand %p6491_p0, %p6485_p11 }
  0x42   :  { %6495 = shalt.err (!%p6492_p1)
}
  0x43   :  { %83 = dma.hbm_to_vmem [thread:$0]  %s7836_s6, 16, %s81_s28, [#allocation11]  }
  0x44   :  { %6496 = dma.done.wait [#allocation3], 12288  }
  0x45   :  { %6497 = vsyncadd [#allocation3], 4294955008 }
  0x46   :  { %6498 = dma.done.wait [#allocation5], 36960  }
  0x47   :  { %6499 = vsyncadd [#allocation5], 4294930336 }
  0x48   :  { %6500 = dma.done.wait [#allocation8], 6240  }
  0x49   :  { %6501 = vsyncadd [#allocation8], 4294961056 }
  0x4a   :  { %6502 = dma.done.wait [#allocation11], 16  }
  0x4b   :  { %6503 = vsyncadd [#allocation11], 4294967280  ;;  %v5727_v0 = vld [vmem:[#allocation2 + $0x154] ss:$24 sps:$4 sm:$0xff]   ;;  %v5731_v2 = vld [vmem:[#allocation2 + $0x150] ss:$24 sps:$4 sm:$0xff]  }
  0x4c   :  { %v5729_v1 = vld [vmem:[#allocation2 + $0x15c] ss:$24 sps:$4 sm:$0xff]   ;;  %807 = vmatprep.subr.bf16.mxu0 %v5727_v0  ;;  %v5732_v3 = vld [vmem:[#allocation2 + $0x158] ss:$24 sps:$4 sm:$0xff]   ;;  %v5735_v5 = vld [vmem:[#allocation2 + $0x12c] ss:$24 sps:$4 sm:$0xff]  }
  0x4d   :  { %920 = vmatprep.subr.bf16.mxu1 %v5729_v1  ;;  %v5733_v4 = vld [vmem:[#allocation2 + $0x124] ss:$24 sps:$4 sm:$0xff]   ;;  %808 = vmatpush1.bf16.msra.mxu0 %v5731_v2  ;;  %v5737_v6 = vld [vmem:[#allocation2 + $0x120] ss:$24 sps:$4 sm:$0xff]   ;;  %v5739_v8 = vld [vmem:[#allocation2 + $0xf4] ss:$24 sps:$4 sm:$0xff]  }
  0x4e   :  { %921 = vmatpush1.bf16.msra.mxu1 %v5732_v3  ;;  %809 = vmatprep.subr.bf16.mxu0 %v5733_v4  ;;  %v5738_v7 = vld [vmem:[#allocation2 + $0x128] ss:$24 sps:$4 sm:$0xff]   ;;  %v5741_v9 = vld [vmem:[#allocation2 + $0xfc] ss:$24 sps:$4 sm:$0xff]   ;;  %v5744_v11 = vld [vmem:[#allocation2 + $0xf8] ss:$24 sps:$4 sm:$0xff]  }
  0x4f   :  { %922 = vmatprep.subr.bf16.mxu1 %v5735_v5  ;;  %v5743_v10 = vld [vmem:[#allocation2 + $0xf0] ss:$24 sps:$4 sm:$0xff]   ;;  %v5745_v12 = vld [vmem:[#allocation2 + $0xc4] ss:$24 sps:$4 sm:$0xff]   ;;  %v5749_v14 = vld [vmem:[#allocation2 + $0xc0] ss:$24 sps:$4 sm:$0xff]  }
  0x50   :  { %v5747_v13 = vld [vmem:[#allocation2 + $0xcc] ss:$24 sps:$4 sm:$0xff]   ;;  %v5750_v15 = vld [vmem:[#allocation2 + $0xc8] ss:$24 sps:$4 sm:$0xff]   ;;  %v5753_v17 = vld [vmem:[#allocation2 + $0x9c] ss:$24 sps:$4 sm:$0xff]  }
  0x51   :  { %810 = vmatpush1.bf16.msra.mxu0 %v5737_v6  ;;  %v5751_v16 = vld [vmem:[#allocation2 + $0x94] ss:$24 sps:$4 sm:$0xff]   ;;  %v5755_v18 = vld [vmem:[#allocation2 + $0x90] ss:$24 sps:$4 sm:$0xff]   ;;  %v5757_v20 = vld [vmem:[#allocation2 + $0x64] ss:$24 sps:$4 sm:$0xff]  }
  0x52   :  { %923 = vmatpush1.bf16.msra.mxu1 %v5738_v7  ;;  %811 = vmatprep.subr.bf16.mxu0 %v5739_v8  ;;  %v5756_v19 = vld [vmem:[#allocation2 + $0x98] ss:$24 sps:$4 sm:$0xff]   ;;  %v5759_v21 = vld [vmem:[#allocation2 + $0x6c] ss:$24 sps:$4 sm:$0xff]   ;;  %v5762_v23 = vld [vmem:[#allocation2 + $0x68] ss:$24 sps:$4 sm:$0xff]  }
  0x53   :  { %924 = vmatprep.subr.bf16.mxu1 %v5741_v9  ;;  %v5761_v22 = vld [vmem:[#allocation2 + $0x60] ss:$24 sps:$4 sm:$0xff]   ;;  %v5763_v24 = vld [vmem:[#allocation2 + $0x34] ss:$24 sps:$4 sm:$0xff]   ;;  %v5767_v26 = vld [vmem:[#allocation2 + $0x30] ss:$24 sps:$4 sm:$0xff]  }
  0x54   :  { %v5765_v25 = vld [vmem:[#allocation2 + $0x3c] ss:$24 sps:$4 sm:$0xff]   ;;  %v5768_v27 = vld [vmem:[#allocation2 + $0x38] ss:$24 sps:$4 sm:$0xff]   ;;  %v5771_v29 = vld [vmem:[#allocation2 + $0xc] ss:$24 sps:$4 sm:$0xff]  }
  0x55   :  { %812 = vmatpush1.bf16.msra.mxu0 %v5743_v10  ;;  %v5769_v28 = vld [vmem:[#allocation2 + $0x4] ss:$24 sps:$4 sm:$0xff]   ;;  %v5773_v30 = vld [vmem:[#allocation2] ss:$24 sps:$4 sm:$0xff]   ;;  %v5775_v32 = vld [vmem:[#allocation2 + $0x2d4] ss:$24 sps:$4 sm:$0xff]  }
  0x56   :  { %925 = vmatpush1.bf16.msra.mxu1 %v5744_v11  ;;  %813 = vmatprep.subr.bf16.mxu0 %v5745_v12  ;;  %v5774_v31 = vld [vmem:[#allocation2 + $0x8] ss:$24 sps:$4 sm:$0xff]   ;;  %v5777_v33 = vld [vmem:[#allocation2 + $0x2dc] ss:$24 sps:$4 sm:$0xff]   ;;  %v5780_v35 = vld [vmem:[#allocation2 + $0x2d8] ss:$24 sps:$4 sm:$0xff]  }
  0x57   :  { %926 = vmatprep.subr.bf16.mxu1 %v5747_v13  ;;  %v5779_v34 = vld [vmem:[#allocation2 + $0x2d0] ss:$24 sps:$4 sm:$0xff]   ;;  %v5781_v36 = vld [vmem:[#allocation2 + $0x2a4] ss:$24 sps:$4 sm:$0xff]   ;;  %v5785_v38 = vld [vmem:[#allocation2 + $0x2a0] ss:$24 sps:$4 sm:$0xff]  }
  0x58   :  { %v5783_v37 = vld [vmem:[#allocation2 + $0x2ac] ss:$24 sps:$4 sm:$0xff]   ;;  %v5786_v39 = vld [vmem:[#allocation2 + $0x2a8] ss:$24 sps:$4 sm:$0xff]   ;;  %v5789_v41 = vld [vmem:[#allocation2 + $0x27c] ss:$24 sps:$4 sm:$0xff]  }
  0x59   :  { %814 = vmatpush1.bf16.msra.mxu0 %v5749_v14  ;;  %v5787_v40 = vld [vmem:[#allocation2 + $0x274] ss:$24 sps:$4 sm:$0xff]   ;;  %v5791_v42 = vld [vmem:[#allocation2 + $0x270] ss:$24 sps:$4 sm:$0xff]   ;;  %v5793_v44 = vld [vmem:[#allocation2 + $0x244] ss:$24 sps:$4 sm:$0xff]  }
  0x5a   :  { %927 = vmatpush1.bf16.msra.mxu1 %v5750_v15  ;;  %815 = vmatprep.subr.bf16.mxu0 %v5751_v16  ;;  %v5792_v43 = vld [vmem:[#allocation2 + $0x278] ss:$24 sps:$4 sm:$0xff]   ;;  %v5795_v45 = vld [vmem:[#allocation2 + $0x24c] ss:$24 sps:$4 sm:$0xff]   ;;  %v5798_v47 = vld [vmem:[#allocation2 + $0x248] ss:$24 sps:$4 sm:$0xff]  }
  0x5b   :  { %928 = vmatprep.subr.bf16.mxu1 %v5753_v17  ;;  %v5797_v46 = vld [vmem:[#allocation2 + $0x240] ss:$24 sps:$4 sm:$0xff]   ;;  %v6575_v48 = vld [vmem:[%s7830_s0 + $0x4] ss:$8 sps:$4 sm:$0xff]   ;;  %v5801_v50 = vld [vmem:[#allocation2 + $0x21c] ss:$24 sps:$4 sm:$0xff]  }
  0x5c   :  { %v5799_v49 = vld [vmem:[#allocation2 + $0x214] ss:$24 sps:$4 sm:$0xff]   ;;  %839 = vmatprep.mubr.bf16.mxu0 %v6575_v48  ;;  %952 = vmatprep.mubr.bf16.mxu1 %v6575_v48  ;;  %v5803_v51 = vld [vmem:[#allocation2 + $0x210] ss:$24 sps:$4 sm:$0xff]   ;;  %v5805_v53 = vld [vmem:[#allocation2 + $0x1e4] ss:$24 sps:$4 sm:$0xff]  }
  0x5d   :  { %816 = vmatpush1.bf16.msra.mxu0 %v5755_v18  ;;  %v5804_v52 = vld [vmem:[#allocation2 + $0x218] ss:$24 sps:$4 sm:$0xff]   ;;  %v5807_v54 = vld [vmem:[#allocation2 + $0x1ec] ss:$24 sps:$4 sm:$0xff]   ;;  %v5810_v56 = vld [vmem:[#allocation2 + $0x1e8] ss:$24 sps:$4 sm:$0xff]  }
  0x5e   :  { %929 = vmatpush1.bf16.msra.mxu1 %v5756_v19  ;;  %817 = vmatprep.subr.bf16.mxu0 %v5757_v20  ;;  %v5809_v55 = vld [vmem:[#allocation2 + $0x1e0] ss:$24 sps:$4 sm:$0xff]   ;;  %v5811_v57 = vld [vmem:[#allocation2 + $0x1b4] ss:$24 sps:$4 sm:$0xff]   ;;  %v5815_v59 = vld [vmem:[#allocation2 + $0x1b0] ss:$24 sps:$4 sm:$0xff]  }
  0x5f   :  { %930 = vmatprep.subr.bf16.mxu1 %v5759_v21  ;;  %v5813_v58 = vld [vmem:[#allocation2 + $0x1bc] ss:$24 sps:$4 sm:$0xff]   ;;  %v5816_v60 = vld [vmem:[#allocation2 + $0x1b8] ss:$24 sps:$4 sm:$0xff]   ;;  %v5819_v62 = vld [vmem:[#allocation2 + $0x18c] ss:$24 sps:$4 sm:$0xff]  }
  0x60   :  { %v5817_v61 = vld [vmem:[#allocation2 + $0x184] ss:$24 sps:$4 sm:$0xff]   ;;  %v5821_v63 = vld [vmem:[#allocation2 + $0x180] ss:$24 sps:$4 sm:$0xff]   ;;  %v5831_v5 = vld [vmem:[#allocation2 + $0x134] ss:$24 sps:$4 sm:$0xff]  }
  0x61   :  { %818 = vmatpush1.bf16.msra.mxu0 %v5761_v22  ;;  %v5822_v0 = vld [vmem:[#allocation2 + $0x188] ss:$24 sps:$4 sm:$0xff]   ;;  %v5828_v1 = vld [vmem:[#allocation2 + $0x164] ss:$24 sps:$4 sm:$0xff]   ;;  %v6596_v8 = vld [vmem:[%s7830_s0 + $0x10] ss:$8 sps:$4 sm:$0xff]  }
  0x62   :  { %931 = vmatpush1.bf16.msra.mxu1 %v5762_v23  ;;  %819 = vmatprep.subr.bf16.mxu0 %v5763_v24  ;;  %v6582_v2 = vld [vmem:[%s7830_s0] ss:$8 sps:$4 sm:$0xff]   ;;  %v6587_v4 = vld [vmem:[%s7830_s0 + $0x14] ss:$8 sps:$4 sm:$0xff]   ;;  %v6601_v10 = vld [vmem:[%s7830_s0 + $0x24] ss:$8 sps:$4 sm:$0xff]  }
  0x63   :  { %932 = vmatprep.subr.bf16.mxu1 %v5765_v25  ;;  %v5826_v3 = vld [vmem:[#allocation2 + $0x160] ss:$24 sps:$4 sm:$0xff]   ;;  %v5829_v6 = vld [vmem:[#allocation2 + $0x130] ss:$24 sps:$4 sm:$0xff]   ;;  %v5837_v7 = vld [vmem:[#allocation2 + $0x104] ss:$24 sps:$4 sm:$0xff]  }
  0x64   :  { %v5835_v9 = vld [vmem:[#allocation2 + $0x100] ss:$24 sps:$4 sm:$0xff]   ;;  %v5840_v11 = vld [vmem:[#allocation2 + $0xd4] ss:$24 sps:$4 sm:$0xff]   ;;  %v5838_v14 = vld [vmem:[#allocation2 + $0xd0] ss:$24 sps:$4 sm:$0xff]  }
  0x65   :  { %820 = vmatpush1.bf16.msra.mxu0 %v5767_v26  ;;  %v5895_v12 = vld [vmem:[#allocation6 + $0x150] ss:$24 sps:$4 sm:$0xff]   ;;  %v5897_v13 = vld [vmem:[#allocation6 + $0x154] ss:$24 sps:$4 sm:$0xff]   ;;  %v5903_v16 = vld [vmem:[#allocation6 + $0x124] ss:$24 sps:$4 sm:$0xff]  }
  0x66   :  { %933 = vmatpush1.bf16.msra.mxu1 %v5768_v27  ;;  %821 = vmatprep.subr.bf16.mxu0 %v5769_v28  ;;  %v5846_v15 = vld [vmem:[#allocation2 + $0xa4] ss:$24 sps:$4 sm:$0xff]   ;;  %v6610_v17 = vld [vmem:[%s7830_s0 + $0x20] ss:$8 sps:$4 sm:$0xff]   ;;  %v5849_v20 = vld [vmem:[#allocation2 + $0x74] ss:$24 sps:$4 sm:$0xff]  }
  0x67   :  { %934 = vmatprep.subr.bf16.mxu1 %v5771_v29  ;;  %v5844_v18 = vld [vmem:[#allocation2 + $0xa0] ss:$24 sps:$4 sm:$0xff]   ;;  %v6615_v19 = vld [vmem:[%s7830_s0 + $0x34] ss:$8 sps:$4 sm:$0xff]   ;;  %v5847_v23 = vld [vmem:[#allocation2 + $0x70] ss:$24 sps:$4 sm:$0xff]  }
  0x68   :  { %v5901_v21 = vld [vmem:[#allocation6 + $0x120] ss:$24 sps:$4 sm:$0xff]   ;;  %v5909_v22 = vld [vmem:[#allocation6 + $0xf4] ss:$24 sps:$4 sm:$0xff]   ;;  %v5907_v25 = vld [vmem:[#allocation6 + $0xf0] ss:$24 sps:$4 sm:$0xff]  }
  0x69   :  { %822 = vmatpush1.bf16.msra.mxu0 %v5773_v30  ;;  %v5855_v24 = vld [vmem:[#allocation2 + $0x44] ss:$24 sps:$4 sm:$0xff]   ;;  %v6624_v26 = vld [vmem:[%s7830_s0 + $0x30] ss:$8 sps:$4 sm:$0xff]   ;;  %v5858_v29 = vld [vmem:[#allocation2 + $0x14] ss:$24 sps:$4 sm:$0xff]  }
  0x6a   :  { %935 = vmatpush1.bf16.msra.mxu1 %v5774_v31  ;;  %823 = vmatprep.subr.bf16.mxu0 %v5775_v32  ;;  %v5853_v27 = vld [vmem:[#allocation2 + $0x40] ss:$24 sps:$4 sm:$0xff]   ;;  %v6629_v28 = vld [vmem:[%s7830_s0 + $0x44] ss:$8 sps:$4 sm:$0xff]   ;;  %v5856_v31 = vld [vmem:[#allocation2 + $0x10] ss:$24 sps:$4 sm:$0xff]  }
  0x6b   :  { %936 = vmatprep.subr.bf16.mxu1 %v5777_v33  ;;  %v5915_v30 = vld [vmem:[#allocation6 + $0xc4] ss:$24 sps:$4 sm:$0xff]   ;;  %v5913_v32 = vld [vmem:[#allocation6 + $0xc0] ss:$24 sps:$4 sm:$0xff]   ;;  %v5921_v33 = vld [vmem:[#allocation6 + $0x94] ss:$24 sps:$4 sm:$0xff]  }
  0x6d   :  { %824 = vmatpush2.bf16.msra.mxu0 %v5779_v34  ;;  %v5864_v34 = vld [vmem:[#allocation2 + $0x2e4] ss:$24 sps:$4 sm:$0xff]  }
  0x6e   :  { %937 = vmatpush2.bf16.msra.mxu1 %v5780_v35  ;;  %825 = vmatprep.subr.bf16.mxu0 %v5781_v36  ;;  %v6638_v35 = vld [vmem:[%s7830_s0 + $0x40] ss:$8 sps:$4 sm:$0xff]  }
  0x6f   :  { %938 = vmatprep.subr.bf16.mxu1 %v5783_v37  ;;  %v5862_v36 = vld [vmem:[#allocation2 + $0x2e0] ss:$24 sps:$4 sm:$0xff]   ;;  %v6643_v37 = vld [vmem:[%s7830_s0 + $0x54] ss:$8 sps:$4 sm:$0xff]  }
  0x71   :  { %826 = vmatpush2.bf16.msra.mxu0 %v5785_v38  ;;  %v5867_v38 = vld [vmem:[#allocation2 + $0x2b4] ss:$24 sps:$4 sm:$0xff]  }
  0x72   :  { %939 = vmatpush2.bf16.msra.mxu1 %v5786_v39  ;;  %827 = vmatprep.subr.bf16.mxu0 %v5787_v40  ;;  %v5919_v39 = vld [vmem:[#allocation6 + $0x90] ss:$24 sps:$4 sm:$0xff]   ;;  %v5927_v40 = vld [vmem:[#allocation6 + $0x64] ss:$24 sps:$4 sm:$0xff]  }
  0x73   :  { %940 = vmatprep.subr.bf16.mxu1 %v5789_v41  ;;  %v5865_v41 = vld [vmem:[#allocation2 + $0x2b0] ss:$24 sps:$4 sm:$0xff]  }
  0x75   :  { %828 = vmatpush2.bf16.msra.mxu0 %v5791_v42  ;;  %v5873_v42 = vld [vmem:[#allocation2 + $0x284] ss:$24 sps:$4 sm:$0xff]  }
  0x76   :  { %941 = vmatpush2.bf16.msra.mxu1 %v5792_v43  ;;  %829 = vmatprep.subr.bf16.mxu0 %v5793_v44  ;;  %v5925_v43 = vld [vmem:[#allocation6 + $0x60] ss:$24 sps:$4 sm:$0xff]   ;;  %v6652_v44 = vld [vmem:[%s7830_s0 + $0x50] ss:$8 sps:$4 sm:$0xff]  }
  0x77   :  { %942 = vmatprep.subr.bf16.mxu1 %v5795_v45  ;;  %v5871_v45 = vld [vmem:[#allocation2 + $0x280] ss:$24 sps:$4 sm:$0xff]  }
  0x79   :  { %830 = vmatpush2.bf16.msra.mxu0 %v5797_v46  ;;  %v6657_v46 = vld [vmem:[%s7830_s0 + $0x64] ss:$8 sps:$4 sm:$0xff]  }
  0x7a   :  { %943 = vmatpush2.bf16.msra.mxu1 %v5798_v47  ;;  %831 = vmatprep.subr.bf16.mxu0 %v5799_v49  ;;  %v5876_v47 = vld [vmem:[#allocation2 + $0x254] ss:$24 sps:$4 sm:$0xff]  }
  0x7b   :  { %944 = vmatprep.subr.bf16.mxu1 %v5801_v50  ;;  %v5933_v49 = vld [vmem:[#allocation6 + $0x34] ss:$24 sps:$4 sm:$0xff]  }
  0x7c   :  { %v5874_v50 = vld [vmem:[#allocation2 + $0x250] ss:$24 sps:$4 sm:$0xff]  }
  0x7d   :  { %832 = vmatpush2.bf16.msra.mxu0 %v5803_v51  ;;  %v5931_v51 = vld [vmem:[#allocation6 + $0x30] ss:$24 sps:$4 sm:$0xff]  }
  0x7e   :  { %945 = vmatpush2.bf16.msra.mxu1 %v5804_v52  ;;  %833 = vmatprep.subr.bf16.mxu0 %v5805_v53  ;;  %v5939_v52 = vld [vmem:[#allocation6 + $0x4] ss:$24 sps:$4 sm:$0xff]  }
  0x7f   :  { %946 = vmatprep.subr.bf16.mxu1 %v5807_v54  ;;  %v6666_v53 = vld [vmem:[%s7830_s0 + $0x60] ss:$8 sps:$4 sm:$0xff]   ;;  %v5882_v54 = vld [vmem:[#allocation2 + $0x224] ss:$24 sps:$4 sm:$0xff]  }
  0x81   :  { %834 = vmatpush2.bf16.msra.mxu0 %v5809_v55  ;;  %v5880_v55 = vld [vmem:[#allocation2 + $0x220] ss:$24 sps:$4 sm:$0xff]  }
  0x82   :  { %947 = vmatpush2.bf16.msra.mxu1 %v5810_v56  ;;  %835 = vmatprep.subr.bf16.mxu0 %v5811_v57  ;;  %v6671_v56 = vld [vmem:[%s7830_s0 + $0x74] ss:$8 sps:$4 sm:$0xff]  }
  0x83   :  { %948 = vmatprep.subr.bf16.mxu1 %v5813_v58  ;;  %v5885_v57 = vld [vmem:[#allocation2 + $0x1f4] ss:$24 sps:$4 sm:$0xff]   ;;  %v5937_v58 = vld [vmem:[#allocation6] ss:$24 sps:$4 sm:$0xff]  }
  0x85   :  { %836 = vmatpush2.bf16.msra.mxu0 %v5815_v59  ;;  %v5945_v59 = vld [vmem:[#allocation6 + $0x2d4] ss:$24 sps:$4 sm:$0xff]  }
  0x86   :  { %949 = vmatpush2.bf16.msra.mxu1 %v5816_v60  ;;  %837 = vmatprep.subr.bf16.mxu0 %v5817_v61  ;;  %v5883_v60 = vld [vmem:[#allocation2 + $0x1f0] ss:$24 sps:$4 sm:$0xff]   ;;  %v5891_v61 = vld [vmem:[#allocation2 + $0x1c4] ss:$24 sps:$4 sm:$0xff]  }
  0x87   :  { %950 = vmatprep.subr.bf16.mxu1 %v5819_v62  ;;  %v5943_v62 = vld [vmem:[#allocation6 + $0x2d0] ss:$24 sps:$4 sm:$0xff]  }
  0x89   :  { %838 = vmatpush2.bf16.msra.mxu0 %v5821_v63  ;;  %v6680_v63 = vld [vmem:[%s7830_s0 + $0x70] ss:$8 sps:$4 sm:$0xff]  }
  0x8a   :  { %951 = vmatpush2.bf16.msra.mxu1 %v5822_v0  ;;  %1033 = vmatprep.subr.bf16.mxu0 %v5828_v1  ;;  %v5889_v0 = vld [vmem:[#allocation2 + $0x1c0] ss:$24 sps:$4 sm:$0xff]   ;;  %v5894_v1 = vld [vmem:[#allocation2 + $0x194] ss:$24 sps:$4 sm:$0xff]  }
  0x8b   :  { %3050 = vmatprep.subr.bf16.mxu1 %v5897_v13  ;;  %v5898_v13 = vld [vmem:[#allocation6 + $0x450] ss:$24 sps:$4 sm:$0xff]  }
  0x8c   :  { %840 = vmatmul.mubr.bf16.vlgmr.msra.gmra.mxu0 %v6582_v2 }
  0x8d   :  { %953 = vmatmul.mubr.bf16.vlgmr.msra.gmra.mxu1 %v6582_v2  ;;  %1034 = vmatpush1.bf16.msra.mxu0 %v5826_v3  ;;  %v5951_v3 = vld [vmem:[#allocation6 + $0x2a4] ss:$24 sps:$4 sm:$0xff]  }
  0x8e   :  { %849 = vmatprep.mubr.bf16.mxu0 %v6587_v4  ;;  %1035 = vmatprep.subr.bf16.mxu0 %v5831_v5  ;;  %v5949_v5 = vld [vmem:[#allocation6 + $0x2a0] ss:$24 sps:$4 sm:$0xff]  }
  0x8f   :  { %962 = vmatprep.mubr.bf16.mxu1 %v6587_v4  ;;  %3051 = vmatpush1.bf16.msra.mxu1 %v5895_v12  ;;  %v5963_v12 = vld [vmem:[#allocation6 + $0x244] ss:$24 sps:$4 sm:$0xff]  }
  0x90   :  { %3052 = vmatprep.subr.bf16.mxu1 %v5903_v16  ;;  %v5904_v16 = vld [vmem:[#allocation6 + $0x420] ss:$24 sps:$4 sm:$0xff]  }
  0x91   :  { %1036 = vmatpush1.bf16.msra.mxu0 %v5829_v6  ;;  %v5957_v6 = vld [vmem:[#allocation6 + $0x274] ss:$24 sps:$4 sm:$0xff]  }
  0x92   :  { %1037 = vmatprep.subr.bf16.mxu0 %v5837_v7  ;;  %v5892_v7 = vld [vmem:[#allocation2 + $0x190] ss:$24 sps:$4 sm:$0xff]  }
  0x93   :  { %3053 = vmatpush1.bf16.msra.mxu1 %v5901_v21  ;;  %v5910_v21 = vld [vmem:[#allocation6 + $0x3f0] ss:$24 sps:$4 sm:$0xff]  }
  0x94   :  { %850 = vmatmul.mubr.bf16.gmra.mxu0 %v6596_v8  ;;  %3054 = vmatprep.subr.bf16.mxu1 %v5909_v22  ;;  %v5975_v22 = vld [vmem:[#allocation6 + $0x1e4] ss:$24 sps:$4 sm:$0xff]  }
  0x95   :  { %963 = vmatmul.mubr.bf16.gmra.mxu1 %v6596_v8  ;;  %1038 = vmatpush1.bf16.msra.mxu0 %v5835_v9  ;;  %v5900_v9 = vld [vmem:[#allocation6 + $0x454] ss:$24 sps:$4 sm:$0xff]  }
  0x96   :  { %859 = vmatprep.mubr.bf16.mxu0 %v6601_v10  ;;  %1039 = vmatprep.subr.bf16.mxu0 %v5840_v11  ;;  %v5955_v11 = vld [vmem:[#allocation6 + $0x270] ss:$24 sps:$4 sm:$0xff]  }
  0x97   :  { %972 = vmatprep.mubr.bf16.mxu1 %v6601_v10  ;;  %3055 = vmatpush1.bf16.msra.mxu1 %v5907_v25  ;;  %v5981_v25 = vld [vmem:[#allocation6 + $0x1b4] ss:$24 sps:$4 sm:$0xff]  }
  0x98   :  { %3056 = vmatprep.subr.bf16.mxu1 %v5915_v30  ;;  %v5922_v30 = vld [vmem:[#allocation6 + $0x390] ss:$24 sps:$4 sm:$0xff]  }
  0x99   :  { %1040 = vmatpush1.bf16.msra.mxu0 %v5838_v14  ;;  %v5906_v14 = vld [vmem:[#allocation6 + $0x424] ss:$24 sps:$4 sm:$0xff]  }
  0x9a   :  { %1041 = vmatprep.subr.bf16.mxu0 %v5846_v15  ;;  %v5961_v15 = vld [vmem:[#allocation6 + $0x240] ss:$24 sps:$4 sm:$0xff]  }
  0x9b   :  { %3057 = vmatpush1.bf16.msra.mxu1 %v5913_v32  ;;  %v5985_v32 = vld [vmem:[#allocation6 + $0x180] ss:$24 sps:$4 sm:$0xff]  }
  0x9c   :  { %860 = vmatmul.mubr.bf16.gmra.mxu0 %v6610_v17  ;;  %3058 = vmatprep.subr.bf16.mxu1 %v5921_v33  ;;  %v5993_v33 = vld [vmem:[#allocation6 + $0x754] ss:$24 sps:$4 sm:$0xff]  }
  0x9d   :  { %973 = vmatmul.mubr.bf16.gmra.mxu1 %v6610_v17  ;;  %1042 = vmatpush1.bf16.msra.mxu0 %v5844_v18  ;;  %v5969_v18 = vld [vmem:[#allocation6 + $0x214] ss:$24 sps:$4 sm:$0xff]  }
  0x9e   :  { %869 = vmatprep.mubr.bf16.mxu0 %v6615_v19  ;;  %1043 = vmatprep.subr.bf16.mxu0 %v5849_v20  ;;  %v5967_v20 = vld [vmem:[#allocation6 + $0x210] ss:$24 sps:$4 sm:$0xff]  }
  0x9f   :  { %982 = vmatprep.mubr.bf16.mxu1 %v6615_v19  ;;  %3059 = vmatpush1.bf16.msra.mxu1 %v5919_v39  ;;  %v5954_v39 = vld [vmem:[#allocation6 + $0x5a4] ss:$24 sps:$4 sm:$0xff]  }
  0xa0   :  { %3060 = vmatprep.subr.bf16.mxu1 %v5927_v40  ;;  %v5952_v40 = vld [vmem:[#allocation6 + $0x5a0] ss:$24 sps:$4 sm:$0xff]  }
  0xa1   :  { %1044 = vmatpush1.bf16.msra.mxu0 %v5847_v23  ;;  %v5918_v23 = vld [vmem:[#allocation6 + $0x3c4] ss:$24 sps:$4 sm:$0xff]  }
  0xa2   :  { %1045 = vmatprep.subr.bf16.mxu0 %v5855_v24  ;;  %v5973_v24 = vld [vmem:[#allocation6 + $0x1e0] ss:$24 sps:$4 sm:$0xff]  }
  0xa3   :  { %3061 = vmatpush1.bf16.msra.mxu1 %v5925_v43  ;;  %v5972_v43 = vld [vmem:[#allocation6 + $0x514] ss:$24 sps:$4 sm:$0xff]  }
  0xa4   :  { %870 = vmatmul.mubr.bf16.gmra.mxu0 %v6624_v26  ;;  %3062 = vmatprep.subr.bf16.mxu1 %v5933_v49  ;;  %v5988_v49 = vld [vmem:[#allocation6 + $0x480] ss:$24 sps:$4 sm:$0xff]  }
  0xa5   :  { %983 = vmatmul.mubr.bf16.gmra.mxu1 %v6624_v26  ;;  %1046 = vmatpush1.bf16.msra.mxu0 %v5853_v27  ;;  %v5979_v27 = vld [vmem:[#allocation6 + $0x1b0] ss:$24 sps:$4 sm:$0xff]  }
  0xa6   :  { %879 = vmatprep.mubr.bf16.mxu0 %v6629_v28  ;;  %1047 = vmatprep.subr.bf16.mxu0 %v5858_v29  ;;  %v5987_v29 = vld [vmem:[#allocation6 + $0x184] ss:$24 sps:$4 sm:$0xff]  }
  0xa7   :  { %992 = vmatprep.mubr.bf16.mxu1 %v6629_v28  ;;  %3063 = vmatpush1.bf16.msra.mxu1 %v5931_v51  ;;  %v217_v51 = vlaneseq }
  0xa8   :  { %3064 = vmatprep.subr.bf16.mxu1 %v5939_v52 }
  0xa9   :  { %1048 = vmatpush1.bf16.msra.mxu0 %v5856_v31  ;;  %v5930_v31 = vld [vmem:[#allocation6 + $0x364] ss:$24 sps:$4 sm:$0xff]   ;;  %v6700_v52 = vshrl.u32 %v217_v51, 7 }
  0xaa   :  { %1049 = vmatprep.subr.bf16.mxu0 %v5864_v34  ;;  %v5934_v34 = vld [vmem:[#allocation6 + $0x330] ss:$24 sps:$4 sm:$0xff]  }
  0xab   :  { %3065 = vmatpush1.bf16.msra.mxu1 %v5937_v58  ;;  %7869 = vst [vmem:[#allocation16_spill] sm:$0xff] %v6700_v52 }
  0xac   :  { %880 = vmatmul.mubr.bf16.gmra.mxu0 %v6638_v35  ;;  %3066 = vmatprep.subr.bf16.mxu1 %v5945_v59 }
  0xad   :  { %993 = vmatmul.mubr.bf16.gmra.mxu1 %v6638_v35  ;;  %1050 = vmatpush2.bf16.msra.mxu0 %v5862_v36  ;;  %v5942_v36 = vld [vmem:[#allocation6 + $0x304] ss:$24 sps:$4 sm:$0xff]  }
  0xae   :  { %889 = vmatprep.mubr.bf16.mxu0 %v6643_v37  ;;  %1051 = vmatprep.subr.bf16.mxu0 %v5867_v38  ;;  %v5940_v38 = vld [vmem:[#allocation6 + $0x300] ss:$24 sps:$4 sm:$0xff]  }
  0xaf   :  { %1002 = vmatprep.mubr.bf16.mxu1 %v6643_v37  ;;  %3067 = vmatpush2.bf16.msra.mxu1 %v5943_v62 }
  0xb0   :  { %3068 = vmatprep.subr.bf16.mxu1 %v5951_v3 }
  0xb1   :  { %1052 = vmatpush2.bf16.msra.mxu0 %v5865_v41  ;;  %v5960_v41 = vld [vmem:[#allocation6 + $0x574] ss:$24 sps:$4 sm:$0xff]  }
  0xb2   :  { %1053 = vmatprep.subr.bf16.mxu0 %v5873_v42  ;;  %v5964_v42 = vld [vmem:[#allocation6 + $0x540] ss:$24 sps:$4 sm:$0xff]  }
  0xb3   :  { %3069 = vmatpush2.bf16.msra.mxu1 %v5949_v5 }
  0xb4   :  { %890 = vmatmul.mubr.bf16.gmra.mxu0 %v6652_v44  ;;  %3070 = vmatprep.subr.bf16.mxu1 %v5957_v6 }
  0xb5   :  { %1003 = vmatmul.mubr.bf16.gmra.mxu1 %v6652_v44  ;;  %1054 = vmatpush2.bf16.msra.mxu0 %v5871_v45  ;;  %v5976_v45 = vld [vmem:[#allocation6 + $0x4e0] ss:$24 sps:$4 sm:$0xff]  }
  0xb6   :  { %899 = vmatprep.mubr.bf16.mxu0 %v6657_v46  ;;  %1055 = vmatprep.subr.bf16.mxu0 %v5876_v47  ;;  %v5984_v47 = vld [vmem:[#allocation6 + $0x4b4] ss:$24 sps:$4 sm:$0xff]  }
  0xb7   :  { %1012 = vmatprep.mubr.bf16.mxu1 %v6657_v46  ;;  %3071 = vmatpush2.bf16.msra.mxu1 %v5955_v11 }
  0xb8   :  { %3072 = vmatprep.subr.bf16.mxu1 %v5963_v12 }
  0xb9   :  { %1056 = vmatpush2.bf16.msra.mxu0 %v5874_v50  ;;  %v5996_v50 = vld [vmem:[#allocation6 + $0x15c] ss:$24 sps:$4 sm:$0xff]  }
  0xba   :  { %1057 = vmatprep.subr.bf16.mxu0 %v5882_v54  ;;  %v7840_v54 = vsub.s32 3, %v6700_v52 }
  0xbb   :  { %3073 = vmatpush2.bf16.msra.mxu1 %v5961_v15 }
  0xbc   :  { %900 = vmatmul.mubr.bf16.gmra.mxu0 %v6666_v53  ;;  %3074 = vmatprep.subr.bf16.mxu1 %v5969_v18 }
  0xbd   :  { %1013 = vmatmul.mubr.bf16.gmra.mxu1 %v6666_v53  ;;  %1058 = vmatpush2.bf16.msra.mxu0 %v5880_v55  ;;  %v6704_v55 = vld [vmem:[#allocation4] sm:$0x3f] }
  0xbe   :  { %909 = vmatprep.mubr.bf16.mxu0 %v6671_v56  ;;  %1059 = vmatprep.subr.bf16.mxu0 %v5885_v57  ;;  %v7843_v57 = vsub.s32 0, %v6700_v52  ;;  %v6716_v59 = vrot.slane %v6704_v55, %v7840_v54  ;;  %v6123_v54 = vld [vmem:[#allocation6 + $0x338] ss:$24 sps:$4 sm:$0xff]  }
  0xbf   :  { %1022 = vmatprep.mubr.bf16.mxu1 %v6671_v56  ;;  %3075 = vmatpush2.bf16.msra.mxu1 %v5967_v20 }
  0xc0   :  { %3076 = vmatprep.subr.bf16.mxu1 %v5975_v22 }
  0xc1   :  { %1060 = vmatpush2.bf16.msra.mxu0 %v5883_v60 }
  0xc2   :  { %1061 = vmatprep.subr.bf16.mxu0 %v5891_v61 }
  0xc3   :  { %3077 = vmatpush2.bf16.msra.mxu1 %v5973_v24 }
  0xc4   :  { %910 = vmatmul.mubr.bf16.gmra.mxu0 %v6680_v63  ;;  %3078 = vmatprep.subr.bf16.mxu1 %v5981_v25 }
  0xc5   :  { %1023 = vmatmul.mubr.bf16.gmra.mxu1 %v6680_v63  ;;  %1062 = vmatpush2.bf16.msra.mxu0 %v5889_v0 }
  0xc6   :  { %1065 = vmatprep.mubr.bf16.mxu0 %v6575_v48  ;;  %1063 = vmatprep.subr.bf16.mxu0 %v5894_v1  ;;  %v5912_v48 = vld [vmem:[#allocation6 + $0x3f4] ss:$24 sps:$4 sm:$0xff]  }
  0xc7   :  { %3079 = vmatpush2.bf16.msra.mxu1 %v5979_v27 }
  0xc8   :  { %3080 = vmatprep.subr.bf16.mxu1 %v5987_v29 }
  0xc9   :  { %1064 = vmatpush2.bf16.msra.mxu0 %v5892_v7 }
  0xca   :  { %3163 = vmatprep.subr.bf16.mxu0 %v5900_v9 }
  0xcb   :  { %3081 = vmatpush2.bf16.msra.mxu1 %v5985_v32 }
  0xcc   :  { %1066 = vmatmul.mubr.bf16.vlgmr.msra.gmra.mxu0 %v6582_v2  ;;  %v5916_v2 = vld [vmem:[#allocation6 + $0x3c0] ss:$24 sps:$4 sm:$0xff]   ;;  %3276 = vmatprep.subr.bf16.mxu1 %v5993_v33 }
  0xcd   :  { %1075 = vmatprep.mubr.bf16.mxu0 %v6587_v4  ;;  %3164 = vmatpush1.bf16.msra.mxu0 %v5898_v13  ;;  %v5924_v4 = vld [vmem:[#allocation6 + $0x394] ss:$24 sps:$4 sm:$0xff]  }
  0xce   :  { %3165 = vmatprep.subr.bf16.mxu0 %v5906_v14 }
  0xd1   :  { %3166 = vmatpush1.bf16.msra.mxu0 %v5904_v16 }
  0xd2   :  { %3167 = vmatprep.subr.bf16.mxu0 %v5912_v48 }
  0xd4   :  { %1076 = vmatmul.mubr.bf16.gmra.mxu0 %v6596_v8  ;;  %v5928_v8 = vld [vmem:[#allocation6 + $0x360] ss:$24 sps:$4 sm:$0xff]  }
  0xd5   :  { %1085 = vmatprep.mubr.bf16.mxu0 %v6601_v10  ;;  %3168 = vmatpush1.bf16.msra.mxu0 %v5910_v21  ;;  %v5936_v10 = vld [vmem:[#allocation6 + $0x334] ss:$24 sps:$4 sm:$0xff]  }
  0xd6   :  { %3169 = vmatprep.subr.bf16.mxu0 %v5918_v23 }
  0xd9   :  { %3170 = vmatpush1.bf16.msra.mxu0 %v5916_v2 }
  0xda   :  { %3171 = vmatprep.subr.bf16.mxu0 %v5924_v4 }
  0xdc   :  { %1086 = vmatmul.mubr.bf16.gmra.mxu0 %v6610_v17  ;;  %v5948_v17 = vld [vmem:[#allocation6 + $0x5d4] ss:$24 sps:$4 sm:$0xff]  }
  0xdd   :  { %1095 = vmatprep.mubr.bf16.mxu0 %v6615_v19  ;;  %3172 = vmatpush1.bf16.msra.mxu0 %v5922_v30  ;;  %v5946_v19 = vld [vmem:[#allocation6 + $0x5d0] ss:$24 sps:$4 sm:$0xff]  }
  0xde   :  { %3173 = vmatprep.subr.bf16.mxu0 %v5930_v31 }
  0xe1   :  { %3174 = vmatpush1.bf16.msra.mxu0 %v5928_v8 }
  0xe2   :  { %3175 = vmatprep.subr.bf16.mxu0 %v5936_v10  ;;  %v5991_v10 = vld [vmem:[#allocation6 + $0x750] ss:$24 sps:$4 sm:$0xff]  }
  0xe4   :  { %1096 = vmatmul.mubr.bf16.gmra.mxu0 %v6624_v26  ;;  %v5958_v26 = vld [vmem:[#allocation6 + $0x570] ss:$24 sps:$4 sm:$0xff]  }
  0xe5   :  { %1105 = vmatprep.mubr.bf16.mxu0 %v6629_v28  ;;  %3176 = vmatpush1.bf16.msra.mxu0 %v5934_v34  ;;  %v5966_v28 = vld [vmem:[#allocation6 + $0x544] ss:$24 sps:$4 sm:$0xff]   ;;  %v5994_v34 = vld [vmem:[#allocation6 + $0x158] ss:$24 sps:$4 sm:$0xff]  }
  0xe6   :  { %3177 = vmatprep.subr.bf16.mxu0 %v5942_v36 }
  0xe9   :  { %3178 = vmatpush1.bf16.msra.mxu0 %v5940_v38 }
  0xea   :  { %3179 = vmatprep.subr.bf16.mxu0 %v5948_v17 }
  0xec   :  { %1106 = vmatmul.mubr.bf16.gmra.mxu0 %v6638_v35  ;;  %v5970_v35 = vld [vmem:[#allocation6 + $0x510] ss:$24 sps:$4 sm:$0xff]  }
  0xed   :  { %1115 = vmatprep.mubr.bf16.mxu0 %v6643_v37  ;;  %3180 = vmatpush2.bf16.msra.mxu0 %v5946_v19  ;;  %v5978_v37 = vld [vmem:[#allocation6 + $0x4e4] ss:$24 sps:$4 sm:$0xff]  }
  0xee   :  { %3181 = vmatprep.subr.bf16.mxu0 %v5954_v39  ;;  %v5999_v39 = vld [vmem:[#allocation6 + $0x724] ss:$24 sps:$4 sm:$0xff]  }
  0xf1   :  { %3182 = vmatpush2.bf16.msra.mxu0 %v5952_v40  ;;  %v6002_v40 = vld [vmem:[#allocation6 + $0x12c] ss:$24 sps:$4 sm:$0xff]  }
  0xf2   :  { %3183 = vmatprep.subr.bf16.mxu0 %v5960_v41 }
  0xf4   :  { %1116 = vmatmul.mubr.bf16.gmra.mxu0 %v6652_v44  ;;  %v5982_v44 = vld [vmem:[#allocation6 + $0x4b0] ss:$24 sps:$4 sm:$0xff]  }
  0xf5   :  { %1125 = vmatprep.mubr.bf16.mxu0 %v6657_v46  ;;  %3184 = vmatpush2.bf16.msra.mxu0 %v5958_v26  ;;  %v5990_v46 = vld [vmem:[#allocation6 + $0x484] ss:$24 sps:$4 sm:$0xff]  }
  0xf6   :  { %3185 = vmatprep.subr.bf16.mxu0 %v5966_v28 }
  0xf9   :  { %3186 = vmatpush2.bf16.msra.mxu0 %v5964_v42 }
  0xfa   :  { %3187 = vmatprep.subr.bf16.mxu0 %v5972_v43 }
  0xfc   :  { %1126 = vmatmul.mubr.bf16.gmra.mxu0 %v6666_v53  ;;  %v7841_v53 = vsub.s32 2, %v6700_v52 }
  0xfd   :  { %1135 = vmatprep.mubr.bf16.mxu0 %v6671_v56  ;;  %3188 = vmatpush2.bf16.msra.mxu0 %v5970_v35  ;;  %v7842_v56 = vsub.s32 1, %v6700_v52 }
  0xfe   :  { %3189 = vmatprep.subr.bf16.mxu0 %v5978_v37  ;;  %v6711_v58 = vrot.slane %v6704_v55, %v7841_v53 }
  0xff   :  { %v6721_v62 = vrot.slane %v6704_v55, %v7842_v56  ;;  %v6135_v56 = vld [vmem:[#allocation6 + $0x5d8] ss:$24 sps:$4 sm:$0xff]  }
 0x101   :  { %3190 = vmatpush2.bf16.msra.mxu0 %v5976_v45 }
 0x102   :  { %3191 = vmatprep.subr.bf16.mxu0 %v5984_v47 }
 0x104   :  { %1136 = vmatmul.mubr.bf16.gmra.mxu0 %v6680_v63  ;;  %v6726_v63 = vrot.slane %v6704_v55, %v7843_v57 }
 0x105   :  { %3192 = vmatpush2.bf16.msra.mxu0 %v5982_v44 }
 0x106   :  { %3193 = vmatprep.subr.bf16.mxu0 %v5990_v46  ;;  %v5997_v46 = vld [vmem:[#allocation6 + $0x720] ss:$24 sps:$4 sm:$0xff]  }
 0x109   :  { %3194 = vmatpush2.bf16.msra.mxu0 %v5988_v49  ;;  %v6000_v49 = vld [vmem:[#allocation6 + $0x128] ss:$24 sps:$4 sm:$0xff]  }
 0x10a   :  { %3389 = vmatprep.subr.bf16.mxu0 %v5996_v50 }
 0x14c   :  { %v841_v60 = vpop.f32.mrf.mxu0 }
 0x14d   :  { %v954_v61 = vpop.f32.mrf.mxu1  ;;  %v842_v13 = vadd.f32 %v841_v60, %v6726_v63 }
 0x14e   :  { %v955_v0 = vadd.f32 %v954_v61, %v6711_v58  ;;  %v843_v1 = vpop.f32.mrf.mxu0 }
 0x14f   :  { %v956_v3 = vpop.f32.mrf.mxu1  ;;  %v844_v9 = vadd.f32 %v843_v1, %v6721_v62  ;;  %v1146_v27 = vmax.f32 %v842_v13, 0.0  ;;  %v6008_v1 = vld [vmem:[#allocation6 + $0xfc] ss:$24 sps:$4 sm:$0xff]  }
 0x150   :  { %v957_v5 = vadd.f32 %v956_v3, %v6716_v59  ;;  %v845_v6 = vpop.f32.mrf.mxu0  ;;  %v1148_v14 = vmax.f32 %v955_v0, 0.0  ;;  %v6005_v0 = vld [vmem:[#allocation6 + $0x6f4] ss:$24 sps:$4 sm:$0xff]  }
 0x151   :  { %v958_v7 = vpop.f32.mrf.mxu1  ;;  %v846_v11 = vadd.f32 %v845_v6, %v6726_v63  ;;  %v1147_v25 = vmax.f32 %v844_v9, 0.0 }
 0x152   :  { %v959_v12 = vadd.f32 %v958_v7, %v6711_v58  ;;  %v847_v15 = vpop.f32.mrf.mxu0  ;;  %v1149_v18 = vmax.f32 %v957_v5, 0.0 }
 0x153   :  { %v960_v16 = vpop.f32.mrf.mxu1  ;;  %v848_v20 = vadd.f32 %v847_v15, %v6721_v62  ;;  %v1152_v22 = vmax.f32 %v846_v11, 0.0 }
 0x154   :  { %v1154_v48 = vmax.f32 %v959_v12, 0.0  ;;  %v961_v21 = vadd.f32 %v960_v16, %v6716_v59  ;;  %v851_v23 = vpop.f32.mrf.mxu0  ;;  %v6003_v16 = vld [vmem:[#allocation6 + $0x6f0] ss:$24 sps:$4 sm:$0xff]  }
 0x155   :  { %v964_v24 = vpop.f32.mrf.mxu1  ;;  %v1153_v2 = vmax.f32 %v848_v20, 0.0  ;;  %v6743_v36 = vpack.c.bf16 %v1152_v22, %v1146_v27  ;;  %v852_v42 = vadd.f32 %v851_v23, %v6726_v63  ;;  %v6006_v22 = vld [vmem:[#allocation6 + $0xf8] ss:$24 sps:$4 sm:$0xff]   ;;  %v6011_v23 = vld [vmem:[#allocation6 + $0x6c4] ss:$24 sps:$4 sm:$0xff]  }
 0x156   :  { %v1155_v4 = vmax.f32 %v961_v21, 0.0  ;;  %v6736_v29 = vpack.c.bf16 %v1154_v48, %v1148_v14  ;;  %v853_v30 = vpop.f32.mrf.mxu0  ;;  %v965_v32 = vadd.f32 %v964_v24, %v6711_v58 }
 0x157   :  { %v966_v31 = vpop.f32.mrf.mxu1  ;;  %v6739_v33 = vpack.c.bf16 %v1153_v2, %v1147_v25  ;;  %v854_v41 = vadd.f32 %v853_v30, %v6721_v62  ;;  %v1158_v7 = vmax.f32 %v852_v42, 0.0 }
 0x158   :  { %v6741_v8 = vpack.c.bf16 %v1155_v4, %v1149_v18  ;;  %v967_v38 = vadd.f32 %v966_v31, %v6716_v59  ;;  %v855_v17 = vpop.f32.mrf.mxu0  ;;  %v1160_v37 = vmax.f32 %v965_v32, 0.0  ;;  %v6014_v4 = vld [vmem:[#allocation6 + $0xcc] ss:$24 sps:$4 sm:$0xff]  }
 0x159   :  { %v968_v19 = vpop.f32.mrf.mxu1  ;;  %v856_v26 = vadd.f32 %v855_v17, %v6726_v63  ;;  %3082 = vmatprep.mubr.bf16.mxu1 %v6739_v33  ;;  %v1159_v3 = vmax.f32 %v854_v41, 0.0 }
 0x15a   :  { %v969_v28 = vadd.f32 %v968_v19, %v6711_v58  ;;  %3195 = vmatprep.mubr.bf16.mxu0 %v6741_v8  ;;  %v857_v43 = vpop.f32.mrf.mxu0  ;;  %3083 = vmatmul.mubr.bf16.vlgmr.msra.gmra.mxu1 %v6743_v36  ;;  %v1161_v50 = vmax.f32 %v967_v38, 0.0  ;;  %v6009_v19 = vld [vmem:[#allocation6 + $0x6c0] ss:$24 sps:$4 sm:$0xff]  }
 0x15b   :  { %v970_v35 = vpop.f32.mrf.mxu1  ;;  %3196 = vmatmul.mubr.bf16.vlgmr.msra.gmra.mxu0 %v6736_v29  ;;  %v858_v47 = vadd.f32 %v857_v43, %v6721_v62  ;;  %3277 = vmatpush1.bf16.msra.mxu1 %v5991_v10  ;;  %v1164_v51 = vmax.f32 %v856_v26, 0.0  ;;  %v6012_v26 = vld [vmem:[#allocation6 + $0xc8] ss:$24 sps:$4 sm:$0xff]  }
 0x15c   :  { %v1166_v45 = vmax.f32 %v969_v28, 0.0  ;;  %v971_v44 = vadd.f32 %v970_v35, %v6716_v59  ;;  %3390 = vmatpush1.bf16.msra.mxu0 %v5994_v34  ;;  %v861_v60 = vpop.f32.mrf.mxu0  ;;  %3278 = vmatprep.subr.bf16.mxu1 %v5999_v39  ;;  %v6017_v28 = vld [vmem:[#allocation6 + $0x694] ss:$24 sps:$4 sm:$0xff]  }
 0x15d   :  { %v974_v61 = vpop.f32.mrf.mxu1  ;;  %3391 = vmatprep.subr.bf16.mxu0 %v6002_v40  ;;  %v1165_v5 = vmax.f32 %v858_v47, 0.0  ;;  %v6762_v18 = vpack.c.bf16 %v1164_v51, %v1158_v7  ;;  %v862_v27 = vadd.f32 %v861_v60, %v6726_v63 }
 0x15e   :  { %v1167_v6 = vmax.f32 %v971_v44, 0.0  ;;  %v975_v9 = vadd.f32 %v974_v61, %v6711_v58  ;;  %v863_v11 = vpop.f32.mrf.mxu0  ;;  %v6757_v13 = vpack.c.bf16 %v1166_v45, %v1160_v37  ;;  %v6015_v61 = vld [vmem:[#allocation6 + $0x690] ss:$24 sps:$4 sm:$0xff]  }
 0x15f   :  { %v976_v12 = vpop.f32.mrf.mxu1  ;;  %3279 = vmatpush1.bf16.msra.mxu1 %v5997_v46  ;;  %v6760_v15 = vpack.c.bf16 %v1165_v5, %v1159_v3  ;;  %v864_v24 = vadd.f32 %v863_v11, %v6721_v62  ;;  %v1170_v37 = vmax.f32 %v862_v27, 0.0  ;;  %v6020_v46 = vld [vmem:[#allocation6 + $0x9c] ss:$24 sps:$4 sm:$0xff]   ;;  %v6018_v5 = vld [vmem:[#allocation6 + $0x98] ss:$24 sps:$4 sm:$0xff]  }
 0x160   :  { %v977_v14 = vadd.f32 %v976_v12, %v6716_v59  ;;  %3392 = vmatpush1.bf16.msra.mxu0 %v6000_v49  ;;  %v865_v48 = vpop.f32.mrf.mxu0  ;;  %v6764_v21 = vpack.c.bf16 %v1167_v6, %v1161_v50  ;;  %3280 = vmatprep.subr.bf16.mxu1 %v6005_v0  ;;  %v1172_v30 = vmax.f32 %v975_v9, 0.0  ;;  %v6023_v6 = vld [vmem:[#allocation6 + $0x664] ss:$24 sps:$4 sm:$0xff]  }
 0x161   :  { %v978_v20 = vpop.f32.mrf.mxu1  ;;  %3393 = vmatprep.subr.bf16.mxu0 %v6008_v1  ;;  %v866_v25 = vadd.f32 %v865_v48, %v6726_v63  ;;  %3092 = vmatprep.mubr.bf16.mxu1 %v6760_v15  ;;  %v1171_v42 = vmax.f32 %v864_v24, 0.0  ;;  %v6026_v12 = vld [vmem:[#allocation6 + $0x6c] ss:$24 sps:$4 sm:$0xff]  }
 0x162   :  { %v979_v2 = vadd.f32 %v978_v20, %v6711_v58  ;;  %3205 = vmatprep.mubr.bf16.mxu0 %v6764_v21  ;;  %v867_v31 = vpop.f32.mrf.mxu0  ;;  %3093 = vmatmul.mubr.bf16.gmra.mxu1 %v6762_v18  ;;  %v1173_v10 = vmax.f32 %v977_v14, 0.0 }
 0x163   :  { %v980_v32 = vpop.f32.mrf.mxu1  ;;  %v868_v38 = vadd.f32 %v867_v31, %v6721_v62  ;;  %3206 = vmatmul.mubr.bf16.gmra.mxu0 %v6757_v13  ;;  %3281 = vmatpush1.bf16.msra.mxu1 %v6003_v16  ;;  %v1176_v39 = vmax.f32 %v866_v25, 0.0  ;;  %v6024_v31 = vld [vmem:[#allocation6 + $0x68] ss:$24 sps:$4 sm:$0xff]  }
 0x164   :  { %v1178_v34 = vmax.f32 %v979_v2, 0.0  ;;  %v981_v17 = vadd.f32 %v980_v32, %v6716_v59  ;;  %3394 = vmatpush1.bf16.msra.mxu0 %v6006_v22  ;;  %v871_v40 = vpop.f32.mrf.mxu0  ;;  %3282 = vmatprep.subr.bf16.mxu1 %v6011_v23  ;;  %v6021_v2 = vld [vmem:[#allocation6 + $0x660] ss:$24 sps:$4 sm:$0xff]   ;;  %v6029_v32 = vld [vmem:[#allocation6 + $0x634] ss:$24 sps:$4 sm:$0xff]  }
 0x165   :  { %v984_v41 = vpop.f32.mrf.mxu1  ;;  %v1177_v43 = vmax.f32 %v868_v38, 0.0  ;;  %3395 = vmatprep.subr.bf16.mxu0 %v6014_v4  ;;  %v6784_v0 = vpack.c.bf16 %v1176_v39, %v1170_v37  ;;  %v872_v14 = vadd.f32 %v871_v40, %v6726_v63 }
 0x166   :  { %v1179_v35 = vmax.f32 %v981_v17, 0.0  ;;  %v985_v45 = vadd.f32 %v984_v41, %v6711_v58  ;;  %v873_v47 = vpop.f32.mrf.mxu0  ;;  %v6777_v49 = vpack.c.bf16 %v1178_v34, %v1172_v30  ;;  %v6032_v41 = vld [vmem:[#allocation6 + $0x3c] ss:$24 sps:$4 sm:$0xff]  }
 0x167   :  { %v986_v44 = vpop.f32.mrf.mxu1  ;;  %3283 = vmatpush1.bf16.msra.mxu1 %v6009_v19  ;;  %v6780_v51 = vpack.c.bf16 %v1177_v43, %v1171_v42  ;;  %v874_v7 = vadd.f32 %v873_v47, %v6721_v62  ;;  %v1182_v17 = vmax.f32 %v872_v14, 0.0 }
 0x168   :  { %v987_v50 = vadd.f32 %v986_v44, %v6716_v59  ;;  %v6782_v60 = vpack.c.bf16 %v1179_v35, %v1173_v10  ;;  %3396 = vmatpush1.bf16.msra.mxu0 %v6012_v26  ;;  %v875_v1 = vpop.f32.mrf.mxu0  ;;  %3284 = vmatprep.subr.bf16.mxu1 %v6017_v28  ;;  %v1184_v16 = vmax.f32 %v985_v45, 0.0  ;;  %v6027_v35 = vld [vmem:[#allocation6 + $0x630] ss:$24 sps:$4 sm:$0xff]  }
 0x169   :  { %v988_v3 = vpop.f32.mrf.mxu1  ;;  %v876_v9 = vadd.f32 %v875_v1, %v6726_v63  ;;  %3102 = vmatprep.mubr.bf16.mxu1 %v6780_v51  ;;  %3397 = vmatprep.subr.bf16.mxu0 %v6020_v46  ;;  %v1183_v10 = vmax.f32 %v874_v7, 0.0  ;;  %v6030_v44 = vld [vmem:[#allocation6 + $0x38] ss:$24 sps:$4 sm:$0xff]   ;;  %v6035_v46 = vld [vmem:[#allocation6 + $0x604] ss:$24 sps:$4 sm:$0xff]  }
 0x16a   :  { %v989_v11 = vadd.f32 %v988_v3, %v6711_v58  ;;  %3215 = vmatprep.mubr.bf16.mxu0 %v6782_v60  ;;  %v877_v48 = vpop.f32.mrf.mxu0  ;;  %3103 = vmatmul.mubr.bf16.gmra.mxu1 %v6784_v0  ;;  %v1185_v22 = vmax.f32 %v987_v50, 0.0  ;;  %v6038_v3 = vld [vmem:[#allocation6 + $0xc] ss:$24 sps:$4 sm:$0xff]  }
 0x16b   :  { %v990_v20 = vpop.f32.mrf.mxu1  ;;  %v878_v24 = vadd.f32 %v877_v48, %v6721_v62  ;;  %3216 = vmatmul.mubr.bf16.gmra.mxu0 %v6777_v49  ;;  %3285 = vmatpush1.bf16.msra.mxu1 %v6015_v61  ;;  %v1188_v4 = vmax.f32 %v876_v9, 0.0  ;;  %v6033_v48 = vld [vmem:[#allocation6 + $0x600] ss:$24 sps:$4 sm:$0xff]  }
 0x16c   :  { %v1190_v23 = vmax.f32 %v989_v11, 0.0  ;;  %v991_v25 = vadd.f32 %v990_v20, %v6716_v59  ;;  %3398 = vmatpush1.bf16.msra.mxu0 %v6018_v5  ;;  %v881_v27 = vpop.f32.mrf.mxu0  ;;  %3286 = vmatprep.subr.bf16.mxu1 %v6023_v6 }
 0x16d   :  { %v994_v30 = vpop.f32.mrf.mxu1  ;;  %v1189_v34 = vmax.f32 %v878_v24, 0.0  ;;  %3399 = vmatprep.subr.bf16.mxu0 %v6026_v12  ;;  %v6804_v37 = vpack.c.bf16 %v1188_v4, %v1182_v17  ;;  %v882_v5 = vadd.f32 %v881_v27, %v6726_v63  ;;  %v6036_v24 = vld [vmem:[#allocation6 + $0x8] ss:$24 sps:$4 sm:$0xff]  }
 0x16e   :  { %v1191_v38 = vmax.f32 %v991_v25, 0.0  ;;  %v995_v19 = vadd.f32 %v994_v30, %v6711_v58  ;;  %v883_v39 = vpop.f32.mrf.mxu0  ;;  %v6797_v26 = vpack.c.bf16 %v1190_v23, %v1184_v16  ;;  %v6041_v25 = vld [vmem:[#allocation6 + $0x8d4] ss:$24 sps:$4 sm:$0xff]  }
 0x16f   :  { %v996_v40 = vpop.f32.mrf.mxu1  ;;  %3287 = vmatpush1.bf16.msra.mxu1 %v6021_v2  ;;  %v6800_v42 = vpack.c.bf16 %v1189_v34, %v1183_v10  ;;  %v884_v50 = vadd.f32 %v883_v39, %v6721_v62  ;;  %v1194_v30 = vmax.f32 %v882_v5, 0.0  ;;  %v6044_v34 = vld [vmem:[#allocation6 + $0x2dc] ss:$24 sps:$4 sm:$0xff]  }
 0x170   :  { %v997_v28 = vadd.f32 %v996_v40, %v6716_v59  ;;  %v6802_v43 = vpack.c.bf16 %v1191_v38, %v1185_v22  ;;  %3400 = vmatpush1.bf16.msra.mxu0 %v6024_v31  ;;  %v885_v45 = vpop.f32.mrf.mxu0  ;;  %3288 = vmatprep.subr.bf16.mxu1 %v6029_v32  ;;  %v1196_v6 = vmax.f32 %v995_v19, 0.0  ;;  %v6039_v40 = vld [vmem:[#allocation6 + $0x8d0] ss:$24 sps:$4 sm:$0xff]  }
 0x171   :  { %v998_v47 = vpop.f32.mrf.mxu1  ;;  %v886_v61 = vadd.f32 %v885_v45, %v6726_v63  ;;  %3112 = vmatprep.mubr.bf16.mxu1 %v6800_v42  ;;  %3401 = vmatprep.subr.bf16.mxu0 %v6032_v41  ;;  %v1195_v2 = vmax.f32 %v884_v50, 0.0  ;;  %v6042_v45 = vld [vmem:[#allocation6 + $0x2d8] ss:$24 sps:$4 sm:$0xff]  }
 0x172   :  { %v999_v1 = vadd.f32 %v998_v47, %v6711_v58  ;;  %3225 = vmatprep.mubr.bf16.mxu0 %v6802_v43  ;;  %v887_v7 = vpop.f32.mrf.mxu0  ;;  %3113 = vmatmul.mubr.bf16.gmra.mxu1 %v6804_v37  ;;  %v1197_v11 = vmax.f32 %v997_v28, 0.0  ;;  %v6047_v47 = vld [vmem:[#allocation6 + $0x8a4] ss:$24 sps:$4 sm:$0xff]  }
 0x173   :  { %v1000_v9 = vpop.f32.mrf.mxu1  ;;  %v888_v14 = vadd.f32 %v887_v7, %v6721_v62  ;;  %3226 = vmatmul.mubr.bf16.gmra.mxu0 %v6797_v26  ;;  %3289 = vmatpush1.bf16.msra.mxu1 %v6027_v35  ;;  %v1200_v20 = vmax.f32 %v886_v61, 0.0  ;;  %v6050_v61 = vld [vmem:[#allocation6 + $0x2ac] ss:$24 sps:$4 sm:$0xff]  }
 0x174   :  { %v1202_v12 = vmax.f32 %v999_v1, 0.0  ;;  %v1001_v16 = vadd.f32 %v1000_v9, %v6716_v59  ;;  %3402 = vmatpush1.bf16.msra.mxu0 %v6030_v44  ;;  %v891_v22 = vpop.f32.mrf.mxu0  ;;  %3290 = vmatprep.subr.bf16.mxu1 %v6035_v46 }
 0x175   :  { %v1004_v23 = vpop.f32.mrf.mxu1  ;;  %v1201_v4 = vmax.f32 %v888_v14, 0.0  ;;  %3403 = vmatprep.subr.bf16.mxu0 %v6038_v3  ;;  %v6824_v41 = vpack.c.bf16 %v1200_v20, %v1194_v30  ;;  %v892_v1 = vadd.f32 %v891_v22, %v6726_v63  ;;  %v6045_v14 = vld [vmem:[#allocation6 + $0x8a0] ss:$24 sps:$4 sm:$0xff]  }
 0x176   :  { %v1203_v27 = vmax.f32 %v1001_v16, 0.0  ;;  %v1005_v31 = vadd.f32 %v1004_v23, %v6711_v58  ;;  %v893_v32 = vpop.f32.mrf.mxu0  ;;  %v6817_v38 = vpack.c.bf16 %v1202_v12, %v1196_v6  ;;  %v6048_v22 = vld [vmem:[#allocation6 + $0x2a8] ss:$24 sps:$4 sm:$0xff]   ;;  %v6053_v23 = vld [vmem:[#allocation6 + $0x874] ss:$24 sps:$4 sm:$0xff]  }
 0x177   :  { %v1006_v10 = vpop.f32.mrf.mxu1  ;;  %3291 = vmatpush1.bf16.msra.mxu1 %v6033_v48  ;;  %v6820_v19 = vpack.c.bf16 %v1201_v4, %v1195_v2  ;;  %7870 = vst [vmem:[#allocation17_spill] sm:$0xff] %v6824_v41  ;;  %v894_v44 = vadd.f32 %v893_v32, %v6721_v62  ;;  %v1206_v4 = vmax.f32 %v892_v1, 0.0  ;;  %v6056_v32 = vld [vmem:[#allocation6 + $0x27c] ss:$24 sps:$4 sm:$0xff]  }
 0x178   :  { %v1007_v17 = vadd.f32 %v1006_v10, %v6716_v59  ;;  %v6822_v39 = vpack.c.bf16 %v1203_v27, %v1197_v11  ;;  %3404 = vmatpush1.bf16.msra.mxu0 %v6036_v24  ;;  %v895_v28 = vpop.f32.mrf.mxu0  ;;  %3292 = vmatprep.subr.bf16.mxu1 %v6041_v25  ;;  %v1208_v3 = vmax.f32 %v1005_v31, 0.0 }
 0x179   :  { %v1008_v35 = vpop.f32.mrf.mxu1  ;;  %v896_v46 = vadd.f32 %v895_v28, %v6726_v63  ;;  %3122 = vmatprep.mubr.bf16.mxu1 %v6820_v19  ;;  %3405 = vmatprep.subr.bf16.mxu0 %v6044_v34  ;;  %v1207_v24 = vmax.f32 %v894_v44, 0.0  ;;  %v6051_v28 = vld [vmem:[#allocation6 + $0x870] ss:$24 sps:$4 sm:$0xff]  }
 0x17a   :  { %v1009_v50 = vadd.f32 %v1008_v35, %v6711_v58  ;;  %3235 = vmatprep.mubr.bf16.mxu0 %v6822_v39  ;;  %v897_v5 = vpop.f32.mrf.mxu0  ;;  %3123 = vmatmul.mubr.bf16.gmra.mxu1 %v6824_v41  ;;  %v1209_v7 = vmax.f32 %v1007_v17, 0.0  ;;  %v6054_v44 = vld [vmem:[#allocation6 + $0x278] ss:$24 sps:$4 sm:$0xff]  }
 0x17b   :  { %v1010_v6 = vpop.f32.mrf.mxu1  ;;  %v898_v11 = vadd.f32 %v897_v5, %v6721_v62  ;;  %3236 = vmatmul.mubr.bf16.gmra.mxu0 %v6817_v38  ;;  %3293 = vmatpush2.bf16.msra.mxu1 %v6039_v40  ;;  %v1212_v16 = vmax.f32 %v896_v46, 0.0  ;;  %v6059_v46 = vld [vmem:[#allocation6 + $0x844] ss:$24 sps:$4 sm:$0xff]  }
 0x17c   :  { %v1214_v9 = vmax.f32 %v1009_v50, 0.0  ;;  %v1011_v12 = vadd.f32 %v1010_v6, %v6716_v59  ;;  %3406 = vmatpush2.bf16.msra.mxu0 %v6042_v45  ;;  %v901_v48 = vpop.f32.mrf.mxu0  ;;  %3294 = vmatprep.subr.bf16.mxu1 %v6047_v47 }
 0x17d   :  { %v1014_v20 = vpop.f32.mrf.mxu1  ;;  %v1213_v25 = vmax.f32 %v898_v11, 0.0  ;;  %3407 = vmatprep.subr.bf16.mxu0 %v6050_v61  ;;  %v6844_v35 = vpack.c.bf16 %v1212_v16, %v1206_v4  ;;  %v902_v5 = vadd.f32 %v901_v48, %v6726_v63 }
 0x17e   :  { %v1215_v2 = vmax.f32 %v1011_v12, 0.0  ;;  %v1015_v27 = vadd.f32 %v1014_v20, %v6711_v58  ;;  %v903_v30 = vpop.f32.mrf.mxu0  ;;  %v6837_v10 = vpack.c.bf16 %v1214_v9, %v1208_v3  ;;  %v6062_v3 = vld [vmem:[#allocation6 + $0x24c] ss:$24 sps:$4 sm:$0xff]   ;;  %v6057_v20 = vld [vmem:[#allocation6 + $0x840] ss:$24 sps:$4 sm:$0xff]  }
 0x17f   :  { %v1016_v31 = vpop.f32.mrf.mxu1  ;;  %3295 = vmatpush2.bf16.msra.mxu1 %v6045_v14  ;;  %v6840_v17 = vpack.c.bf16 %v1213_v25, %v1207_v24  ;;  %7872 = vst [vmem:[#allocation19_spill] sm:$0xff] %v6844_v35  ;;  %v904_v50 = vadd.f32 %v903_v30, %v6721_v62  ;;  %v6060_v24 = vld [vmem:[#allocation6 + $0x248] ss:$24 sps:$4 sm:$0xff]   ;;  %v6065_v25 = vld [vmem:[#allocation6 + $0x814] ss:$24 sps:$4 sm:$0xff]   ;;  %v1218_v30 = vmax.f32 %v902_v5, 0.0 }
 0x180   :  { %v1017_v34 = vadd.f32 %v1016_v31, %v6716_v59  ;;  %v6842_v40 = vpack.c.bf16 %v1215_v2, %v1209_v7  ;;  %3408 = vmatpush2.bf16.msra.mxu0 %v6048_v22  ;;  %v905_v45 = vpop.f32.mrf.mxu0  ;;  %3296 = vmatprep.subr.bf16.mxu1 %v6053_v23  ;;  %v1220_v6 = vmax.f32 %v1015_v27, 0.0  ;;  %v6066_v5 = vld [vmem:[#allocation6 + $0x218] ss:$24 sps:$4 sm:$0xff]  }
 0x181   :  { %7871 = vst [vmem:[#allocation18_spill] sm:$0xff] %v6840_v17  ;;  %v1018_v47 = vpop.f32.mrf.mxu1  ;;  %v906_v61 = vadd.f32 %v905_v45, %v6726_v63  ;;  %3132 = vmatprep.mubr.bf16.mxu1 %v6840_v17  ;;  %3409 = vmatprep.subr.bf16.mxu0 %v6056_v32  ;;  %v1219_v2 = vmax.f32 %v904_v50, 0.0  ;;  %v6068_v45 = vld [vmem:[#allocation6 + $0x21c] ss:$24 sps:$4 sm:$0xff]  }
 0x182   :  { %v1019_v1 = vadd.f32 %v1018_v47, %v6711_v58  ;;  %3245 = vmatprep.mubr.bf16.mxu0 %v6842_v40  ;;  %v907_v7 = vpop.f32.mrf.mxu0  ;;  %3133 = vmatmul.mubr.bf16.gmra.mxu1 %v6844_v35  ;;  %v1221_v11 = vmax.f32 %v1017_v34, 0.0 }
 0x183   :  { %v1020_v9 = vpop.f32.mrf.mxu1  ;;  %v908_v14 = vadd.f32 %v907_v7, %v6721_v62  ;;  %3246 = vmatmul.mubr.bf16.gmra.mxu0 %v6837_v10  ;;  %3297 = vmatpush2.bf16.msra.mxu1 %v6051_v28  ;;  %v1224_v22 = vmax.f32 %v906_v61, 0.0  ;;  %v6063_v61 = vld [vmem:[#allocation6 + $0x810] ss:$24 sps:$4 sm:$0xff]   ;;  %v6071_v7 = vld [vmem:[#allocation6 + $0x7e4] ss:$24 sps:$4 sm:$0xff]  }
 0x184   :  { %v1226_v12 = vmax.f32 %v1019_v1, 0.0  ;;  %v1021_v16 = vadd.f32 %v1020_v9, %v6716_v59  ;;  %3410 = vmatpush2.bf16.msra.mxu0 %v6054_v44  ;;  %v911_v23 = vpop.f32.mrf.mxu0  ;;  %3298 = vmatprep.subr.bf16.mxu1 %v6059_v46 }
 0x185   :  { %v1024_v48 = vpop.f32.mrf.mxu1  ;;  %v1225_v4 = vmax.f32 %v908_v14, 0.0  ;;  %3411 = vmatprep.subr.bf16.mxu0 %v6062_v3  ;;  %v6864_v50 = vpack.c.bf16 %v1224_v22, %v1218_v30  ;;  %v6074_v14 = vld [vmem:[#allocation6 + $0x1ec] ss:$24 sps:$4 sm:$0xff]  }
 0x186   :  { %v1227_v27 = vmax.f32 %v1021_v16, 0.0  ;;  %v1025_v31 = vadd.f32 %v1024_v48, %v6711_v58  ;;  %v913_v32 = vpop.f32.mrf.mxu0  ;;  %v6857_v47 = vpack.c.bf16 %v1226_v12, %v1220_v6  ;;  %v912_v16 = vadd.f32 %v911_v23, %v6726_v63  ;;  %v6072_v23 = vld [vmem:[#allocation6 + $0x1e8] ss:$24 sps:$4 sm:$0xff]  }
 0x187   :  { %v1026_v34 = vpop.f32.mrf.mxu1  ;;  %3299 = vmatpush2.bf16.msra.mxu1 %v6057_v20  ;;  %v6860_v44 = vpack.c.bf16 %v1225_v4, %v1219_v2  ;;  %v914_v9 = vadd.f32 %v913_v32, %v6721_v62 }
 0x188   :  { %v1027_v28 = vadd.f32 %v1026_v34, %v6716_v59  ;;  %v6862_v46 = vpack.c.bf16 %v1227_v27, %v1221_v11  ;;  %3412 = vmatpush2.bf16.msra.mxu0 %v6060_v24  ;;  %v915_v1 = vpop.f32.mrf.mxu0  ;;  %3300 = vmatprep.subr.bf16.mxu1 %v6065_v25  ;;  %v7839_v11 = vsub.s32 5, %v6700_v52  ;;  %v1232_v20 = vmax.f32 %v1025_v31, 0.0  ;;  %v6069_v27 = vld [vmem:[#allocation6 + $0x7e0] ss:$24 sps:$4 sm:$0xff]   ;;  %v6077_v31 = vld [vmem:[#allocation6 + $0x7b4] ss:$24 sps:$4 sm:$0xff]  }
 0x189   :  { %7873 = vst [vmem:[#allocation20_spill] sm:$0xff] %v6860_v44  ;;  %v1028_v3 = vpop.f32.mrf.mxu1  ;;  %v916_v6 = vadd.f32 %v915_v1, %v6726_v63  ;;  %3142 = vmatprep.mubr.bf16.mxu1 %v6860_v44  ;;  %3413 = vmatprep.subr.bf16.mxu0 %v6068_v45  ;;  %v7838_v24 = vsub.s32 4, %v6700_v52  ;;  %v1231_v32 = vmax.f32 %v914_v9, 0.0  ;;  %v6080_v1 = vld [vmem:[#allocation6 + $0x1bc] ss:$24 sps:$4 sm:$0xff]  }
 0x18a   :  { %v1029_v12 = vadd.f32 %v1028_v3, %v6711_v58  ;;  %3255 = vmatprep.mubr.bf16.mxu0 %v6862_v46  ;;  %v917_v22 = vpop.f32.mrf.mxu0  ;;  %3143 = vmatmul.mubr.bf16.gmra.mxu1 %v6864_v50  ;;  %v1233_v25 = vmax.f32 %v1027_v28, 0.0  ;;  %v6881_v28 = vrot.slane %v6704_v55, %v7839_v11  ;;  %v6075_v9 = vld [vmem:[#allocation6 + $0x7b0] ss:$24 sps:$4 sm:$0xff]  }
 0x18b   :  { %v1030_v48 = vpop.f32.mrf.mxu1  ;;  %v918_v58 = vadd.f32 %v917_v22, %v6721_v62  ;;  %3256 = vmatmul.mubr.bf16.gmra.mxu0 %v6857_v47  ;;  %3301 = vmatpush2.bf16.msra.mxu1 %v6063_v61  ;;  %v1236_v30 = vmax.f32 %v916_v6, 0.0  ;;  %v6886_v62 = vrot.slane %v6704_v55, %v7838_v24  ;;  %v6086_v22 = vld [vmem:[#allocation6 + $0x18c] ss:$24 sps:$4 sm:$0xff]   ;;  %v6111_v24 = vld [vmem:[#allocation6 + $0x398] ss:$24 sps:$4 sm:$0xff]  }
 0x18c   :  { %v1238_v2 = vmax.f32 %v1029_v12, 0.0  ;;  %v1031_v4 = vadd.f32 %v1030_v48, %v6716_v59  ;;  %3414 = vmatpush2.bf16.msra.mxu0 %v6066_v5  ;;  %v1067_v63 = vpop.f32.mrf.mxu0  ;;  %3302 = vmatprep.subr.bf16.mxu1 %v6071_v7  ;;  %v1230_v59 = vmax.f32 %v912_v16, 0.0 }
 0x18d   :  { %v1237_v34 = vmax.f32 %v918_v58, 0.0  ;;  %3415 = vmatprep.subr.bf16.mxu0 %v6074_v14  ;;  %v6078_v14 = vld [vmem:[#allocation6 + $0x1b8] ss:$24 sps:$4 sm:$0xff]   ;;  %v1068_v48 = vadd.f32 %v1067_v63, %v6886_v62  ;;  %v6092_v63 = vld [vmem:[#allocation6 + $0x75c] ss:$24 sps:$4 sm:$0xff]  }
 0x18e   :  { %v1239_v45 = vmax.f32 %v1031_v4, 0.0  ;;  %v1069_v61 = vpop.f32.mrf.mxu0  ;;  %v6888_v3 = vpack.c.bf16 %v1238_v2, %v1232_v20  ;;  %v6894_v6 = vpack.c.bf16 %v1236_v30, %v1230_v59  ;;  %v6083_v20 = vld [vmem:[#allocation6 + $0x784] ss:$24 sps:$4 sm:$0xff]   ;;  %v6081_v58 = vld [vmem:[#allocation6 + $0x780] ss:$24 sps:$4 sm:$0xff]  }
 0x18f   :  { %3303 = vmatpush2.bf16.msra.mxu1 %v6069_v27  ;;  %v6890_v5 = vpack.c.bf16 %v1237_v34, %v1231_v32  ;;  %v1070_v16 = vadd.f32 %v1069_v61, %v6881_v28  ;;  %v6084_v30 = vld [vmem:[#allocation6 + $0x188] ss:$24 sps:$4 sm:$0xff]   ;;  %v1150_v34 = vmax.f32 %v1068_v48, 0.0  ;;  %v6087_v61 = vld [vmem:[#allocation6 + $0x458] ss:$24 sps:$4 sm:$0xff]  }
 0x190   :  { %v6892_v7 = vpack.c.bf16 %v1239_v45, %v1233_v25  ;;  %3416 = vmatpush2.bf16.msra.mxu0 %v6072_v23  ;;  %v1071_v12 = vpop.f32.mrf.mxu0  ;;  %3304 = vmatprep.subr.bf16.mxu1 %v6077_v31  ;;  %v6089_v23 = vld [vmem:[#allocation6 + $0x45c] ss:$24 sps:$4 sm:$0xff]  }
 0x191   :  { %v1072_v55 = vadd.f32 %v1071_v12, %v6886_v62  ;;  %3152 = vmatprep.mubr.bf16.mxu1 %v6890_v5  ;;  %3417 = vmatprep.subr.bf16.mxu0 %v6080_v1  ;;  %v1151_v31 = vmax.f32 %v1070_v16, 0.0  ;;  %v6090_v12 = vld [vmem:[#allocation6 + $0x758] ss:$24 sps:$4 sm:$0xff]  }
 0x192   :  { %3265 = vmatprep.mubr.bf16.mxu0 %v6892_v7  ;;  %v1073_v25 = vpop.f32.mrf.mxu0  ;;  %3153 = vmatmul.mubr.bf16.gmra.mxu1 %v6894_v6 }
 0x193   :  { %v1074_v2 = vadd.f32 %v1073_v25, %v6881_v28  ;;  %3266 = vmatmul.mubr.bf16.gmra.mxu0 %v6888_v3  ;;  %3305 = vmatpush2.bf16.msra.mxu1 %v6075_v9  ;;  %v1156_v4 = vmax.f32 %v1072_v55, 0.0  ;;  %v6095_v55 = vld [vmem:[#allocation6 + $0x42c] ss:$24 sps:$4 sm:$0xff]  }
 0x194   :  { %3418 = vmatpush2.bf16.msra.mxu0 %v6078_v14  ;;  %3421 = vmatprep.mubr.bf16.mxu0 %v6739_v33  ;;  %v1077_v27 = vpop.f32.mrf.mxu0 }
 0x195   :  { %v1157_v32 = vmax.f32 %v1074_v2, 0.0  ;;  %3306 = vmatprep.subr.bf16.mxu1 %v6083_v20  ;;  %3419 = vmatprep.subr.bf16.mxu0 %v6086_v22  ;;  %v6907_v1 = vpack.c.bf16 %v1156_v4, %v1150_v34  ;;  %v6098_v20 = vld [vmem:[#allocation6 + $0x72c] ss:$24 sps:$4 sm:$0xff]   ;;  %v1078_v22 = vadd.f32 %v1077_v27, %v6886_v62  ;;  %v6093_v2 = vld [vmem:[#allocation6 + $0x428] ss:$24 sps:$4 sm:$0xff]  }
 0x196   :  { %v1079_v45 = vpop.f32.mrf.mxu0  ;;  %v6104_v27 = vld [vmem:[#allocation6 + $0x6fc] ss:$24 sps:$4 sm:$0xff]  }
 0x197   :  { %3307 = vmatpush2.bf16.msra.mxu1 %v6081_v58  ;;  %v6905_v59 = vpack.c.bf16 %v1157_v32, %v1151_v31  ;;  %v1080_v14 = vadd.f32 %v1079_v45, %v6881_v28 }
 0x198   :  { %3420 = vmatpush2.bf16.msra.mxu0 %v6084_v30  ;;  %v1081_v9 = vpop.f32.mrf.mxu0  ;;  %3502 = vmatprep.subr.bf16.mxu1 %v6089_v23  ;;  %v6096_v30 = vld [vmem:[#allocation6 + $0x728] ss:$24 sps:$4 sm:$0xff]   ;;  %v6101_v23 = vld [vmem:[#allocation6 + $0x3fc] ss:$24 sps:$4 sm:$0xff]  }
 0x199   :  { %v1082_v16 = vadd.f32 %v1081_v9, %v6886_v62  ;;  %3308 = vmatprep.mubr.bf16.mxu1 %v6905_v59  ;;  %3615 = vmatprep.subr.bf16.mxu0 %v6092_v63  ;;  %v1163_v31 = vmax.f32 %v1080_v14, 0.0  ;;  %v1162_v63 = vmax.f32 %v1078_v22, 0.0  ;;  %v6099_v9 = vld [vmem:[#allocation6 + $0x3f8] ss:$24 sps:$4 sm:$0xff]  }
 0x19a   :  { %v1083_v48 = vpop.f32.mrf.mxu0  ;;  %3309 = vmatmul.mubr.bf16.vlgmr.msra.gmra.mxu1 %v6907_v1 }
 0x19b   :  { %v1084_v25 = vadd.f32 %v1083_v48, %v6881_v28  ;;  %3422 = vmatmul.mubr.bf16.vlgmr.msra.gmra.mxu0 %v6743_v36  ;;  %3503 = vmatpush1.bf16.msra.mxu1 %v6087_v61  ;;  %v1168_v58 = vmax.f32 %v1082_v16, 0.0 }
 0x19c   :  { %3431 = vmatprep.mubr.bf16.mxu0 %v6760_v15  ;;  %3616 = vmatpush1.bf16.msra.mxu0 %v6090_v12  ;;  %v1087_v4 = vpop.f32.mrf.mxu0  ;;  %v6102_v12 = vld [vmem:[#allocation6 + $0x6f8] ss:$24 sps:$4 sm:$0xff]  }
 0x19d   :  { %v1169_v32 = vmax.f32 %v1084_v25, 0.0  ;;  %3504 = vmatprep.subr.bf16.mxu1 %v6095_v55  ;;  %3617 = vmatprep.subr.bf16.mxu0 %v6098_v20  ;;  %v6919_v61 = vpack.c.bf16 %v1168_v58, %v1162_v63  ;;  %v6107_v55 = vld [vmem:[#allocation6 + $0x3cc] ss:$24 sps:$4 sm:$0xff]   ;;  %v1088_v22 = vadd.f32 %v1087_v4, %v6886_v62  ;;  %v6105_v58 = vld [vmem:[#allocation6 + $0x3c8] ss:$24 sps:$4 sm:$0xff]  }
 0x19e   :  { %v1089_v34 = vpop.f32.mrf.mxu0  ;;  %v6110_v20 = vld [vmem:[#allocation6 + $0x6cc] ss:$24 sps:$4 sm:$0xff]   ;;  %v6116_v4 = vld [vmem:[#allocation6 + $0x69c] ss:$24 sps:$4 sm:$0xff]  }
 0x19f   :  { %3505 = vmatpush1.bf16.msra.mxu1 %v6093_v2  ;;  %v6917_v45 = vpack.c.bf16 %v1169_v32, %v1163_v31  ;;  %v1090_v48 = vadd.f32 %v1089_v34, %v6881_v28  ;;  %v6108_v31 = vld [vmem:[#allocation6 + $0x6c8] ss:$24 sps:$4 sm:$0xff]   ;;  %v6113_v32 = vld [vmem:[#allocation6 + $0x39c] ss:$24 sps:$4 sm:$0xff]   ;;  %v1174_v34 = vmax.f32 %v1088_v22, 0.0 }
 0x1a0   :  { %3618 = vmatpush1.bf16.msra.mxu0 %v6096_v30  ;;  %v1091_v16 = vpop.f32.mrf.mxu0  ;;  %3506 = vmatprep.subr.bf16.mxu1 %v6101_v23 }
 0x1a1   :  { %v1092_v14 = vadd.f32 %v1091_v16, %v6886_v62  ;;  %3318 = vmatprep.mubr.bf16.mxu1 %v6917_v45  ;;  %3619 = vmatprep.subr.bf16.mxu0 %v6104_v27  ;;  %v1175_v27 = vmax.f32 %v1090_v48, 0.0 }
 0x1a2   :  { %v1093_v25 = vpop.f32.mrf.mxu0  ;;  %3319 = vmatmul.mubr.bf16.gmra.mxu1 %v6919_v61 }
 0x1a3   :  { %v1094_v2 = vadd.f32 %v1093_v25, %v6881_v28  ;;  %3432 = vmatmul.mubr.bf16.gmra.mxu0 %v6762_v18  ;;  %3507 = vmatpush1.bf16.msra.mxu1 %v6099_v9  ;;  %v1180_v30 = vmax.f32 %v1092_v14, 0.0 }
 0x1a4   :  { %3441 = vmatprep.mubr.bf16.mxu0 %v6780_v51  ;;  %3620 = vmatpush1.bf16.msra.mxu0 %v6102_v12  ;;  %v1097_v23 = vpop.f32.mrf.mxu0  ;;  %v6114_v12 = vld [vmem:[#allocation6 + $0x698] ss:$24 sps:$4 sm:$0xff]  }
 0x1a5   :  { %v1181_v63 = vmax.f32 %v1094_v2, 0.0  ;;  %3508 = vmatprep.subr.bf16.mxu1 %v6107_v55  ;;  %3621 = vmatprep.subr.bf16.mxu0 %v6110_v20  ;;  %v6931_v9 = vpack.c.bf16 %v1180_v30, %v1174_v34  ;;  %v6119_v55 = vld [vmem:[#allocation6 + $0x36c] ss:$24 sps:$4 sm:$0xff]   ;;  %v1098_v22 = vadd.f32 %v1097_v23, %v6886_v62  ;;  %v6117_v30 = vld [vmem:[#allocation6 + $0x368] ss:$24 sps:$4 sm:$0xff]  }
 0x1a6   :  { %v1099_v16 = vpop.f32.mrf.mxu0  ;;  %v6122_v20 = vld [vmem:[#allocation6 + $0x66c] ss:$24 sps:$4 sm:$0xff]   ;;  %v6128_v23 = vld [vmem:[#allocation6 + $0x63c] ss:$24 sps:$4 sm:$0xff]  }
 0x1a7   :  { %3509 = vmatpush1.bf16.msra.mxu1 %v6105_v58  ;;  %v6929_v25 = vpack.c.bf16 %v1181_v63, %v1175_v27  ;;  %v1100_v11 = vadd.f32 %v1099_v16, %v6881_v28  ;;  %v6120_v27 = vld [vmem:[#allocation6 + $0x668] ss:$24 sps:$4 sm:$0xff]   ;;  %v6125_v63 = vld [vmem:[#allocation6 + $0x33c] ss:$24 sps:$4 sm:$0xff]   ;;  %v1186_v16 = vmax.f32 %v1098_v22, 0.0 }
 0x1a8   :  { %3622 = vmatpush1.bf16.msra.mxu0 %v6108_v31  ;;  %v1101_v14 = vpop.f32.mrf.mxu0  ;;  %3510 = vmatprep.subr.bf16.mxu1 %v6113_v32 }
 0x1a9   :  { %v1102_v48 = vadd.f32 %v1101_v14, %v6886_v62  ;;  %3328 = vmatprep.mubr.bf16.mxu1 %v6929_v25  ;;  %3623 = vmatprep.subr.bf16.mxu0 %v6116_v4  ;;  %v1187_v4 = vmax.f32 %v1100_v11, 0.0 }
 0x1aa   :  { %v1103_v2 = vpop.f32.mrf.mxu0  ;;  %3329 = vmatmul.mubr.bf16.gmra.mxu1 %v6931_v9 }
 0x1ab   :  { %v1104_v58 = vadd.f32 %v1103_v2, %v6881_v28  ;;  %3442 = vmatmul.mubr.bf16.gmra.mxu0 %v6784_v0  ;;  %3511 = vmatpush1.bf16.msra.mxu1 %v6111_v24  ;;  %v1192_v31 = vmax.f32 %v1102_v48, 0.0 }
 0x1ac   :  { %3451 = vmatprep.mubr.bf16.mxu0 %v6800_v42  ;;  %3624 = vmatpush1.bf16.msra.mxu0 %v6114_v12  ;;  %v1107_v32 = vpop.f32.mrf.mxu0  ;;  %v6126_v12 = vld [vmem:[#allocation6 + $0x638] ss:$24 sps:$4 sm:$0xff]  }
 0x1ad   :  { %v1193_v34 = vmax.f32 %v1104_v58, 0.0  ;;  %3512 = vmatprep.subr.bf16.mxu1 %v6119_v55  ;;  %3625 = vmatprep.subr.bf16.mxu0 %v6122_v20  ;;  %v6943_v24 = vpack.c.bf16 %v1192_v31, %v1186_v16  ;;  %v6131_v55 = vld [vmem:[#allocation6 + $0x30c] ss:$24 sps:$4 sm:$0xff]   ;;  %v1108_v22 = vadd.f32 %v1107_v32, %v6886_v62  ;;  %v6129_v31 = vld [vmem:[#allocation6 + $0x308] ss:$24 sps:$4 sm:$0xff]  }
 0x1ae   :  { %v1109_v14 = vpop.f32.mrf.mxu0  ;;  %v6134_v20 = vld [vmem:[#allocation6 + $0x60c] ss:$24 sps:$4 sm:$0xff]   ;;  %v6140_v32 = vld [vmem:[#allocation6 + $0x8dc] ss:$24 sps:$4 sm:$0xff]  }
 0x1af   :  { %3513 = vmatpush1.bf16.msra.mxu1 %v6117_v30  ;;  %v6941_v2 = vpack.c.bf16 %v1193_v34, %v1187_v4  ;;  %7875 = vst [vmem:[#allocation22_spill] sm:$0xff] %v6943_v24  ;;  %v1110_v53 = vadd.f32 %v1109_v14, %v6881_v28  ;;  %v6132_v4 = vld [vmem:[#allocation6 + $0x608] ss:$24 sps:$4 sm:$0xff]   ;;  %v6137_v34 = vld [vmem:[#allocation6 + $0x5dc] ss:$24 sps:$4 sm:$0xff]   ;;  %v1198_v14 = vmax.f32 %v1108_v22, 0.0 }
 0x1b0   :  { %3626 = vmatpush1.bf16.msra.mxu0 %v6120_v27  ;;  %v1111_v48 = vpop.f32.mrf.mxu0  ;;  %3514 = vmatprep.subr.bf16.mxu1 %v6125_v63 }
 0x1b1   :  { %7874 = vst [vmem:[#allocation21_spill] sm:$0xff] %v6941_v2  ;;  %v1112_v11 = vadd.f32 %v1111_v48, %v6886_v62  ;;  %3338 = vmatprep.mubr.bf16.mxu1 %v6941_v2  ;;  %3627 = vmatprep.subr.bf16.mxu0 %v6128_v23  ;;  %v1199_v23 = vmax.f32 %v1110_v53, 0.0 }
 0x1b2   :  { %v1113_v58 = vpop.f32.mrf.mxu0  ;;  %3339 = vmatmul.mubr.bf16.gmra.mxu1 %v6943_v24 }
 0x1b3   :  { %v1114_v30 = vadd.f32 %v1113_v58, %v6881_v28  ;;  %3452 = vmatmul.mubr.bf16.gmra.mxu0 %v6804_v37  ;;  %3515 = vmatpush1.bf16.msra.mxu1 %v6123_v54  ;;  %v1204_v27 = vmax.f32 %v1112_v11, 0.0 }
 0x1b4   :  { %3461 = vmatprep.mubr.bf16.mxu0 %v6820_v19  ;;  %3628 = vmatpush1.bf16.msra.mxu0 %v6126_v12  ;;  %v1117_v63 = vpop.f32.mrf.mxu0  ;;  %v6138_v12 = vld [vmem:[#allocation6 + $0x8d8] ss:$24 sps:$4 sm:$0xff]  }
 0x1b5   :  { %v1205_v16 = vmax.f32 %v1114_v30, 0.0  ;;  %3516 = vmatprep.subr.bf16.mxu1 %v6131_v55  ;;  %3629 = vmatprep.subr.bf16.mxu0 %v6134_v20  ;;  %v6955_v54 = vpack.c.bf16 %v1204_v27, %v1198_v14  ;;  %v6143_v55 = vld [vmem:[#allocation6 + $0x5ac] ss:$24 sps:$4 sm:$0xff]   ;;  %v1118_v22 = vadd.f32 %v1117_v63, %v6886_v62  ;;  %v6141_v27 = vld [vmem:[#allocation6 + $0x5a8] ss:$24 sps:$4 sm:$0xff]  }
 0x1b6   :  { %v1119_v48 = vpop.f32.mrf.mxu0  ;;  %v6146_v20 = vld [vmem:[#allocation6 + $0x8ac] ss:$24 sps:$4 sm:$0xff]   ;;  %v6152_v63 = vld [vmem:[#allocation6 + $0x87c] ss:$24 sps:$4 sm:$0xff]  }
 0x1b7   :  { %3517 = vmatpush1.bf16.msra.mxu1 %v6129_v31  ;;  %v6953_v58 = vpack.c.bf16 %v1205_v16, %v1199_v23  ;;  %7877 = vst [vmem:[#allocation24_spill] sm:$0xff] %v6955_v54  ;;  %v1120_v57 = vadd.f32 %v1119_v48, %v6881_v28  ;;  %v6144_v23 = vld [vmem:[#allocation6 + $0x8a8] ss:$24 sps:$4 sm:$0xff]   ;;  %v6149_v16 = vld [vmem:[#allocation6 + $0x57c] ss:$24 sps:$4 sm:$0xff]   ;;  %v1210_v48 = vmax.f32 %v1118_v22, 0.0 }
 0x1b8   :  { %3630 = vmatpush1.bf16.msra.mxu0 %v6132_v4  ;;  %v1121_v11 = vpop.f32.mrf.mxu0  ;;  %3518 = vmatprep.subr.bf16.mxu1 %v6137_v34 }
 0x1b9   :  { %7876 = vst [vmem:[#allocation23_spill] sm:$0xff] %v6953_v58  ;;  %v1122_v53 = vadd.f32 %v1121_v11, %v6886_v62  ;;  %3348 = vmatprep.mubr.bf16.mxu1 %v6953_v58  ;;  %3631 = vmatprep.subr.bf16.mxu0 %v6140_v32  ;;  %v1211_v32 = vmax.f32 %v1120_v57, 0.0 }
 0x1ba   :  { %v1123_v30 = vpop.f32.mrf.mxu0  ;;  %3349 = vmatmul.mubr.bf16.gmra.mxu1 %v6955_v54 }
 0x1bb   :  { %v1124_v31 = vadd.f32 %v1123_v30, %v6881_v28  ;;  %3462 = vmatmul.mubr.bf16.gmra.mxu0 %v6824_v41  ;;  %3519 = vmatpush2.bf16.msra.mxu1 %v6135_v56  ;;  %v1216_v4 = vmax.f32 %v1122_v53, 0.0  ;;  %v6147_v41 = vld [vmem:[#allocation6 + $0x578] ss:$24 sps:$4 sm:$0xff]  }
 0x1bc   :  { %3471 = vmatprep.mubr.bf16.mxu0 %v6840_v17  ;;  %3632 = vmatpush2.bf16.msra.mxu0 %v6138_v12  ;;  %v1127_v34 = vpop.f32.mrf.mxu0  ;;  %v6150_v12 = vld [vmem:[#allocation6 + $0x878] ss:$24 sps:$4 sm:$0xff]  }
 0x1bd   :  { %v1217_v14 = vmax.f32 %v1124_v31, 0.0  ;;  %3520 = vmatprep.subr.bf16.mxu1 %v6143_v55  ;;  %3633 = vmatprep.subr.bf16.mxu0 %v6146_v20  ;;  %v6967_v56 = vpack.c.bf16 %v1216_v4, %v1210_v48  ;;  %v6155_v55 = vld [vmem:[#allocation6 + $0x54c] ss:$24 sps:$4 sm:$0xff]   ;;  %v1128_v22 = vadd.f32 %v1127_v34, %v6886_v62  ;;  %v6153_v4 = vld [vmem:[#allocation6 + $0x548] ss:$24 sps:$4 sm:$0xff]  }
 0x1be   :  { %v1129_v11 = vpop.f32.mrf.mxu0  ;;  %v6158_v20 = vld [vmem:[#allocation6 + $0x84c] ss:$24 sps:$4 sm:$0xff]   ;;  %v6164_v34 = vld [vmem:[#allocation6 + $0x81c] ss:$24 sps:$4 sm:$0xff]  }
 0x1bf   :  { %3521 = vmatpush2.bf16.msra.mxu1 %v6141_v27  ;;  %v6965_v30 = vpack.c.bf16 %v1217_v14, %v1211_v32  ;;  %7879 = vst [vmem:[#allocation26_spill] sm:$0xff] %v6967_v56  ;;  %v1130_v17 = vadd.f32 %v1129_v11, %v6881_v28  ;;  %v6156_v32 = vld [vmem:[#allocation6 + $0x848] ss:$24 sps:$4 sm:$0xff]   ;;  %v6161_v14 = vld [vmem:[#allocation6 + $0x51c] ss:$24 sps:$4 sm:$0xff]   ;;  %v1222_v11 = vmax.f32 %v1128_v22, 0.0 }
 0x1c0   :  { %3634 = vmatpush2.bf16.msra.mxu0 %v6144_v23  ;;  %v1131_v53 = vpop.f32.mrf.mxu0  ;;  %3522 = vmatprep.subr.bf16.mxu1 %v6149_v16 }
 0x1c1   :  { %7878 = vst [vmem:[#allocation25_spill] sm:$0xff] %v6965_v30  ;;  %v1132_v57 = vadd.f32 %v1131_v53, %v6886_v62  ;;  %3358 = vmatprep.mubr.bf16.mxu1 %v6965_v30  ;;  %3635 = vmatprep.subr.bf16.mxu0 %v6152_v63  ;;  %v1223_v63 = vmax.f32 %v1130_v17, 0.0 }
 0x1c2   :  { %v1133_v31 = vpop.f32.mrf.mxu0  ;;  %3359 = vmatmul.mubr.bf16.gmra.mxu1 %v6967_v56 }
 0x1c3   :  { %v1134_v27 = vadd.f32 %v1133_v31, %v6881_v28  ;;  %3472 = vmatmul.mubr.bf16.gmra.mxu0 %v6844_v35  ;;  %3523 = vmatpush2.bf16.msra.mxu1 %v6147_v41  ;;  %v1228_v23 = vmax.f32 %v1132_v57, 0.0  ;;  %v6159_v35 = vld [vmem:[#allocation6 + $0x518] ss:$24 sps:$4 sm:$0xff]  }
 0x1c4   :  { %3481 = vmatprep.mubr.bf16.mxu0 %v6860_v44  ;;  %3636 = vmatpush2.bf16.msra.mxu0 %v6150_v12  ;;  %v1137_v16 = vpop.f32.mrf.mxu0  ;;  %v6162_v12 = vld [vmem:[#allocation6 + $0x818] ss:$24 sps:$4 sm:$0xff]  }
 0x1c5   :  { %v1229_v48 = vmax.f32 %v1134_v27, 0.0  ;;  %3524 = vmatprep.subr.bf16.mxu1 %v6155_v55  ;;  %3637 = vmatprep.subr.bf16.mxu0 %v6158_v20  ;;  %v6979_v41 = vpack.c.bf16 %v1228_v23, %v1222_v11  ;;  %v6167_v55 = vld [vmem:[#allocation6 + $0x4ec] ss:$24 sps:$4 sm:$0xff]   ;;  %v1138_v22 = vadd.f32 %v1137_v16, %v6886_v62  ;;  %v6165_v23 = vld [vmem:[#allocation6 + $0x4e8] ss:$24 sps:$4 sm:$0xff]  }
 0x1c6   :  { %v1139_v53 = vpop.f32.mrf.mxu0  ;;  %v6170_v20 = vld [vmem:[#allocation6 + $0x7ec] ss:$24 sps:$4 sm:$0xff]  }
 0x1c7   :  { %3525 = vmatpush2.bf16.msra.mxu1 %v6153_v4  ;;  %v6977_v31 = vpack.c.bf16 %v1229_v48, %v1223_v63  ;;  %7881 = vst [vmem:[#allocation28_spill] sm:$0xff] %v6979_v41  ;;  %v1140_v44 = vadd.f32 %v1139_v53, %v6881_v28  ;;  %v6173_v63 = vld [vmem:[#allocation6 + $0x4bc] ss:$24 sps:$4 sm:$0xff]   ;;  %v1234_v16 = vmax.f32 %v1138_v22, 0.0  ;;  %v6183_v22 = vld [vmem:[#allocation6 + $0x160] ss:$24 sps:$4 sm:$0xff]  }
 0x1c8   :  { %3638 = vmatpush2.bf16.msra.mxu0 %v6156_v32  ;;  %v1141_v57 = vpop.f32.mrf.mxu0  ;;  %3526 = vmatprep.subr.bf16.mxu1 %v6161_v14  ;;  %v6168_v14 = vld [vmem:[#allocation6 + $0x7e8] ss:$24 sps:$4 sm:$0xff]  }
 0x1c9   :  { %7880 = vst [vmem:[#allocation27_spill] sm:$0xff] %v6977_v31  ;;  %v1142_v17 = vadd.f32 %v1141_v57, %v6886_v62  ;;  %3368 = vmatprep.mubr.bf16.mxu1 %v6977_v31  ;;  %3639 = vmatprep.subr.bf16.mxu0 %v6164_v34  ;;  %v1235_v48 = vmax.f32 %v1140_v44, 0.0  ;;  %v6176_v62 = vld [vmem:[#allocation6 + $0x7bc] ss:$24 sps:$4 sm:$0xff]   ;;  %v6179_v57 = vld [vmem:[#allocation6 + $0x48c] ss:$24 sps:$4 sm:$0xff]  }
 0x1ca   :  { %v1143_v27 = vpop.f32.mrf.mxu0  ;;  %3369 = vmatmul.mubr.bf16.gmra.mxu1 %v6979_v41  ;;  %v6182_v44 = vld [vmem:[#allocation6 + $0x78c] ss:$24 sps:$4 sm:$0xff]  }
 0x1cb   :  { %v1144_v4 = vadd.f32 %v1143_v27, %v6881_v28  ;;  %3482 = vmatmul.mubr.bf16.gmra.mxu0 %v6864_v50  ;;  %3527 = vmatpush2.bf16.msra.mxu1 %v6159_v35  ;;  %v1240_v32 = vmax.f32 %v1142_v17, 0.0  ;;  %v6171_v28 = vld [vmem:[#allocation6 + $0x4b8] ss:$24 sps:$4 sm:$0xff]   ;;  %v6180_v17 = vld [vmem:[#allocation6 + $0x788] ss:$24 sps:$4 sm:$0xff]  }
 0x1cc   :  { %3491 = vmatprep.mubr.bf16.mxu0 %v6890_v5  ;;  %3640 = vmatpush2.bf16.msra.mxu0 %v6162_v12  ;;  %v6174_v35 = vld [vmem:[#allocation6 + $0x7b8] ss:$24 sps:$4 sm:$0xff]   ;;  %v6177_v12 = vld [vmem:[#allocation6 + $0x488] ss:$24 sps:$4 sm:$0xff]  }
 0x1cd   :  { %v1241_v34 = vmax.f32 %v1144_v4, 0.0  ;;  %3528 = vmatprep.subr.bf16.mxu1 %v6167_v55  ;;  %3641 = vmatprep.subr.bf16.mxu0 %v6170_v20  ;;  %v6991_v53 = vpack.c.bf16 %v1240_v32, %v1234_v16  ;;  %v6185_v55 = vld [vmem:[#allocation6 + $0x164] ss:$24 sps:$4 sm:$0xff]   ;;  %v6186_v27 = vld [vmem:[#allocation6 + $0x460] ss:$24 sps:$4 sm:$0xff]  }
 0x1ce   :  { %v6188_v20 = vld [vmem:[#allocation6 + $0x464] ss:$24 sps:$4 sm:$0xff]   ;;  %v6191_v4 = vld [vmem:[#allocation6 + $0x134] ss:$24 sps:$4 sm:$0xff]   ;;  %v6189_v32 = vld [vmem:[#allocation6 + $0x130] ss:$24 sps:$4 sm:$0xff]  }
 0x1cf   :  { %3529 = vmatpush2.bf16.msra.mxu1 %v6165_v23  ;;  %v6989_v11 = vpack.c.bf16 %v1241_v34, %v1235_v48  ;;  %7883 = vst [vmem:[#allocation30_spill] sm:$0xff] %v6991_v53  ;;  %v6194_v23 = vld [vmem:[#allocation6 + $0x434] ss:$24 sps:$4 sm:$0xff]   ;;  %v6200_v48 = vld [vmem:[#allocation6 + $0x404] ss:$24 sps:$4 sm:$0xff]  }
 0x1d0   :  { %3642 = vmatpush2.bf16.msra.mxu0 %v6168_v14  ;;  %3530 = vmatprep.subr.bf16.mxu1 %v6173_v63  ;;  %v6192_v14 = vld [vmem:[#allocation6 + $0x430] ss:$24 sps:$4 sm:$0xff]   ;;  %v6197_v63 = vld [vmem:[#allocation6 + $0x104] ss:$24 sps:$4 sm:$0xff]   ;;  %v6195_v34 = vld [vmem:[#allocation6 + $0x100] ss:$24 sps:$4 sm:$0xff]  }
 0x1d1   :  { %7882 = vst [vmem:[#allocation29_spill] sm:$0xff] %v6989_v11  ;;  %3378 = vmatprep.mubr.bf16.mxu1 %v6989_v11  ;;  %3643 = vmatprep.subr.bf16.mxu0 %v6176_v62  ;;  %v6198_v62 = vld [vmem:[#allocation6 + $0x400] ss:$24 sps:$4 sm:$0xff]   ;;  %v6203_v16 = vld [vmem:[#allocation6 + $0xd4] ss:$24 sps:$4 sm:$0xff]  }
 0x1d2   :  { %3379 = vmatmul.mubr.bf16.gmra.mxu1 %v6991_v53 }
 0x1d3   :  { %3492 = vmatmul.mubr.bf16.gmra.mxu0 %v6894_v6  ;;  %3531 = vmatpush2.bf16.msra.mxu1 %v6171_v28  ;;  %v6206_v28 = vld [vmem:[#allocation6 + $0x3d4] ss:$24 sps:$4 sm:$0xff]  }
 0x1d4   :  { %3534 = vmatprep.mubr.bf16.mxu1 %v6741_v8  ;;  %3644 = vmatpush2.bf16.msra.mxu0 %v6174_v35  ;;  %v6201_v35 = vld [vmem:[#allocation6 + $0xd0] ss:$24 sps:$4 sm:$0xff]  }
 0x1d5   :  { %3647 = vmatprep.mubr.bf16.mxu0 %v6905_v59  ;;  %3532 = vmatprep.subr.bf16.mxu1 %v6179_v57  ;;  %v6204_v57 = vld [vmem:[#allocation6 + $0x3d0] ss:$24 sps:$4 sm:$0xff]  }
 0x1d6   :  { %3645 = vmatprep.subr.bf16.mxu0 %v6182_v44  ;;  %v6209_v44 = vld [vmem:[#allocation6 + $0xa4] ss:$24 sps:$4 sm:$0xff]  }
 0x1d7   :  { %3533 = vmatpush2.bf16.msra.mxu1 %v6177_v12  ;;  %v6212_v12 = vld [vmem:[#allocation6 + $0x3a4] ss:$24 sps:$4 sm:$0xff]  }
 0x1d8   :  { %3646 = vmatpush2.bf16.msra.mxu0 %v6180_v17  ;;  %3728 = vmatprep.subr.bf16.mxu1 %v6185_v55  ;;  %v6207_v17 = vld [vmem:[#allocation6 + $0xa0] ss:$24 sps:$4 sm:$0xff]  }
 0x1d9   :  { %3841 = vmatprep.subr.bf16.mxu0 %v6188_v20  ;;  %v6210_v55 = vld [vmem:[#allocation6 + $0x3a0] ss:$24 sps:$4 sm:$0xff]   ;;  %v6215_v20 = vld [vmem:[#allocation6 + $0x74] ss:$24 sps:$4 sm:$0xff]  }
 0x1da   :  { %3535 = vmatmul.mubr.bf16.vlgmr.msra.gmra.mxu1 %v6736_v29 }
 0x1db   :  { %3648 = vmatmul.mubr.bf16.vlgmr.msra.gmra.mxu0 %v6907_v1  ;;  %3544 = vmatprep.mubr.bf16.mxu1 %v6764_v21 }
 0x1dc   :  { %3657 = vmatprep.mubr.bf16.mxu0 %v6917_v45  ;;  %3729 = vmatpush1.bf16.msra.mxu1 %v6183_v22  ;;  %v6218_v22 = vld [vmem:[#allocation6 + $0x374] ss:$24 sps:$4 sm:$0xff]  }
 0x1dd   :  { %3842 = vmatpush1.bf16.msra.mxu0 %v6186_v27  ;;  %3730 = vmatprep.subr.bf16.mxu1 %v6191_v4  ;;  %v6213_v27 = vld [vmem:[#allocation6 + $0x70] ss:$24 sps:$4 sm:$0xff]  }
 0x1de   :  { %3843 = vmatprep.subr.bf16.mxu0 %v6194_v23  ;;  %v6216_v4 = vld [vmem:[#allocation6 + $0x370] ss:$24 sps:$4 sm:$0xff]   ;;  %v6221_v23 = vld [vmem:[#allocation6 + $0x44] ss:$24 sps:$4 sm:$0xff]  }
 0x1e0   :  { %3731 = vmatpush1.bf16.msra.mxu1 %v6189_v32  ;;  %v6224_v32 = vld [vmem:[#allocation6 + $0x344] ss:$24 sps:$4 sm:$0xff]  }
 0x1e1   :  { %3844 = vmatpush1.bf16.msra.mxu0 %v6192_v14  ;;  %3732 = vmatprep.subr.bf16.mxu1 %v6197_v63  ;;  %v6219_v14 = vld [vmem:[#allocation6 + $0x40] ss:$24 sps:$4 sm:$0xff]  }
 0x1e2   :  { %3545 = vmatmul.mubr.bf16.gmra.mxu1 %v6757_v13  ;;  %3845 = vmatprep.subr.bf16.mxu0 %v6200_v48  ;;  %v6222_v63 = vld [vmem:[#allocation6 + $0x340] ss:$24 sps:$4 sm:$0xff]   ;;  %v6227_v48 = vld [vmem:[#allocation6 + $0x14] ss:$24 sps:$4 sm:$0xff]  }
 0x1e3   :  { %3658 = vmatmul.mubr.bf16.gmra.mxu0 %v6919_v61  ;;  %3554 = vmatprep.mubr.bf16.mxu1 %v6782_v60 }
 0x1e4   :  { %3667 = vmatprep.mubr.bf16.mxu0 %v6929_v25  ;;  %3733 = vmatpush1.bf16.msra.mxu1 %v6195_v34  ;;  %v6230_v34 = vld [vmem:[#allocation6 + $0x314] ss:$24 sps:$4 sm:$0xff]  }
 0x1e5   :  { %3846 = vmatpush1.bf16.msra.mxu0 %v6198_v62  ;;  %3734 = vmatprep.subr.bf16.mxu1 %v6203_v16  ;;  %v6225_v62 = vld [vmem:[#allocation6 + $0x10] ss:$24 sps:$4 sm:$0xff]  }
 0x1e6   :  { %3847 = vmatprep.subr.bf16.mxu0 %v6206_v28  ;;  %v6228_v16 = vld [vmem:[#allocation6 + $0x310] ss:$24 sps:$4 sm:$0xff]   ;;  %v6233_v28 = vld [vmem:[#allocation6 + $0x2e4] ss:$24 sps:$4 sm:$0xff]  }
 0x1e8   :  { %3735 = vmatpush1.bf16.msra.mxu1 %v6201_v35  ;;  %v6236_v35 = vld [vmem:[#allocation6 + $0x5e4] ss:$24 sps:$4 sm:$0xff]  }
 0x1e9   :  { %3848 = vmatpush1.bf16.msra.mxu0 %v6204_v57  ;;  %3736 = vmatprep.subr.bf16.mxu1 %v6209_v44  ;;  %v6231_v57 = vld [vmem:[#allocation6 + $0x2e0] ss:$24 sps:$4 sm:$0xff]  }
 0x1ea   :  { %3555 = vmatmul.mubr.bf16.gmra.mxu1 %v6777_v49  ;;  %3849 = vmatprep.subr.bf16.mxu0 %v6212_v12  ;;  %v6234_v44 = vld [vmem:[#allocation6 + $0x5e0] ss:$24 sps:$4 sm:$0xff]   ;;  %v6239_v12 = vld [vmem:[#allocation6 + $0x2b4] ss:$24 sps:$4 sm:$0xff]  }
 0x1eb   :  { %3668 = vmatmul.mubr.bf16.gmra.mxu0 %v6931_v9  ;;  %3564 = vmatprep.mubr.bf16.mxu1 %v6802_v43 }
 0x1ec   :  { %3677 = vmatprep.mubr.bf16.mxu0 %v6941_v2  ;;  %3737 = vmatpush1.bf16.msra.mxu1 %v6207_v17  ;;  %v6242_v17 = vld [vmem:[#allocation6 + $0x5b4] ss:$24 sps:$4 sm:$0xff]  }
 0x1ed   :  { %3850 = vmatpush1.bf16.msra.mxu0 %v6210_v55  ;;  %3738 = vmatprep.subr.bf16.mxu1 %v6215_v20  ;;  %v6237_v55 = vld [vmem:[#allocation6 + $0x2b0] ss:$24 sps:$4 sm:$0xff]  }
 0x1ee   :  { %3851 = vmatprep.subr.bf16.mxu0 %v6218_v22  ;;  %v6240_v20 = vld [vmem:[#allocation6 + $0x5b0] ss:$24 sps:$4 sm:$0xff]   ;;  %v6245_v22 = vld [vmem:[#allocation6 + $0x284] ss:$24 sps:$4 sm:$0xff]  }
 0x1f0   :  { %3739 = vmatpush1.bf16.msra.mxu1 %v6213_v27  ;;  %v6248_v27 = vld [vmem:[#allocation6 + $0x584] ss:$24 sps:$4 sm:$0xff]  }
 0x1f1   :  { %3852 = vmatpush1.bf16.msra.mxu0 %v6216_v4  ;;  %3740 = vmatprep.subr.bf16.mxu1 %v6221_v23  ;;  %v6243_v4 = vld [vmem:[#allocation6 + $0x280] ss:$24 sps:$4 sm:$0xff]  }
 0x1f2   :  { %3565 = vmatmul.mubr.bf16.gmra.mxu1 %v6797_v26  ;;  %3853 = vmatprep.subr.bf16.mxu0 %v6224_v32  ;;  %v6246_v23 = vld [vmem:[#allocation6 + $0x580] ss:$24 sps:$4 sm:$0xff]   ;;  %v6251_v32 = vld [vmem:[#allocation6 + $0x254] ss:$24 sps:$4 sm:$0xff]  }
 0x1f3   :  { %3678 = vmatmul.mubr.bf16.gmra.mxu0 %v6943_v24  ;;  %3574 = vmatprep.mubr.bf16.mxu1 %v6822_v39 }
 0x1f4   :  { %3687 = vmatprep.mubr.bf16.mxu0 %v6953_v58  ;;  %3741 = vmatpush1.bf16.msra.mxu1 %v6219_v14  ;;  %v6254_v14 = vld [vmem:[#allocation6 + $0x554] ss:$24 sps:$4 sm:$0xff]  }
 0x1f5   :  { %3854 = vmatpush1.bf16.msra.mxu0 %v6222_v63  ;;  %3742 = vmatprep.subr.bf16.mxu1 %v6227_v48  ;;  %v6249_v63 = vld [vmem:[#allocation6 + $0x250] ss:$24 sps:$4 sm:$0xff]  }
 0x1f6   :  { %3855 = vmatprep.subr.bf16.mxu0 %v6230_v34  ;;  %v6252_v48 = vld [vmem:[#allocation6 + $0x550] ss:$24 sps:$4 sm:$0xff]   ;;  %v6257_v34 = vld [vmem:[#allocation6 + $0x224] ss:$24 sps:$4 sm:$0xff]  }
 0x1f8   :  { %3743 = vmatpush1.bf16.msra.mxu1 %v6225_v62  ;;  %v6260_v62 = vld [vmem:[#allocation6 + $0x524] ss:$24 sps:$4 sm:$0xff]  }
 0x1f9   :  { %3856 = vmatpush1.bf16.msra.mxu0 %v6228_v16  ;;  %3744 = vmatprep.subr.bf16.mxu1 %v6233_v28  ;;  %v6255_v16 = vld [vmem:[#allocation6 + $0x220] ss:$24 sps:$4 sm:$0xff]  }
 0x1fa   :  { %3575 = vmatmul.mubr.bf16.gmra.mxu1 %v6817_v38  ;;  %3857 = vmatprep.subr.bf16.mxu0 %v6236_v35  ;;  %v6258_v28 = vld [vmem:[#allocation6 + $0x520] ss:$24 sps:$4 sm:$0xff]   ;;  %v6263_v35 = vld [vmem:[#allocation6 + $0x1f4] ss:$24 sps:$4 sm:$0xff]  }
 0x1fb   :  { %3688 = vmatmul.mubr.bf16.gmra.mxu0 %v6955_v54  ;;  %3584 = vmatprep.mubr.bf16.mxu1 %v6842_v40  ;;  %v7116_v54 = vld [vmem:[#allocation9 + $0x10] sm:$0xff]  }
 0x1fc   :  { %3697 = vmatprep.mubr.bf16.mxu0 %v6965_v30  ;;  %3745 = vmatpush2.bf16.msra.mxu1 %v6231_v57  ;;  %v6266_v57 = vld [vmem:[#allocation6 + $0x4f4] ss:$24 sps:$4 sm:$0xff]   ;;  %7887 = vst [vmem:[#allocation34_spill] sm:$0xff] %v7116_v54 }
 0x1fd   :  { %3858 = vmatpush2.bf16.msra.mxu0 %v6234_v44  ;;  %3746 = vmatprep.subr.bf16.mxu1 %v6239_v12  ;;  %v6261_v44 = vld [vmem:[#allocation6 + $0x1f0] ss:$24 sps:$4 sm:$0xff]  }
 0x1fe   :  { %3859 = vmatprep.subr.bf16.mxu0 %v6242_v17  ;;  %v6264_v12 = vld [vmem:[#allocation6 + $0x4f0] ss:$24 sps:$4 sm:$0xff]   ;;  %v6269_v17 = vld [vmem:[#allocation6 + $0x1c4] ss:$24 sps:$4 sm:$0xff]  }
 0x200   :  { %3747 = vmatpush2.bf16.msra.mxu1 %v6237_v55  ;;  %v6272_v55 = vld [vmem:[#allocation6 + $0x4c4] ss:$24 sps:$4 sm:$0xff]  }
 0x201   :  { %3860 = vmatpush2.bf16.msra.mxu0 %v6240_v20  ;;  %3748 = vmatprep.subr.bf16.mxu1 %v6245_v22  ;;  %v6267_v20 = vld [vmem:[#allocation6 + $0x1c0] ss:$24 sps:$4 sm:$0xff]  }
 0x202   :  { %3585 = vmatmul.mubr.bf16.gmra.mxu1 %v6837_v10  ;;  %3861 = vmatprep.subr.bf16.mxu0 %v6248_v27  ;;  %v6270_v22 = vld [vmem:[#allocation6 + $0x4c0] ss:$24 sps:$4 sm:$0xff]   ;;  %v6275_v27 = vld [vmem:[#allocation6 + $0x194] ss:$24 sps:$4 sm:$0xff]  }
 0x203   :  { %3698 = vmatmul.mubr.bf16.gmra.mxu0 %v6967_v56  ;;  %3594 = vmatprep.mubr.bf16.mxu1 %v6862_v46  ;;  %v6294_v56 = vld [vmem:[#allocation6 + $0x670] ss:$24 sps:$4 sm:$0xff]  }
 0x204   :  { %3707 = vmatprep.mubr.bf16.mxu0 %v6977_v31  ;;  %3749 = vmatpush2.bf16.msra.mxu1 %v6243_v4  ;;  %v6278_v4 = vld [vmem:[#allocation6 + $0x494] ss:$24 sps:$4 sm:$0xff]  }
 0x205   :  { %3862 = vmatpush2.bf16.msra.mxu0 %v6246_v23  ;;  %3750 = vmatprep.subr.bf16.mxu1 %v6251_v32  ;;  %v6273_v23 = vld [vmem:[#allocation6 + $0x190] ss:$24 sps:$4 sm:$0xff]   ;;  %v7104_v31 = vld [vmem:[#allocation9 + $0x50] sm:$0xff]  }
 0x206   :  { %3863 = vmatprep.subr.bf16.mxu0 %v6254_v14  ;;  %v6276_v32 = vld [vmem:[#allocation6 + $0x490] ss:$24 sps:$4 sm:$0xff]   ;;  %v6281_v14 = vld [vmem:[#allocation6 + $0x764] ss:$24 sps:$4 sm:$0xff]   ;;  %7886 = vst [vmem:[#allocation33_spill] sm:$0xff] %v7104_v31 }
 0x208   :  { %3751 = vmatpush2.bf16.msra.mxu1 %v6249_v63  ;;  %v7030_v63 = vld [vmem:[#allocation9 + $0x78] sm:$0xff]  }
 0x209   :  { %3864 = vmatpush2.bf16.msra.mxu0 %v6252_v48  ;;  %3752 = vmatprep.subr.bf16.mxu1 %v6257_v34  ;;  %v6279_v48 = vld [vmem:[#allocation6 + $0x760] ss:$24 sps:$4 sm:$0xff]  }
 0x20a   :  { %3595 = vmatmul.mubr.bf16.gmra.mxu1 %v6857_v47  ;;  %3865 = vmatprep.subr.bf16.mxu0 %v6260_v62 }
 0x20b   :  { %3708 = vmatmul.mubr.bf16.gmra.mxu0 %v6979_v41  ;;  %3604 = vmatprep.mubr.bf16.mxu1 %v6892_v7 }
 0x20c   :  { %3717 = vmatprep.mubr.bf16.mxu0 %v6989_v11  ;;  %3753 = vmatpush2.bf16.msra.mxu1 %v6255_v16  ;;  %v7040_v16 = vld [vmem:[#allocation9 + $0x70] sm:$0xff]   ;;  %v7098_v11 = vld [vmem:[#allocation9 + $0x18] sm:$0xff]  }
 0x20d   :  { %3866 = vmatpush2.bf16.msra.mxu0 %v6258_v28  ;;  %3754 = vmatprep.subr.bf16.mxu1 %v6263_v35  ;;  %7884 = vst [vmem:[#allocation31_spill] sm:$0xff] %v7098_v11 }
 0x20e   :  { %3867 = vmatprep.subr.bf16.mxu0 %v6266_v57  ;;  %v6282_v57 = vld [vmem:[#allocation6 + $0x730] ss:$24 sps:$4 sm:$0xff]  }
 0x210   :  { %3755 = vmatpush2.bf16.msra.mxu1 %v6261_v44 }
 0x211   :  { %3868 = vmatpush2.bf16.msra.mxu0 %v6264_v12  ;;  %3756 = vmatprep.subr.bf16.mxu1 %v6269_v17  ;;  %v7054_v17 = vld [vmem:[#allocation9 + $0x30] sm:$0xff]  }
 0x212   :  { %3605 = vmatmul.mubr.bf16.gmra.mxu1 %v6888_v3  ;;  %3869 = vmatprep.subr.bf16.mxu0 %v6272_v55 }
 0x213   :  { %3718 = vmatmul.mubr.bf16.gmra.mxu0 %v6991_v53  ;;  %3760 = vmatprep.mubr.bf16.mxu1 %v6739_v33  ;;  %v6284_v33 = vld [vmem:[#allocation6 + $0x734] ss:$24 sps:$4 sm:$0xff]  }
 0x214   :  { %3757 = vmatpush2.bf16.msra.mxu1 %v6267_v20  ;;  %3873 = vmatprep.mubr.bf16.mxu0 %v6741_v8  ;;  %v7037_v8 = vld [vmem:[#allocation9 + $0x38] sm:$0xff]  }
 0x215   :  { %3870 = vmatpush2.bf16.msra.mxu0 %v6270_v22  ;;  %3758 = vmatprep.subr.bf16.mxu1 %v6275_v27  ;;  %v6290_v22 = vld [vmem:[#allocation6 + $0x6d4] ss:$24 sps:$4 sm:$0xff]  }
 0x216   :  { %3871 = vmatprep.subr.bf16.mxu0 %v6278_v4  ;;  %v7066_v27 = vld [vmem:[#allocation9 + $0x28] sm:$0xff]  }
 0x218   :  { %3759 = vmatpush2.bf16.msra.mxu1 %v6273_v23  ;;  %v7072_v23 = vld [vmem:[#allocation9 + $0x60] sm:$0xff]  }
 0x219   :  { %3872 = vmatpush2.bf16.msra.mxu0 %v6276_v32  ;;  %3954 = vmatprep.subr.bf16.mxu1 %v6281_v14 }
 0x21a   :  { %v7032_v34 = vpop.f32.mrf.mxu1  ;;  %5509 = vmatprep.subr.bf16.mxu0 %v7030_v63 }
 0x21b   :  { %v7034_v62 = vpop.f32.mrf.mxu0  ;;  %3761 = vmatmul.mubr.bf16.vlgmr.msra.gmra.mxu1 %v6743_v36  ;;  %v6287_v36 = vld [vmem:[#allocation6 + $0x704] ss:$24 sps:$4 sm:$0xff]  }
 0x21c   :  { %3874 = vmatmul.mubr.bf16.vlgmr.msra.gmra.mxu0 %v6736_v29  ;;  %3770 = vmatprep.mubr.bf16.mxu1 %v6760_v15  ;;  %v7044_v28 = vpop.f32.mrf.mxu1  ;;  %v7057_v29 = vld [vmem:[#allocation9 + $0x68] sm:$0xff]  }
 0x21d   :  { %v7046_v35 = vpop.f32.mrf.mxu0  ;;  %3883 = vmatprep.mubr.bf16.mxu0 %v6764_v21  ;;  %3955 = vmatpush1.bf16.msra.mxu1 %v6279_v48  ;;  %v6285_v21 = vld [vmem:[#allocation6 + $0x700] ss:$24 sps:$4 sm:$0xff]   ;;  %v6288_v48 = vld [vmem:[#allocation6 + $0x6d0] ss:$24 sps:$4 sm:$0xff]  }
 0x21e   :  { %v7049_v44 = vpop.f32.mrf.mxu1  ;;  %3956 = vmatprep.subr.bf16.mxu1 %v6284_v33  ;;  %5510 = vmatpush3.bf16.msra.mxu0 %v7037_v8 }
 0x21f   :  { %v7051_v12 = vpop.f32.mrf.mxu0  ;;  %5511 = vmatprep.subr.bf16.mxu0 %v7040_v16 }
 0x220   :  { %v7059_v15 = vpop.f32.mrf.mxu1 }
 0x221   :  { %v7061_v55 = vpop.f32.mrf.mxu0  ;;  %3957 = vmatpush1.bf16.msra.mxu1 %v6282_v57  ;;  %v7084_v57 = vld [vmem:[#allocation9 + $0x20] sm:$0xff]  }
 0x222   :  { %v7063_v20 = vpop.f32.mrf.mxu1  ;;  %3958 = vmatprep.subr.bf16.mxu1 %v6287_v36  ;;  %5512 = vmatpush3.bf16.msra.mxu0 %v7054_v17 }
 0x223   :  { %v7068_v4 = vpop.f32.mrf.mxu0  ;;  %3771 = vmatmul.mubr.bf16.gmra.mxu1 %v6762_v18  ;;  %5513 = vmatprep.subr.bf16.mxu0 %v7057_v29  ;;  %v6293_v18 = vld [vmem:[#allocation6 + $0x6a4] ss:$24 sps:$4 sm:$0xff]  }
 0x224   :  { %3884 = vmatmul.mubr.bf16.gmra.mxu0 %v6757_v13  ;;  %3780 = vmatprep.mubr.bf16.mxu1 %v6780_v51  ;;  %v7076_v32 = vpop.f32.mrf.mxu1  ;;  %v7089_v13 = vld [vmem:[#allocation9 + $0x58] sm:$0xff]  }
 0x225   :  { %3893 = vmatprep.mubr.bf16.mxu0 %v6782_v60  ;;  %3959 = vmatpush1.bf16.msra.mxu1 %v6285_v21  ;;  %v7079_v14 = vpop.f32.mrf.mxu0  ;;  %v6291_v21 = vld [vmem:[#allocation6 + $0x6a0] ss:$24 sps:$4 sm:$0xff]  }
 0x226   :  { %v7081_v33 = vpop.f32.mrf.mxu1  ;;  %3960 = vmatprep.subr.bf16.mxu1 %v6290_v22  ;;  %5514 = vmatpush3.bf16.msra.mxu0 %v7066_v27  ;;  %v6296_v22 = vld [vmem:[#allocation6 + $0x674] ss:$24 sps:$4 sm:$0xff]  }
 0x227   :  { %v7086_v36 = vpop.f32.mrf.mxu0  ;;  %5515 = vmatprep.subr.bf16.mxu0 %v7072_v23 }
 0x228   :  { %v7091_v51 = vpop.f32.mrf.mxu1 }
 0x229   :  { %3961 = vmatpush1.bf16.msra.mxu1 %v6288_v48  ;;  %v7093_v60 = vpop.f32.mrf.mxu0 }
 0x22a   :  { %v7095_v53 = vpop.f32.mrf.mxu1  ;;  %3962 = vmatprep.subr.bf16.mxu1 %v6293_v18  ;;  %5516 = vmatpush3.bf16.msra.mxu0 %v7084_v57 }
 0x22b   :  { %v7100_v41 = vpop.f32.mrf.mxu0  ;;  %3781 = vmatmul.mubr.bf16.gmra.mxu1 %v6784_v0  ;;  %5517 = vmatprep.subr.bf16.mxu0 %v7089_v13  ;;  %v6299_v0 = vld [vmem:[#allocation6 + $0x644] ss:$24 sps:$4 sm:$0xff]  }
 0x22c   :  { %7885 = vst [vmem:[#allocation32_spill] sm:$0xff] %v7100_v41  ;;  %3894 = vmatmul.mubr.bf16.gmra.mxu0 %v6777_v49  ;;  %3790 = vmatprep.mubr.bf16.mxu1 %v6800_v42  ;;  %v7108_v48 = vpop.f32.mrf.mxu1  ;;  %v7121_v49 = vld [vmem:[#allocation9 + $0x48] sm:$0xff]  }
 0x22d   :  { %3903 = vmatprep.mubr.bf16.mxu0 %v6802_v43  ;;  %3963 = vmatpush1.bf16.msra.mxu1 %v6291_v21  ;;  %v7111_v18 = vpop.f32.mrf.mxu0  ;;  %7888 = vst [vmem:[#allocation35_spill] sm:$0xff] %v7121_v49  ;;  %v6297_v21 = vld [vmem:[#allocation6 + $0x640] ss:$24 sps:$4 sm:$0xff]   ;;  %v7130_v41 = vld [vmem:[#allocation9 + $0x8] sm:$0xff]  }
 0x22e   :  { %v7113_v30 = vpop.f32.mrf.mxu1  ;;  %3964 = vmatprep.subr.bf16.mxu1 %v6296_v22  ;;  %5518 = vmatpush3.bf16.msra.mxu0 %v7098_v11  ;;  %v6302_v22 = vld [vmem:[#allocation6 + $0x614] ss:$24 sps:$4 sm:$0xff]   ;;  %7891 = vst [vmem:[#allocation38_spill] sm:$0xff] %v7130_v41 }
 0x22f   :  { %v7118_v58 = vpop.f32.mrf.mxu0  ;;  %5519 = vmatprep.subr.bf16.mxu0 %v7104_v31  ;;  %v7136_v31 = vld [vmem:[#allocation9 + $0x40] sm:$0xff]  }
 0x230   :  { %v7123_v42 = vpop.f32.mrf.mxu1  ;;  %7893 = vst [vmem:[#allocation40_spill] sm:$0xff] %v7136_v31 }
 0x231   :  { %3965 = vmatpush1.bf16.msra.mxu1 %v6294_v56  ;;  %v7125_v43 = vpop.f32.mrf.mxu0 }
 0x232   :  { %7889 = vst [vmem:[#allocation36_spill] sm:$0xff] %v7125_v43  ;;  %v7127_v24 = vpop.f32.mrf.mxu1  ;;  %3966 = vmatprep.subr.bf16.mxu1 %v6299_v0  ;;  %5520 = vmatpush3.bf16.msra.mxu0 %v7116_v54  ;;  %v7145_v54 = vld [vmem:[#allocation7] sm:$0x3f]  ;;  %v7904_v43 = vld [vmem:[#allocation17_spill] sm:$0xff] }
 0x233   :  { %7890 = vst [vmem:[#allocation37_spill] sm:$0xff] %v7127_v24  ;;  %v7132_v11 = vpop.f32.mrf.mxu0  ;;  %3791 = vmatmul.mubr.bf16.gmra.mxu1 %v6804_v37  ;;  %5521 = vmatprep.subr.bf16.mxu0 %v7121_v49  ;;  %v6300_v24 = vld [vmem:[#allocation6 + $0x610] ss:$24 sps:$4 sm:$0xff]   ;;  %7896 = vst [vmem:[#allocation43_spill] sm:$0xff] %v7145_v54  ;;  %v6305_v37 = vld [vmem:[#allocation6 + $0x8e4] ss:$24 sps:$4 sm:$0xff]  }
 0x234   :  { %7892 = vst [vmem:[#allocation39_spill] sm:$0xff] %v7132_v11  ;;  %3904 = vmatmul.mubr.bf16.gmra.mxu0 %v6797_v26  ;;  %3800 = vmatprep.mubr.bf16.mxu1 %v6820_v19  ;;  %v7140_v56 = vpop.f32.mrf.mxu1  ;;  %v7150_v49 = vld [vmem:[#allocation9] sm:$0xff]  }
 0x235   :  { %7894 = vst [vmem:[#allocation41_spill] sm:$0xff] %v7140_v56  ;;  %3913 = vmatprep.mubr.bf16.mxu0 %v6822_v39  ;;  %3967 = vmatpush1.bf16.msra.mxu1 %v6297_v21  ;;  %v7143_v0 = vpop.f32.mrf.mxu0  ;;  %7898 = vst [vmem:[#allocation45_spill] sm:$0xff] %v7150_v49  ;;  %v7901_v39 = vsub.s32 0, %v6700_v52 }
 0x236   :  { %7895 = vst [vmem:[#allocation42_spill] sm:$0xff] %v7143_v0  ;;  %v7147_v11 = vpop.f32.mrf.mxu1  ;;  %3968 = vmatprep.subr.bf16.mxu1 %v6302_v22  ;;  %5522 = vmatpush3.bf16.msra.mxu0 %v7130_v41  ;;  %v6303_v22 = vld [vmem:[#allocation6 + $0x8e0] ss:$24 sps:$4 sm:$0xff]   ;;  %v6308_v41 = vld [vmem:[#allocation6 + $0x8b4] ss:$24 sps:$4 sm:$0xff]  }
 0x237   :  { %7897 = vst [vmem:[#allocation44_spill] sm:$0xff] %v7147_v11  ;;  %v7152_v26 = vpop.f32.mrf.mxu0  ;;  %5523 = vmatprep.subr.bf16.mxu0 %v7136_v31  ;;  %v7160_v21 = vrot.slane %v7145_v54, %v7901_v39 }
 0x238   :  { %7899 = vst [vmem:[#allocation46_spill] sm:$0xff] %v7152_v26  ;;  %v7155_v19 = vpop.f32.mrf.mxu1  ;;  %v7903_v26 = vsub.s32 1, %v6700_v52 }
 0x239   :  { %7900 = vst [vmem:[#allocation47_spill] sm:$0xff] %v7155_v19  ;;  %3969 = vmatpush1.bf16.msra.mxu1 %v6300_v24  ;;  %v7162_v0 = vpop.f32.mrf.mxu0  ;;  %v7905_v24 = vld [vmem:[#allocation18_spill] sm:$0xff] }
 0x23a   :  { %7902 = vst [vmem:[#allocation48_spill] sm:$0xff] %v7162_v0  ;;  %v3124_v11 = vpop.f32.mrf.mxu1  ;;  %3970 = vmatprep.subr.bf16.mxu1 %v6305_v37  ;;  %5524 = vmatpush3.bf16.msra.mxu0 %v7150_v49  ;;  %v7168_v31 = vrot.slane %v7145_v54, %v7903_v26  ;;  %v6306_v26 = vld [vmem:[#allocation6 + $0x8b0] ss:$24 sps:$4 sm:$0xff]  }
 0x23b   :  { %v3125_v19 = vadd.f32 %v3124_v11, %v7160_v21  ;;  %v3237_v56 = vpop.f32.mrf.mxu0  ;;  %3801 = vmatmul.mubr.bf16.gmra.mxu1 %v7904_v43  ;;  %v6311_v11 = vld [vmem:[#allocation6 + $0x884] ss:$24 sps:$4 sm:$0xff]  }
 0x23c   :  { %3914 = vmatmul.mubr.bf16.gmra.mxu0 %v6817_v38  ;;  %3810 = vmatprep.mubr.bf16.mxu1 %v7905_v24  ;;  %v3126_v39 = vpop.f32.mrf.mxu1 }
 0x23d   :  { %v7174_v0 = vadd.f32 %v3237_v56, %v3125_v19  ;;  %3923 = vmatprep.mubr.bf16.mxu0 %v6842_v40  ;;  %3971 = vmatpush2.bf16.msra.mxu1 %v6303_v22  ;;  %v3127_v37 = vadd.f32 %v3126_v39, %v7168_v31  ;;  %v3239_v52 = vpop.f32.mrf.mxu0  ;;  %v6309_v40 = vld [vmem:[#allocation6 + $0x880] ss:$24 sps:$4 sm:$0xff]   ;;  %v6314_v22 = vld [vmem:[#allocation6 + $0x854] ss:$24 sps:$4 sm:$0xff]  }
 0x23e   :  { %v3128_v54 = vpop.f32.mrf.mxu1  ;;  %3972 = vmatprep.subr.bf16.mxu1 %v6308_v41 }
 0x23f   :  { %7906 = vst [vmem:[#allocation17_spill] sm:$0xff] %v7174_v0  ;;  %v7178_v49 = vadd.f32 %v3239_v52, %v3127_v37  ;;  %v3129_v43 = vadd.f32 %v3128_v54, %v7160_v21  ;;  %v3241_v38 = vpop.f32.mrf.mxu0  ;;  %v7909_v0 = vld [vmem:[#allocation19_spill] sm:$0xff]  ;;  %v7910_v52 = vld [vmem:[#allocation20_spill] sm:$0xff] }
 0x240   :  { %v7181_v2 = vpop.f32.mrf.mxu1 }
 0x241   :  { %7907 = vst [vmem:[#allocation18_spill] sm:$0xff] %v7178_v49  ;;  %v7183_v24 = vadd.f32 %v3241_v38, %v3129_v43  ;;  %3973 = vmatpush2.bf16.msra.mxu1 %v6306_v26  ;;  %v7185_v56 = vpop.f32.mrf.mxu0 }
 0x242   :  { %v3134_v19 = vpop.f32.mrf.mxu1  ;;  %3974 = vmatprep.subr.bf16.mxu1 %v6311_v11  ;;  %v6312_v11 = vld [vmem:[#allocation6 + $0x850] ss:$24 sps:$4 sm:$0xff]  }
 0x243   :  { %7908 = vst [vmem:[#allocation49_spill] sm:$0xff] %v7183_v24  ;;  %v3135_v39 = vadd.f32 %v3134_v19, %v7160_v21  ;;  %v3247_v41 = vpop.f32.mrf.mxu0  ;;  %3811 = vmatmul.mubr.bf16.gmra.mxu1 %v7909_v0  ;;  %v6319_v19 = vld [vmem:[#allocation6 + $0x824] ss:$24 sps:$4 sm:$0xff]  }
 0x244   :  { %3924 = vmatmul.mubr.bf16.gmra.mxu0 %v6837_v10  ;;  %3820 = vmatprep.mubr.bf16.mxu1 %v7910_v52  ;;  %v3136_v54 = vpop.f32.mrf.mxu1 }
 0x245   :  { %v7191_v37 = vadd.f32 %v3247_v41, %v3135_v39  ;;  %3933 = vmatprep.mubr.bf16.mxu0 %v6862_v46  ;;  %3975 = vmatpush2.bf16.msra.mxu1 %v6309_v40  ;;  %v3137_v26 = vadd.f32 %v3136_v54, %v7168_v31  ;;  %v3249_v43 = vpop.f32.mrf.mxu0  ;;  %v6317_v46 = vld [vmem:[#allocation6 + $0x820] ss:$24 sps:$4 sm:$0xff]   ;;  %v6324_v41 = vld [vmem:[#allocation6 + $0x7f4] ss:$24 sps:$4 sm:$0xff]  }
 0x246   :  { %v3138_v38 = vpop.f32.mrf.mxu1  ;;  %3976 = vmatprep.subr.bf16.mxu1 %v6314_v22 }
 0x247   :  { %v7195_v24 = vadd.f32 %v3249_v43, %v3137_v26  ;;  %v3139_v0 = vadd.f32 %v3138_v38, %v7160_v21  ;;  %v3251_v10 = vpop.f32.mrf.mxu0 }
 0x248   :  { %v7198_v49 = vpop.f32.mrf.mxu1 }
 0x249   :  { %v7200_v52 = vadd.f32 %v3251_v10, %v3139_v0  ;;  %3977 = vmatpush2.bf16.msra.mxu1 %v6312_v11  ;;  %v7202_v39 = vpop.f32.mrf.mxu0  ;;  %v6329_v10 = vld [vmem:[#allocation6 + $0x7c4] ss:$24 sps:$4 sm:$0xff]  }
 0x24a   :  { %v3144_v40 = vpop.f32.mrf.mxu1  ;;  %3978 = vmatprep.subr.bf16.mxu1 %v6319_v19  ;;  %v6322_v19 = vld [vmem:[#allocation6 + $0x7f0] ss:$24 sps:$4 sm:$0xff]  }
 0x24b   :  { %7911 = vst [vmem:[#allocation19_spill] sm:$0xff] %v7200_v52  ;;  %v3145_v54 = vadd.f32 %v3144_v40, %v7160_v21  ;;  %v3257_v22 = vpop.f32.mrf.mxu0  ;;  %3821 = vmatmul.mubr.bf16.gmra.mxu1 %v6864_v50 }
 0x24c   :  { %3934 = vmatmul.mubr.bf16.gmra.mxu0 %v6857_v47  ;;  %3830 = vmatprep.mubr.bf16.mxu1 %v6890_v5  ;;  %v3146_v26 = vpop.f32.mrf.mxu1 }
 0x24d   :  { %v7208_v43 = vadd.f32 %v3257_v22, %v3145_v54  ;;  %3943 = vmatprep.mubr.bf16.mxu0 %v6892_v7  ;;  %3979 = vmatpush2.bf16.msra.mxu1 %v6317_v46  ;;  %v3147_v11 = vadd.f32 %v3146_v26, %v7168_v31  ;;  %v3259_v38 = vpop.f32.mrf.mxu0  ;;  %v6327_v7 = vld [vmem:[#allocation6 + $0x7c0] ss:$24 sps:$4 sm:$0xff]   ;;  %v6334_v22 = vld [vmem:[#allocation6 + $0x794] ss:$24 sps:$4 sm:$0xff]  }
 0x24e   :  { %v3148_v0 = vpop.f32.mrf.mxu1  ;;  %3980 = vmatprep.subr.bf16.mxu1 %v6324_v41 }
 0x24f   :  { %v7212_v40 = vadd.f32 %v3259_v38, %v3147_v11  ;;  %v3149_v50 = vadd.f32 %v3148_v0, %v7160_v21  ;;  %v3261_v47 = vpop.f32.mrf.mxu0 }
 0x250   :  { %v7215_v52 = vpop.f32.mrf.mxu1 }
 0x251   :  { %v7217_v5 = vadd.f32 %v3261_v47, %v3149_v50  ;;  %3981 = vmatpush2.bf16.msra.mxu1 %v6322_v19  ;;  %v7219_v54 = vpop.f32.mrf.mxu0  ;;  %v6332_v50 = vld [vmem:[#allocation6 + $0x790] ss:$24 sps:$4 sm:$0xff]  }
 0x252   :  { %v3154_v46 = vpop.f32.mrf.mxu1  ;;  %3982 = vmatprep.subr.bf16.mxu1 %v6329_v10 }
 0x253   :  { %7912 = vst [vmem:[#allocation20_spill] sm:$0xff] %v7217_v5  ;;  %v3155_v26 = vadd.f32 %v3154_v46, %v7160_v21  ;;  %v3267_v41 = vpop.f32.mrf.mxu0  ;;  %3831 = vmatmul.mubr.bf16.gmra.mxu1 %v6894_v6 }
 0x254   :  { %3944 = vmatmul.mubr.bf16.gmra.mxu0 %v6888_v3  ;;  %3986 = vmatprep.mubr.bf16.mxu1 %v6905_v59  ;;  %v3156_v11 = vpop.f32.mrf.mxu1  ;;  %v3087_v3 = vadd.f32 %v7044_v28, %v7168_v31  ;;  %v3089_v59 = vadd.f32 %v7049_v44, %v7160_v21  ;;  %v3091_v28 = vadd.f32 %v7059_v15, %v7168_v31 }
 0x255   :  { %v7225_v38 = vadd.f32 %v3267_v41, %v3155_v26  ;;  %3983 = vmatpush2.bf16.msra.mxu1 %v6327_v7  ;;  %v3157_v19 = vadd.f32 %v3156_v11, %v7168_v31  ;;  %v3269_v0 = vpop.f32.mrf.mxu0 }
 0x256   :  { %v3158_v47 = vpop.f32.mrf.mxu1  ;;  %3984 = vmatprep.subr.bf16.mxu1 %v6334_v22  ;;  %v3085_v22 = vadd.f32 %v7032_v34, %v7160_v21  ;;  %v3204_v15 = vadd.f32 %v7061_v55, %v3091_v28 }
 0x257   :  { %v7228_v10 = vadd.f32 %v3269_v0, %v3157_v19  ;;  %v3159_v46 = vadd.f32 %v3158_v47, %v7160_v21  ;;  %v3271_v5 = vpop.f32.mrf.mxu0  ;;  %v3202_v0 = vadd.f32 %v7051_v12, %v3089_v59  ;;  %v3099_v12 = vadd.f32 %v7081_v33, %v7160_v21 }
 0x258   :  { %v3160_v6 = vpop.f32.mrf.mxu1  ;;  %v3101_v59 = vadd.f32 %v7091_v51, %v7168_v31 }
 0x259   :  { %v7235_v26 = vadd.f32 %v3271_v5, %v3159_v46  ;;  %3985 = vmatpush2.bf16.msra.mxu1 %v6332_v50  ;;  %v7238_v7 = vadd.f32 %v3160_v6, %v7168_v31  ;;  %v7240_v41 = vpop.f32.mrf.mxu0  ;;  %v3200_v5 = vadd.f32 %v7046_v35, %v3087_v3 }
 0x25a   :  { %v3310_v11 = vpop.f32.mrf.mxu1  ;;  %5701 = vmatprep.subr.bf16.mxu1 %v7030_v63  ;;  %v3198_v63 = vadd.f32 %v7034_v62, %v3085_v22  ;;  %v3095_v62 = vadd.f32 %v7063_v20, %v7160_v21 }
 0x25b   :  { %v7247_v19 = vpop.f32.mrf.mxu0 }
 0x25c   :  { %3987 = vmatmul.mubr.bf16.vlgmr.msra.gmra.mxu1 %v6907_v1  ;;  %v3312_v44 = vpop.f32.mrf.mxu1  ;;  %v3311_v35 = vadd.f32 %v3310_v11, %v3198_v63  ;;  %v3208_v51 = vadd.f32 %v7068_v4, %v3095_v62 }
 0x25d   :  { %3996 = vmatprep.mubr.bf16.mxu1 %v6917_v45  ;;  %v7253_v50 = vpop.f32.mrf.mxu0  ;;  %5709 = vmatpush3.bf16.msra.mxu1 %v7037_v8  ;;  %v3313_v47 = vadd.f32 %v3312_v44, %v3200_v5  ;;  %v3097_v45 = vadd.f32 %v7076_v32, %v7168_v31  ;;  %v3212_v44 = vadd.f32 %v7086_v36, %v3099_v12 }
 0x25e   :  { %v3314_v34 = vpop.f32.mrf.mxu1  ;;  %5702 = vmatprep.subr.bf16.mxu1 %v7040_v16  ;;  %v4067_v33 = vmax.f32 %v3311_v35, 0.0  ;;  %v3111_v35 = vadd.f32 %v7123_v42, %v7168_v31  ;;  %v7915_v42 = vld [vmem:[#allocation32_spill] sm:$0xff] }
 0x25f   :  { %v3315_v1 = vadd.f32 %v3314_v34, %v3202_v0  ;;  %v7259_v46 = vpop.f32.mrf.mxu0  ;;  %v4068_v22 = vmax.f32 %v3313_v47, 0.0 }
 0x260   :  { %v3316_v6 = vpop.f32.mrf.mxu1 }
 0x261   :  { %v3317_v8 = vadd.f32 %v3316_v6, %v3204_v15  ;;  %v7265_v3 = vpop.f32.mrf.mxu0  ;;  %5710 = vmatpush3.bf16.msra.mxu1 %v7054_v17  ;;  %v4073_v16 = vmax.f32 %v3315_v1, 0.0  ;;  %v3210_v17 = vadd.f32 %v7079_v14, %v3097_v45  ;;  %v3107_v15 = vadd.f32 %v7108_v48, %v7168_v31 }
 0x262   :  { %v3320_v55 = vpop.f32.mrf.mxu1  ;;  %5703 = vmatprep.subr.bf16.mxu1 %v7057_v29 }
 0x263   :  { %v4074_v32 = vmax.f32 %v3317_v8, 0.0  ;;  %v7273_v11 = vpop.f32.mrf.mxu0  ;;  %v4163_v5 = vpack.c.bf16 %v4073_v16, %v4067_v33  ;;  %v3321_v36 = vadd.f32 %v3320_v55, %v3208_v51  ;;  %v7914_v16 = vld [vmem:[#allocation31_spill] sm:$0xff]  ;;  %v7917_v33 = vld [vmem:[#allocation36_spill] sm:$0xff] }
 0x264   :  { %3997 = vmatmul.mubr.bf16.gmra.mxu1 %v6919_v61  ;;  %v3322_v28 = vpop.f32.mrf.mxu1  ;;  %v3214_v61 = vadd.f32 %v7093_v60, %v3101_v59 }
 0x265   :  { %4006 = vmatprep.mubr.bf16.mxu1 %v6929_v25  ;;  %v7279_v20 = vpop.f32.mrf.mxu0  ;;  %v4164_v29 = vpack.c.bf16 %v4074_v32, %v4068_v22  ;;  %5711 = vmatpush3.bf16.msra.mxu1 %v7066_v27  ;;  %v3323_v63 = vadd.f32 %v3322_v28, %v3210_v17  ;;  %v3109_v27 = vadd.f32 %v7113_v30, %v7160_v21  ;;  %v4079_v30 = vmax.f32 %v3321_v36, 0.0  ;;  %v7916_v32 = vld [vmem:[#allocation33_spill] sm:$0xff] }
 0x266   :  { %v3324_v0 = vpop.f32.mrf.mxu1  ;;  %5704 = vmatprep.subr.bf16.mxu1 %v7072_v23  ;;  %v3105_v23 = vadd.f32 %v7095_v53, %v7160_v21  ;;  %v7913_v53 = vld [vmem:[#allocation21_spill] sm:$0xff] }
 0x267   :  { %v3325_v34 = vadd.f32 %v3324_v0, %v3212_v44  ;;  %v7285_v14 = vpop.f32.mrf.mxu0  ;;  %4634 = vmatprep.mubr.bf16.mxu0 %v4164_v29  ;;  %v4080_v6 = vmax.f32 %v3323_v63, 0.0  ;;  %v3222_v8 = vadd.f32 %v7118_v58, %v3109_v27  ;;  %v7918_v29 = vld [vmem:[#allocation41_spill] sm:$0xff] }
 0x268   :  { %v3326_v25 = vpop.f32.mrf.mxu1  ;;  %4635 = vmatmul.mubr.bf16.vlgmr.msra.gmra.mxu0 %v4163_v5  ;;  %v3218_v55 = vadd.f32 %v7915_v42, %v3105_v23  ;;  %v3117_v51 = vadd.f32 %v7918_v29, %v7168_v31  ;;  %v7919_v5 = vld [vmem:[#allocation44_spill] sm:$0xff]  ;;  %v7921_v36 = vld [vmem:[#allocation37_spill] sm:$0xff]  ;;  %v7923_v23 = vld [vmem:[#allocation47_spill] sm:$0xff] }
 0x269   :  { %v3327_v4 = vadd.f32 %v3326_v25, %v3214_v61  ;;  %v7291_v47 = vpop.f32.mrf.mxu0  ;;  %5712 = vmatpush3.bf16.msra.mxu1 %v7084_v57  ;;  %v4085_v60 = vmax.f32 %v3325_v34, 0.0  ;;  %v3220_v57 = vadd.f32 %v7111_v18, %v3107_v15  ;;  %v3119_v0 = vadd.f32 %v7919_v5, %v7160_v21  ;;  %v7920_v34 = vld [vmem:[#allocation34_spill] sm:$0xff] }
 0x26a   :  { %v3330_v1 = vpop.f32.mrf.mxu1  ;;  %5705 = vmatprep.subr.bf16.mxu1 %v7089_v13  ;;  %v3115_v25 = vadd.f32 %v7921_v36, %v7160_v21  ;;  %v7927_v21 = vld [vmem:[#allocation23_spill] sm:$0xff]  ;;  %v7932_v36 = vld [vmem:[#allocation45_spill] sm:$0xff] }
 0x26b   :  { %v4086_v48 = vmax.f32 %v3327_v4, 0.0  ;;  %v7299_v45 = vpop.f32.mrf.mxu0  ;;  %v4169_v59 = vpack.c.bf16 %v4085_v60, %v4079_v30  ;;  %v3331_v58 = vadd.f32 %v3330_v1, %v3218_v55  ;;  %v7922_v4 = vld [vmem:[#allocation35_spill] sm:$0xff]  ;;  %v3121_v60 = vadd.f32 %v7923_v23, %v7168_v31  ;;  %v7924_v30 = vld [vmem:[#allocation22_spill] sm:$0xff] }
 0x26c   :  { %4007 = vmatmul.mubr.bf16.gmra.mxu1 %v6931_v9  ;;  %v3332_v12 = vpop.f32.mrf.mxu1  ;;  %v3224_v9 = vadd.f32 %v7917_v33, %v3111_v35  ;;  %v7928_v55 = vld [vmem:[#allocation38_spill] sm:$0xff] }
 0x26d   :  { %4016 = vmatprep.mubr.bf16.mxu1 %v7913_v53  ;;  %v7305_v62 = vpop.f32.mrf.mxu0  ;;  %v4170_v13 = vpack.c.bf16 %v4086_v48, %v4080_v6  ;;  %5713 = vmatpush3.bf16.msra.mxu1 %v7914_v16  ;;  %v3333_v28 = vadd.f32 %v3332_v12, %v3220_v57  ;;  %v4091_v48 = vmax.f32 %v3331_v58, 0.0  ;;  %v7925_v57 = vld [vmem:[#allocation42_spill] sm:$0xff] }
 0x26e   :  { %v3334_v22 = vpop.f32.mrf.mxu1  ;;  %5706 = vmatprep.subr.bf16.mxu1 %v7916_v32  ;;  %v7926_v53 = vld [vmem:[#allocation46_spill] sm:$0xff] }
 0x26f   :  { %v3335_v17 = vadd.f32 %v3334_v22, %v3222_v8  ;;  %v7311_v18 = vpop.f32.mrf.mxu0  ;;  %4642 = vmatprep.mubr.bf16.mxu0 %v4170_v13  ;;  %v4092_v1 = vmax.f32 %v3333_v28, 0.0  ;;  %v3230_v8 = vadd.f32 %v7925_v57, %v3117_v51  ;;  %v3232_v13 = vadd.f32 %v7926_v53, %v3119_v0  ;;  %v6343_v28 = vld [vmem:[#allocation9 + $0xf8] sm:$0xff]   ;;  %v7935_v57 = vld [vmem:[#allocation25_spill] sm:$0xff] }
 0x270   :  { %v3336_v44 = vpop.f32.mrf.mxu1  ;;  %4643 = vmatmul.mubr.bf16.gmra.mxu0 %v4169_v59  ;;  %v7929_v59 = vld [vmem:[#allocation39_spill] sm:$0xff] }
 0x271   :  { %v3337_v61 = vadd.f32 %v3336_v44, %v3224_v9  ;;  %v7317_v63 = vpop.f32.mrf.mxu0  ;;  %5714 = vmatpush3.bf16.msra.mxu1 %v7920_v34  ;;  %v4097_v15 = vmax.f32 %v3335_v17, 0.0  ;;  %v3228_v22 = vadd.f32 %v7929_v59, %v3115_v25  ;;  %v7930_v9 = vld [vmem:[#allocation40_spill] sm:$0xff]  ;;  %v7937_v59 = vld [vmem:[#allocation49_spill] sm:$0xff] }
 0x272   :  { %v3340_v27 = vpop.f32.mrf.mxu1  ;;  %5707 = vmatprep.subr.bf16.mxu1 %v7922_v4  ;;  %v7931_v17 = vld [vmem:[#allocation48_spill] sm:$0xff]  ;;  %v3131_v4 = vadd.f32 %v7181_v2, %v7168_v31  ;;  %v7936_v2 = vld [vmem:[#allocation18_spill] sm:$0xff] }
 0x273   :  { %v4098_v35 = vmax.f32 %v3337_v61, 0.0  ;;  %v7325_v6 = vpop.f32.mrf.mxu0  ;;  %v4175_v32 = vpack.c.bf16 %v4097_v15, %v4091_v48  ;;  %v3234_v58 = vadd.f32 %v7931_v17, %v3121_v60  ;;  %v3341_v5 = vadd.f32 %v3340_v27, %v3228_v22  ;;  %v7933_v48 = vld [vmem:[#allocation24_spill] sm:$0xff] }
 0x274   :  { %4017 = vmatmul.mubr.bf16.gmra.mxu1 %v7924_v30  ;;  %v3342_v12 = vpop.f32.mrf.mxu1  ;;  %v7934_v30 = vld [vmem:[#allocation17_spill] sm:$0xff] }
 0x275   :  { %4026 = vmatprep.mubr.bf16.mxu1 %v7927_v21  ;;  %v7331_v16 = vpop.f32.mrf.mxu0  ;;  %v4176_v42 = vpack.c.bf16 %v4098_v35, %v4092_v1  ;;  %5715 = vmatpush3.bf16.msra.mxu1 %v7928_v55  ;;  %v3343_v44 = vadd.f32 %v3342_v12, %v3230_v8  ;;  %v4103_v35 = vmax.f32 %v3341_v5, 0.0 }
 0x276   :  { %v3344_v33 = vpop.f32.mrf.mxu1  ;;  %5708 = vmatprep.subr.bf16.mxu1 %v7930_v9 }
 0x277   :  { %v3345_v29 = vadd.f32 %v3344_v33, %v3232_v13  ;;  %v7337_v51 = vpop.f32.mrf.mxu0  ;;  %4650 = vmatprep.mubr.bf16.mxu0 %v4176_v42  ;;  %v4104_v23 = vmax.f32 %v3343_v44, 0.0  ;;  %v3244_v42 = vadd.f32 %v7185_v56, %v3131_v4  ;;  %v7939_v4 = vld [vmem:[#allocation27_spill] sm:$0xff] }
 0x278   :  { %v3346_v0 = vpop.f32.mrf.mxu1  ;;  %4651 = vmatmul.mubr.bf16.gmra.mxu0 %v4175_v32 }
 0x279   :  { %v3347_v61 = vadd.f32 %v3346_v0, %v3234_v58  ;;  %v7339_v34 = vpop.f32.mrf.mxu0  ;;  %5716 = vmatpush3.bf16.msra.mxu1 %v7932_v36  ;;  %v4109_v25 = vmax.f32 %v3345_v29, 0.0  ;;  %v3141_v29 = vadd.f32 %v7198_v49, %v7168_v31  ;;  %v7938_v36 = vld [vmem:[#allocation26_spill] sm:$0xff] }
 0x27a   :  { %v3350_v15 = vpop.f32.mrf.mxu1  ;;  %5573 = vmatprep.subr.bf16.mxu1 %v6343_v28 }
 0x27b   :  { %v4110_v60 = vmax.f32 %v3347_v61, 0.0  ;;  %v7344_v1 = vpop.f32.mrf.mxu0  ;;  %v3351_v12 = vadd.f32 %v3350_v15, %v7934_v30  ;;  %v4181_v13 = vpack.c.bf16 %v4109_v25, %v4103_v35 }
 0x27c   :  { %4027 = vmatmul.mubr.bf16.gmra.mxu1 %v7933_v48  ;;  %v3352_v27 = vpop.f32.mrf.mxu1  ;;  %v3254_v48 = vadd.f32 %v7202_v39, %v3141_v29  ;;  %v7942_v29 = vld [vmem:[#allocation29_spill] sm:$0xff] }
 0x27d   :  { %4036 = vmatprep.mubr.bf16.mxu1 %v7935_v57  ;;  %v7349_v8 = vpop.f32.mrf.mxu0  ;;  %v4182_v53 = vpack.c.bf16 %v4110_v60, %v4104_v23  ;;  %v3353_v55 = vadd.f32 %v3352_v27, %v7936_v2  ;;  %v4115_v9 = vmax.f32 %v3351_v12, 0.0  ;;  %v7940_v27 = vld [vmem:[#allocation19_spill] sm:$0xff] }
 0x27e   :  { %v3354_v21 = vpop.f32.mrf.mxu1  ;;  %v6360_v2 = vld [vmem:[#allocation9 + $0x138] sm:$0xff]  }
 0x27f   :  { %v3355_v22 = vadd.f32 %v3354_v21, %v7937_v59  ;;  %v7354_v32 = vpop.f32.mrf.mxu0  ;;  %4658 = vmatprep.mubr.bf16.mxu0 %v4182_v53  ;;  %v4116_v5 = vmax.f32 %v3353_v55, 0.0  ;;  %v6359_v53 = vld [vmem:[#allocation9 + $0x178] sm:$0xff]   ;;  %v3151_v59 = vadd.f32 %v7215_v52, %v7168_v31 }
 0x280   :  { %v3356_v33 = vpop.f32.mrf.mxu1  ;;  %4659 = vmatmul.mubr.bf16.gmra.mxu0 %v4181_v13  ;;  %5637 = vmatprep.subr.bf16.mxu0 %v6359_v53  ;;  %v6364_v53 = vld [vmem:[#allocation9 + $0x128] sm:$0xff]  }
 0x281   :  { %v4121_v28 = vmax.f32 %v3355_v22, 0.0  ;;  %v3357_v17 = vadd.f32 %v3356_v33, %v3244_v42  ;;  %v7356_v58 = vpop.f32.mrf.mxu0  ;;  %5638 = vmatpush3.bf16.msra.mxu0 %v6360_v2  ;;  %v3264_v52 = vadd.f32 %v7219_v54, %v3151_v59  ;;  %v7944_v2 = vld [vmem:[#allocation30_spill] sm:$0xff]  ;;  %v6365_v59 = vld [vmem:[#allocation9 + $0x160] sm:$0xff]  }
 0x282   :  { %v3360_v44 = vpop.f32.mrf.mxu1 }
 0x283   :  { %v7360_v56 = vpack.c.bf16 %v4121_v28, %v4115_v9  ;;  %v4122_v0 = vmax.f32 %v3357_v17, 0.0  ;;  %v7362_v61 = vpop.f32.mrf.mxu0  ;;  %v3361_v15 = vadd.f32 %v3360_v44, %v7191_v37  ;;  %v7941_v9 = vld [vmem:[#allocation28_spill] sm:$0xff]  ;;  %v6361_v17 = vld [vmem:[#allocation9 + $0x170] sm:$0xff]  }
 0x284   :  { %4037 = vmatmul.mubr.bf16.gmra.mxu1 %v7938_v36  ;;  %v3362_v25 = vpop.f32.mrf.mxu1  ;;  %v6362_v36 = vld [vmem:[#allocation9 + $0x130] sm:$0xff]   ;;  %5639 = vmatprep.subr.bf16.mxu0 %v6361_v17 }
 0x285   :  { %4046 = vmatprep.mubr.bf16.mxu1 %v7939_v4  ;;  %v7367_v23 = vpop.f32.mrf.mxu0  ;;  %v4188_v60 = vpack.c.bf16 %v4122_v0, %v4116_v5  ;;  %v3363_v49 = vadd.f32 %v3362_v25, %v7195_v24  ;;  %v4127_v13 = vmax.f32 %v3361_v15, 0.0  ;;  %v7943_v15 = vld [vmem:[#allocation20_spill] sm:$0xff]  ;;  %5640 = vmatpush3.bf16.msra.mxu0 %v6362_v36 }
 0x286   :  { %v3364_v35 = vpop.f32.mrf.mxu1  ;;  %v6366_v36 = vld [vmem:[#allocation9 + $0x120] sm:$0xff]  }
 0x287   :  { %v3365_v30 = vadd.f32 %v3364_v35, %v7940_v27  ;;  %v7372_v12 = vpop.f32.mrf.mxu0  ;;  %v4128_v39 = vmax.f32 %v3363_v49, 0.0  ;;  %v6363_v49 = vld [vmem:[#allocation9 + $0x168] sm:$0xff]  }
 0x288   :  { %v3366_v57 = vpop.f32.mrf.mxu1  ;;  %5641 = vmatprep.subr.bf16.mxu0 %v6363_v49 }
 0x289   :  { %v4133_v21 = vmax.f32 %v3365_v30, 0.0  ;;  %v3367_v42 = vadd.f32 %v3366_v57, %v3254_v48  ;;  %v7374_v37 = vpop.f32.mrf.mxu0  ;;  %5642 = vmatpush3.bf16.msra.mxu0 %v6364_v53  ;;  %v6344_v53 = vld [vmem:[#allocation9 + $0xb8] sm:$0xff]  }
 0x28a   :  { %v3370_v55 = vpop.f32.mrf.mxu1  ;;  %5643 = vmatprep.subr.bf16.mxu0 %v6365_v59 }
 0x28b   :  { %v7378_v22 = vpack.c.bf16 %v4133_v21, %v4127_v13  ;;  %v4134_v24 = vmax.f32 %v3367_v42, 0.0  ;;  %v7380_v33 = vpop.f32.mrf.mxu0  ;;  %v3371_v44 = vadd.f32 %v3370_v55, %v7208_v43 }
 0x28c   :  { %4047 = vmatmul.mubr.bf16.gmra.mxu1 %v7941_v9  ;;  %v3372_v28 = vpop.f32.mrf.mxu1  ;;  %v7947_v9 = vld [vmem:[#allocation43_spill] sm:$0xff] }
 0x28d   :  { %4056 = vmatprep.mubr.bf16.mxu1 %v7942_v29  ;;  %v7385_v5 = vpop.f32.mrf.mxu0  ;;  %v4194_v0 = vpack.c.bf16 %v4134_v24, %v4128_v39  ;;  %v3373_v25 = vadd.f32 %v3372_v28, %v7212_v40  ;;  %v4139_v43 = vmax.f32 %v3371_v44, 0.0  ;;  %v7945_v39 = vld [vmem:[#allocation16_spill] sm:$0xff]  ;;  %5644 = vmatpush3.bf16.msra.mxu0 %v6366_v36 }
 0x28e   :  { %v3374_v31 = vpop.f32.mrf.mxu1  ;;  %v7946_v24 = vsub.s32 2, %v7945_v39 }
 0x28f   :  { %v3375_v4 = vadd.f32 %v3374_v31, %v7943_v15  ;;  %v7390_v35 = vpop.f32.mrf.mxu0  ;;  %v4140_v21 = vmax.f32 %v3373_v25, 0.0 }
 0x290   :  { %v3376_v48 = vpop.f32.mrf.mxu1  ;;  %v7402_v28 = vrot.slane %v7947_v9, %v7946_v24 }
 0x291   :  { %v4145_v27 = vmax.f32 %v3375_v4, 0.0  ;;  %v3377_v30 = vadd.f32 %v3376_v48, %v3264_v52  ;;  %v7392_v57 = vpop.f32.mrf.mxu0  ;;  %v3274_v52 = vadd.f32 %v7240_v41, %v7238_v7  ;;  %v6345_v41 = vld [vmem:[#allocation9 + $0xf0] sm:$0xff]  }
 0x292   :  { %v3380_v13 = vpop.f32.mrf.mxu1  ;;  %v3428_v59 = vadd.f32 %v7259_v46, %v7402_v28  ;;  %v3434_v46 = vadd.f32 %v7273_v11, %v7402_v28 }
 0x293   :  { %v7394_v42 = vpack.c.bf16 %v4145_v27, %v4139_v43  ;;  %v4146_v54 = vmax.f32 %v3377_v30, 0.0  ;;  %v7396_v40 = vpop.f32.mrf.mxu0  ;;  %v3381_v17 = vadd.f32 %v3380_v13, %v7225_v38  ;;  %v6367_v38 = vld [vmem:[#allocation9 + $0x158] sm:$0xff]  }
 0x294   :  { %4057 = vmatmul.mubr.bf16.gmra.mxu1 %v7944_v2  ;;  %v3382_v55 = vpop.f32.mrf.mxu1  ;;  %v6368_v13 = vld [vmem:[#allocation9 + $0x118] sm:$0xff]   ;;  %5645 = vmatprep.subr.bf16.mxu0 %v6367_v38 }
 0x295   :  { %4666 = vmatprep.mubr.bf16.mxu1 %v4188_v60  ;;  %v7405_v44 = vpop.f32.mrf.mxu0  ;;  %v7407_v29 = vpack.c.bf16 %v4146_v54, %v4140_v21  ;;  %v3383_v25 = vadd.f32 %v3382_v55, %v7228_v10  ;;  %v3424_v60 = vadd.f32 %v7247_v19, %v7402_v28  ;;  %v4151_v49 = vmax.f32 %v3381_v17, 0.0  ;;  %5646 = vmatpush3.bf16.msra.mxu0 %v6368_v13  ;;  %v6369_v55 = vld [vmem:[#allocation9 + $0x150] sm:$0xff]  }
 0x296   :  { %v3384_v31 = vpop.f32.mrf.mxu1  ;;  %v6346_v17 = vld [vmem:[#allocation9 + $0xb0] sm:$0xff]   ;;  %5647 = vmatprep.subr.bf16.mxu0 %v6369_v55 }
 0x297   :  { %v3385_v15 = vadd.f32 %v3384_v31, %v7235_v26  ;;  %v7413_v4 = vpop.f32.mrf.mxu0  ;;  %v4152_v10 = vmax.f32 %v3383_v25, 0.0  ;;  %v6370_v31 = vld [vmem:[#allocation9 + $0x110] sm:$0xff]   ;;  %v6347_v25 = vld [vmem:[#allocation9 + $0xe8] sm:$0xff]  }
 0x298   :  { %v3386_v48 = vpop.f32.mrf.mxu1 }
 0x299   :  { %v4157_v43 = vmax.f32 %v3385_v15, 0.0  ;;  %v3387_v27 = vadd.f32 %v3386_v48, %v3274_v52  ;;  %v7417_v30 = vpop.f32.mrf.mxu0  ;;  %5648 = vmatpush3.bf16.msra.mxu0 %v6370_v31 }
 0x29a   :  { %v3536_v7 = vpop.f32.mrf.mxu1 }
 0x29b   :  { %v7419_v26 = vpack.c.bf16 %v4157_v43, %v4151_v49  ;;  %v4158_v21 = vmax.f32 %v3387_v27, 0.0  ;;  %v3537_v54 = vadd.f32 %v3536_v7, %v3424_v60  ;;  %v3649_v2 = vpop.f32.mrf.mxu0  ;;  %v6371_v60 = vld [vmem:[#allocation9 + $0x148] sm:$0xff]  }
 0x29c   :  { %4667 = vmatmul.mubr.bf16.vlgmr.msra.gmra.mxu1 %v7360_v56  ;;  %v3538_v19 = vpop.f32.mrf.mxu1  ;;  %v6348_v43 = vld [vmem:[#allocation9 + $0xa8] sm:$0xff]   ;;  %5649 = vmatprep.subr.bf16.mxu0 %v6371_v60 }
 0x29d   :  { %4674 = vmatprep.mubr.bf16.mxu1 %v4194_v0  ;;  %5574 = vmatpush3.bf16.msra.mxu1 %v6344_v53  ;;  %v7424_v24 = vpop.f32.mrf.mxu0  ;;  %v7426_v36 = vpack.c.bf16 %v4158_v21, %v4152_v10  ;;  %v3650_v15 = vadd.f32 %v3649_v2, %v3537_v54  ;;  %v6372_v27 = vld [vmem:[#allocation9 + $0x108] sm:$0xff]   ;;  %v7948_v53 = vsub.s32 3, %v7945_v39 }
 0x29e   :  { %v3540_v52 = vpop.f32.mrf.mxu1  ;;  %5575 = vmatprep.subr.bf16.mxu1 %v6345_v41  ;;  %v6349_v41 = vld [vmem:[#allocation9 + $0xe0] sm:$0xff]   ;;  %5650 = vmatpush3.bf16.msra.mxu0 %v6372_v27 }
 0x29f   :  { %v3541_v48 = vadd.f32 %v3540_v52, %v3428_v59  ;;  %v3653_v56 = vpop.f32.mrf.mxu0  ;;  %v7433_v13 = vrot.slane %v7947_v9, %v7948_v53  ;;  %v4069_v10 = vmax.f32 %v3650_v15, 0.0  ;;  %v6373_v59 = vld [vmem:[#allocation9 + $0x140] sm:$0xff]   ;;  %v3438_v9 = vadd.f32 %v7285_v14, %v7402_v28  ;;  %v6352_v53 = vld [vmem:[#allocation9 + $0x98] sm:$0xff]  }
 0x2a0   :  { %v3542_v38 = vpop.f32.mrf.mxu1  ;;  %v6350_v52 = vld [vmem:[#allocation9 + $0xa0] sm:$0xff]   ;;  %5651 = vmatprep.subr.bf16.mxu0 %v6373_v59 }
 0x2a1   :  { %v3654_v0 = vadd.f32 %v3653_v56, %v3541_v48  ;;  %5576 = vmatpush3.bf16.msra.mxu1 %v6346_v17  ;;  %v3655_v49 = vpop.f32.mrf.mxu0  ;;  %v3430_v11 = vadd.f32 %v7265_v3, %v7433_v13  ;;  %v3426_v15 = vadd.f32 %v7253_v50, %v7433_v13 }
 0x2a2   :  { %v3546_v7 = vpop.f32.mrf.mxu1  ;;  %5577 = vmatprep.subr.bf16.mxu1 %v6347_v25  ;;  %v6374_v25 = vld [vmem:[#allocation9 + $0x100] sm:$0xff]  }
 0x2a3   :  { %v4075_v21 = vmax.f32 %v3654_v0, 0.0  ;;  %v3547_v54 = vadd.f32 %v3546_v7, %v3434_v46  ;;  %v3659_v2 = vpop.f32.mrf.mxu0  ;;  %v3543_v3 = vadd.f32 %v3542_v38, %v3430_v11  ;;  %5652 = vmatpush3.bf16.msra.mxu0 %v6374_v25  ;;  %v3539_v46 = vadd.f32 %v3538_v19, %v3426_v15  ;;  %v6353_v38 = vld [vmem:[#allocation9 + $0xd0] sm:$0xff]  }
 0x2a4   :  { %4675 = vmatmul.mubr.bf16.gmra.mxu1 %v7378_v22  ;;  %v3548_v55 = vpop.f32.mrf.mxu1  ;;  %v6351_v22 = vld [vmem:[#allocation9 + $0xd8] sm:$0xff]   ;;  %v3448_v11 = vadd.f32 %v7311_v18, %v7402_v28 }
 0x2a5   :  { %v7440_v17 = vpack.c.bf16 %v4075_v21, %v4069_v10  ;;  %4682 = vmatprep.mubr.bf16.mxu1 %v7407_v29  ;;  %5578 = vmatpush3.bf16.msra.mxu1 %v6348_v43  ;;  %v7443_v31 = vpop.f32.mrf.mxu0  ;;  %v3660_v56 = vadd.f32 %v3659_v2, %v3547_v54  ;;  %v3444_v29 = vadd.f32 %v7299_v45, %v7402_v28 }
 0x2a6   :  { %v3550_v48 = vpop.f32.mrf.mxu1  ;;  %5579 = vmatprep.subr.bf16.mxu1 %v6349_v41  ;;  %v3656_v7 = vadd.f32 %v3655_v49, %v3543_v3  ;;  %v3652_v2 = vadd.f32 %v7424_v24, %v3539_v46  ;;  %v3440_v45 = vadd.f32 %v7291_v47, %v7433_v13  ;;  %v6355_v24 = vld [vmem:[#allocation9 + $0xc8] sm:$0xff]  }
 0x2a7   :  { %v3551_v60 = vadd.f32 %v3550_v48, %v3438_v9  ;;  %v3663_v14 = vpop.f32.mrf.mxu0  ;;  %v4081_v41 = vmax.f32 %v3660_v56, 0.0  ;;  %v6354_v9 = vld [vmem:[#allocation9 + $0x90] sm:$0xff]   ;;  %v3454_v56 = vadd.f32 %v7325_v6, %v7402_v28  ;;  %v6356_v46 = vld [vmem:[#allocation9 + $0x88] sm:$0xff]  }
 0x2a8   :  { %v3552_v0 = vpop.f32.mrf.mxu1 }
 0x2a9   :  { %v3664_v43 = vadd.f32 %v3663_v14, %v3551_v60  ;;  %5580 = vmatpush3.bf16.msra.mxu1 %v6350_v52  ;;  %v3665_v27 = vpop.f32.mrf.mxu0  ;;  %v4076_v52 = vmax.f32 %v3656_v7, 0.0  ;;  %v3553_v15 = vadd.f32 %v3552_v0, %v3440_v45 }
 0x2aa   :  { %v3556_v50 = vpop.f32.mrf.mxu1  ;;  %5581 = vmatprep.subr.bf16.mxu1 %v6351_v22  ;;  %v4070_v22 = vmax.f32 %v3652_v2, 0.0  ;;  %v3446_v2 = vadd.f32 %v7305_v62, %v7433_v13 }
 0x2ab   :  { %v4087_v10 = vmax.f32 %v3664_v43, 0.0  ;;  %v3557_v21 = vadd.f32 %v3556_v50, %v3444_v29  ;;  %v3669_v54 = vpop.f32.mrf.mxu0  ;;  %v3666_v7 = vadd.f32 %v3665_v27, %v3553_v15 }
 0x2ac   :  { %4683 = vmatmul.mubr.bf16.gmra.mxu1 %v7394_v42  ;;  %v3558_v19 = vpop.f32.mrf.mxu1  ;;  %v3436_v42 = vadd.f32 %v7279_v20, %v7433_v13  ;;  %v4166_v29 = vpack.c.bf16 %v4076_v52, %v4070_v22 }
 0x2ad   :  { %v7455_v59 = vpack.c.bf16 %v4087_v10, %v4081_v41  ;;  %4690 = vmatprep.mubr.bf16.mxu1 %v7426_v36  ;;  %5582 = vmatpush3.bf16.msra.mxu1 %v6352_v53  ;;  %v3671_v49 = vpop.f32.mrf.mxu0  ;;  %v3670_v3 = vadd.f32 %v3669_v54, %v3557_v21  ;;  %v6357_v53 = vld [vmem:[#allocation9 + $0xc0] sm:$0xff]   ;;  %v3450_v41 = vadd.f32 %v7317_v63, %v7433_v13  ;;  %v4088_v63 = vmax.f32 %v3666_v7, 0.0 }
 0x2ae   :  { %v3560_v25 = vpop.f32.mrf.mxu1  ;;  %5583 = vmatprep.subr.bf16.mxu1 %v6353_v38  ;;  %v3549_v36 = vadd.f32 %v3548_v55, %v3436_v42  ;;  %v3458_v55 = vadd.f32 %v7337_v51, %v7402_v28  ;;  %v6358_v54 = vld [vmem:[#allocation9 + $0x80] sm:$0xff]  }
 0x2af   :  { %v3561_v47 = vadd.f32 %v3560_v25, %v3448_v11  ;;  %v3673_v48 = vpop.f32.mrf.mxu0  ;;  %v4093_v20 = vmax.f32 %v3670_v3, 0.0  ;;  %v3559_v25 = vadd.f32 %v3558_v19, %v3446_v2  ;;  %v3460_v19 = vadd.f32 %v7339_v34, %v7433_v13 }
 0x2b0   :  { %v3562_v18 = vpop.f32.mrf.mxu1  ;;  %v3662_v10 = vadd.f32 %v7443_v31, %v3549_v36  ;;  %v3464_v31 = vadd.f32 %v7344_v1, %v7402_v28  ;;  %v3468_v1 = vadd.f32 %v7354_v32, %v7402_v28  ;;  %v3474_v34 = vadd.f32 %v7362_v61, %v7402_v28 }
 0x2b1   :  { %v3674_v60 = vadd.f32 %v3673_v48, %v3561_v47  ;;  %5584 = vmatpush3.bf16.msra.mxu1 %v6354_v9  ;;  %v3675_v14 = vpop.f32.mrf.mxu0  ;;  %v3563_v45 = vadd.f32 %v3562_v18, %v3450_v41  ;;  %v3672_v36 = vadd.f32 %v3671_v49, %v3559_v25  ;;  %v3466_v25 = vadd.f32 %v7349_v8, %v7433_v13 }
 0x2b2   :  { %v3566_v43 = vpop.f32.mrf.mxu1  ;;  %5585 = vmatprep.subr.bf16.mxu1 %v6355_v24  ;;  %v4082_v24 = vmax.f32 %v3662_v10, 0.0 }
 0x2b3   :  { %v4099_v0 = vmax.f32 %v3674_v60, 0.0  ;;  %v3567_v50 = vadd.f32 %v3566_v43, %v3454_v56  ;;  %v3679_v38 = vpop.f32.mrf.mxu0  ;;  %v3676_v3 = vadd.f32 %v3675_v14, %v3563_v45 }
 0x2b4   :  { %4691 = vmatmul.mubr.bf16.gmra.mxu1 %v7419_v26  ;;  %v3568_v6 = vpop.f32.mrf.mxu1  ;;  %v4172_v48 = vpack.c.bf16 %v4088_v63, %v4082_v24 }
 0x2b5   :  { %v7468_v21 = vpack.c.bf16 %v4099_v0, %v4093_v20  ;;  %5586 = vmatpush3.bf16.msra.mxu1 %v6356_v46  ;;  %4731 = vmatprep.mubr.bf16.mxu1 %v4166_v29  ;;  %v3681_v27 = vpop.f32.mrf.mxu0  ;;  %v3680_v26 = vadd.f32 %v3679_v38, %v3567_v50  ;;  %v4100_v29 = vmax.f32 %v3676_v3, 0.0  ;;  %v4094_v0 = vmax.f32 %v3672_v36, 0.0 }
 0x2b6   :  { %v3570_v11 = vpop.f32.mrf.mxu1  ;;  %5587 = vmatprep.subr.bf16.mxu1 %v6357_v53  ;;  %v3456_v53 = vadd.f32 %v7331_v16, %v7433_v13  ;;  %v3470_v16 = vadd.f32 %v7356_v58, %v7433_v13 }
 0x2b7   :  { %v3571_v9 = vadd.f32 %v3570_v11, %v3458_v55  ;;  %v3683_v52 = vpop.f32.mrf.mxu0  ;;  %v4105_v62 = vmax.f32 %v3680_v26, 0.0  ;;  %v4178_v55 = vpack.c.bf16 %v4100_v29, %v4094_v0 }
 0x2b8   :  { %v3572_v51 = vpop.f32.mrf.mxu1  ;;  %v3569_v38 = vadd.f32 %v3568_v6, %v3456_v53 }
 0x2b9   :  { %v3684_v42 = vadd.f32 %v3683_v52, %v3571_v9  ;;  %5588 = vmatpush3.bf16.msra.mxu1 %v6358_v54  ;;  %v3685_v15 = vpop.f32.mrf.mxu0  ;;  %v3573_v7 = vadd.f32 %v3572_v51, %v3460_v19  ;;  %v3478_v9 = vadd.f32 %v7372_v12, %v7402_v28 }
 0x2ba   :  { %v3576_v47 = vpop.f32.mrf.mxu1  ;;  %v3682_v61 = vadd.f32 %v3681_v27, %v3569_v38 }
 0x2bb   :  { %v4111_v22 = vmax.f32 %v3684_v42, 0.0  ;;  %v3577_v18 = vadd.f32 %v3576_v47, %v3464_v31  ;;  %v3689_v56 = vpop.f32.mrf.mxu0  ;;  %v3686_v54 = vadd.f32 %v3685_v15, %v3573_v7  ;;  %v3484_v47 = vadd.f32 %v7380_v33, %v7402_v28 }
 0x2bc   :  { %4732 = vmatmul.mubr.bf16.vlgmr.msra.gmra.mxu1 %v7440_v17  ;;  %v3578_v60 = vpop.f32.mrf.mxu1  ;;  %v4106_v12 = vmax.f32 %v3682_v61, 0.0  ;;  %v3488_v33 = vadd.f32 %v7390_v35, %v7402_v28  ;;  %v3486_v61 = vadd.f32 %v7385_v5, %v7433_v13  ;;  %v3500_v5 = vadd.f32 %v7417_v30, %v7433_v13 }
 0x2bd   :  { %v7479_v46 = vpack.c.bf16 %v4111_v22, %v4105_v62  ;;  %4739 = vmatprep.mubr.bf16.mxu1 %v4172_v48  ;;  %v3691_v14 = vpop.f32.mrf.mxu0  ;;  %v3690_v49 = vadd.f32 %v3689_v56, %v3577_v18  ;;  %v4112_v24 = vmax.f32 %v3686_v54, 0.0  ;;  %v3579_v3 = vadd.f32 %v3578_v60, %v3466_v25 }
 0x2be   :  { %v3580_v43 = vpop.f32.mrf.mxu1  ;;  %v3480_v60 = vadd.f32 %v7374_v37, %v7433_v13  ;;  %v3494_v37 = vadd.f32 %v7396_v40, %v7402_v28 }
 0x2bf   :  { %v3581_v20 = vadd.f32 %v3580_v43, %v3468_v1  ;;  %v3693_v17 = vpop.f32.mrf.mxu0  ;;  %v4117_v2 = vmax.f32 %v3690_v49, 0.0  ;;  %v4184_v18 = vpack.c.bf16 %v4112_v24, %v4106_v12  ;;  %v3692_v1 = vadd.f32 %v3691_v14, %v3579_v3 }
 0x2c0   :  { %v3582_v50 = vpop.f32.mrf.mxu1 }
 0x2c1   :  { %v3694_v32 = vadd.f32 %v3693_v17, %v3581_v20  ;;  %v3695_v41 = vpop.f32.mrf.mxu0  ;;  %v3583_v51 = vadd.f32 %v3582_v50, %v3470_v16  ;;  %v3476_v20 = vadd.f32 %v7367_v23, %v7433_v13  ;;  %v4118_v50 = vmax.f32 %v3692_v1, 0.0 }
 0x2c2   :  { %v3586_v10 = vpop.f32.mrf.mxu1  ;;  %v3498_v16 = vadd.f32 %v7413_v4, %v7402_v28 }
 0x2c3   :  { %v4123_v45 = vmax.f32 %v3694_v32, 0.0  ;;  %v3587_v11 = vadd.f32 %v3586_v10, %v3474_v34  ;;  %v3699_v63 = vpop.f32.mrf.mxu0  ;;  %v3696_v62 = vadd.f32 %v3695_v41, %v3583_v51 }
 0x2c4   :  { %4740 = vmatmul.mubr.bf16.gmra.mxu1 %v7455_v59  ;;  %v3588_v26 = vpop.f32.mrf.mxu1 }
 0x2c5   :  { %v7490_v6 = vpack.c.bf16 %v4123_v45, %v4117_v2  ;;  %4747 = vmatprep.mubr.bf16.mxu1 %v4178_v55  ;;  %v3701_v52 = vpop.f32.mrf.mxu0  ;;  %v3700_v42 = vadd.f32 %v3699_v63, %v3587_v11  ;;  %v4124_v7 = vmax.f32 %v3696_v62, 0.0  ;;  %v3589_v38 = vadd.f32 %v3588_v26, %v3476_v20 }
 0x2c6   :  { %v3590_v31 = vpop.f32.mrf.mxu1  ;;  %v3490_v63 = vadd.f32 %v7392_v57, %v7433_v13 }
 0x2c7   :  { %v3591_v15 = vadd.f32 %v3590_v31, %v3478_v9  ;;  %v3703_v58 = vpop.f32.mrf.mxu0  ;;  %v4129_v56 = vmax.f32 %v3700_v42, 0.0  ;;  %v4190_v41 = vpack.c.bf16 %v4124_v7, %v4118_v50  ;;  %v3702_v40 = vadd.f32 %v3701_v52, %v3589_v38 }
 0x2c8   :  { %v3592_v59 = vpop.f32.mrf.mxu1 }
 0x2c9   :  { %v3704_v27 = vadd.f32 %v3703_v58, %v3591_v15  ;;  %v3705_v48 = vpop.f32.mrf.mxu0  ;;  %v3593_v17 = vadd.f32 %v3592_v59, %v3480_v60  ;;  %v4130_v58 = vmax.f32 %v3702_v40, 0.0 }
 0x2ca   :  { %v3596_v22 = vpop.f32.mrf.mxu1 }
 0x2cb   :  { %v4135_v36 = vmax.f32 %v3704_v27, 0.0  ;;  %v3597_v8 = vadd.f32 %v3596_v22, %v3484_v47  ;;  %v3709_v19 = vpop.f32.mrf.mxu0  ;;  %v3706_v10 = vadd.f32 %v3705_v48, %v3593_v17 }
 0x2cc   :  { %4748 = vmatmul.mubr.bf16.gmra.mxu1 %v7468_v21  ;;  %v3598_v29 = vpop.f32.mrf.mxu1 }
 0x2cd   :  { %v7501_v43 = vpack.c.bf16 %v4135_v36, %v4129_v56  ;;  %4755 = vmatprep.mubr.bf16.mxu1 %v4184_v18  ;;  %v3711_v53 = vpop.f32.mrf.mxu0  ;;  %v3710_v14 = vadd.f32 %v3709_v19, %v3597_v8  ;;  %v4136_v51 = vmax.f32 %v3706_v10, 0.0  ;;  %v3599_v3 = vadd.f32 %v3598_v29, %v3486_v61 }
 0x2ce   :  { %v3600_v49 = vpop.f32.mrf.mxu1  ;;  %v3496_v18 = vadd.f32 %v7405_v44, %v7433_v13 }
 0x2cf   :  { %v3601_v0 = vadd.f32 %v3600_v49, %v3488_v33  ;;  %v3713_v21 = vpop.f32.mrf.mxu0  ;;  %v4141_v54 = vmax.f32 %v3710_v14, 0.0  ;;  %v4196_v47 = vpack.c.bf16 %v4136_v51, %v4130_v58  ;;  %v3712_v48 = vadd.f32 %v3711_v53, %v3599_v3 }
 0x2d0   :  { %v3602_v34 = vpop.f32.mrf.mxu1 }
 0x2d1   :  { %v3714_v35 = vadd.f32 %v3713_v21, %v3601_v0  ;;  %v3715_v32 = vpop.f32.mrf.mxu0  ;;  %v3603_v31 = vadd.f32 %v3602_v34, %v3490_v63  ;;  %v4142_v1 = vmax.f32 %v3712_v48, 0.0 }
 0x2d2   :  { %v3606_v55 = vpop.f32.mrf.mxu1 }
 0x2d3   :  { %v4147_v2 = vmax.f32 %v3714_v35, 0.0  ;;  %v3607_v45 = vadd.f32 %v3606_v55, %v3494_v37  ;;  %v3719_v11 = vpop.f32.mrf.mxu0  ;;  %v3716_v28 = vadd.f32 %v3715_v32, %v3603_v31 }
 0x2d4   :  { %4756 = vmatmul.mubr.bf16.gmra.mxu1 %v7479_v46  ;;  %v3608_v23 = vpop.f32.mrf.mxu1 }
 0x2d5   :  { %v4201_v26 = vpack.c.bf16 %v4147_v2, %v4141_v54  ;;  %4763 = vmatprep.mubr.bf16.mxu1 %v4190_v41  ;;  %v3721_v9 = vpop.f32.mrf.mxu0  ;;  %v3720_v24 = vadd.f32 %v3719_v11, %v3607_v45  ;;  %v4148_v56 = vmax.f32 %v3716_v28, 0.0  ;;  %v3609_v29 = vadd.f32 %v3608_v23, %v3496_v18 }
 0x2d6   :  { %v3610_v25 = vpop.f32.mrf.mxu1  ;;  %v7950_v28 = vsub.s32 5, %v7945_v39 }
 0x2d7   :  { %v3611_v42 = vadd.f32 %v3610_v25, %v3498_v16  ;;  %v3723_v46 = vpop.f32.mrf.mxu0  ;;  %v4153_v4 = vmax.f32 %v3720_v24, 0.0  ;;  %v3722_v53 = vadd.f32 %v3721_v9, %v3609_v29 }
 0x2d8   :  { %v3612_v15 = vpop.f32.mrf.mxu1 }
 0x2d9   :  { %v3724_v57 = vadd.f32 %v3723_v46, %v3611_v42  ;;  %v3725_v59 = vpop.f32.mrf.mxu0  ;;  %v3613_v36 = vadd.f32 %v3612_v15, %v3500_v5  ;;  %v4154_v17 = vmax.f32 %v3722_v53, 0.0  ;;  %v7951_v5 = vsub.s32 4, %v7945_v39 }
 0x2db   :  { %v4159_v52 = vmax.f32 %v3724_v57, 0.0  ;;  %v7514_v12 = vpop.f32.mrf.mxu1  ;;  %v3726_v33 = vadd.f32 %v3725_v59, %v3613_v36 }
 0x2dc   :  { %v7516_v27 = vpop.f32.mrf.mxu0  ;;  %4764 = vmatmul.mubr.bf16.gmra.mxu1 %v7490_v6  ;;  %v4202_v6 = vpack.c.bf16 %v4148_v56, %v4142_v1 }
 0x2dd   :  { %v4207_v62 = vpack.c.bf16 %v4159_v52, %v4153_v4  ;;  %4771 = vmatprep.mubr.bf16.mxu1 %v4196_v47  ;;  %v7521_v22 = vpop.f32.mrf.mxu1  ;;  %v4160_v44 = vmax.f32 %v3726_v33, 0.0  ;;  %v6375_v47 = vld [vmem:[#allocation7] sm:$0x3f] }
 0x2de   :  { %v7525_v19 = vpop.f32.mrf.mxu0  ;;  %v7604_v4 = vrot.slane %v6375_v47, %v7950_v28  ;;  %v7610_v48 = vrot.slane %v6375_v47, %v7951_v5 }
 0x2df   :  { %v3766_v8 = vpop.f32.mrf.mxu1  ;;  %v4208_v0 = vpack.c.bf16 %v4160_v44, %v4154_v17 }
 0x2e0   :  { %v3879_v30 = vpop.f32.mrf.mxu0  ;;  %v3765_v56 = vadd.f32 %v7521_v22, %v7604_v4  ;;  %v3767_v36 = vadd.f32 %v3766_v8, %v7610_v48  ;;  %v3763_v1 = vadd.f32 %v7514_v12, %v7610_v48 }
 0x2e1   :  { %v3768_v60 = vpop.f32.mrf.mxu1 }
 0x2e2   :  { %v3881_v20 = vpop.f32.mrf.mxu0  ;;  %v3769_v33 = vadd.f32 %v3768_v60, %v7604_v4  ;;  %v3878_v53 = vadd.f32 %v7525_v19, %v3765_v56  ;;  %v3880_v44 = vadd.f32 %v3879_v30, %v3767_v36  ;;  %v3876_v17 = vadd.f32 %v7516_v27, %v3763_v1 }
 0x2e3   :  { %v7527_v7 = vpop.f32.mrf.mxu1 }
 0x2e4   :  { %4772 = vmatmul.mubr.bf16.gmra.mxu1 %v7501_v43  ;;  %v7538_v50 = vpop.f32.mrf.mxu0  ;;  %v3882_v22 = vadd.f32 %v3881_v20, %v3769_v33  ;;  %v3773_v19 = vadd.f32 %v7527_v7, %v7610_v48 }
 0x2e5   :  { %4779 = vmatprep.mubr.bf16.mxu1 %v4202_v6  ;;  %v7530_v49 = vpop.f32.mrf.mxu1 }
 0x2e6   :  { %v7544_v37 = vpop.f32.mrf.mxu0  ;;  %v3775_v12 = vadd.f32 %v7530_v49, %v7604_v4 }
 0x2e7   :  { %v7532_v13 = vpop.f32.mrf.mxu1 }
 0x2e8   :  { %v7550_v32 = vpop.f32.mrf.mxu0  ;;  %v3777_v60 = vadd.f32 %v7532_v13, %v7610_v48  ;;  %v3888_v49 = vadd.f32 %v7544_v37, %v3775_v12 }
 0x2e9   :  { %v7534_v14 = vpop.f32.mrf.mxu1 }
 0x2ea   :  { %v7556_v10 = vpop.f32.mrf.mxu0  ;;  %v3779_v20 = vadd.f32 %v7534_v14, %v7604_v4 }
 0x2eb   :  { %v7536_v21 = vpop.f32.mrf.mxu1 }
 0x2ec   :  { %4780 = vmatmul.mubr.bf16.gmra.mxu1 %v4201_v26  ;;  %v7562_v45 = vpop.f32.mrf.mxu0 }
 0x2ed   :  { %4787 = vmatprep.mubr.bf16.mxu1 %v4208_v0  ;;  %v7540_v34 = vpop.f32.mrf.mxu1 }
 0x2ee   :  { %v7568_v63 = vpop.f32.mrf.mxu0  ;;  %v3785_v37 = vadd.f32 %v7540_v34, %v7604_v4 }
 0x2ef   :  { %v7542_v43 = vpop.f32.mrf.mxu1 }
 0x2f0   :  { %v7574_v26 = vpop.f32.mrf.mxu0  ;;  %v3898_v34 = vadd.f32 %v7568_v63, %v3785_v37 }
 0x2f1   :  { %v7546_v38 = vpop.f32.mrf.mxu1 }
 0x2f2   :  { %v7580_v25 = vpop.f32.mrf.mxu0  ;;  %v3789_v12 = vadd.f32 %v7546_v38, %v7604_v4 }
 0x2f3   :  { %v7548_v35 = vpop.f32.mrf.mxu1 }
 0x2f4   :  { %4788 = vmatmul.mubr.bf16.gmra.mxu1 %v4207_v62  ;;  %v7586_v24 = vpop.f32.mrf.mxu0 }
 0x2f5   :  { %v7552_v41 = vpop.f32.mrf.mxu1 }
 0x2f6   :  { %v7592_v15 = vpop.f32.mrf.mxu0  ;;  %v3795_v63 = vadd.f32 %v7552_v41, %v7604_v4 }
 0x2f7   :  { %v7554_v55 = vpop.f32.mrf.mxu1 }
 0x2f8   :  { %v7598_v57 = vpop.f32.mrf.mxu0  ;;  %v3908_v37 = vadd.f32 %v7592_v15, %v3795_v63 }
 0x2f9   :  { %v7558_v54 = vpop.f32.mrf.mxu1 }
 0x2fa   :  { %v7612_v62 = vpop.f32.mrf.mxu0 }
 0x2fb   :  { %v7560_v2 = vpop.f32.mrf.mxu1 }
 0x2fc   :  { %v7621_v29 = vpop.f32.mrf.mxu0 }
 0x2fd   :  { %v7564_v11 = vpop.f32.mrf.mxu1 }
 0x2fe   :  { %v7626_v0 = vpop.f32.mrf.mxu0 }
 0x2ff   :  { %v7566_v23 = vpop.f32.mrf.mxu1 }
 0x300   :  { %v7634_v30 = vpop.f32.mrf.mxu0  ;;  %v3807_v15 = vadd.f32 %v7566_v23, %v7610_v48 }
 0x301   :  { %v7570_v16 = vpop.f32.mrf.mxu1 }
 0x303   :  { %v7572_v40 = vpop.f32.mrf.mxu1 }
 0x305   :  { %v7576_v9 = vpop.f32.mrf.mxu1 }
 0x307   :  { %v7578_v61 = vpop.f32.mrf.mxu1 }
 0x309   :  { %v7582_v51 = vpop.f32.mrf.mxu1 }
 0x30b   :  { %v7584_v31 = vpop.f32.mrf.mxu1 }
 0x30d   :  { %v7588_v42 = vpop.f32.mrf.mxu1 }
 0x30f   :  { %v7590_v46 = vpop.f32.mrf.mxu1 }
 0x311   :  { %v7594_v58 = vpop.f32.mrf.mxu1 }
 0x313   :  { %v7596_v3 = vpop.f32.mrf.mxu1 }
 0x314   :  { %7949 = vst [vmem:[#allocation21_spill] sm:$0xff] %v7596_v3 }
 0x315   :  { %v7600_v59 = vpop.f32.mrf.mxu1 }
 0x317   :  { %v7606_v52 = vpop.f32.mrf.mxu1 }
 0x319   :  { %v7614_v18 = vpop.f32.mrf.mxu1 }
 0x31a   :  { %7952 = vst [vmem:[#allocation31_spill] sm:$0xff] %v7614_v18 }
 0x31c   :  { %v3988_v6 = vpop.f32.mrf.mxu1 }
 0x31d   :  { %v3989_v5 = vadd.f32 %v3988_v6, %v3876_v17  ;;  %v3892_v17 = vadd.f32 %v7556_v10, %v3779_v20 }
 0x31e   :  { %v3990_v39 = vpop.f32.mrf.mxu1 }
 0x31f   :  { %v3991_v28 = vadd.f32 %v3990_v39, %v3878_v53  ;;  %v4071_v6 = vmax.f32 %v3989_v5, 0.0  ;;  %v3890_v39 = vadd.f32 %v7550_v32, %v3777_v60  ;;  %v7641_v53 = vpop.f32.mrf.mxu0  ;;  %v3787_v32 = vadd.f32 %v7542_v43, %v7610_v48 }
 0x320   :  { %v3992_v47 = vpop.f32.mrf.mxu1 }
 0x321   :  { %v3993_v8 = vadd.f32 %v3992_v47, %v3880_v44  ;;  %v4072_v36 = vmax.f32 %v3991_v28, 0.0  ;;  %v3900_v20 = vadd.f32 %v7574_v26, %v3787_v32  ;;  %v3797_v26 = vadd.f32 %v7554_v55, %v7610_v48 }
 0x322   :  { %v3994_v18 = vpop.f32.mrf.mxu1 }
 0x323   :  { %v3995_v3 = vadd.f32 %v3994_v18, %v3882_v22  ;;  %v4077_v27 = vmax.f32 %v3993_v8, 0.0  ;;  %v3886_v18 = vadd.f32 %v7538_v50, %v3773_v19  ;;  %v3783_v50 = vadd.f32 %v7536_v21, %v7610_v48  ;;  %v7650_v8 = vpop.f32.mrf.mxu0 }
 0x324   :  { %v3998_v56 = vpop.f32.mrf.mxu1  ;;  %v3910_v41 = vadd.f32 %v7598_v57, %v3797_v26 }
 0x325   :  { %v4078_v1 = vmax.f32 %v3995_v3, 0.0  ;;  %v4167_v7 = vpack.c.bf16 %v4077_v27, %v4071_v6  ;;  %v3999_v14 = vadd.f32 %v3998_v56, %v3886_v18 }
 0x326   :  { %v4000_v33 = vpop.f32.mrf.mxu1 }
 0x327   :  { %v4168_v13 = vpack.c.bf16 %v4078_v1, %v4072_v36  ;;  %v4001_v47 = vadd.f32 %v4000_v33, %v3888_v49  ;;  %v4083_v27 = vmax.f32 %v3999_v14, 0.0  ;;  %v3896_v36 = vadd.f32 %v7562_v45, %v3783_v50  ;;  %v7657_v1 = vpop.f32.mrf.mxu0 }
 0x328   :  { %v4002_v44 = vpop.f32.mrf.mxu1  ;;  %v3902_v33 = vadd.f32 %v7580_v25, %v3789_v12  ;;  %v3793_v45 = vadd.f32 %v7548_v35, %v7610_v48  ;;  %v3799_v25 = vadd.f32 %v7558_v54, %v7604_v4 }
 0x329   :  { %v4003_v22 = vadd.f32 %v4002_v44, %v3890_v39  ;;  %4828 = vmatprep.mubr.bf16.mxu0 %v4168_v13  ;;  %v4084_v60 = vmax.f32 %v4001_v47, 0.0 }
 0x32a   :  { %v4004_v3 = vpop.f32.mrf.mxu1  ;;  %4829 = vmatmul.mubr.bf16.vlgmr.msra.gmra.mxu0 %v4167_v7  ;;  %v3929_v7 = vpop.f32.mrf.mxu0  ;;  %v3906_v55 = vadd.f32 %v7586_v24, %v3793_v45  ;;  %v3803_v24 = vadd.f32 %v7560_v2, %v7610_v48 }
 0x32b   :  { %v4005_v28 = vadd.f32 %v4004_v3, %v3892_v17  ;;  %v4089_v5 = vmax.f32 %v4003_v22, 0.0 }
 0x32c   :  { %v4008_v10 = vpop.f32.mrf.mxu1 }
 0x32d   :  { %v4090_v19 = vmax.f32 %v4005_v28, 0.0  ;;  %v4173_v21 = vpack.c.bf16 %v4089_v5, %v4083_v27  ;;  %v4009_v38 = vadd.f32 %v4008_v10, %v3896_v36  ;;  %v3931_v28 = vpop.f32.mrf.mxu0  ;;  %v3912_v5 = vadd.f32 %v7612_v62, %v3799_v25 }
 0x32e   :  { %v4010_v56 = vpop.f32.mrf.mxu1 }
 0x32f   :  { %v4174_v43 = vpack.c.bf16 %v4090_v19, %v4084_v60  ;;  %v4011_v49 = vadd.f32 %v4010_v56, %v3898_v34  ;;  %v4095_v14 = vmax.f32 %v4009_v38, 0.0  ;;  %v3805_v19 = vadd.f32 %v7564_v11, %v7604_v4  ;;  %v7678_v27 = vpop.f32.mrf.mxu0 }
 0x330   :  { %v4012_v6 = vpop.f32.mrf.mxu1  ;;  %v3809_v34 = vadd.f32 %v7570_v16, %v7604_v4 }
 0x331   :  { %v4013_v39 = vadd.f32 %v4012_v6, %v3900_v20  ;;  %4836 = vmatprep.mubr.bf16.mxu0 %v4174_v43  ;;  %v4096_v47 = vmax.f32 %v4011_v49, 0.0  ;;  %v3918_v11 = vadd.f32 %v7626_v0, %v3805_v19  ;;  %v3920_v6 = vadd.f32 %v7634_v30, %v3807_v15  ;;  %v3937_v49 = vpop.f32.mrf.mxu0 }
 0x332   :  { %v4014_v13 = vpop.f32.mrf.mxu1  ;;  %4837 = vmatmul.mubr.bf16.gmra.mxu0 %v4173_v21  ;;  %v3922_v38 = vadd.f32 %v7641_v53, %v3809_v34  ;;  %v3817_v0 = vadd.f32 %v7578_v61, %v7610_v48  ;;  %v3819_v53 = vadd.f32 %v7582_v51, %v7604_v4  ;;  %v3825_v51 = vadd.f32 %v7588_v42, %v7604_v4 }
 0x333   :  { %v4015_v18 = vadd.f32 %v4014_v13, %v3902_v33  ;;  %v4101_v44 = vmax.f32 %v4013_v39, 0.0  ;;  %v3916_v33 = vadd.f32 %v7621_v29, %v3803_v24  ;;  %v3813_v29 = vadd.f32 %v7572_v40, %v7610_v48  ;;  %v3939_v45 = vpop.f32.mrf.mxu0 }
 0x334   :  { %v4018_v17 = vpop.f32.mrf.mxu1  ;;  %v3932_v40 = vadd.f32 %v3931_v28, %v3819_v53  ;;  %v3829_v28 = vadd.f32 %v7594_v58, %v7604_v4  ;;  %v3835_v58 = vadd.f32 %v7600_v59, %v7604_v4 }
 0x335   :  { %v4102_v22 = vmax.f32 %v4015_v18, 0.0  ;;  %v4179_v50 = vpack.c.bf16 %v4101_v44, %v4095_v14  ;;  %v4019_v54 = vadd.f32 %v4018_v17, %v3906_v55  ;;  %v3815_v18 = vadd.f32 %v7576_v9, %v7604_v4 }
 0x336   :  { %v4020_v3 = vpop.f32.mrf.mxu1  ;;  %v3930_v9 = vadd.f32 %v3929_v7, %v3817_v0  ;;  %v3926_v61 = vadd.f32 %v7650_v8, %v3813_v29  ;;  %v3823_v8 = vadd.f32 %v7584_v31, %v7610_v48 }
 0x337   :  { %v4180_v32 = vpack.c.bf16 %v4102_v22, %v4096_v47  ;;  %v4021_v10 = vadd.f32 %v4020_v3, %v3908_v37  ;;  %v4107_v36 = vmax.f32 %v4019_v54, 0.0  ;;  %v3928_v3 = vadd.f32 %v7657_v1, %v3815_v18 }
 0x338   :  { %v4022_v35 = vpop.f32.mrf.mxu1  ;;  %v3827_v1 = vadd.f32 %v7590_v46, %v7610_v48  ;;  %v3936_v34 = vadd.f32 %v7678_v27, %v3823_v8 }
 0x339   :  { %v4023_v12 = vadd.f32 %v4022_v35, %v3910_v41  ;;  %4844 = vmatprep.mubr.bf16.mxu0 %v4180_v32  ;;  %v4108_v20 = vmax.f32 %v4021_v10, 0.0  ;;  %v3941_v41 = vpop.f32.mrf.mxu0 }
 0x33a   :  { %v4024_v60 = vpop.f32.mrf.mxu1  ;;  %4845 = vmatmul.mubr.bf16.gmra.mxu0 %v4179_v50 }
 0x33b   :  { %v4025_v57 = vadd.f32 %v4024_v60, %v3912_v5  ;;  %v4113_v56 = vmax.f32 %v4023_v12, 0.0  ;;  %v3945_v12 = vpop.f32.mrf.mxu0 }
 0x33c   :  { %v4028_v62 = vpop.f32.mrf.mxu1 }
 0x33d   :  { %v4114_v43 = vmax.f32 %v4025_v57, 0.0  ;;  %v4185_v2 = vpack.c.bf16 %v4113_v56, %v4107_v36  ;;  %v4029_v16 = vadd.f32 %v4028_v62, %v3916_v33  ;;  %v3938_v56 = vadd.f32 %v3937_v49, %v3825_v51  ;;  %v3947_v46 = vpop.f32.mrf.mxu0  ;;  %v7953_v49 = vld [vmem:[#allocation21_spill] sm:$0xff] }
 0x33e   :  { %v4030_v21 = vpop.f32.mrf.mxu1  ;;  %v3940_v62 = vadd.f32 %v3939_v45, %v3827_v1  ;;  %v3942_v36 = vadd.f32 %v3941_v41, %v3829_v28  ;;  %v3833_v27 = vadd.f32 %v7953_v49, %v7610_v48 }
 0x33f   :  { %v4186_v23 = vpack.c.bf16 %v4114_v43, %v4108_v20  ;;  %v4031_v13 = vadd.f32 %v4030_v21, %v3918_v11  ;;  %v4119_v22 = vmax.f32 %v4029_v16, 0.0 }
 0x340   :  { %v4032_v39 = vpop.f32.mrf.mxu1  ;;  %v3946_v45 = vadd.f32 %v3945_v12, %v3833_v27 }
 0x341   :  { %v4033_v63 = vadd.f32 %v4032_v39, %v3920_v6  ;;  %4852 = vmatprep.mubr.bf16.mxu0 %v4186_v23  ;;  %v4120_v25 = vmax.f32 %v4031_v13, 0.0  ;;  %v3837_v23 = vadd.f32 %v7606_v52, %v7610_v48  ;;  %v7954_v13 = vld [vmem:[#allocation31_spill] sm:$0xff] }
 0x342   :  { %v4034_v26 = vpop.f32.mrf.mxu1  ;;  %4853 = vmatmul.mubr.bf16.gmra.mxu0 %v4185_v2  ;;  %v3949_v2 = vpop.f32.mrf.mxu0 }
 0x343   :  { %v4035_v30 = vadd.f32 %v4034_v26, %v3922_v38  ;;  %v4125_v44 = vmax.f32 %v4033_v63, 0.0  ;;  %v3839_v63 = vadd.f32 %v7954_v13, %v7604_v4  ;;  %v3950_v29 = vadd.f32 %v3949_v2, %v3837_v23 }
 0x344   :  { %v4038_v17 = vpop.f32.mrf.mxu1 }
 0x345   :  { %v4126_v47 = vmax.f32 %v4035_v30, 0.0  ;;  %v4191_v32 = vpack.c.bf16 %v4125_v44, %v4119_v22  ;;  %v4039_v5 = vadd.f32 %v4038_v17, %v3926_v61  ;;  %v3948_v30 = vadd.f32 %v3947_v46, %v3835_v58  ;;  %v3951_v44 = vpop.f32.mrf.mxu0 }
 0x346   :  { %v4040_v14 = vpop.f32.mrf.mxu1  ;;  %v3952_v53 = vadd.f32 %v3951_v44, %v3839_v63 }
 0x347   :  { %v4192_v37 = vpack.c.bf16 %v4126_v47, %v4120_v25  ;;  %v4041_v50 = vadd.f32 %v4040_v14, %v3928_v3  ;;  %v4131_v57 = vmax.f32 %v4039_v5, 0.0 }
 0x348   :  { %v4042_v55 = vpop.f32.mrf.mxu1 }
 0x349   :  { %v4043_v35 = vadd.f32 %v4042_v55, %v3930_v9  ;;  %4860 = vmatprep.mubr.bf16.mxu0 %v4192_v37  ;;  %v4132_v19 = vmax.f32 %v4041_v50, 0.0 }
 0x34a   :  { %v4044_v10 = vpop.f32.mrf.mxu1  ;;  %4861 = vmatmul.mubr.bf16.gmra.mxu0 %v4191_v32 }
 0x34b   :  { %v4045_v7 = vadd.f32 %v4044_v10, %v3932_v40  ;;  %v4137_v54 = vmax.f32 %v4043_v35, 0.0 }
 0x34c   :  { %v4048_v60 = vpop.f32.mrf.mxu1 }
 0x34d   :  { %v4138_v15 = vmax.f32 %v4045_v7, 0.0  ;;  %v4197_v20 = vpack.c.bf16 %v4137_v54, %v4131_v57  ;;  %v4049_v11 = vadd.f32 %v4048_v60, %v3936_v34  ;;  %v5525_v34 = vpop.f32.mrf.mxu0 }
 0x34e   :  { %v4050_v24 = vpop.f32.mrf.mxu1 }
 0x34f   :  { %v4198_v42 = vpack.c.bf16 %v4138_v15, %v4132_v19  ;;  %v4051_v31 = vadd.f32 %v4050_v24, %v3938_v56  ;;  %v4143_v18 = vmax.f32 %v4049_v11, 0.0 }
 0x350   :  { %v4052_v43 = vpop.f32.mrf.mxu1 }
 0x351   :  { %v4053_v21 = vadd.f32 %v4052_v43, %v3940_v62  ;;  %4868 = vmatprep.mubr.bf16.mxu0 %v4198_v42  ;;  %v4144_v16 = vmax.f32 %v4051_v31, 0.0 }
 0x352   :  { %v4054_v6 = vpop.f32.mrf.mxu1  ;;  %4869 = vmatmul.mubr.bf16.gmra.mxu0 %v4197_v20  ;;  %v5526_v20 = vpop.f32.mrf.mxu0 }
 0x353   :  { %v4055_v33 = vadd.f32 %v4054_v6, %v3942_v36  ;;  %v4149_v39 = vmax.f32 %v4053_v21, 0.0 }
 0x354   :  { %v4058_v38 = vpop.f32.mrf.mxu1  ;;  %v5528_v36 = vpop.f32.mrf.mxu0 }
 0x355   :  { %v4150_v26 = vmax.f32 %v4055_v33, 0.0  ;;  %v4203_v52 = vpack.c.bf16 %v4149_v39, %v4143_v18  ;;  %v4059_v47 = vadd.f32 %v4058_v38, %v3946_v45 }
 0x356   :  { %v4060_v0 = vpop.f32.mrf.mxu1  ;;  %v5529_v21 = vpop.f32.mrf.mxu0 }
 0x357   :  { %v4204_v59 = vpack.c.bf16 %v4150_v26, %v4144_v16  ;;  %v4061_v25 = vadd.f32 %v4060_v0, %v3948_v30  ;;  %v4155_v61 = vmax.f32 %v4059_v47, 0.0  ;;  %v5527_v47 = vadd.f32 %v5526_v20, %v5525_v34 }
 0x358   :  { %v4062_v17 = vpop.f32.mrf.mxu1  ;;  %v5531_v6 = vpop.f32.mrf.mxu0 }
 0x359   :  { %v4063_v48 = vadd.f32 %v4062_v17, %v3950_v29  ;;  %4876 = vmatprep.mubr.bf16.mxu0 %v4204_v59  ;;  %v4156_v9 = vmax.f32 %v4061_v25, 0.0 }
 0x35a   :  { %v4064_v22 = vpop.f32.mrf.mxu1  ;;  %4877 = vmatmul.mubr.bf16.gmra.mxu0 %v4203_v52  ;;  %v5532_v23 = vpop.f32.mrf.mxu0 }
 0x35b   :  { %v4065_v14 = vadd.f32 %v4064_v22, %v3952_v53  ;;  %v4161_v4 = vmax.f32 %v4063_v48, 0.0  ;;  %v5530_v22 = vadd.f32 %v5529_v21, %v5528_v36  ;;  %v5533_v34 = vadd.f32 %v5532_v23, %v5531_v6 }
 0x35c   :  { %v5549_v3 = vpop.f32.mrf.mxu1  ;;  %v5534_v49 = vpop.f32.mrf.mxu0 }
 0x35d   :  { %v4162_v37 = vmax.f32 %v4065_v14, 0.0  ;;  %v4209_v40 = vpack.c.bf16 %v4161_v4, %v4155_v61  ;;  %v7755_v14 = vld [vmem:[#allocation10] ss:$0 sm:$0xff] }
 0x35e   :  { %v5550_v41 = vpop.f32.mrf.mxu1  ;;  %v5535_v2 = vpop.f32.mrf.mxu0 }
 0x35f   :  { %v4210_v32 = vpack.c.bf16 %v4162_v37, %v4156_v9  ;;  %v7713_v55 = vadd.f32 %v5550_v41, %v5549_v3  ;;  %v4637_v41 = vadd.f32 %v5527_v47, %v7755_v14  ;;  %v5536_v20 = vadd.f32 %v5535_v2, %v5534_v49 }
 0x360   :  { %v7715_v50 = vpop.f32.mrf.mxu1  ;;  %v5537_v38 = vpop.f32.mrf.mxu0 }
 0x361   :  { %4884 = vmatprep.mubr.bf16.mxu0 %v4210_v32  ;;  %v4640_v32 = vadd.f32 %v5530_v22, %v7755_v14  ;;  %v4648_v22 = vadd.f32 %v5536_v20, %v7755_v14 }
 0x362   :  { %v7717_v35 = vpop.f32.mrf.mxu1  ;;  %4885 = vmatmul.mubr.bf16.gmra.mxu0 %v4209_v40  ;;  %v5538_v63 = vpop.f32.mrf.mxu0 }
 0x364   :  { %v5555_v5 = vpop.f32.mrf.mxu1  ;;  %v5540_v26 = vpop.f32.mrf.mxu0 }
 0x366   :  { %v5556_v10 = vpop.f32.mrf.mxu1  ;;  %v5541_v0 = vpop.f32.mrf.mxu0 }
 0x367   :  { %v7719_v51 = vadd.f32 %v5556_v10, %v5555_v5 }
 0x368   :  { %v7721_v1 = vpop.f32.mrf.mxu1  ;;  %v7741_v29 = vpop.f32.mrf.mxu0 }
 0x36a   :  { %v7723_v7 = vpop.f32.mrf.mxu1  ;;  %v7745_v45 = vpop.f32.mrf.mxu0 }
 0x36c   :  { %v5561_v8 = vpop.f32.mrf.mxu1  ;;  %v7749_v52 = vpop.f32.mrf.mxu0 }
 0x36e   :  { %v5562_v12 = vpop.f32.mrf.mxu1  ;;  %v5547_v53 = vpop.f32.mrf.mxu0 }
 0x36f   :  { %v7725_v54 = vadd.f32 %v5562_v12, %v5561_v8 }
 0x370   :  { %v7727_v60 = vpop.f32.mrf.mxu1 }
 0x372   :  { %v7729_v28 = vpop.f32.mrf.mxu1 }
 0x374   :  { %v5567_v19 = vpop.f32.mrf.mxu1 }
 0x376   :  { %v5568_v15 = vpop.f32.mrf.mxu1 }
 0x377   :  { %v7731_v57 = vadd.f32 %v5568_v15, %v5567_v19 }
 0x378   :  { %v7733_v24 = vpop.f32.mrf.mxu1 }
 0x379   :  { %7955 = vst [vmem:[#allocation32_spill] sm:$0xff] %v7731_v57 }
 0x37a   :  { %v7735_v56 = vpop.f32.mrf.mxu1 }
 0x37c   :  { %v5589_v62 = vpop.f32.mrf.mxu1 }
 0x37e   :  { %v5590_v42 = vpop.f32.mrf.mxu1 }
 0x37f   :  { %v5591_v3 = vadd.f32 %v5590_v42, %v5589_v62 }
 0x380   :  { %v5592_v46 = vpop.f32.mrf.mxu1 }
 0x381   :  { %v4734_v10 = vadd.f32 %v5591_v3, %v4637_v41 }
 0x382   :  { %v5593_v43 = vpop.f32.mrf.mxu1 }
 0x383   :  { %v5594_v9 = vadd.f32 %v5593_v43, %v5592_v46 }
 0x384   :  { %v5595_v31 = vpop.f32.mrf.mxu1 }
 0x385   :  { %v4737_v8 = vadd.f32 %v5594_v9, %v4640_v32 }
 0x386   :  { %v5596_v11 = vpop.f32.mrf.mxu1 }
 0x387   :  { %v5597_v46 = vadd.f32 %v5596_v11, %v5595_v31  ;;  %v5539_v11 = vadd.f32 %v5538_v63, %v5537_v38 }
 0x388   :  { %v5598_v58 = vpop.f32.mrf.mxu1 }
 0x38a   :  { %v5599_v33 = vpop.f32.mrf.mxu1 }
 0x38b   :  { %v5600_v43 = vadd.f32 %v5599_v33, %v5598_v58  ;;  %v5542_v58 = vadd.f32 %v5541_v0, %v5540_v26 }
 0x38c   :  { %v5601_v27 = vpop.f32.mrf.mxu1 }
 0x38d   :  { %v4745_v49 = vadd.f32 %v5600_v43, %v4648_v22 }
 0x38e   :  { %v5602_v39 = vpop.f32.mrf.mxu1 }
 0x38f   :  { %v5603_v41 = vadd.f32 %v5602_v39, %v5601_v27  ;;  %v5545_v27 = vadd.f32 %v7745_v45, %v7741_v29  ;;  %v5548_v39 = vadd.f32 %v5547_v53, %v7749_v52 }
 0x390   :  { %v5604_v13 = vpop.f32.mrf.mxu1 }
 0x392   :  { %v5605_v16 = vpop.f32.mrf.mxu1 }
 0x393   :  { %v5606_v32 = vadd.f32 %v5605_v16, %v5604_v13 }
 0x394   :  { %v7737_v18 = vpop.f32.mrf.mxu1 }
 0x396   :  { %v7739_v30 = vpop.f32.mrf.mxu1 }
 0x398   :  { %v7743_v59 = vpop.f32.mrf.mxu1 }
 0x39a   :  { %v7747_v44 = vpop.f32.mrf.mxu1 }
 0x39c   :  { %v7751_v17 = vpop.f32.mrf.mxu1 }
 0x39e   :  { %v7753_v25 = vpop.f32.mrf.mxu1 }
 0x3a0   :  { %v7757_v37 = vpop.f32.mrf.mxu1 }
 0x3a2   :  { %v7761_v19 = vpop.f32.mrf.mxu1 }
 0x3a4   :  { %v7763_v57 = vpop.f32.mrf.mxu1 }
 0x3a6   :  { %v7770_v3 = vpop.f32.mrf.mxu1 }
 0x3ea   :  { %v5653_v48 = vpop.f32.mrf.mxu0 }
 0x3ec   :  { %v5654_v4 = vpop.f32.mrf.mxu0 }
 0x3ed   :  { %v5655_v40 = vadd.f32 %v5654_v4, %v5653_v48  ;;  %v4645_v48 = vadd.f32 %v5533_v34, %v7755_v14 }
 0x3ee   :  { %v5656_v61 = vpop.f32.mrf.mxu0 }
 0x3ef   :  { %v4831_v36 = vadd.f32 %v5655_v40, %v4734_v10  ;;  %v4742_v23 = vadd.f32 %v5597_v46, %v4645_v48  ;;  %v4664_v48 = vadd.f32 %v5548_v39, %v7755_v14 }
 0x3f0   :  { %v5657_v5 = vpop.f32.mrf.mxu0 }
 0x3f1   :  { %v5658_v12 = vadd.f32 %v5657_v5, %v5656_v61  ;;  %v5622_v5 = vpop.f32.mrf.mxu1 }
 0x3f2   :  { %v5659_v15 = vpop.f32.mrf.mxu0 }
 0x3f3   :  { %v4834_v62 = vadd.f32 %v5658_v12, %v4737_v8  ;;  %v4653_v8 = vadd.f32 %v5539_v11, %v7755_v14  ;;  %v4656_v12 = vadd.f32 %v5542_v58, %v7755_v14  ;;  %v5623_v0 = vpop.f32.mrf.mxu1  ;;  %v4669_v58 = vadd.f32 %v7713_v55, %v7755_v14 }
 0x3f4   :  { %v5660_v42 = vpop.f32.mrf.mxu0  ;;  %v5621_v55 = vadd.f32 %v7770_v3, %v7763_v57  ;;  %v5566_v3 = vadd.f32 %v7729_v28, %v7727_v60 }
 0x3f5   :  { %v5465_v21 = vpack.c.bf16 %v4834_v62, %v4831_v36  ;;  %v5661_v4 = vadd.f32 %v5660_v42, %v5659_v15  ;;  %v4750_v38 = vadd.f32 %v5603_v41, %v4653_v8  ;;  %v4753_v63 = vadd.f32 %v5606_v32, %v4656_v12  ;;  %v5625_v43 = vpop.f32.mrf.mxu1 }
 0x3f6   :  { %v5662_v47 = vpop.f32.mrf.mxu0  ;;  %v5609_v62 = vadd.f32 %v7739_v30, %v7737_v18  ;;  %v5612_v42 = vadd.f32 %v7747_v44, %v7743_v59  ;;  %v5554_v59 = vadd.f32 %v7717_v35, %v7715_v50 }
 0x3f7   :  { %5466 = vst [vmem:[%s7837_s7] sm:$0xff] %v5465_v21   ;;  %v4839_v33 = vadd.f32 %v5661_v4, %v4742_v23  ;;  %v5626_v18 = vpop.f32.mrf.mxu1  ;;  %v5615_v23 = vadd.f32 %v7753_v25, %v7751_v17 }
 0x3f8   :  { %v5663_v6 = vpop.f32.mrf.mxu0  ;;  %v4761_v53 = vadd.f32 %v5612_v42, %v4664_v48  ;;  %v4685_v42 = vadd.f32 %v7725_v54, %v7755_v14 }
 0x3f9   :  { %v5664_v2 = vadd.f32 %v5663_v6, %v5662_v47  ;;  %v4661_v47 = vadd.f32 %v5545_v27, %v7755_v14 }
 0x3fa   :  { %v5665_v31 = vpop.f32.mrf.mxu0 }
 0x3fb   :  { %v4842_v9 = vadd.f32 %v5664_v2, %v4745_v49  ;;  %v4758_v52 = vadd.f32 %v5609_v62, %v4661_v47  ;;  %v5618_v49 = vadd.f32 %v7761_v19, %v7757_v37  ;;  %v5560_v37 = vadd.f32 %v7723_v7, %v7721_v1 }
 0x3fc   :  { %v5666_v61 = vpop.f32.mrf.mxu0 }
 0x3fd   :  { %v5470_v40 = vpack.c.bf16 %v4842_v9, %v4839_v33  ;;  %v5667_v15 = vadd.f32 %v5666_v61, %v5665_v31  ;;  %v5628_v31 = vpop.f32.mrf.mxu1  ;;  %v4672_v33 = vadd.f32 %v5554_v59, %v7755_v14  ;;  %v4766_v9 = vadd.f32 %v5615_v23, %v4669_v58 }
 0x3fe   :  { %v5668_v10 = vpop.f32.mrf.mxu0 }
 0x3ff   :  { %5502 = vst [vmem:[%s7837_s7 + $0x8] sm:$0xff] %v5470_v40   ;;  %v4847_v13 = vadd.f32 %v5667_v15, %v4750_v38  ;;  %v4769_v61 = vadd.f32 %v5618_v49, %v4672_v33  ;;  %v5629_v25 = vpop.f32.mrf.mxu1  ;;  %v4680_v38 = vadd.f32 %v5560_v37, %v7755_v14 }
 0x400   :  { %v5669_v34 = vpop.f32.mrf.mxu0 }
 0x401   :  { %v5670_v26 = vadd.f32 %v5669_v34, %v5668_v10  ;;  %v5624_v10 = vadd.f32 %v5623_v0, %v5622_v5  ;;  %v5631_v12 = vpop.f32.mrf.mxu1  ;;  %v4677_v34 = vadd.f32 %v7719_v51, %v7755_v14  ;;  %v5627_v51 = vadd.f32 %v5626_v18, %v5625_v43 }
 0x402   :  { %v5671_v20 = vpop.f32.mrf.mxu0 }
 0x403   :  { %v4850_v16 = vadd.f32 %v5670_v26, %v4753_v63  ;;  %v4774_v63 = vadd.f32 %v5621_v55, %v4677_v34  ;;  %v4777_v26 = vadd.f32 %v5624_v10, %v4680_v38  ;;  %v5632_v27 = vpop.f32.mrf.mxu1  ;;  %v4782_v60 = vadd.f32 %v5627_v51, %v4685_v42 }
 0x404   :  { %v5672_v36 = vpop.f32.mrf.mxu0  ;;  %v5633_v54 = vadd.f32 %v5632_v27, %v5631_v12 }
 0x405   :  { %v5475_v46 = vpack.c.bf16 %v4850_v16, %v4847_v13  ;;  %v5673_v29 = vadd.f32 %v5672_v36, %v5671_v20  ;;  %v5630_v13 = vadd.f32 %v5629_v25, %v5628_v31  ;;  %v5634_v36 = vpop.f32.mrf.mxu1 }
 0x406   :  { %v5674_v21 = vpop.f32.mrf.mxu0 }
 0x407   :  { %5503 = vst [vmem:[%s7837_s7 + $0x10] sm:$0xff] %v5475_v46   ;;  %v4855_v44 = vadd.f32 %v5673_v29, %v4758_v52  ;;  %v4688_v46 = vadd.f32 %v5566_v3, %v7755_v14  ;;  %v5635_v29 = vpop.f32.mrf.mxu1 }
 0x408   :  { %v5675_v45 = vpop.f32.mrf.mxu0  ;;  %v5636_v18 = vadd.f32 %v5635_v29, %v5634_v36 }
 0x409   :  { %v5676_v22 = vadd.f32 %v5675_v45, %v5674_v21  ;;  %v4785_v28 = vadd.f32 %v5630_v13, %v4688_v46  ;;  %v5572_v45 = vadd.f32 %v7735_v56, %v7733_v24 }
 0x40a   :  { %v5677_v30 = vpop.f32.mrf.mxu0 }
 0x40b   :  { %v4858_v4 = vadd.f32 %v5676_v22, %v4761_v53 }
 0x40c   :  { %v5678_v6 = vpop.f32.mrf.mxu0 }
 0x40d   :  { %v5480_v2 = vpack.c.bf16 %v4858_v4, %v4855_v44  ;;  %v5679_v50 = vadd.f32 %v5678_v6, %v5677_v30  ;;  %v7956_v44 = vld [vmem:[#allocation32_spill] sm:$0xff]  ;;  %v4696_v6 = vadd.f32 %v5572_v45, %v7755_v14 }
 0x40e   :  { %v5680_v11 = vpop.f32.mrf.mxu0  ;;  %v4693_v4 = vadd.f32 %v7956_v44, %v7755_v14 }
 0x40f   :  { %5504 = vst [vmem:[%s7837_s7 + $0x18] sm:$0xff] %v5480_v2   ;;  %v4863_v19 = vadd.f32 %v5679_v50, %v4766_v9  ;;  %v4793_v24 = vadd.f32 %v5636_v18, %v4696_v6 }
 0x410   :  { %v5681_v35 = vpop.f32.mrf.mxu0  ;;  %v4790_v2 = vadd.f32 %v5633_v54, %v4693_v4 }
 0x411   :  { %v5682_v17 = vadd.f32 %v5681_v35, %v5680_v11 }
 0x412   :  { %v5683_v41 = vpop.f32.mrf.mxu0 }
 0x413   :  { %v4866_v32 = vadd.f32 %v5682_v17, %v4769_v61 }
 0x414   :  { %v5684_v40 = vpop.f32.mrf.mxu0 }
 0x415   :  { %v5485_v8 = vpack.c.bf16 %v4866_v32, %v4863_v19  ;;  %v5685_v1 = vadd.f32 %v5684_v40, %v5683_v41 }
 0x416   :  { %v5686_v15 = vpop.f32.mrf.mxu0 }
 0x417   :  { %5505 = vst [vmem:[%s7837_s7 + $0x20] sm:$0xff] %v5485_v8   ;;  %v4871_v5 = vadd.f32 %v5685_v1, %v4774_v63 }
 0x418   :  { %v5687_v7 = vpop.f32.mrf.mxu0 }
 0x419   :  { %v5688_v20 = vadd.f32 %v5687_v7, %v5686_v15 }
 0x41a   :  { %v5689_v57 = vpop.f32.mrf.mxu0 }
 0x41b   :  { %v4874_v0 = vadd.f32 %v5688_v20, %v4777_v26 }
 0x41c   :  { %v5690_v39 = vpop.f32.mrf.mxu0 }
 0x41d   :  { %v5490_v16 = vpack.c.bf16 %v4874_v0, %v4871_v5  ;;  %v5691_v21 = vadd.f32 %v5690_v39, %v5689_v57 }
 0x41e   :  { %v5692_v62 = vpop.f32.mrf.mxu0 }
 0x41f   :  { %5506 = vst [vmem:[%s7837_s7 + $0x28] sm:$0xff] %v5490_v16   ;;  %v4879_v52 = vadd.f32 %v5691_v21, %v4782_v60 }
 0x420   :  { %v5693_v47 = vpop.f32.mrf.mxu0 }
 0x421   :  { %v5694_v48 = vadd.f32 %v5693_v47, %v5692_v62 }
 0x422   :  { %v5695_v43 = vpop.f32.mrf.mxu0 }
 0x423   :  { %v4882_v53 = vadd.f32 %v5694_v48, %v4785_v28 }
 0x424   :  { %v5696_v22 = vpop.f32.mrf.mxu0 }
 0x425   :  { %v5495_v30 = vpack.c.bf16 %v4882_v53, %v4879_v52  ;;  %v5697_v23 = vadd.f32 %v5696_v22, %v5695_v43 }
 0x426   :  { %v5698_v59 = vpop.f32.mrf.mxu0 }
 0x427   :  { %5507 = vst [vmem:[%s7837_s7 + $0x30] sm:$0xff] %v5495_v30   ;;  %v4887_v31 = vadd.f32 %v5697_v23, %v4790_v2 }
 0x428   :  { %v5699_v49 = vpop.f32.mrf.mxu0 }
 0x429   :  { %v5700_v56 = vadd.f32 %v5699_v49, %v5698_v59 }
 0x42b   :  { %v4890_v11 = vadd.f32 %v5700_v56, %v4793_v24 }
 0x42d   :  { %v5500_v58 = vpack.c.bf16 %v4890_v11, %v4887_v31 }
 0x42f   :  { %5508 = vst [vmem:[%s7837_s7 + $0x38] sm:$0xff] %v5500_v58  }
 0x430   :  { %4977 = vsyncpa [#allocation3], 1 }
 0x431   :  { %4978 = vsyncpa [#allocation5], 1 }
 0x432   :  { %4979 = vsyncpa [#allocation8], 1 }
 0x433   :  { %4980 = vsyncpa [#allocation11], 1 }

</bundles_post_ra>
